<compile_context>
chip_gen: v5e
topology: v5e:2x2
jax: 0.10.0
libtpu: 0.0.40
codegen_flags: <defaults>
</compile_context>

<pallas_src>
import functools

import jax
import jax.numpy as jnp
from jax import lax
from jax.experimental import pallas as pl
from jax.experimental.pallas import tpu as pltpu

EPS = 1e-6  # module's stability_eps


# ----------------------------- shared helpers --------------------------------

def _smooth3_last(x):
    """3-tap replicate-padded mean along the last axis (== the module's conv1d)."""
    left = jnp.concatenate([x[..., :1], x[..., :-1]], axis=-1)
    right = jnp.concatenate([x[..., 1:], x[..., -1:]], axis=-1)
    return (left + x + right) / 3.0


def _thomas_precompute_last(coeff):
    """u-independent part of the Thomas factorization along the last axis.

    Returns (a, c_star, inv_denom) so the in-kernel sweeps are only
        d*[0] = d[0] * inv[0]
        d*[i] = (d[i] - a[i] * d*[i-1]) * inv[i]
        x[i]  = d*[i] - c_star[i] * x[i+1]
    Matches the PyTorch recurrence (+eps stabilization, Neumann-style boundary
    rows) up to division -> multiply-by-exact-reciprocal.
    """
    a = -coeff
    c = -coeff
    b = jnp.concatenate(
        [1.0 + coeff[..., :1], 1.0 + 2.0 * coeff[..., 1:-1], 1.0 + coeff[..., -1:]],
        axis=-1)
    a_s = jnp.moveaxis(a, -1, 0)
    b_s = jnp.moveaxis(b, -1, 0)
    c_s = jnp.moveaxis(c, -1, 0)
    inv0 = 1.0 / (b_s[0] + EPS)
    cs0 = c_s[0] * inv0

    def body(cs_prev, abc):
        a_i, b_i, c_i = abc
        inv_i = 1.0 / (b_i - a_i * cs_prev + EPS)
        cs_i = c_i * inv_i
        return cs_i, (cs_i, inv_i)

    _, (cs_rest, inv_rest) = lax.scan(body, cs0, (a_s[1:], b_s[1:], c_s[1:]))
    cs = jnp.concatenate([cs0[None], cs_rest], axis=0)
    inv = jnp.concatenate([inv0[None], inv_rest], axis=0)
    return a, jnp.moveaxis(cs, 0, -1), jnp.moveaxis(inv, 0, -1)


# --------------------------------- kernel ------------------------------------

def diffusion_kernel(u0_ref, ax0_ref, cx0_ref, ix0_ref, ax1_ref, cx1_ref, ix1_ref,
                     ay_ref, cy_ref, iy_ref, coup_ref, skip_ref, o_ref,
                     ux, uy, *, B, C, H, W):
    """One ADI time step per grid iteration; state persists in VMEM scratch."""
    step = pl.program_id(0)

    @pl.when(step == 0)
    def _():
        ux[...] = u0_ref[...]

    # Identity matrices for the MXU-based page transposes (exact 0/1 entries).
    def _eye(n):
        r = lax.broadcasted_iota(jnp.int32, (n, n), 0)
        c = lax.broadcasted_iota(jnp.int32, (n, n), 1)
        return (r == c).astype(jnp.float32)

    eye_h = _eye(H)
    eye_w = _eye(W)
    nt_dims = (((1,), (1,)), ((), ()))      # "A @ B^T" contraction

    def tridiag_sweep(state, a_ref, c_ref, i_ref, n):
        # Thomas solve along the leading (major) axis.  Rows are lane/sublane-
        # dense (B, C*len) slabs; a/c*/inv rows are (1, C*len) and broadcast
        # over the batch sublanes.  Previous row is carried in registers.
        row0 = state[0] * i_ref[0]
        state[0] = row0

        def fwd(i, prev):
            cur = (state[i] - a_ref[i] * prev) * i_ref[i]
            state[i] = cur
            return cur

        # TODO(synk): cap unroll at 4..8 for large W/H; full unroll is fine at 16.
        last = lax.fori_loop(1, n, fwd, row0, unroll=True)

        def bwd(j, nxt):
            i = n - 2 - j
            cur = state[i] - c_ref[i] * nxt
            state[i] = cur
            return cur

        lax.fori_loop(0, n - 1, bwd, last, unroll=True)

    def transpose_pages(src, dst, eye_mat, src_lane, dst_lane):
        # Per-(batch, channel) (len_src x len_dst) page transpose via an
        # identity matmul on the MXU: out[i, j] = sum_k eye[i, k] * page[j, k].
        for b in range(B):
            for c in range(C):
                page = src[:, b, c * src_lane:(c + 1) * src_lane]
                dst[:, b, c * dst_lane:(c + 1) * dst_lane] = lax.dot_general(
                    eye_mat, page, nt_dims,
                    precision=lax.Precision.HIGHEST,
                    preferred_element_type=jnp.float32)

    # --- one ADI step: x half-step @ t, y full step @ t+dt/2, x half-step @ t+dt
    tridiag_sweep(ux, ax0_ref, cx0_ref, ix0_ref, W)
    transpose_pages(ux, uy, eye_h, H, W)
    tridiag_sweep(uy, ay_ref, cy_ref, iy_ref, H)
    transpose_pages(uy, ux, eye_w, W, H)
    tridiag_sweep(ux, ax1_ref, cx1_ref, ix1_ref, W)

    # Cross-channel coupling: new_c[o] = sum_i coupling[o, i] * old_c[i].
    # Channels are static lane blocks of width H: snapshot first, then write
    # each output block directly (no lane-axis concatenation).
    u_ch = [ux[:, :, c * H:(c + 1) * H] for c in range(C)]
    for co in range(C):
        acc = coup_ref[co, 0] * u_ch[0]
        for ci in range(1, C):
            acc = acc + coup_ref[co, ci] * u_ch[ci]
        ux[:, :, co * H:(co + 1) * H] = acc

    @pl.when(step == pl.num_programs(0) - 1)
    def _():
        g = skip_ref[0, 0]
        o_ref[...] = g * u0_ref[...] + (1.0 - g) * ux[...]


# -------------------------------- wrapper ------------------------------------

def diffusion_layer(u, params, *, dt=0.01, dx=1.0, num_steps=3):
    u = u.astype(jnp.float32)
    B, C, H, W = u.shape
    CH, CW = C * H, C * W

    alpha_base = params["alpha_base"].astype(jnp.float32)       # (C, H, W)
    beta_base = params["beta_base"].astype(jnp.float32)
    alpha_tc = params["alpha_time_coeff"].astype(jnp.float32)
    beta_tc = params["beta_time_coeff"].astype(jnp.float32)

    def x_fields(t):
        # clamp THEN smooth (max and the 3-tap mean do not commute).
        alpha_t = jnp.maximum(alpha_base + alpha_tc * t, EPS)            # (C, H, W)
        coeff = _smooth3_last(alpha_t) * ((dt * 0.5) / (dx * dx))        # solve axis W
        fields = _thomas_precompute_last(coeff)
        # (C, H, W) -> (W, 1, C*H): W major (solve axis), lanes (c, h), no batch.
        return tuple(jnp.transpose(f, (2, 0, 1)).reshape(W, 1, CH) for f in fields)

    def y_fields(t):
        beta_t = jnp.maximum(beta_base + beta_tc * t, EPS)               # (C, H, W)
        bt = jnp.transpose(beta_t, (0, 2, 1))                            # (C, W, H)
        coeff = _smooth3_last(bt) * (dt / (dx * dx))                     # solve axis H
        fields = _thomas_precompute_last(coeff)
        # (C, W, H) -> (H, 1, C*W): H major (solve axis), lanes (c, w).
        return tuple(jnp.transpose(f, (2, 0, 1)).reshape(H, 1, CW) for f in fields)

    # t is a static Python float (same accumulation as the PyTorch module); the
    # second x half-step of step k shares its time with the first of step k+1,
    # so only num_steps+1 x-coefficient slabs are materialized (dedup).
    x_times, y_times = [0.0], []
    t = 0.0
    for _ in range(num_steps):
        t += dt / 2
        y_times.append(t)
        t += dt / 2
        x_times.append(t)

    ax_l, cx_l, ix_l = zip(*(x_fields(tv) for tv in x_times))
    ay_l, cy_l, iy_l = zip(*(y_fields(tv) for tv in y_times))
    axs, cxs, ixs = (jnp.stack(v) for v in (ax_l, cx_l, ix_l))   # (num_steps+1, W, 1, CH)
    ays, cys, iys = (jnp.stack(v) for v in (ay_l, cy_l, iy_l))   # (num_steps,   H, 1, CW)

    # u: (B, C, H, W) -> x-sweep layout (W, B, C*H); lanes flattened (c, h).
    u_x = jnp.transpose(u, (3, 0, 1, 2)).reshape(W, B, CH)
    coup = params["channel_coupling"].astype(jnp.float32)
    skip_sig = jax.nn.sigmoid(params["skip_weight"]).reshape(1, 1).astype(jnp.float32)

    kernel = functools.partial(diffusion_kernel, B=B, C=C, H=H, W=W)

    full = lambda shp: pl.BlockSpec(shp, lambda s: (0,) * len(shp))
    x_lo = pl.BlockSpec((None, W, 1, CH), lambda s: (s, 0, 0, 0))
    x_hi = pl.BlockSpec((None, W, 1, CH), lambda s: (s + 1, 0, 0, 0))
    y_sp = pl.BlockSpec((None, H, 1, CW), lambda s: (s, 0, 0, 0))
    smem = pl.BlockSpec(memory_space=pltpu.MemorySpace.SMEM)

    out_x = pl.pallas_call(
        kernel,
        grid=(num_steps,),
        out_shape=jax.ShapeDtypeStruct((W, B, CH), jnp.float32),
        in_specs=[
            full((W, B, CH)),          # u0 (resident, constant block index)
            x_lo, x_lo, x_lo,          # a / c* / inv for the x half-step at t
            x_hi, x_hi, x_hi,          # a / c* / inv for the x half-step at t+dt
            y_sp, y_sp, y_sp,          # a / c* / inv for the y full step at t+dt/2
            smem,                      # channel coupling (C, C) scalars
            smem,                      # sigmoid(skip_weight)
        ],
        out_specs=full((W, B, CH)),
        scratch_shapes=[pltpu.VMEM((W, B, CH), jnp.float32),    # x-layout state
                        pltpu.VMEM((H, B, CW), jnp.float32)],   # y-layout state
        compiler_params=pltpu.CompilerParams(dimension_semantics=("arbitrary",)),
    )(u_x, axs, cxs, ixs, axs, cxs, ixs, ays, cys, iys, coup, skip_sig)

    # Back to NCHW (wrapper-side layout plumbing).
    return jnp.transpose(out_x.reshape(W, B, C, H), (1, 2, 3, 0))


# ------------------------ pure-JAX reference (for checking) ------------------

def diffusion_reference(u, params, *, dt=0.01, dx=1.0, num_steps=3):
    """Straightforward JAX port of the PyTorch module (independent code path)."""
    u = u.astype(jnp.float32)
    u0 = u

    def thomas(a, b, c, d):
        n = d.shape[-1]
        cs = [c[..., 0] / (b[..., 0] + EPS)]
        ds = [d[..., 0] / (b[..., 0] + EPS)]
        for i in range(1, n):
            denom = b[..., i] - a[..., i] * cs[i - 1] + EPS
            cs.append(c[..., i] / denom)
            ds.append((d[..., i] - a[..., i] * ds[i - 1]) / denom)
        x = [None] * n
        x[n - 1] = ds[n - 1]
        for i in range(n - 2, -1, -1):
            x[i] = ds[i] - cs[i] * x[i + 1]
        return jnp.stack(x, axis=-1)

    def solve_last(v, field, dt_step):
        coeff = _smooth3_last(field) * dt_step / dx ** 2
        coeff = jnp.broadcast_to(coeff[None], v.shape)
        a = -coeff
        c = -coeff
        b = 1.0 + 2.0 * coeff
        b = b.at[..., 0].set(1.0 + coeff[..., 0])
        b = b.at[..., -1].set(1.0 + coeff[..., -1])
        return thomas(a, b, c, v)

    coup = params["channel_coupling"].astype(jnp.float32)
    g = jax.nn.sigmoid(params["skip_weight"].astype(jnp.float32))
    ab = params["alpha_base"].astype(jnp.float32)
    bb = params["beta_base"].astype(jnp.float32)
    atc = params["alpha_time_coeff"].astype(jnp.float32)
    btc = params["beta_time_coeff"].astype(jnp.float32)

    t = 0.0
    for _ in range(num_steps):
        alpha_t = jnp.maximum(ab + atc * t, EPS)
        u = solve_last(u, alpha_t, dt / 2)                               # x sweep
        t += dt / 2
        beta_t = jnp.maximum(bb + btc * t, EPS)
        u = jnp.swapaxes(
            solve_last(jnp.swapaxes(u, -1, -2), jnp.swapaxes(beta_t, -1, -2), dt),
            -1, -2)                                                       # y sweep
        t += dt / 2
        alpha_t = jnp.maximum(ab + atc * t, EPS)
        u = solve_last(u, alpha_t, dt / 2)                               # x sweep
        u = jnp.einsum("oi,bihw->bohw", coup, u)                         # coupling
    return g * u0 + (1.0 - g) * u


# --------------------------------- driver ------------------------------------

if __name__ == "__main__":
    B, C, H, W = 2, 3, 16, 16
    num_steps = 3
    dt, dx = 0.01, 1.0

    key = jax.random.PRNGKey(0)
    k_ab, k_bb, k_atc, k_btc, k_cc, k_u = jax.random.split(key, 6)

    # Spatially varying, asymmetric parameters so layout / orientation / gate
    # bugs would show up against the reference (the module's default init of
    # constant bases and eye()*0.01 coupling would mask them).
    params = {
        "alpha_base": 0.1 + 0.05 * jax.random.uniform(k_ab, (C, H, W), dtype=jnp.float32),
        "beta_base": 0.1 + 0.05 * jax.random.uniform(k_bb, (C, H, W), dtype=jnp.float32),
        "alpha_time_coeff": 0.01 * jax.random.normal(k_atc, (C, H, W), dtype=jnp.float32),
        "beta_time_coeff": 0.01 * jax.random.normal(k_btc, (C, H, W), dtype=jnp.float32),
        "channel_coupling": (0.85 * jnp.eye(C, dtype=jnp.float32)
                             + 0.05 * jax.random.normal(k_cc, (C, C), dtype=jnp.float32)),
        "skip_weight": jnp.array(0.3, dtype=jnp.float32),
    }
    u = jax.random.normal(k_u, (B, C, H, W), dtype=jnp.float32)

    fwd = jax.jit(functools.partial(diffusion_layer, dt=dt, dx=dx, num_steps=num_steps))
    out = jax.block_until_ready(fwd(u, params))

    ref = jax.block_until_ready(
        jax.jit(functools.partial(diffusion_reference, dt=dt, dx=dx,
                                  num_steps=num_steps))(u, params))

    assert out.shape == (B, C, H, W) and out.dtype == jnp.float32
    assert bool(jnp.all(jnp.isfinite(out)))
    err = float(jnp.max(jnp.abs(out - ref)))
    # Loose bound: tolerant of MXU f32-emulation noise in the identity-matmul
    # relayout, but still catches layout / gate / coupling-orientation mistakes.
    assert err < 2e-2, f"kernel deviates from reference: max|diff|={err}"
    print("KERNEL_OK")
</pallas_src>

<mosaic_0001>
module attributes {stable_mosaic.version = 11 : i64} {
  func.func @diffusion_kernel(%arg0: i32, %arg1: memref<16x2x48xf32, #tpu.memory_space<vmem>>, %arg2: memref<1x16x1x48xf32, #tpu.memory_space<vmem>>, %arg3: memref<1x16x1x48xf32, #tpu.memory_space<vmem>>, %arg4: memref<1x16x1x48xf32, #tpu.memory_space<vmem>>, %arg5: memref<1x16x1x48xf32, #tpu.memory_space<vmem>>, %arg6: memref<1x16x1x48xf32, #tpu.memory_space<vmem>>, %arg7: memref<1x16x1x48xf32, #tpu.memory_space<vmem>>, %arg8: memref<1x16x1x48xf32, #tpu.memory_space<vmem>>, %arg9: memref<1x16x1x48xf32, #tpu.memory_space<vmem>>, %arg10: memref<1x16x1x48xf32, #tpu.memory_space<vmem>>, %arg11: memref<3x3xf32, #tpu.memory_space<smem>>, %arg12: memref<1x1xf32, #tpu.memory_space<smem>>, %arg13: memref<16x2x48xf32, #tpu.memory_space<vmem>>, %arg14: memref<16x2x48xf32, #tpu.memory_space<vmem>>, %arg15: memref<16x2x48xf32, #tpu.memory_space<vmem>>) attributes {dimension_semantics = [#tpu.dimension_semantics<arbitrary>], iteration_bounds = array<i64: 3>, scalar_prefetch = 0 : i64, scratch_operands = 2 : i64, tpu.core_type = #tpu.core_type<tc>, window_params = [{pipeline_mode = #tpu.pipeline_mode<synchronous>, transform_indices = @transform_0, window_bounds = array<i64: 16, 2, 48>}, {transform_indices = @transform_1, window_bounds = array<i64: 1, 16, 1, 48>}, {transform_indices = @transform_2, window_bounds = array<i64: 1, 16, 1, 48>}, {transform_indices = @transform_3, window_bounds = array<i64: 1, 16, 1, 48>}, {transform_indices = @transform_4, window_bounds = array<i64: 1, 16, 1, 48>}, {transform_indices = @transform_5, window_bounds = array<i64: 1, 16, 1, 48>}, {transform_indices = @transform_6, window_bounds = array<i64: 1, 16, 1, 48>}, {transform_indices = @transform_7, window_bounds = array<i64: 1, 16, 1, 48>}, {transform_indices = @transform_8, window_bounds = array<i64: 1, 16, 1, 48>}, {transform_indices = @transform_9, window_bounds = array<i64: 1, 16, 1, 48>}, {transform_indices = @transform_10, window_bounds = array<i64: 3, 3>}, {transform_indices = @transform_11, window_bounds = array<i64: 1, 1>}, {pipeline_mode = #tpu.pipeline_mode<synchronous>, transform_indices = @transform_12, window_bounds = array<i64: 16, 2, 48>}]} {
    %c0_i32 = arith.constant 0 : i32
    %0 = arith.cmpi eq, %arg0, %c0_i32 : i32
    %1 = arith.extui %0 : i1 to i32
    %c0_i32_0 = arith.constant 0 : i32
    %2 = arith.cmpi ne, %1, %c0_i32_0 : i32
    scf.if %2 {
      %c0_1038 = arith.constant 0 : index
      %c0_1039 = arith.constant 0 : index
      %c0_1040 = arith.constant 0 : index
      %1594 = vector.load %arg1[%c0_1038, %c0_1039, %c0_1040] : memref<16x2x48xf32, #tpu.memory_space<vmem>>, vector<16x2x48xf32>
      %c0_1041 = arith.constant 0 : index
      %c0_1042 = arith.constant 0 : index
      %c0_1043 = arith.constant 0 : index
      %1595 = vector.load %arg14[%c0_1041, %c0_1042, %c0_1043] : memref<16x2x48xf32, #tpu.memory_space<vmem>>, vector<16x2x48xf32>
      tpu.vector_store %arg14[%c0_1041, %c0_1042, %c0_1043], %1594 {strides = array<i32>} : memref<16x2x48xf32, #tpu.memory_space<vmem>>, vector<16x2x48xf32>,
    } else {
    }
    %3 = tpu.iota {dimensions = array<i32: 0>} : vector<16x16xi32>
    %4 = tpu.iota {dimensions = array<i32: 1>} : vector<16x16xi32>
    %5 = arith.cmpi eq, %3, %4 : vector<16x16xi32>
    %6 = arith.extui %5 : vector<16x16xi1> to vector<16x16xi32>
    %7 = arith.sitofp %6 : vector<16x16xi32> to vector<16x16xf32>
    %8 = tpu.iota {dimensions = array<i32: 0>} : vector<16x16xi32>
    %9 = tpu.iota {dimensions = array<i32: 1>} : vector<16x16xi32>
    %10 = arith.cmpi eq, %8, %9 : vector<16x16xi32>
    %11 = arith.extui %10 : vector<16x16xi1> to vector<16x16xi32>
    %12 = arith.sitofp %11 : vector<16x16xi32> to vector<16x16xf32>
    %c0 = arith.constant 0 : index
    %c0_1 = arith.constant 0 : index
    %c0_2 = arith.constant 0 : index
    %13 = vector.load %arg14[%c0, %c0_1, %c0_2] : memref<16x2x48xf32, #tpu.memory_space<vmem>>, vector<1x2x48xf32>
    %14 = vector.shape_cast %13 : vector<1x2x48xf32> to vector<2x48xf32>
    %c0_3 = arith.constant 0 : index
    %c0_4 = arith.constant 0 : index
    %c0_5 = arith.constant 0 : index
    %c0_6 = arith.constant 0 : index
    %15 = vector.load %arg4[%c0_3, %c0_4, %c0_5, %c0_6] : memref<1x16x1x48xf32, #tpu.memory_space<vmem>>, vector<1x1x1x48xf32>
    %16 = vector.shape_cast %15 : vector<1x1x1x48xf32> to vector<1x48xf32>
    %17 = vector.broadcast %16 : vector<1x48xf32> to vector<2x48xf32>
    %18 = arith.mulf %14, %17 : vector<2x48xf32>
    %c0_7 = arith.constant 0 : index
    %c0_8 = arith.constant 0 : index
    %c0_9 = arith.constant 0 : index
    %19 = vector.load %arg14[%c0_7, %c0_8, %c0_9] : memref<16x2x48xf32, #tpu.memory_space<vmem>>, vector<1x2x48xf32>
    %20 = vector.shape_cast %19 : vector<1x2x48xf32> to vector<2x48xf32>
    %21 = vector.shape_cast %18 : vector<2x48xf32> to vector<1x2x48xf32>
    tpu.vector_store %arg14[%c0_7, %c0_8, %c0_9], %21 {strides = array<i32>} : memref<16x2x48xf32, #tpu.memory_space<vmem>>, vector<1x2x48xf32>,
    %c1_i32 = arith.constant 1 : i32
    %22 = arith.index_cast %c1_i32 : i32 to index
    %c0_10 = arith.constant 0 : index
    %c0_11 = arith.constant 0 : index
    %23 = vector.load %arg14[%22, %c0_10, %c0_11] : memref<16x2x48xf32, #tpu.memory_space<vmem>>, vector<1x2x48xf32>
    %24 = vector.shape_cast %23 : vector<1x2x48xf32> to vector<2x48xf32>
    %c0_12 = arith.constant 0 : index
    %25 = arith.index_cast %c1_i32 : i32 to index
    %c0_13 = arith.constant 0 : index
    %c0_14 = arith.constant 0 : index
    %26 = vector.load %arg2[%c0_12, %25, %c0_13, %c0_14] : memref<1x16x1x48xf32, #tpu.memory_space<vmem>>, vector<1x1x1x48xf32>
    %27 = vector.shape_cast %26 : vector<1x1x1x48xf32> to vector<1x48xf32>
    %28 = vector.broadcast %27 : vector<1x48xf32> to vector<2x48xf32>
    %29 = arith.mulf %28, %18 : vector<2x48xf32>
    %30 = arith.subf %24, %29 : vector<2x48xf32>
    %c0_15 = arith.constant 0 : index
    %31 = arith.index_cast %c1_i32 : i32 to index
    %c0_16 = arith.constant 0 : index
    %c0_17 = arith.constant 0 : index
    %32 = vector.load %arg4[%c0_15, %31, %c0_16, %c0_17] : memref<1x16x1x48xf32, #tpu.memory_space<vmem>>, vector<1x1x1x48xf32>
    %33 = vector.shape_cast %32 : vector<1x1x1x48xf32> to vector<1x48xf32>
    %34 = vector.broadcast %33 : vector<1x48xf32> to vector<2x48xf32>
    %35 = arith.mulf %30, %34 : vector<2x48xf32>
    %36 = arith.index_cast %c1_i32 : i32 to index
    %c0_18 = arith.constant 0 : index
    %c0_19 = arith.constant 0 : index
    %37 = vector.load %arg14[%36, %c0_18, %c0_19] : memref<16x2x48xf32, #tpu.memory_space<vmem>>, vector<1x2x48xf32>
    %38 = vector.shape_cast %37 : vector<1x2x48xf32> to vector<2x48xf32>
    %39 = vector.shape_cast %35 : vector<2x48xf32> to vector<1x2x48xf32>
    tpu.vector_store %arg14[%36, %c0_18, %c0_19], %39 {strides = array<i32>} : memref<16x2x48xf32, #tpu.memory_space<vmem>>, vector<1x2x48xf32>,
    %c2_i32 = arith.constant 2 : i32
    %40 = arith.index_cast %c2_i32 : i32 to index
    %c0_20 = arith.constant 0 : index
    %c0_21 = arith.constant 0 : index
    %41 = vector.load %arg14[%40, %c0_20, %c0_21] : memref<16x2x48xf32, #tpu.memory_space<vmem>>, vector<1x2x48xf32>
    %42 = vector.shape_cast %41 : vector<1x2x48xf32> to vector<2x48xf32>
    %c0_22 = arith.constant 0 : index
    %43 = arith.index_cast %c2_i32 : i32 to index
    %c0_23 = arith.constant 0 : index
    %c0_24 = arith.constant 0 : index
    %44 = vector.load %arg2[%c0_22, %43, %c0_23, %c0_24] : memref<1x16x1x48xf32, #tpu.memory_space<vmem>>, vector<1x1x1x48xf32>
    %45 = vector.shape_cast %44 : vector<1x1x1x48xf32> to vector<1x48xf32>
    %46 = vector.broadcast %45 : vector<1x48xf32> to vector<2x48xf32>
    %47 = arith.mulf %46, %35 : vector<2x48xf32>
    %48 = arith.subf %42, %47 : vector<2x48xf32>
    %c0_25 = arith.constant 0 : index
    %49 = arith.index_cast %c2_i32 : i32 to index
    %c0_26 = arith.constant 0 : index
    %c0_27 = arith.constant 0 : index
    %50 = vector.load %arg4[%c0_25, %49, %c0_26, %c0_27] : memref<1x16x1x48xf32, #tpu.memory_space<vmem>>, vector<1x1x1x48xf32>
    %51 = vector.shape_cast %50 : vector<1x1x1x48xf32> to vector<1x48xf32>
    %52 = vector.broadcast %51 : vector<1x48xf32> to vector<2x48xf32>
    %53 = arith.mulf %48, %52 : vector<2x48xf32>
    %54 = arith.index_cast %c2_i32 : i32 to index
    %c0_28 = arith.constant 0 : index
    %c0_29 = arith.constant 0 : index
    %55 = vector.load %arg14[%54, %c0_28, %c0_29] : memref<16x2x48xf32, #tpu.memory_space<vmem>>, vector<1x2x48xf32>
    %56 = vector.shape_cast %55 : vector<1x2x48xf32> to vector<2x48xf32>
    %57 = vector.shape_cast %53 : vector<2x48xf32> to vector<1x2x48xf32>
    tpu.vector_store %arg14[%54, %c0_28, %c0_29], %57 {strides = array<i32>} : memref<16x2x48xf32, #tpu.memory_space<vmem>>, vector<1x2x48xf32>,
    %c3_i32 = arith.constant 3 : i32
    %58 = arith.index_cast %c3_i32 : i32 to index
    %c0_30 = arith.constant 0 : index
    %c0_31 = arith.constant 0 : index
    %59 = vector.load %arg14[%58, %c0_30, %c0_31] : memref<16x2x48xf32, #tpu.memory_space<vmem>>, vector<1x2x48xf32>
    %60 = vector.shape_cast %59 : vector<1x2x48xf32> to vector<2x48xf32>
    %c0_32 = arith.constant 0 : index
    %61 = arith.index_cast %c3_i32 : i32 to index
    %c0_33 = arith.constant 0 : index
    %c0_34 = arith.constant 0 : index
    %62 = vector.load %arg2[%c0_32, %61, %c0_33, %c0_34] : memref<1x16x1x48xf32, #tpu.memory_space<vmem>>, vector<1x1x1x48xf32>
    %63 = vector.shape_cast %62 : vector<1x1x1x48xf32> to vector<1x48xf32>
    %64 = vector.broadcast %63 : vector<1x48xf32> to vector<2x48xf32>
    %65 = arith.mulf %64, %53 : vector<2x48xf32>
    %66 = arith.subf %60, %65 : vector<2x48xf32>
    %c0_35 = arith.constant 0 : index
    %67 = arith.index_cast %c3_i32 : i32 to index
    %c0_36 = arith.constant 0 : index
    %c0_37 = arith.constant 0 : index
    %68 = vector.load %arg4[%c0_35, %67, %c0_36, %c0_37] : memref<1x16x1x48xf32, #tpu.memory_space<vmem>>, vector<1x1x1x48xf32>
    %69 = vector.shape_cast %68 : vector<1x1x1x48xf32> to vector<1x48xf32>
    %70 = vector.broadcast %69 : vector<1x48xf32> to vector<2x48xf32>
    %71 = arith.mulf %66, %70 : vector<2x48xf32>
    %72 = arith.index_cast %c3_i32 : i32 to index
    %c0_38 = arith.constant 0 : index
    %c0_39 = arith.constant 0 : index
    %73 = vector.load %arg14[%72, %c0_38, %c0_39] : memref<16x2x48xf32, #tpu.memory_space<vmem>>, vector<1x2x48xf32>
    %74 = vector.shape_cast %73 : vector<1x2x48xf32> to vector<2x48xf32>
    %75 = vector.shape_cast %71 : vector<2x48xf32> to vector<1x2x48xf32>
    tpu.vector_store %arg14[%72, %c0_38, %c0_39], %75 {strides = array<i32>} : memref<16x2x48xf32, #tpu.memory_space<vmem>>, vector<1x2x48xf32>,
    %c4_i32 = arith.constant 4 : i32
    %76 = arith.index_cast %c4_i32 : i32 to index
    %c0_40 = arith.constant 0 : index
    %c0_41 = arith.constant 0 : index
    %77 = vector.load %arg14[%76, %c0_40, %c0_41] : memref<16x2x48xf32, #tpu.memory_space<vmem>>, vector<1x2x48xf32>
    %78 = vector.shape_cast %77 : vector<1x2x48xf32> to vector<2x48xf32>
    %c0_42 = arith.constant 0 : index
    %79 = arith.index_cast %c4_i32 : i32 to index
    %c0_43 = arith.constant 0 : index
    %c0_44 = arith.constant 0 : index
    %80 = vector.load %arg2[%c0_42, %79, %c0_43, %c0_44] : memref<1x16x1x48xf32, #tpu.memory_space<vmem>>, vector<1x1x1x48xf32>
    %81 = vector.shape_cast %80 : vector<1x1x1x48xf32> to vector<1x48xf32>
    %82 = vector.broadcast %81 : vector<1x48xf32> to vector<2x48xf32>
    %83 = arith.mulf %82, %71 : vector<2x48xf32>
    %84 = arith.subf %78, %83 : vector<2x48xf32>
    %c0_45 = arith.constant 0 : index
    %85 = arith.index_cast %c4_i32 : i32 to index
    %c0_46 = arith.constant 0 : index
    %c0_47 = arith.constant 0 : index
    %86 = vector.load %arg4[%c0_45, %85, %c0_46, %c0_47] : memref<1x16x1x48xf32, #tpu.memory_space<vmem>>, vector<1x1x1x48xf32>
    %87 = vector.shape_cast %86 : vector<1x1x1x48xf32> to vector<1x48xf32>
    %88 = vector.broadcast %87 : vector<1x48xf32> to vector<2x48xf32>
    %89 = arith.mulf %84, %88 : vector<2x48xf32>
    %90 = arith.index_cast %c4_i32 : i32 to index
    %c0_48 = arith.constant 0 : index
    %c0_49 = arith.constant 0 : index
    %91 = vector.load %arg14[%90, %c0_48, %c0_49] : memref<16x2x48xf32, #tpu.memory_space<vmem>>, vector<1x2x48xf32>
    %92 = vector.shape_cast %91 : vector<1x2x48xf32> to vector<2x48xf32>
    %93 = vector.shape_cast %89 : vector<2x48xf32> to vector<1x2x48xf32>
    tpu.vector_store %arg14[%90, %c0_48, %c0_49], %93 {strides = array<i32>} : memref<16x2x48xf32, #tpu.memory_space<vmem>>, vector<1x2x48xf32>,
    %c5_i32 = arith.constant 5 : i32
    %94 = arith.index_cast %c5_i32 : i32 to index
    %c0_50 = arith.constant 0 : index
    %c0_51 = arith.constant 0 : index
    %95 = vector.load %arg14[%94, %c0_50, %c0_51] : memref<16x2x48xf32, #tpu.memory_space<vmem>>, vector<1x2x48xf32>
    %96 = vector.shape_cast %95 : vector<1x2x48xf32> to vector<2x48xf32>
    %c0_52 = arith.constant 0 : index
    %97 = arith.index_cast %c5_i32 : i32 to index
    %c0_53 = arith.constant 0 : index
    %c0_54 = arith.constant 0 : index
    %98 = vector.load %arg2[%c0_52, %97, %c0_53, %c0_54] : memref<1x16x1x48xf32, #tpu.memory_space<vmem>>, vector<1x1x1x48xf32>
    %99 = vector.shape_cast %98 : vector<1x1x1x48xf32> to vector<1x48xf32>
    %100 = vector.broadcast %99 : vector<1x48xf32> to vector<2x48xf32>
    %101 = arith.mulf %100, %89 : vector<2x48xf32>
    %102 = arith.subf %96, %101 : vector<2x48xf32>
    %c0_55 = arith.constant 0 : index
    %103 = arith.index_cast %c5_i32 : i32 to index
    %c0_56 = arith.constant 0 : index
    %c0_57 = arith.constant 0 : index
    %104 = vector.load %arg4[%c0_55, %103, %c0_56, %c0_57] : memref<1x16x1x48xf32, #tpu.memory_space<vmem>>, vector<1x1x1x48xf32>
    %105 = vector.shape_cast %104 : vector<1x1x1x48xf32> to vector<1x48xf32>
    %106 = vector.broadcast %105 : vector<1x48xf32> to vector<2x48xf32>
    %107 = arith.mulf %102, %106 : vector<2x48xf32>
    %108 = arith.index_cast %c5_i32 : i32 to index
    %c0_58 = arith.constant 0 : index
    %c0_59 = arith.constant 0 : index
    %109 = vector.load %arg14[%108, %c0_58, %c0_59] : memref<16x2x48xf32, #tpu.memory_space<vmem>>, vector<1x2x48xf32>
    %110 = vector.shape_cast %109 : vector<1x2x48xf32> to vector<2x48xf32>
    %111 = vector.shape_cast %107 : vector<2x48xf32> to vector<1x2x48xf32>
    tpu.vector_store %arg14[%108, %c0_58, %c0_59], %111 {strides = array<i32>} : memref<16x2x48xf32, #tpu.memory_space<vmem>>, vector<1x2x48xf32>,
    %c6_i32 = arith.constant 6 : i32
    %112 = arith.index_cast %c6_i32 : i32 to index
    %c0_60 = arith.constant 0 : index
    %c0_61 = arith.constant 0 : index
    %113 = vector.load %arg14[%112, %c0_60, %c0_61] : memref<16x2x48xf32, #tpu.memory_space<vmem>>, vector<1x2x48xf32>
    %114 = vector.shape_cast %113 : vector<1x2x48xf32> to vector<2x48xf32>
    %c0_62 = arith.constant 0 : index
    %115 = arith.index_cast %c6_i32 : i32 to index
    %c0_63 = arith.constant 0 : index
    %c0_64 = arith.constant 0 : index
    %116 = vector.load %arg2[%c0_62, %115, %c0_63, %c0_64] : memref<1x16x1x48xf32, #tpu.memory_space<vmem>>, vector<1x1x1x48xf32>
    %117 = vector.shape_cast %116 : vector<1x1x1x48xf32> to vector<1x48xf32>
    %118 = vector.broadcast %117 : vector<1x48xf32> to vector<2x48xf32>
    %119 = arith.mulf %118, %107 : vector<2x48xf32>
    %120 = arith.subf %114, %119 : vector<2x48xf32>
    %c0_65 = arith.constant 0 : index
    %121 = arith.index_cast %c6_i32 : i32 to index
    %c0_66 = arith.constant 0 : index
    %c0_67 = arith.constant 0 : index
    %122 = vector.load %arg4[%c0_65, %121, %c0_66, %c0_67] : memref<1x16x1x48xf32, #tpu.memory_space<vmem>>, vector<1x1x1x48xf32>
    %123 = vector.shape_cast %122 : vector<1x1x1x48xf32> to vector<1x48xf32>
    %124 = vector.broadcast %123 : vector<1x48xf32> to vector<2x48xf32>
    %125 = arith.mulf %120, %124 : vector<2x48xf32>
    %126 = arith.index_cast %c6_i32 : i32 to index
    %c0_68 = arith.constant 0 : index
    %c0_69 = arith.constant 0 : index
    %127 = vector.load %arg14[%126, %c0_68, %c0_69] : memref<16x2x48xf32, #tpu.memory_space<vmem>>, vector<1x2x48xf32>
    %128 = vector.shape_cast %127 : vector<1x2x48xf32> to vector<2x48xf32>
    %129 = vector.shape_cast %125 : vector<2x48xf32> to vector<1x2x48xf32>
    tpu.vector_store %arg14[%126, %c0_68, %c0_69], %129 {strides = array<i32>} : memref<16x2x48xf32, #tpu.memory_space<vmem>>, vector<1x2x48xf32>,
    %c7_i32 = arith.constant 7 : i32
    %130 = arith.index_cast %c7_i32 : i32 to index
    %c0_70 = arith.constant 0 : index
    %c0_71 = arith.constant 0 : index
    %131 = vector.load %arg14[%130, %c0_70, %c0_71] : memref<16x2x48xf32, #tpu.memory_space<vmem>>, vector<1x2x48xf32>
    %132 = vector.shape_cast %131 : vector<1x2x48xf32> to vector<2x48xf32>
    %c0_72 = arith.constant 0 : index
    %133 = arith.index_cast %c7_i32 : i32 to index
    %c0_73 = arith.constant 0 : index
    %c0_74 = arith.constant 0 : index
    %134 = vector.load %arg2[%c0_72, %133, %c0_73, %c0_74] : memref<1x16x1x48xf32, #tpu.memory_space<vmem>>, vector<1x1x1x48xf32>
    %135 = vector.shape_cast %134 : vector<1x1x1x48xf32> to vector<1x48xf32>
    %136 = vector.broadcast %135 : vector<1x48xf32> to vector<2x48xf32>
    %137 = arith.mulf %136, %125 : vector<2x48xf32>
    %138 = arith.subf %132, %137 : vector<2x48xf32>
    %c0_75 = arith.constant 0 : index
    %139 = arith.index_cast %c7_i32 : i32 to index
    %c0_76 = arith.constant 0 : index
    %c0_77 = arith.constant 0 : index
    %140 = vector.load %arg4[%c0_75, %139, %c0_76, %c0_77] : memref<1x16x1x48xf32, #tpu.memory_space<vmem>>, vector<1x1x1x48xf32>
    %141 = vector.shape_cast %140 : vector<1x1x1x48xf32> to vector<1x48xf32>
    %142 = vector.broadcast %141 : vector<1x48xf32> to vector<2x48xf32>
    %143 = arith.mulf %138, %142 : vector<2x48xf32>
    %144 = arith.index_cast %c7_i32 : i32 to index
    %c0_78 = arith.constant 0 : index
    %c0_79 = arith.constant 0 : index
    %145 = vector.load %arg14[%144, %c0_78, %c0_79] : memref<16x2x48xf32, #tpu.memory_space<vmem>>, vector<1x2x48xf32>
    %146 = vector.shape_cast %145 : vector<1x2x48xf32> to vector<2x48xf32>
    %147 = vector.shape_cast %143 : vector<2x48xf32> to vector<1x2x48xf32>
    tpu.vector_store %arg14[%144, %c0_78, %c0_79], %147 {strides = array<i32>} : memref<16x2x48xf32, #tpu.memory_space<vmem>>, vector<1x2x48xf32>,
    %c8_i32 = arith.constant 8 : i32
    %148 = arith.index_cast %c8_i32 : i32 to index
    %c0_80 = arith.constant 0 : index
    %c0_81 = arith.constant 0 : index
    %149 = vector.load %arg14[%148, %c0_80, %c0_81] : memref<16x2x48xf32, #tpu.memory_space<vmem>>, vector<1x2x48xf32>
    %150 = vector.shape_cast %149 : vector<1x2x48xf32> to vector<2x48xf32>
    %c0_82 = arith.constant 0 : index
    %151 = arith.index_cast %c8_i32 : i32 to index
    %c0_83 = arith.constant 0 : index
    %c0_84 = arith.constant 0 : index
    %152 = vector.load %arg2[%c0_82, %151, %c0_83, %c0_84] : memref<1x16x1x48xf32, #tpu.memory_space<vmem>>, vector<1x1x1x48xf32>
    %153 = vector.shape_cast %152 : vector<1x1x1x48xf32> to vector<1x48xf32>
    %154 = vector.broadcast %153 : vector<1x48xf32> to vector<2x48xf32>
    %155 = arith.mulf %154, %143 : vector<2x48xf32>
    %156 = arith.subf %150, %155 : vector<2x48xf32>
    %c0_85 = arith.constant 0 : index
    %157 = arith.index_cast %c8_i32 : i32 to index
    %c0_86 = arith.constant 0 : index
    %c0_87 = arith.constant 0 : index
    %158 = vector.load %arg4[%c0_85, %157, %c0_86, %c0_87] : memref<1x16x1x48xf32, #tpu.memory_space<vmem>>, vector<1x1x1x48xf32>
    %159 = vector.shape_cast %158 : vector<1x1x1x48xf32> to vector<1x48xf32>
    %160 = vector.broadcast %159 : vector<1x48xf32> to vector<2x48xf32>
    %161 = arith.mulf %156, %160 : vector<2x48xf32>
    %162 = arith.index_cast %c8_i32 : i32 to index
    %c0_88 = arith.constant 0 : index
    %c0_89 = arith.constant 0 : index
    %163 = vector.load %arg14[%162, %c0_88, %c0_89] : memref<16x2x48xf32, #tpu.memory_space<vmem>>, vector<1x2x48xf32>
    %164 = vector.shape_cast %163 : vector<1x2x48xf32> to vector<2x48xf32>
    %165 = vector.shape_cast %161 : vector<2x48xf32> to vector<1x2x48xf32>
    tpu.vector_store %arg14[%162, %c0_88, %c0_89], %165 {strides = array<i32>} : memref<16x2x48xf32, #tpu.memory_space<vmem>>, vector<1x2x48xf32>,
    %c9_i32 = arith.constant 9 : i32
    %166 = arith.index_cast %c9_i32 : i32 to index
    %c0_90 = arith.constant 0 : index
    %c0_91 = arith.constant 0 : index
    %167 = vector.load %arg14[%166, %c0_90, %c0_91] : memref<16x2x48xf32, #tpu.memory_space<vmem>>, vector<1x2x48xf32>
    %168 = vector.shape_cast %167 : vector<1x2x48xf32> to vector<2x48xf32>
    %c0_92 = arith.constant 0 : index
    %169 = arith.index_cast %c9_i32 : i32 to index
    %c0_93 = arith.constant 0 : index
    %c0_94 = arith.constant 0 : index
    %170 = vector.load %arg2[%c0_92, %169, %c0_93, %c0_94] : memref<1x16x1x48xf32, #tpu.memory_space<vmem>>, vector<1x1x1x48xf32>
    %171 = vector.shape_cast %170 : vector<1x1x1x48xf32> to vector<1x48xf32>
    %172 = vector.broadcast %171 : vector<1x48xf32> to vector<2x48xf32>
    %173 = arith.mulf %172, %161 : vector<2x48xf32>
    %174 = arith.subf %168, %173 : vector<2x48xf32>
    %c0_95 = arith.constant 0 : index
    %175 = arith.index_cast %c9_i32 : i32 to index
    %c0_96 = arith.constant 0 : index
    %c0_97 = arith.constant 0 : index
    %176 = vector.load %arg4[%c0_95, %175, %c0_96, %c0_97] : memref<1x16x1x48xf32, #tpu.memory_space<vmem>>, vector<1x1x1x48xf32>
    %177 = vector.shape_cast %176 : vector<1x1x1x48xf32> to vector<1x48xf32>
    %178 = vector.broadcast %177 : vector<1x48xf32> to vector<2x48xf32>
    %179 = arith.mulf %174, %178 : vector<2x48xf32>
    %180 = arith.index_cast %c9_i32 : i32 to index
    %c0_98 = arith.constant 0 : index
    %c0_99 = arith.constant 0 : index
    %181 = vector.load %arg14[%180, %c0_98, %c0_99] : memref<16x2x48xf32, #tpu.memory_space<vmem>>, vector<1x2x48xf32>
    %182 = vector.shape_cast %181 : vector<1x2x48xf32> to vector<2x48xf32>
    %183 = vector.shape_cast %179 : vector<2x48xf32> to vector<1x2x48xf32>
    tpu.vector_store %arg14[%180, %c0_98, %c0_99], %183 {strides = array<i32>} : memref<16x2x48xf32, #tpu.memory_space<vmem>>, vector<1x2x48xf32>,
    %c10_i32 = arith.constant 10 : i32
    %184 = arith.index_cast %c10_i32 : i32 to index
    %c0_100 = arith.constant 0 : index
    %c0_101 = arith.constant 0 : index
    %185 = vector.load %arg14[%184, %c0_100, %c0_101] : memref<16x2x48xf32, #tpu.memory_space<vmem>>, vector<1x2x48xf32>
    %186 = vector.shape_cast %185 : vector<1x2x48xf32> to vector<2x48xf32>
    %c0_102 = arith.constant 0 : index
    %187 = arith.index_cast %c10_i32 : i32 to index
    %c0_103 = arith.constant 0 : index
    %c0_104 = arith.constant 0 : index
    %188 = vector.load %arg2[%c0_102, %187, %c0_103, %c0_104] : memref<1x16x1x48xf32, #tpu.memory_space<vmem>>, vector<1x1x1x48xf32>
    %189 = vector.shape_cast %188 : vector<1x1x1x48xf32> to vector<1x48xf32>
    %190 = vector.broadcast %189 : vector<1x48xf32> to vector<2x48xf32>
    %191 = arith.mulf %190, %179 : vector<2x48xf32>
    %192 = arith.subf %186, %191 : vector<2x48xf32>
    %c0_105 = arith.constant 0 : index
    %193 = arith.index_cast %c10_i32 : i32 to index
    %c0_106 = arith.constant 0 : index
    %c0_107 = arith.constant 0 : index
    %194 = vector.load %arg4[%c0_105, %193, %c0_106, %c0_107] : memref<1x16x1x48xf32, #tpu.memory_space<vmem>>, vector<1x1x1x48xf32>
    %195 = vector.shape_cast %194 : vector<1x1x1x48xf32> to vector<1x48xf32>
    %196 = vector.broadcast %195 : vector<1x48xf32> to vector<2x48xf32>
    %197 = arith.mulf %192, %196 : vector<2x48xf32>
    %198 = arith.index_cast %c10_i32 : i32 to index
    %c0_108 = arith.constant 0 : index
    %c0_109 = arith.constant 0 : index
    %199 = vector.load %arg14[%198, %c0_108, %c0_109] : memref<16x2x48xf32, #tpu.memory_space<vmem>>, vector<1x2x48xf32>
    %200 = vector.shape_cast %199 : vector<1x2x48xf32> to vector<2x48xf32>
    %201 = vector.shape_cast %197 : vector<2x48xf32> to vector<1x2x48xf32>
    tpu.vector_store %arg14[%198, %c0_108, %c0_109], %201 {strides = array<i32>} : memref<16x2x48xf32, #tpu.memory_space<vmem>>, vector<1x2x48xf32>,
    %c11_i32 = arith.constant 11 : i32
    %202 = arith.index_cast %c11_i32 : i32 to index
    %c0_110 = arith.constant 0 : index
    %c0_111 = arith.constant 0 : index
    %203 = vector.load %arg14[%202, %c0_110, %c0_111] : memref<16x2x48xf32, #tpu.memory_space<vmem>>, vector<1x2x48xf32>
    %204 = vector.shape_cast %203 : vector<1x2x48xf32> to vector<2x48xf32>
    %c0_112 = arith.constant 0 : index
    %205 = arith.index_cast %c11_i32 : i32 to index
    %c0_113 = arith.constant 0 : index
    %c0_114 = arith.constant 0 : index
    %206 = vector.load %arg2[%c0_112, %205, %c0_113, %c0_114] : memref<1x16x1x48xf32, #tpu.memory_space<vmem>>, vector<1x1x1x48xf32>
    %207 = vector.shape_cast %206 : vector<1x1x1x48xf32> to vector<1x48xf32>
    %208 = vector.broadcast %207 : vector<1x48xf32> to vector<2x48xf32>
    %209 = arith.mulf %208, %197 : vector<2x48xf32>
    %210 = arith.subf %204, %209 : vector<2x48xf32>
    %c0_115 = arith.constant 0 : index
    %211 = arith.index_cast %c11_i32 : i32 to index
    %c0_116 = arith.constant 0 : index
    %c0_117 = arith.constant 0 : index
    %212 = vector.load %arg4[%c0_115, %211, %c0_116, %c0_117] : memref<1x16x1x48xf32, #tpu.memory_space<vmem>>, vector<1x1x1x48xf32>
    %213 = vector.shape_cast %212 : vector<1x1x1x48xf32> to vector<1x48xf32>
    %214 = vector.broadcast %213 : vector<1x48xf32> to vector<2x48xf32>
    %215 = arith.mulf %210, %214 : vector<2x48xf32>
    %216 = arith.index_cast %c11_i32 : i32 to index
    %c0_118 = arith.constant 0 : index
    %c0_119 = arith.constant 0 : index
    %217 = vector.load %arg14[%216, %c0_118, %c0_119] : memref<16x2x48xf32, #tpu.memory_space<vmem>>, vector<1x2x48xf32>
    %218 = vector.shape_cast %217 : vector<1x2x48xf32> to vector<2x48xf32>
    %219 = vector.shape_cast %215 : vector<2x48xf32> to vector<1x2x48xf32>
    tpu.vector_store %arg14[%216, %c0_118, %c0_119], %219 {strides = array<i32>} : memref<16x2x48xf32, #tpu.memory_space<vmem>>, vector<1x2x48xf32>,
    %c12_i32 = arith.constant 12 : i32
    %220 = arith.index_cast %c12_i32 : i32 to index
    %c0_120 = arith.constant 0 : index
    %c0_121 = arith.constant 0 : index
    %221 = vector.load %arg14[%220, %c0_120, %c0_121] : memref<16x2x48xf32, #tpu.memory_space<vmem>>, vector<1x2x48xf32>
    %222 = vector.shape_cast %221 : vector<1x2x48xf32> to vector<2x48xf32>
    %c0_122 = arith.constant 0 : index
    %223 = arith.index_cast %c12_i32 : i32 to index
    %c0_123 = arith.constant 0 : index
    %c0_124 = arith.constant 0 : index
    %224 = vector.load %arg2[%c0_122, %223, %c0_123, %c0_124] : memref<1x16x1x48xf32, #tpu.memory_space<vmem>>, vector<1x1x1x48xf32>
    %225 = vector.shape_cast %224 : vector<1x1x1x48xf32> to vector<1x48xf32>
    %226 = vector.broadcast %225 : vector<1x48xf32> to vector<2x48xf32>
    %227 = arith.mulf %226, %215 : vector<2x48xf32>
    %228 = arith.subf %222, %227 : vector<2x48xf32>
    %c0_125 = arith.constant 0 : index
    %229 = arith.index_cast %c12_i32 : i32 to index
    %c0_126 = arith.constant 0 : index
    %c0_127 = arith.constant 0 : index
    %230 = vector.load %arg4[%c0_125, %229, %c0_126, %c0_127] : memref<1x16x1x48xf32, #tpu.memory_space<vmem>>, vector<1x1x1x48xf32>
    %231 = vector.shape_cast %230 : vector<1x1x1x48xf32> to vector<1x48xf32>
    %232 = vector.broadcast %231 : vector<1x48xf32> to vector<2x48xf32>
    %233 = arith.mulf %228, %232 : vector<2x48xf32>
    %234 = arith.index_cast %c12_i32 : i32 to index
    %c0_128 = arith.constant 0 : index
    %c0_129 = arith.constant 0 : index
    %235 = vector.load %arg14[%234, %c0_128, %c0_129] : memref<16x2x48xf32, #tpu.memory_space<vmem>>, vector<1x2x48xf32>
    %236 = vector.shape_cast %235 : vector<1x2x48xf32> to vector<2x48xf32>
    %237 = vector.shape_cast %233 : vector<2x48xf32> to vector<1x2x48xf32>
    tpu.vector_store %arg14[%234, %c0_128, %c0_129], %237 {strides = array<i32>} : memref<16x2x48xf32, #tpu.memory_space<vmem>>, vector<1x2x48xf32>,
    %c13_i32 = arith.constant 13 : i32
    %238 = arith.index_cast %c13_i32 : i32 to index
    %c0_130 = arith.constant 0 : index
    %c0_131 = arith.constant 0 : index
    %239 = vector.load %arg14[%238, %c0_130, %c0_131] : memref<16x2x48xf32, #tpu.memory_space<vmem>>, vector<1x2x48xf32>
    %240 = vector.shape_cast %239 : vector<1x2x48xf32> to vector<2x48xf32>
    %c0_132 = arith.constant 0 : index
    %241 = arith.index_cast %c13_i32 : i32 to index
    %c0_133 = arith.constant 0 : index
    %c0_134 = arith.constant 0 : index
    %242 = vector.load %arg2[%c0_132, %241, %c0_133, %c0_134] : memref<1x16x1x48xf32, #tpu.memory_space<vmem>>, vector<1x1x1x48xf32>
    %243 = vector.shape_cast %242 : vector<1x1x1x48xf32> to vector<1x48xf32>
    %244 = vector.broadcast %243 : vector<1x48xf32> to vector<2x48xf32>
    %245 = arith.mulf %244, %233 : vector<2x48xf32>
    %246 = arith.subf %240, %245 : vector<2x48xf32>
    %c0_135 = arith.constant 0 : index
    %247 = arith.index_cast %c13_i32 : i32 to index
    %c0_136 = arith.constant 0 : index
    %c0_137 = arith.constant 0 : index
    %248 = vector.load %arg4[%c0_135, %247, %c0_136, %c0_137] : memref<1x16x1x48xf32, #tpu.memory_space<vmem>>, vector<1x1x1x48xf32>
    %249 = vector.shape_cast %248 : vector<1x1x1x48xf32> to vector<1x48xf32>
    %250 = vector.broadcast %249 : vector<1x48xf32> to vector<2x48xf32>
    %251 = arith.mulf %246, %250 : vector<2x48xf32>
    %252 = arith.index_cast %c13_i32 : i32 to index
    %c0_138 = arith.constant 0 : index
    %c0_139 = arith.constant 0 : index
    %253 = vector.load %arg14[%252, %c0_138, %c0_139] : memref<16x2x48xf32, #tpu.memory_space<vmem>>, vector<1x2x48xf32>
    %254 = vector.shape_cast %253 : vector<1x2x48xf32> to vector<2x48xf32>
    %255 = vector.shape_cast %251 : vector<2x48xf32> to vector<1x2x48xf32>
    tpu.vector_store %arg14[%252, %c0_138, %c0_139], %255 {strides = array<i32>} : memref<16x2x48xf32, #tpu.memory_space<vmem>>, vector<1x2x48xf32>,
    %c14_i32 = arith.constant 14 : i32
    %256 = arith.index_cast %c14_i32 : i32 to index
    %c0_140 = arith.constant 0 : index
    %c0_141 = arith.constant 0 : index
    %257 = vector.load %arg14[%256, %c0_140, %c0_141] : memref<16x2x48xf32, #tpu.memory_space<vmem>>, vector<1x2x48xf32>
    %258 = vector.shape_cast %257 : vector<1x2x48xf32> to vector<2x48xf32>
    %c0_142 = arith.constant 0 : index
    %259 = arith.index_cast %c14_i32 : i32 to index
    %c0_143 = arith.constant 0 : index
    %c0_144 = arith.constant 0 : index
    %260 = vector.load %arg2[%c0_142, %259, %c0_143, %c0_144] : memref<1x16x1x48xf32, #tpu.memory_space<vmem>>, vector<1x1x1x48xf32>
    %261 = vector.shape_cast %260 : vector<1x1x1x48xf32> to vector<1x48xf32>
    %262 = vector.broadcast %261 : vector<1x48xf32> to vector<2x48xf32>
    %263 = arith.mulf %262, %251 : vector<2x48xf32>
    %264 = arith.subf %258, %263 : vector<2x48xf32>
    %c0_145 = arith.constant 0 : index
    %265 = arith.index_cast %c14_i32 : i32 to index
    %c0_146 = arith.constant 0 : index
    %c0_147 = arith.constant 0 : index
    %266 = vector.load %arg4[%c0_145, %265, %c0_146, %c0_147] : memref<1x16x1x48xf32, #tpu.memory_space<vmem>>, vector<1x1x1x48xf32>
    %267 = vector.shape_cast %266 : vector<1x1x1x48xf32> to vector<1x48xf32>
    %268 = vector.broadcast %267 : vector<1x48xf32> to vector<2x48xf32>
    %269 = arith.mulf %264, %268 : vector<2x48xf32>
    %270 = arith.index_cast %c14_i32 : i32 to index
    %c0_148 = arith.constant 0 : index
    %c0_149 = arith.constant 0 : index
    %271 = vector.load %arg14[%270, %c0_148, %c0_149] : memref<16x2x48xf32, #tpu.memory_space<vmem>>, vector<1x2x48xf32>
    %272 = vector.shape_cast %271 : vector<1x2x48xf32> to vector<2x48xf32>
    %273 = vector.shape_cast %269 : vector<2x48xf32> to vector<1x2x48xf32>
    tpu.vector_store %arg14[%270, %c0_148, %c0_149], %273 {strides = array<i32>} : memref<16x2x48xf32, #tpu.memory_space<vmem>>, vector<1x2x48xf32>,
    %c15_i32 = arith.constant 15 : i32
    %274 = arith.index_cast %c15_i32 : i32 to index
    %c0_150 = arith.constant 0 : index
    %c0_151 = arith.constant 0 : index
    %275 = vector.load %arg14[%274, %c0_150, %c0_151] : memref<16x2x48xf32, #tpu.memory_space<vmem>>, vector<1x2x48xf32>
    %276 = vector.shape_cast %275 : vector<1x2x48xf32> to vector<2x48xf32>
    %c0_152 = arith.constant 0 : index
    %277 = arith.index_cast %c15_i32 : i32 to index
    %c0_153 = arith.constant 0 : index
    %c0_154 = arith.constant 0 : index
    %278 = vector.load %arg2[%c0_152, %277, %c0_153, %c0_154] : memref<1x16x1x48xf32, #tpu.memory_space<vmem>>, vector<1x1x1x48xf32>
    %279 = vector.shape_cast %278 : vector<1x1x1x48xf32> to vector<1x48xf32>
    %280 = vector.broadcast %279 : vector<1x48xf32> to vector<2x48xf32>
    %281 = arith.mulf %280, %269 : vector<2x48xf32>
    %282 = arith.subf %276, %281 : vector<2x48xf32>
    %c0_155 = arith.constant 0 : index
    %283 = arith.index_cast %c15_i32 : i32 to index
    %c0_156 = arith.constant 0 : index
    %c0_157 = arith.constant 0 : index
    %284 = vector.load %arg4[%c0_155, %283, %c0_156, %c0_157] : memref<1x16x1x48xf32, #tpu.memory_space<vmem>>, vector<1x1x1x48xf32>
    %285 = vector.shape_cast %284 : vector<1x1x1x48xf32> to vector<1x48xf32>
    %286 = vector.broadcast %285 : vector<1x48xf32> to vector<2x48xf32>
    %287 = arith.mulf %282, %286 : vector<2x48xf32>
    %288 = arith.index_cast %c15_i32 : i32 to index
    %c0_158 = arith.constant 0 : index
    %c0_159 = arith.constant 0 : index
    %289 = vector.load %arg14[%288, %c0_158, %c0_159] : memref<16x2x48xf32, #tpu.memory_space<vmem>>, vector<1x2x48xf32>
    %290 = vector.shape_cast %289 : vector<1x2x48xf32> to vector<2x48xf32>
    %291 = vector.shape_cast %287 : vector<2x48xf32> to vector<1x2x48xf32>
    tpu.vector_store %arg14[%288, %c0_158, %c0_159], %291 {strides = array<i32>} : memref<16x2x48xf32, #tpu.memory_space<vmem>>, vector<1x2x48xf32>,
    %c15_i32_160 = arith.constant 15 : i32
    %c0_i32_161 = arith.constant 0 : i32
    %c14_i32_162 = arith.constant 14 : i32
    %292 = arith.subi %c14_i32_162, %c0_i32_161 : i32
    %293 = arith.index_cast %292 : i32 to index
    %c0_163 = arith.constant 0 : index
    %c0_164 = arith.constant 0 : index
    %294 = vector.load %arg14[%293, %c0_163, %c0_164] : memref<16x2x48xf32, #tpu.memory_space<vmem>>, vector<1x2x48xf32>
    %295 = vector.shape_cast %294 : vector<1x2x48xf32> to vector<2x48xf32>
    %c0_165 = arith.constant 0 : index
    %296 = arith.index_cast %292 : i32 to index
    %c0_166 = arith.constant 0 : index
    %c0_167 = arith.constant 0 : index
    %297 = vector.load %arg3[%c0_165, %296, %c0_166, %c0_167] : memref<1x16x1x48xf32, #tpu.memory_space<vmem>>, vector<1x1x1x48xf32>
    %298 = vector.shape_cast %297 : vector<1x1x1x48xf32> to vector<1x48xf32>
    %299 = vector.broadcast %298 : vector<1x48xf32> to vector<2x48xf32>
    %300 = arith.mulf %299, %287 : vector<2x48xf32>
    %301 = arith.subf %295, %300 : vector<2x48xf32>
    %302 = arith.index_cast %292 : i32 to index
    %c0_168 = arith.constant 0 : index
    %c0_169 = arith.constant 0 : index
    %303 = vector.load %arg14[%302, %c0_168, %c0_169] : memref<16x2x48xf32, #tpu.memory_space<vmem>>, vector<1x2x48xf32>
    %304 = vector.shape_cast %303 : vector<1x2x48xf32> to vector<2x48xf32>
    %305 = vector.shape_cast %301 : vector<2x48xf32> to vector<1x2x48xf32>
    tpu.vector_store %arg14[%302, %c0_168, %c0_169], %305 {strides = array<i32>} : memref<16x2x48xf32, #tpu.memory_space<vmem>>, vector<1x2x48xf32>,
    %c1_i32_170 = arith.constant 1 : i32
    %c14_i32_171 = arith.constant 14 : i32
    %306 = arith.subi %c14_i32_171, %c1_i32_170 : i32
    %307 = arith.index_cast %306 : i32 to index
    %c0_172 = arith.constant 0 : index
    %c0_173 = arith.constant 0 : index
    %308 = vector.load %arg14[%307, %c0_172, %c0_173] : memref<16x2x48xf32, #tpu.memory_space<vmem>>, vector<1x2x48xf32>
    %309 = vector.shape_cast %308 : vector<1x2x48xf32> to vector<2x48xf32>
    %c0_174 = arith.constant 0 : index
    %310 = arith.index_cast %306 : i32 to index
    %c0_175 = arith.constant 0 : index
    %c0_176 = arith.constant 0 : index
    %311 = vector.load %arg3[%c0_174, %310, %c0_175, %c0_176] : memref<1x16x1x48xf32, #tpu.memory_space<vmem>>, vector<1x1x1x48xf32>
    %312 = vector.shape_cast %311 : vector<1x1x1x48xf32> to vector<1x48xf32>
    %313 = vector.broadcast %312 : vector<1x48xf32> to vector<2x48xf32>
    %314 = arith.mulf %313, %301 : vector<2x48xf32>
    %315 = arith.subf %309, %314 : vector<2x48xf32>
    %316 = arith.index_cast %306 : i32 to index
    %c0_177 = arith.constant 0 : index
    %c0_178 = arith.constant 0 : index
    %317 = vector.load %arg14[%316, %c0_177, %c0_178] : memref<16x2x48xf32, #tpu.memory_space<vmem>>, vector<1x2x48xf32>
    %318 = vector.shape_cast %317 : vector<1x2x48xf32> to vector<2x48xf32>
    %319 = vector.shape_cast %315 : vector<2x48xf32> to vector<1x2x48xf32>
    tpu.vector_store %arg14[%316, %c0_177, %c0_178], %319 {strides = array<i32>} : memref<16x2x48xf32, #tpu.memory_space<vmem>>, vector<1x2x48xf32>,
    %c2_i32_179 = arith.constant 2 : i32
    %c14_i32_180 = arith.constant 14 : i32
    %320 = arith.subi %c14_i32_180, %c2_i32_179 : i32
    %321 = arith.index_cast %320 : i32 to index
    %c0_181 = arith.constant 0 : index
    %c0_182 = arith.constant 0 : index
    %322 = vector.load %arg14[%321, %c0_181, %c0_182] : memref<16x2x48xf32, #tpu.memory_space<vmem>>, vector<1x2x48xf32>
    %323 = vector.shape_cast %322 : vector<1x2x48xf32> to vector<2x48xf32>
    %c0_183 = arith.constant 0 : index
    %324 = arith.index_cast %320 : i32 to index
    %c0_184 = arith.constant 0 : index
    %c0_185 = arith.constant 0 : index
    %325 = vector.load %arg3[%c0_183, %324, %c0_184, %c0_185] : memref<1x16x1x48xf32, #tpu.memory_space<vmem>>, vector<1x1x1x48xf32>
    %326 = vector.shape_cast %325 : vector<1x1x1x48xf32> to vector<1x48xf32>
    %327 = vector.broadcast %326 : vector<1x48xf32> to vector<2x48xf32>
    %328 = arith.mulf %327, %315 : vector<2x48xf32>
    %329 = arith.subf %323, %328 : vector<2x48xf32>
    %330 = arith.index_cast %320 : i32 to index
    %c0_186 = arith.constant 0 : index
    %c0_187 = arith.constant 0 : index
    %331 = vector.load %arg14[%330, %c0_186, %c0_187] : memref<16x2x48xf32, #tpu.memory_space<vmem>>, vector<1x2x48xf32>
    %332 = vector.shape_cast %331 : vector<1x2x48xf32> to vector<2x48xf32>
    %333 = vector.shape_cast %329 : vector<2x48xf32> to vector<1x2x48xf32>
    tpu.vector_store %arg14[%330, %c0_186, %c0_187], %333 {strides = array<i32>} : memref<16x2x48xf32, #tpu.memory_space<vmem>>, vector<1x2x48xf32>,
    %c3_i32_188 = arith.constant 3 : i32
    %c14_i32_189 = arith.constant 14 : i32
    %334 = arith.subi %c14_i32_189, %c3_i32_188 : i32
    %335 = arith.index_cast %334 : i32 to index
    %c0_190 = arith.constant 0 : index
    %c0_191 = arith.constant 0 : index
    %336 = vector.load %arg14[%335, %c0_190, %c0_191] : memref<16x2x48xf32, #tpu.memory_space<vmem>>, vector<1x2x48xf32>
    %337 = vector.shape_cast %336 : vector<1x2x48xf32> to vector<2x48xf32>
    %c0_192 = arith.constant 0 : index
    %338 = arith.index_cast %334 : i32 to index
    %c0_193 = arith.constant 0 : index
    %c0_194 = arith.constant 0 : index
    %339 = vector.load %arg3[%c0_192, %338, %c0_193, %c0_194] : memref<1x16x1x48xf32, #tpu.memory_space<vmem>>, vector<1x1x1x48xf32>
    %340 = vector.shape_cast %339 : vector<1x1x1x48xf32> to vector<1x48xf32>
    %341 = vector.broadcast %340 : vector<1x48xf32> to vector<2x48xf32>
    %342 = arith.mulf %341, %329 : vector<2x48xf32>
    %343 = arith.subf %337, %342 : vector<2x48xf32>
    %344 = arith.index_cast %334 : i32 to index
    %c0_195 = arith.constant 0 : index
    %c0_196 = arith.constant 0 : index
    %345 = vector.load %arg14[%344, %c0_195, %c0_196] : memref<16x2x48xf32, #tpu.memory_space<vmem>>, vector<1x2x48xf32>
    %346 = vector.shape_cast %345 : vector<1x2x48xf32> to vector<2x48xf32>
    %347 = vector.shape_cast %343 : vector<2x48xf32> to vector<1x2x48xf32>
    tpu.vector_store %arg14[%344, %c0_195, %c0_196], %347 {strides = array<i32>} : memref<16x2x48xf32, #tpu.memory_space<vmem>>, vector<1x2x48xf32>,
    %c4_i32_197 = arith.constant 4 : i32
    %c14_i32_198 = arith.constant 14 : i32
    %348 = arith.subi %c14_i32_198, %c4_i32_197 : i32
    %349 = arith.index_cast %348 : i32 to index
    %c0_199 = arith.constant 0 : index
    %c0_200 = arith.constant 0 : index
    %350 = vector.load %arg14[%349, %c0_199, %c0_200] : memref<16x2x48xf32, #tpu.memory_space<vmem>>, vector<1x2x48xf32>
    %351 = vector.shape_cast %350 : vector<1x2x48xf32> to vector<2x48xf32>
    %c0_201 = arith.constant 0 : index
    %352 = arith.index_cast %348 : i32 to index
    %c0_202 = arith.constant 0 : index
    %c0_203 = arith.constant 0 : index
    %353 = vector.load %arg3[%c0_201, %352, %c0_202, %c0_203] : memref<1x16x1x48xf32, #tpu.memory_space<vmem>>, vector<1x1x1x48xf32>
    %354 = vector.shape_cast %353 : vector<1x1x1x48xf32> to vector<1x48xf32>
    %355 = vector.broadcast %354 : vector<1x48xf32> to vector<2x48xf32>
    %356 = arith.mulf %355, %343 : vector<2x48xf32>
    %357 = arith.subf %351, %356 : vector<2x48xf32>
    %358 = arith.index_cast %348 : i32 to index
    %c0_204 = arith.constant 0 : index
    %c0_205 = arith.constant 0 : index
    %359 = vector.load %arg14[%358, %c0_204, %c0_205] : memref<16x2x48xf32, #tpu.memory_space<vmem>>, vector<1x2x48xf32>
    %360 = vector.shape_cast %359 : vector<1x2x48xf32> to vector<2x48xf32>
    %361 = vector.shape_cast %357 : vector<2x48xf32> to vector<1x2x48xf32>
    tpu.vector_store %arg14[%358, %c0_204, %c0_205], %361 {strides = array<i32>} : memref<16x2x48xf32, #tpu.memory_space<vmem>>, vector<1x2x48xf32>,
    %c5_i32_206 = arith.constant 5 : i32
    %c14_i32_207 = arith.constant 14 : i32
    %362 = arith.subi %c14_i32_207, %c5_i32_206 : i32
    %363 = arith.index_cast %362 : i32 to index
    %c0_208 = arith.constant 0 : index
    %c0_209 = arith.constant 0 : index
    %364 = vector.load %arg14[%363, %c0_208, %c0_209] : memref<16x2x48xf32, #tpu.memory_space<vmem>>, vector<1x2x48xf32>
    %365 = vector.shape_cast %364 : vector<1x2x48xf32> to vector<2x48xf32>
    %c0_210 = arith.constant 0 : index
    %366 = arith.index_cast %362 : i32 to index
    %c0_211 = arith.constant 0 : index
    %c0_212 = arith.constant 0 : index
    %367 = vector.load %arg3[%c0_210, %366, %c0_211, %c0_212] : memref<1x16x1x48xf32, #tpu.memory_space<vmem>>, vector<1x1x1x48xf32>
    %368 = vector.shape_cast %367 : vector<1x1x1x48xf32> to vector<1x48xf32>
    %369 = vector.broadcast %368 : vector<1x48xf32> to vector<2x48xf32>
    %370 = arith.mulf %369, %357 : vector<2x48xf32>
    %371 = arith.subf %365, %370 : vector<2x48xf32>
    %372 = arith.index_cast %362 : i32 to index
    %c0_213 = arith.constant 0 : index
    %c0_214 = arith.constant 0 : index
    %373 = vector.load %arg14[%372, %c0_213, %c0_214] : memref<16x2x48xf32, #tpu.memory_space<vmem>>, vector<1x2x48xf32>
    %374 = vector.shape_cast %373 : vector<1x2x48xf32> to vector<2x48xf32>
    %375 = vector.shape_cast %371 : vector<2x48xf32> to vector<1x2x48xf32>
    tpu.vector_store %arg14[%372, %c0_213, %c0_214], %375 {strides = array<i32>} : memref<16x2x48xf32, #tpu.memory_space<vmem>>, vector<1x2x48xf32>,
    %c6_i32_215 = arith.constant 6 : i32
    %c14_i32_216 = arith.constant 14 : i32
    %376 = arith.subi %c14_i32_216, %c6_i32_215 : i32
    %377 = arith.index_cast %376 : i32 to index
    %c0_217 = arith.constant 0 : index
    %c0_218 = arith.constant 0 : index
    %378 = vector.load %arg14[%377, %c0_217, %c0_218] : memref<16x2x48xf32, #tpu.memory_space<vmem>>, vector<1x2x48xf32>
    %379 = vector.shape_cast %378 : vector<1x2x48xf32> to vector<2x48xf32>
    %c0_219 = arith.constant 0 : index
    %380 = arith.index_cast %376 : i32 to index
    %c0_220 = arith.constant 0 : index
    %c0_221 = arith.constant 0 : index
    %381 = vector.load %arg3[%c0_219, %380, %c0_220, %c0_221] : memref<1x16x1x48xf32, #tpu.memory_space<vmem>>, vector<1x1x1x48xf32>
    %382 = vector.shape_cast %381 : vector<1x1x1x48xf32> to vector<1x48xf32>
    %383 = vector.broadcast %382 : vector<1x48xf32> to vector<2x48xf32>
    %384 = arith.mulf %383, %371 : vector<2x48xf32>
    %385 = arith.subf %379, %384 : vector<2x48xf32>
    %386 = arith.index_cast %376 : i32 to index
    %c0_222 = arith.constant 0 : index
    %c0_223 = arith.constant 0 : index
    %387 = vector.load %arg14[%386, %c0_222, %c0_223] : memref<16x2x48xf32, #tpu.memory_space<vmem>>, vector<1x2x48xf32>
    %388 = vector.shape_cast %387 : vector<1x2x48xf32> to vector<2x48xf32>
    %389 = vector.shape_cast %385 : vector<2x48xf32> to vector<1x2x48xf32>
    tpu.vector_store %arg14[%386, %c0_222, %c0_223], %389 {strides = array<i32>} : memref<16x2x48xf32, #tpu.memory_space<vmem>>, vector<1x2x48xf32>,
    %c7_i32_224 = arith.constant 7 : i32
    %c14_i32_225 = arith.constant 14 : i32
    %390 = arith.subi %c14_i32_225, %c7_i32_224 : i32
    %391 = arith.index_cast %390 : i32 to index
    %c0_226 = arith.constant 0 : index
    %c0_227 = arith.constant 0 : index
    %392 = vector.load %arg14[%391, %c0_226, %c0_227] : memref<16x2x48xf32, #tpu.memory_space<vmem>>, vector<1x2x48xf32>
    %393 = vector.shape_cast %392 : vector<1x2x48xf32> to vector<2x48xf32>
    %c0_228 = arith.constant 0 : index
    %394 = arith.index_cast %390 : i32 to index
    %c0_229 = arith.constant 0 : index
    %c0_230 = arith.constant 0 : index
    %395 = vector.load %arg3[%c0_228, %394, %c0_229, %c0_230] : memref<1x16x1x48xf32, #tpu.memory_space<vmem>>, vector<1x1x1x48xf32>
    %396 = vector.shape_cast %395 : vector<1x1x1x48xf32> to vector<1x48xf32>
    %397 = vector.broadcast %396 : vector<1x48xf32> to vector<2x48xf32>
    %398 = arith.mulf %397, %385 : vector<2x48xf32>
    %399 = arith.subf %393, %398 : vector<2x48xf32>
    %400 = arith.index_cast %390 : i32 to index
    %c0_231 = arith.constant 0 : index
    %c0_232 = arith.constant 0 : index
    %401 = vector.load %arg14[%400, %c0_231, %c0_232] : memref<16x2x48xf32, #tpu.memory_space<vmem>>, vector<1x2x48xf32>
    %402 = vector.shape_cast %401 : vector<1x2x48xf32> to vector<2x48xf32>
    %403 = vector.shape_cast %399 : vector<2x48xf32> to vector<1x2x48xf32>
    tpu.vector_store %arg14[%400, %c0_231, %c0_232], %403 {strides = array<i32>} : memref<16x2x48xf32, #tpu.memory_space<vmem>>, vector<1x2x48xf32>,
    %c8_i32_233 = arith.constant 8 : i32
    %c14_i32_234 = arith.constant 14 : i32
    %404 = arith.subi %c14_i32_234, %c8_i32_233 : i32
    %405 = arith.index_cast %404 : i32 to index
    %c0_235 = arith.constant 0 : index
    %c0_236 = arith.constant 0 : index
    %406 = vector.load %arg14[%405, %c0_235, %c0_236] : memref<16x2x48xf32, #tpu.memory_space<vmem>>, vector<1x2x48xf32>
    %407 = vector.shape_cast %406 : vector<1x2x48xf32> to vector<2x48xf32>
    %c0_237 = arith.constant 0 : index
    %408 = arith.index_cast %404 : i32 to index
    %c0_238 = arith.constant 0 : index
    %c0_239 = arith.constant 0 : index
    %409 = vector.load %arg3[%c0_237, %408, %c0_238, %c0_239] : memref<1x16x1x48xf32, #tpu.memory_space<vmem>>, vector<1x1x1x48xf32>
    %410 = vector.shape_cast %409 : vector<1x1x1x48xf32> to vector<1x48xf32>
    %411 = vector.broadcast %410 : vector<1x48xf32> to vector<2x48xf32>
    %412 = arith.mulf %411, %399 : vector<2x48xf32>
    %413 = arith.subf %407, %412 : vector<2x48xf32>
    %414 = arith.index_cast %404 : i32 to index
    %c0_240 = arith.constant 0 : index
    %c0_241 = arith.constant 0 : index
    %415 = vector.load %arg14[%414, %c0_240, %c0_241] : memref<16x2x48xf32, #tpu.memory_space<vmem>>, vector<1x2x48xf32>
    %416 = vector.shape_cast %415 : vector<1x2x48xf32> to vector<2x48xf32>
    %417 = vector.shape_cast %413 : vector<2x48xf32> to vector<1x2x48xf32>
    tpu.vector_store %arg14[%414, %c0_240, %c0_241], %417 {strides = array<i32>} : memref<16x2x48xf32, #tpu.memory_space<vmem>>, vector<1x2x48xf32>,
    %c9_i32_242 = arith.constant 9 : i32
    %c14_i32_243 = arith.constant 14 : i32
    %418 = arith.subi %c14_i32_243, %c9_i32_242 : i32
    %419 = arith.index_cast %418 : i32 to index
    %c0_244 = arith.constant 0 : index
    %c0_245 = arith.constant 0 : index
    %420 = vector.load %arg14[%419, %c0_244, %c0_245] : memref<16x2x48xf32, #tpu.memory_space<vmem>>, vector<1x2x48xf32>
    %421 = vector.shape_cast %420 : vector<1x2x48xf32> to vector<2x48xf32>
    %c0_246 = arith.constant 0 : index
    %422 = arith.index_cast %418 : i32 to index
    %c0_247 = arith.constant 0 : index
    %c0_248 = arith.constant 0 : index
    %423 = vector.load %arg3[%c0_246, %422, %c0_247, %c0_248] : memref<1x16x1x48xf32, #tpu.memory_space<vmem>>, vector<1x1x1x48xf32>
    %424 = vector.shape_cast %423 : vector<1x1x1x48xf32> to vector<1x48xf32>
    %425 = vector.broadcast %424 : vector<1x48xf32> to vector<2x48xf32>
    %426 = arith.mulf %425, %413 : vector<2x48xf32>
    %427 = arith.subf %421, %426 : vector<2x48xf32>
    %428 = arith.index_cast %418 : i32 to index
    %c0_249 = arith.constant 0 : index
    %c0_250 = arith.constant 0 : index
    %429 = vector.load %arg14[%428, %c0_249, %c0_250] : memref<16x2x48xf32, #tpu.memory_space<vmem>>, vector<1x2x48xf32>
    %430 = vector.shape_cast %429 : vector<1x2x48xf32> to vector<2x48xf32>
    %431 = vector.shape_cast %427 : vector<2x48xf32> to vector<1x2x48xf32>
    tpu.vector_store %arg14[%428, %c0_249, %c0_250], %431 {strides = array<i32>} : memref<16x2x48xf32, #tpu.memory_space<vmem>>, vector<1x2x48xf32>,
    %c10_i32_251 = arith.constant 10 : i32
    %c14_i32_252 = arith.constant 14 : i32
    %432 = arith.subi %c14_i32_252, %c10_i32_251 : i32
    %433 = arith.index_cast %432 : i32 to index
    %c0_253 = arith.constant 0 : index
    %c0_254 = arith.constant 0 : index
    %434 = vector.load %arg14[%433, %c0_253, %c0_254] : memref<16x2x48xf32, #tpu.memory_space<vmem>>, vector<1x2x48xf32>
    %435 = vector.shape_cast %434 : vector<1x2x48xf32> to vector<2x48xf32>
    %c0_255 = arith.constant 0 : index
    %436 = arith.index_cast %432 : i32 to index
    %c0_256 = arith.constant 0 : index
    %c0_257 = arith.constant 0 : index
    %437 = vector.load %arg3[%c0_255, %436, %c0_256, %c0_257] : memref<1x16x1x48xf32, #tpu.memory_space<vmem>>, vector<1x1x1x48xf32>
    %438 = vector.shape_cast %437 : vector<1x1x1x48xf32> to vector<1x48xf32>
    %439 = vector.broadcast %438 : vector<1x48xf32> to vector<2x48xf32>
    %440 = arith.mulf %439, %427 : vector<2x48xf32>
    %441 = arith.subf %435, %440 : vector<2x48xf32>
    %442 = arith.index_cast %432 : i32 to index
    %c0_258 = arith.constant 0 : index
    %c0_259 = arith.constant 0 : index
    %443 = vector.load %arg14[%442, %c0_258, %c0_259] : memref<16x2x48xf32, #tpu.memory_space<vmem>>, vector<1x2x48xf32>
    %444 = vector.shape_cast %443 : vector<1x2x48xf32> to vector<2x48xf32>
    %445 = vector.shape_cast %441 : vector<2x48xf32> to vector<1x2x48xf32>
    tpu.vector_store %arg14[%442, %c0_258, %c0_259], %445 {strides = array<i32>} : memref<16x2x48xf32, #tpu.memory_space<vmem>>, vector<1x2x48xf32>,
    %c11_i32_260 = arith.constant 11 : i32
    %c14_i32_261 = arith.constant 14 : i32
    %446 = arith.subi %c14_i32_261, %c11_i32_260 : i32
    %447 = arith.index_cast %446 : i32 to index
    %c0_262 = arith.constant 0 : index
    %c0_263 = arith.constant 0 : index
    %448 = vector.load %arg14[%447, %c0_262, %c0_263] : memref<16x2x48xf32, #tpu.memory_space<vmem>>, vector<1x2x48xf32>
    %449 = vector.shape_cast %448 : vector<1x2x48xf32> to vector<2x48xf32>
    %c0_264 = arith.constant 0 : index
    %450 = arith.index_cast %446 : i32 to index
    %c0_265 = arith.constant 0 : index
    %c0_266 = arith.constant 0 : index
    %451 = vector.load %arg3[%c0_264, %450, %c0_265, %c0_266] : memref<1x16x1x48xf32, #tpu.memory_space<vmem>>, vector<1x1x1x48xf32>
    %452 = vector.shape_cast %451 : vector<1x1x1x48xf32> to vector<1x48xf32>
    %453 = vector.broadcast %452 : vector<1x48xf32> to vector<2x48xf32>
    %454 = arith.mulf %453, %441 : vector<2x48xf32>
    %455 = arith.subf %449, %454 : vector<2x48xf32>
    %456 = arith.index_cast %446 : i32 to index
    %c0_267 = arith.constant 0 : index
    %c0_268 = arith.constant 0 : index
    %457 = vector.load %arg14[%456, %c0_267, %c0_268] : memref<16x2x48xf32, #tpu.memory_space<vmem>>, vector<1x2x48xf32>
    %458 = vector.shape_cast %457 : vector<1x2x48xf32> to vector<2x48xf32>
    %459 = vector.shape_cast %455 : vector<2x48xf32> to vector<1x2x48xf32>
    tpu.vector_store %arg14[%456, %c0_267, %c0_268], %459 {strides = array<i32>} : memref<16x2x48xf32, #tpu.memory_space<vmem>>, vector<1x2x48xf32>,
    %c12_i32_269 = arith.constant 12 : i32
    %c14_i32_270 = arith.constant 14 : i32
    %460 = arith.subi %c14_i32_270, %c12_i32_269 : i32
    %461 = arith.index_cast %460 : i32 to index
    %c0_271 = arith.constant 0 : index
    %c0_272 = arith.constant 0 : index
    %462 = vector.load %arg14[%461, %c0_271, %c0_272] : memref<16x2x48xf32, #tpu.memory_space<vmem>>, vector<1x2x48xf32>
    %463 = vector.shape_cast %462 : vector<1x2x48xf32> to vector<2x48xf32>
    %c0_273 = arith.constant 0 : index
    %464 = arith.index_cast %460 : i32 to index
    %c0_274 = arith.constant 0 : index
    %c0_275 = arith.constant 0 : index
    %465 = vector.load %arg3[%c0_273, %464, %c0_274, %c0_275] : memref<1x16x1x48xf32, #tpu.memory_space<vmem>>, vector<1x1x1x48xf32>
    %466 = vector.shape_cast %465 : vector<1x1x1x48xf32> to vector<1x48xf32>
    %467 = vector.broadcast %466 : vector<1x48xf32> to vector<2x48xf32>
    %468 = arith.mulf %467, %455 : vector<2x48xf32>
    %469 = arith.subf %463, %468 : vector<2x48xf32>
    %470 = arith.index_cast %460 : i32 to index
    %c0_276 = arith.constant 0 : index
    %c0_277 = arith.constant 0 : index
    %471 = vector.load %arg14[%470, %c0_276, %c0_277] : memref<16x2x48xf32, #tpu.memory_space<vmem>>, vector<1x2x48xf32>
    %472 = vector.shape_cast %471 : vector<1x2x48xf32> to vector<2x48xf32>
    %473 = vector.shape_cast %469 : vector<2x48xf32> to vector<1x2x48xf32>
    tpu.vector_store %arg14[%470, %c0_276, %c0_277], %473 {strides = array<i32>} : memref<16x2x48xf32, #tpu.memory_space<vmem>>, vector<1x2x48xf32>,
    %c13_i32_278 = arith.constant 13 : i32
    %c14_i32_279 = arith.constant 14 : i32
    %474 = arith.subi %c14_i32_279, %c13_i32_278 : i32
    %475 = arith.index_cast %474 : i32 to index
    %c0_280 = arith.constant 0 : index
    %c0_281 = arith.constant 0 : index
    %476 = vector.load %arg14[%475, %c0_280, %c0_281] : memref<16x2x48xf32, #tpu.memory_space<vmem>>, vector<1x2x48xf32>
    %477 = vector.shape_cast %476 : vector<1x2x48xf32> to vector<2x48xf32>
    %c0_282 = arith.constant 0 : index
    %478 = arith.index_cast %474 : i32 to index
    %c0_283 = arith.constant 0 : index
    %c0_284 = arith.constant 0 : index
    %479 = vector.load %arg3[%c0_282, %478, %c0_283, %c0_284] : memref<1x16x1x48xf32, #tpu.memory_space<vmem>>, vector<1x1x1x48xf32>
    %480 = vector.shape_cast %479 : vector<1x1x1x48xf32> to vector<1x48xf32>
    %481 = vector.broadcast %480 : vector<1x48xf32> to vector<2x48xf32>
    %482 = arith.mulf %481, %469 : vector<2x48xf32>
    %483 = arith.subf %477, %482 : vector<2x48xf32>
    %484 = arith.index_cast %474 : i32 to index
    %c0_285 = arith.constant 0 : index
    %c0_286 = arith.constant 0 : index
    %485 = vector.load %arg14[%484, %c0_285, %c0_286] : memref<16x2x48xf32, #tpu.memory_space<vmem>>, vector<1x2x48xf32>
    %486 = vector.shape_cast %485 : vector<1x2x48xf32> to vector<2x48xf32>
    %487 = vector.shape_cast %483 : vector<2x48xf32> to vector<1x2x48xf32>
    tpu.vector_store %arg14[%484, %c0_285, %c0_286], %487 {strides = array<i32>} : memref<16x2x48xf32, #tpu.memory_space<vmem>>, vector<1x2x48xf32>,
    %c14_i32_287 = arith.constant 14 : i32
    %c14_i32_288 = arith.constant 14 : i32
    %488 = arith.subi %c14_i32_288, %c14_i32_287 : i32
    %489 = arith.index_cast %488 : i32 to index
    %c0_289 = arith.constant 0 : index
    %c0_290 = arith.constant 0 : index
    %490 = vector.load %arg14[%489, %c0_289, %c0_290] : memref<16x2x48xf32, #tpu.memory_space<vmem>>, vector<1x2x48xf32>
    %491 = vector.shape_cast %490 : vector<1x2x48xf32> to vector<2x48xf32>
    %c0_291 = arith.constant 0 : index
    %492 = arith.index_cast %488 : i32 to index
    %c0_292 = arith.constant 0 : index
    %c0_293 = arith.constant 0 : index
    %493 = vector.load %arg3[%c0_291, %492, %c0_292, %c0_293] : memref<1x16x1x48xf32, #tpu.memory_space<vmem>>, vector<1x1x1x48xf32>
    %494 = vector.shape_cast %493 : vector<1x1x1x48xf32> to vector<1x48xf32>
    %495 = vector.broadcast %494 : vector<1x48xf32> to vector<2x48xf32>
    %496 = arith.mulf %495, %483 : vector<2x48xf32>
    %497 = arith.subf %491, %496 : vector<2x48xf32>
    %498 = arith.index_cast %488 : i32 to index
    %c0_294 = arith.constant 0 : index
    %c0_295 = arith.constant 0 : index
    %499 = vector.load %arg14[%498, %c0_294, %c0_295] : memref<16x2x48xf32, #tpu.memory_space<vmem>>, vector<1x2x48xf32>
    %500 = vector.shape_cast %499 : vector<1x2x48xf32> to vector<2x48xf32>
    %501 = vector.shape_cast %497 : vector<2x48xf32> to vector<1x2x48xf32>
    tpu.vector_store %arg14[%498, %c0_294, %c0_295], %501 {strides = array<i32>} : memref<16x2x48xf32, #tpu.memory_space<vmem>>, vector<1x2x48xf32>,
    %c15_i32_296 = arith.constant 15 : i32
    %c0_297 = arith.constant 0 : index
    %c0_298 = arith.constant 0 : index
    %c0_299 = arith.constant 0 : index
    %502 = vector.load %arg14[%c0_297, %c0_298, %c0_299] : memref<16x2x48xf32, #tpu.memory_space<vmem>>, vector<16x1x16xf32>
    %503 = vector.shape_cast %502 : vector<16x1x16xf32> to vector<16x16xf32>
    %cst = arith.constant dense<0.000000e+00> : vector<16x16xf32>
    %504 = tpu.matmul %7, %503, %cst {dimension_numbers = #tpu.dot_dimension_numbers<[1], [1], [0], [0], [0, 0, 1, 0], [], []>, precision = #tpu.contract_precision<fp32>} : vector<16x16xf32>, vector<16x16xf32>, vector<16x16xf32> -> vector<16x16xf32>
    %c0_300 = arith.constant 0 : index
    %c0_301 = arith.constant 0 : index
    %c0_302 = arith.constant 0 : index
    %505 = vector.load %arg15[%c0_300, %c0_301, %c0_302] : memref<16x2x48xf32, #tpu.memory_space<vmem>>, vector<16x1x16xf32>
    %506 = vector.shape_cast %505 : vector<16x1x16xf32> to vector<16x16xf32>
    %507 = vector.shape_cast %504 : vector<16x16xf32> to vector<16x1x16xf32>
    tpu.vector_store %arg15[%c0_300, %c0_301, %c0_302], %507 {strides = array<i32>} : memref<16x2x48xf32, #tpu.memory_space<vmem>>, vector<16x1x16xf32>,
    %c0_303 = arith.constant 0 : index
    %c0_304 = arith.constant 0 : index
    %c16 = arith.constant 16 : index
    %508 = vector.load %arg14[%c0_303, %c0_304, %c16] : memref<16x2x48xf32, #tpu.memory_space<vmem>>, vector<16x1x16xf32>
    %509 = vector.shape_cast %508 : vector<16x1x16xf32> to vector<16x16xf32>
    %cst_305 = arith.constant dense<0.000000e+00> : vector<16x16xf32>
    %510 = tpu.matmul %7, %509, %cst_305 {dimension_numbers = #tpu.dot_dimension_numbers<[1], [1], [0], [0], [0, 0, 1, 0], [], []>, precision = #tpu.contract_precision<fp32>} : vector<16x16xf32>, vector<16x16xf32>, vector<16x16xf32> -> vector<16x16xf32>
    %c0_306 = arith.constant 0 : index
    %c0_307 = arith.constant 0 : index
    %c16_308 = arith.constant 16 : index
    %511 = vector.load %arg15[%c0_306, %c0_307, %c16_308] : memref<16x2x48xf32, #tpu.memory_space<vmem>>, vector<16x1x16xf32>
    %512 = vector.shape_cast %511 : vector<16x1x16xf32> to vector<16x16xf32>
    %513 = vector.shape_cast %510 : vector<16x16xf32> to vector<16x1x16xf32>
    tpu.vector_store %arg15[%c0_306, %c0_307, %c16_308], %513 {strides = array<i32>} : memref<16x2x48xf32, #tpu.memory_space<vmem>>, vector<16x1x16xf32>,
    %c0_309 = arith.constant 0 : index
    %c0_310 = arith.constant 0 : index
    %c32 = arith.constant 32 : index
    %514 = vector.load %arg14[%c0_309, %c0_310, %c32] : memref<16x2x48xf32, #tpu.memory_space<vmem>>, vector<16x1x16xf32>
    %515 = vector.shape_cast %514 : vector<16x1x16xf32> to vector<16x16xf32>
    %cst_311 = arith.constant dense<0.000000e+00> : vector<16x16xf32>
    %516 = tpu.matmul %7, %515, %cst_311 {dimension_numbers = #tpu.dot_dimension_numbers<[1], [1], [0], [0], [0, 0, 1, 0], [], []>, precision = #tpu.contract_precision<fp32>} : vector<16x16xf32>, vector<16x16xf32>, vector<16x16xf32> -> vector<16x16xf32>
    %c0_312 = arith.constant 0 : index
    %c0_313 = arith.constant 0 : index
    %c32_314 = arith.constant 32 : index
    %517 = vector.load %arg15[%c0_312, %c0_313, %c32_314] : memref<16x2x48xf32, #tpu.memory_space<vmem>>, vector<16x1x16xf32>
    %518 = vector.shape_cast %517 : vector<16x1x16xf32> to vector<16x16xf32>
    %519 = vector.shape_cast %516 : vector<16x16xf32> to vector<16x1x16xf32>
    tpu.vector_store %arg15[%c0_312, %c0_313, %c32_314], %519 {strides = array<i32>} : memref<16x2x48xf32, #tpu.memory_space<vmem>>, vector<16x1x16xf32>,
    %c0_315 = arith.constant 0 : index
    %c1 = arith.constant 1 : index
    %c0_316 = arith.constant 0 : index
    %520 = vector.load %arg14[%c0_315, %c1, %c0_316] : memref<16x2x48xf32, #tpu.memory_space<vmem>>, vector<16x1x16xf32>
    %521 = vector.shape_cast %520 : vector<16x1x16xf32> to vector<16x16xf32>
    %cst_317 = arith.constant dense<0.000000e+00> : vector<16x16xf32>
    %522 = tpu.matmul %7, %521, %cst_317 {dimension_numbers = #tpu.dot_dimension_numbers<[1], [1], [0], [0], [0, 0, 1, 0], [], []>, precision = #tpu.contract_precision<fp32>} : vector<16x16xf32>, vector<16x16xf32>, vector<16x16xf32> -> vector<16x16xf32>
    %c0_318 = arith.constant 0 : index
    %c1_319 = arith.constant 1 : index
    %c0_320 = arith.constant 0 : index
    %523 = vector.load %arg15[%c0_318, %c1_319, %c0_320] : memref<16x2x48xf32, #tpu.memory_space<vmem>>, vector<16x1x16xf32>
    %524 = vector.shape_cast %523 : vector<16x1x16xf32> to vector<16x16xf32>
    %525 = vector.shape_cast %522 : vector<16x16xf32> to vector<16x1x16xf32>
    tpu.vector_store %arg15[%c0_318, %c1_319, %c0_320], %525 {strides = array<i32>} : memref<16x2x48xf32, #tpu.memory_space<vmem>>, vector<16x1x16xf32>,
    %c0_321 = arith.constant 0 : index
    %c1_322 = arith.constant 1 : index
    %c16_323 = arith.constant 16 : index
    %526 = vector.load %arg14[%c0_321, %c1_322, %c16_323] : memref<16x2x48xf32, #tpu.memory_space<vmem>>, vector<16x1x16xf32>
    %527 = vector.shape_cast %526 : vector<16x1x16xf32> to vector<16x16xf32>
    %cst_324 = arith.constant dense<0.000000e+00> : vector<16x16xf32>
    %528 = tpu.matmul %7, %527, %cst_324 {dimension_numbers = #tpu.dot_dimension_numbers<[1], [1], [0], [0], [0, 0, 1, 0], [], []>, precision = #tpu.contract_precision<fp32>} : vector<16x16xf32>, vector<16x16xf32>, vector<16x16xf32> -> vector<16x16xf32>
    %c0_325 = arith.constant 0 : index
    %c1_326 = arith.constant 1 : index
    %c16_327 = arith.constant 16 : index
    %529 = vector.load %arg15[%c0_325, %c1_326, %c16_327] : memref<16x2x48xf32, #tpu.memory_space<vmem>>, vector<16x1x16xf32>
    %530 = vector.shape_cast %529 : vector<16x1x16xf32> to vector<16x16xf32>
    %531 = vector.shape_cast %528 : vector<16x16xf32> to vector<16x1x16xf32>
    tpu.vector_store %arg15[%c0_325, %c1_326, %c16_327], %531 {strides = array<i32>} : memref<16x2x48xf32, #tpu.memory_space<vmem>>, vector<16x1x16xf32>,
    %c0_328 = arith.constant 0 : index
    %c1_329 = arith.constant 1 : index
    %c32_330 = arith.constant 32 : index
    %532 = vector.load %arg14[%c0_328, %c1_329, %c32_330] : memref<16x2x48xf32, #tpu.memory_space<vmem>>, vector<16x1x16xf32>
    %533 = vector.shape_cast %532 : vector<16x1x16xf32> to vector<16x16xf32>
    %cst_331 = arith.constant dense<0.000000e+00> : vector<16x16xf32>
    %534 = tpu.matmul %7, %533, %cst_331 {dimension_numbers = #tpu.dot_dimension_numbers<[1], [1], [0], [0], [0, 0, 1, 0], [], []>, precision = #tpu.contract_precision<fp32>} : vector<16x16xf32>, vector<16x16xf32>, vector<16x16xf32> -> vector<16x16xf32>
    %c0_332 = arith.constant 0 : index
    %c1_333 = arith.constant 1 : index
    %c32_334 = arith.constant 32 : index
    %535 = vector.load %arg15[%c0_332, %c1_333, %c32_334] : memref<16x2x48xf32, #tpu.memory_space<vmem>>, vector<16x1x16xf32>
    %536 = vector.shape_cast %535 : vector<16x1x16xf32> to vector<16x16xf32>
    %537 = vector.shape_cast %534 : vector<16x16xf32> to vector<16x1x16xf32>
    tpu.vector_store %arg15[%c0_332, %c1_333, %c32_334], %537 {strides = array<i32>} : memref<16x2x48xf32, #tpu.memory_space<vmem>>, vector<16x1x16xf32>,
    %c0_335 = arith.constant 0 : index
    %c0_336 = arith.constant 0 : index
    %c0_337 = arith.constant 0 : index
    %538 = vector.load %arg15[%c0_335, %c0_336, %c0_337] : memref<16x2x48xf32, #tpu.memory_space<vmem>>, vector<1x2x48xf32>
    %539 = vector.shape_cast %538 : vector<1x2x48xf32> to vector<2x48xf32>
    %c0_338 = arith.constant 0 : index
    %c0_339 = arith.constant 0 : index
    %c0_340 = arith.constant 0 : index
    %c0_341 = arith.constant 0 : index
    %540 = vector.load %arg10[%c0_338, %c0_339, %c0_340, %c0_341] : memref<1x16x1x48xf32, #tpu.memory_space<vmem>>, vector<1x1x1x48xf32>
    %541 = vector.shape_cast %540 : vector<1x1x1x48xf32> to vector<1x48xf32>
    %542 = vector.broadcast %541 : vector<1x48xf32> to vector<2x48xf32>
    %543 = arith.mulf %539, %542 : vector<2x48xf32>
    %c0_342 = arith.constant 0 : index
    %c0_343 = arith.constant 0 : index
    %c0_344 = arith.constant 0 : index
    %544 = vector.load %arg15[%c0_342, %c0_343, %c0_344] : memref<16x2x48xf32, #tpu.memory_space<vmem>>, vector<1x2x48xf32>
    %545 = vector.shape_cast %544 : vector<1x2x48xf32> to vector<2x48xf32>
    %546 = vector.shape_cast %543 : vector<2x48xf32> to vector<1x2x48xf32>
    tpu.vector_store %arg15[%c0_342, %c0_343, %c0_344], %546 {strides = array<i32>} : memref<16x2x48xf32, #tpu.memory_space<vmem>>, vector<1x2x48xf32>,
    %c1_i32_345 = arith.constant 1 : i32
    %547 = arith.index_cast %c1_i32_345 : i32 to index
    %c0_346 = arith.constant 0 : index
    %c0_347 = arith.constant 0 : index
    %548 = vector.load %arg15[%547, %c0_346, %c0_347] : memref<16x2x48xf32, #tpu.memory_space<vmem>>, vector<1x2x48xf32>
    %549 = vector.shape_cast %548 : vector<1x2x48xf32> to vector<2x48xf32>
    %c0_348 = arith.constant 0 : index
    %550 = arith.index_cast %c1_i32_345 : i32 to index
    %c0_349 = arith.constant 0 : index
    %c0_350 = arith.constant 0 : index
    %551 = vector.load %arg8[%c0_348, %550, %c0_349, %c0_350] : memref<1x16x1x48xf32, #tpu.memory_space<vmem>>, vector<1x1x1x48xf32>
    %552 = vector.shape_cast %551 : vector<1x1x1x48xf32> to vector<1x48xf32>
    %553 = vector.broadcast %552 : vector<1x48xf32> to vector<2x48xf32>
    %554 = arith.mulf %553, %543 : vector<2x48xf32>
    %555 = arith.subf %549, %554 : vector<2x48xf32>
    %c0_351 = arith.constant 0 : index
    %556 = arith.index_cast %c1_i32_345 : i32 to index
    %c0_352 = arith.constant 0 : index
    %c0_353 = arith.constant 0 : index
    %557 = vector.load %arg10[%c0_351, %556, %c0_352, %c0_353] : memref<1x16x1x48xf32, #tpu.memory_space<vmem>>, vector<1x1x1x48xf32>
    %558 = vector.shape_cast %557 : vector<1x1x1x48xf32> to vector<1x48xf32>
    %559 = vector.broadcast %558 : vector<1x48xf32> to vector<2x48xf32>
    %560 = arith.mulf %555, %559 : vector<2x48xf32>
    %561 = arith.index_cast %c1_i32_345 : i32 to index
    %c0_354 = arith.constant 0 : index
    %c0_355 = arith.constant 0 : index
    %562 = vector.load %arg15[%561, %c0_354, %c0_355] : memref<16x2x48xf32, #tpu.memory_space<vmem>>, vector<1x2x48xf32>
    %563 = vector.shape_cast %562 : vector<1x2x48xf32> to vector<2x48xf32>
    %564 = vector.shape_cast %560 : vector<2x48xf32> to vector<1x2x48xf32>
    tpu.vector_store %arg15[%561, %c0_354, %c0_355], %564 {strides = array<i32>} : memref<16x2x48xf32, #tpu.memory_space<vmem>>, vector<1x2x48xf32>,
    %c2_i32_356 = arith.constant 2 : i32
    %565 = arith.index_cast %c2_i32_356 : i32 to index
    %c0_357 = arith.constant 0 : index
    %c0_358 = arith.constant 0 : index
    %566 = vector.load %arg15[%565, %c0_357, %c0_358] : memref<16x2x48xf32, #tpu.memory_space<vmem>>, vector<1x2x48xf32>
    %567 = vector.shape_cast %566 : vector<1x2x48xf32> to vector<2x48xf32>
    %c0_359 = arith.constant 0 : index
    %568 = arith.index_cast %c2_i32_356 : i32 to index
    %c0_360 = arith.constant 0 : index
    %c0_361 = arith.constant 0 : index
    %569 = vector.load %arg8[%c0_359, %568, %c0_360, %c0_361] : memref<1x16x1x48xf32, #tpu.memory_space<vmem>>, vector<1x1x1x48xf32>
    %570 = vector.shape_cast %569 : vector<1x1x1x48xf32> to vector<1x48xf32>
    %571 = vector.broadcast %570 : vector<1x48xf32> to vector<2x48xf32>
    %572 = arith.mulf %571, %560 : vector<2x48xf32>
    %573 = arith.subf %567, %572 : vector<2x48xf32>
    %c0_362 = arith.constant 0 : index
    %574 = arith.index_cast %c2_i32_356 : i32 to index
    %c0_363 = arith.constant 0 : index
    %c0_364 = arith.constant 0 : index
    %575 = vector.load %arg10[%c0_362, %574, %c0_363, %c0_364] : memref<1x16x1x48xf32, #tpu.memory_space<vmem>>, vector<1x1x1x48xf32>
    %576 = vector.shape_cast %575 : vector<1x1x1x48xf32> to vector<1x48xf32>
    %577 = vector.broadcast %576 : vector<1x48xf32> to vector<2x48xf32>
    %578 = arith.mulf %573, %577 : vector<2x48xf32>
    %579 = arith.index_cast %c2_i32_356 : i32 to index
    %c0_365 = arith.constant 0 : index
    %c0_366 = arith.constant 0 : index
    %580 = vector.load %arg15[%579, %c0_365, %c0_366] : memref<16x2x48xf32, #tpu.memory_space<vmem>>, vector<1x2x48xf32>
    %581 = vector.shape_cast %580 : vector<1x2x48xf32> to vector<2x48xf32>
    %582 = vector.shape_cast %578 : vector<2x48xf32> to vector<1x2x48xf32>
    tpu.vector_store %arg15[%579, %c0_365, %c0_366], %582 {strides = array<i32>} : memref<16x2x48xf32, #tpu.memory_space<vmem>>, vector<1x2x48xf32>,
    %c3_i32_367 = arith.constant 3 : i32
    %583 = arith.index_cast %c3_i32_367 : i32 to index
    %c0_368 = arith.constant 0 : index
    %c0_369 = arith.constant 0 : index
    %584 = vector.load %arg15[%583, %c0_368, %c0_369] : memref<16x2x48xf32, #tpu.memory_space<vmem>>, vector<1x2x48xf32>
    %585 = vector.shape_cast %584 : vector<1x2x48xf32> to vector<2x48xf32>
    %c0_370 = arith.constant 0 : index
    %586 = arith.index_cast %c3_i32_367 : i32 to index
    %c0_371 = arith.constant 0 : index
    %c0_372 = arith.constant 0 : index
    %587 = vector.load %arg8[%c0_370, %586, %c0_371, %c0_372] : memref<1x16x1x48xf32, #tpu.memory_space<vmem>>, vector<1x1x1x48xf32>
    %588 = vector.shape_cast %587 : vector<1x1x1x48xf32> to vector<1x48xf32>
    %589 = vector.broadcast %588 : vector<1x48xf32> to vector<2x48xf32>
    %590 = arith.mulf %589, %578 : vector<2x48xf32>
    %591 = arith.subf %585, %590 : vector<2x48xf32>
    %c0_373 = arith.constant 0 : index
    %592 = arith.index_cast %c3_i32_367 : i32 to index
    %c0_374 = arith.constant 0 : index
    %c0_375 = arith.constant 0 : index
    %593 = vector.load %arg10[%c0_373, %592, %c0_374, %c0_375] : memref<1x16x1x48xf32, #tpu.memory_space<vmem>>, vector<1x1x1x48xf32>
    %594 = vector.shape_cast %593 : vector<1x1x1x48xf32> to vector<1x48xf32>
    %595 = vector.broadcast %594 : vector<1x48xf32> to vector<2x48xf32>
    %596 = arith.mulf %591, %595 : vector<2x48xf32>
    %597 = arith.index_cast %c3_i32_367 : i32 to index
    %c0_376 = arith.constant 0 : index
    %c0_377 = arith.constant 0 : index
    %598 = vector.load %arg15[%597, %c0_376, %c0_377] : memref<16x2x48xf32, #tpu.memory_space<vmem>>, vector<1x2x48xf32>
    %599 = vector.shape_cast %598 : vector<1x2x48xf32> to vector<2x48xf32>
    %600 = vector.shape_cast %596 : vector<2x48xf32> to vector<1x2x48xf32>
    tpu.vector_store %arg15[%597, %c0_376, %c0_377], %600 {strides = array<i32>} : memref<16x2x48xf32, #tpu.memory_space<vmem>>, vector<1x2x48xf32>,
    %c4_i32_378 = arith.constant 4 : i32
    %601 = arith.index_cast %c4_i32_378 : i32 to index
    %c0_379 = arith.constant 0 : index
    %c0_380 = arith.constant 0 : index
    %602 = vector.load %arg15[%601, %c0_379, %c0_380] : memref<16x2x48xf32, #tpu.memory_space<vmem>>, vector<1x2x48xf32>
    %603 = vector.shape_cast %602 : vector<1x2x48xf32> to vector<2x48xf32>
    %c0_381 = arith.constant 0 : index
    %604 = arith.index_cast %c4_i32_378 : i32 to index
    %c0_382 = arith.constant 0 : index
    %c0_383 = arith.constant 0 : index
    %605 = vector.load %arg8[%c0_381, %604, %c0_382, %c0_383] : memref<1x16x1x48xf32, #tpu.memory_space<vmem>>, vector<1x1x1x48xf32>
    %606 = vector.shape_cast %605 : vector<1x1x1x48xf32> to vector<1x48xf32>
    %607 = vector.broadcast %606 : vector<1x48xf32> to vector<2x48xf32>
    %608 = arith.mulf %607, %596 : vector<2x48xf32>
    %609 = arith.subf %603, %608 : vector<2x48xf32>
    %c0_384 = arith.constant 0 : index
    %610 = arith.index_cast %c4_i32_378 : i32 to index
    %c0_385 = arith.constant 0 : index
    %c0_386 = arith.constant 0 : index
    %611 = vector.load %arg10[%c0_384, %610, %c0_385, %c0_386] : memref<1x16x1x48xf32, #tpu.memory_space<vmem>>, vector<1x1x1x48xf32>
    %612 = vector.shape_cast %611 : vector<1x1x1x48xf32> to vector<1x48xf32>
    %613 = vector.broadcast %612 : vector<1x48xf32> to vector<2x48xf32>
    %614 = arith.mulf %609, %613 : vector<2x48xf32>
    %615 = arith.index_cast %c4_i32_378 : i32 to index
    %c0_387 = arith.constant 0 : index
    %c0_388 = arith.constant 0 : index
    %616 = vector.load %arg15[%615, %c0_387, %c0_388] : memref<16x2x48xf32, #tpu.memory_space<vmem>>, vector<1x2x48xf32>
    %617 = vector.shape_cast %616 : vector<1x2x48xf32> to vector<2x48xf32>
    %618 = vector.shape_cast %614 : vector<2x48xf32> to vector<1x2x48xf32>
    tpu.vector_store %arg15[%615, %c0_387, %c0_388], %618 {strides = array<i32>} : memref<16x2x48xf32, #tpu.memory_space<vmem>>, vector<1x2x48xf32>,
    %c5_i32_389 = arith.constant 5 : i32
    %619 = arith.index_cast %c5_i32_389 : i32 to index
    %c0_390 = arith.constant 0 : index
    %c0_391 = arith.constant 0 : index
    %620 = vector.load %arg15[%619, %c0_390, %c0_391] : memref<16x2x48xf32, #tpu.memory_space<vmem>>, vector<1x2x48xf32>
    %621 = vector.shape_cast %620 : vector<1x2x48xf32> to vector<2x48xf32>
    %c0_392 = arith.constant 0 : index
    %622 = arith.index_cast %c5_i32_389 : i32 to index
    %c0_393 = arith.constant 0 : index
    %c0_394 = arith.constant 0 : index
    %623 = vector.load %arg8[%c0_392, %622, %c0_393, %c0_394] : memref<1x16x1x48xf32, #tpu.memory_space<vmem>>, vector<1x1x1x48xf32>
    %624 = vector.shape_cast %623 : vector<1x1x1x48xf32> to vector<1x48xf32>
    %625 = vector.broadcast %624 : vector<1x48xf32> to vector<2x48xf32>
    %626 = arith.mulf %625, %614 : vector<2x48xf32>
    %627 = arith.subf %621, %626 : vector<2x48xf32>
    %c0_395 = arith.constant 0 : index
    %628 = arith.index_cast %c5_i32_389 : i32 to index
    %c0_396 = arith.constant 0 : index
    %c0_397 = arith.constant 0 : index
    %629 = vector.load %arg10[%c0_395, %628, %c0_396, %c0_397] : memref<1x16x1x48xf32, #tpu.memory_space<vmem>>, vector<1x1x1x48xf32>
    %630 = vector.shape_cast %629 : vector<1x1x1x48xf32> to vector<1x48xf32>
    %631 = vector.broadcast %630 : vector<1x48xf32> to vector<2x48xf32>
    %632 = arith.mulf %627, %631 : vector<2x48xf32>
    %633 = arith.index_cast %c5_i32_389 : i32 to index
    %c0_398 = arith.constant 0 : index
    %c0_399 = arith.constant 0 : index
    %634 = vector.load %arg15[%633, %c0_398, %c0_399] : memref<16x2x48xf32, #tpu.memory_space<vmem>>, vector<1x2x48xf32>
    %635 = vector.shape_cast %634 : vector<1x2x48xf32> to vector<2x48xf32>
    %636 = vector.shape_cast %632 : vector<2x48xf32> to vector<1x2x48xf32>
    tpu.vector_store %arg15[%633, %c0_398, %c0_399], %636 {strides = array<i32>} : memref<16x2x48xf32, #tpu.memory_space<vmem>>, vector<1x2x48xf32>,
    %c6_i32_400 = arith.constant 6 : i32
    %637 = arith.index_cast %c6_i32_400 : i32 to index
    %c0_401 = arith.constant 0 : index
    %c0_402 = arith.constant 0 : index
    %638 = vector.load %arg15[%637, %c0_401, %c0_402] : memref<16x2x48xf32, #tpu.memory_space<vmem>>, vector<1x2x48xf32>
    %639 = vector.shape_cast %638 : vector<1x2x48xf32> to vector<2x48xf32>
    %c0_403 = arith.constant 0 : index
    %640 = arith.index_cast %c6_i32_400 : i32 to index
    %c0_404 = arith.constant 0 : index
    %c0_405 = arith.constant 0 : index
    %641 = vector.load %arg8[%c0_403, %640, %c0_404, %c0_405] : memref<1x16x1x48xf32, #tpu.memory_space<vmem>>, vector<1x1x1x48xf32>
    %642 = vector.shape_cast %641 : vector<1x1x1x48xf32> to vector<1x48xf32>
    %643 = vector.broadcast %642 : vector<1x48xf32> to vector<2x48xf32>
    %644 = arith.mulf %643, %632 : vector<2x48xf32>
    %645 = arith.subf %639, %644 : vector<2x48xf32>
    %c0_406 = arith.constant 0 : index
    %646 = arith.index_cast %c6_i32_400 : i32 to index
    %c0_407 = arith.constant 0 : index
    %c0_408 = arith.constant 0 : index
    %647 = vector.load %arg10[%c0_406, %646, %c0_407, %c0_408] : memref<1x16x1x48xf32, #tpu.memory_space<vmem>>, vector<1x1x1x48xf32>
    %648 = vector.shape_cast %647 : vector<1x1x1x48xf32> to vector<1x48xf32>
    %649 = vector.broadcast %648 : vector<1x48xf32> to vector<2x48xf32>
    %650 = arith.mulf %645, %649 : vector<2x48xf32>
    %651 = arith.index_cast %c6_i32_400 : i32 to index
    %c0_409 = arith.constant 0 : index
    %c0_410 = arith.constant 0 : index
    %652 = vector.load %arg15[%651, %c0_409, %c0_410] : memref<16x2x48xf32, #tpu.memory_space<vmem>>, vector<1x2x48xf32>
    %653 = vector.shape_cast %652 : vector<1x2x48xf32> to vector<2x48xf32>
    %654 = vector.shape_cast %650 : vector<2x48xf32> to vector<1x2x48xf32>
    tpu.vector_store %arg15[%651, %c0_409, %c0_410], %654 {strides = array<i32>} : memref<16x2x48xf32, #tpu.memory_space<vmem>>, vector<1x2x48xf32>,
    %c7_i32_411 = arith.constant 7 : i32
    %655 = arith.index_cast %c7_i32_411 : i32 to index
    %c0_412 = arith.constant 0 : index
    %c0_413 = arith.constant 0 : index
    %656 = vector.load %arg15[%655, %c0_412, %c0_413] : memref<16x2x48xf32, #tpu.memory_space<vmem>>, vector<1x2x48xf32>
    %657 = vector.shape_cast %656 : vector<1x2x48xf32> to vector<2x48xf32>
    %c0_414 = arith.constant 0 : index
    %658 = arith.index_cast %c7_i32_411 : i32 to index
    %c0_415 = arith.constant 0 : index
    %c0_416 = arith.constant 0 : index
    %659 = vector.load %arg8[%c0_414, %658, %c0_415, %c0_416] : memref<1x16x1x48xf32, #tpu.memory_space<vmem>>, vector<1x1x1x48xf32>
    %660 = vector.shape_cast %659 : vector<1x1x1x48xf32> to vector<1x48xf32>
    %661 = vector.broadcast %660 : vector<1x48xf32> to vector<2x48xf32>
    %662 = arith.mulf %661, %650 : vector<2x48xf32>
    %663 = arith.subf %657, %662 : vector<2x48xf32>
    %c0_417 = arith.constant 0 : index
    %664 = arith.index_cast %c7_i32_411 : i32 to index
    %c0_418 = arith.constant 0 : index
    %c0_419 = arith.constant 0 : index
    %665 = vector.load %arg10[%c0_417, %664, %c0_418, %c0_419] : memref<1x16x1x48xf32, #tpu.memory_space<vmem>>, vector<1x1x1x48xf32>
    %666 = vector.shape_cast %665 : vector<1x1x1x48xf32> to vector<1x48xf32>
    %667 = vector.broadcast %666 : vector<1x48xf32> to vector<2x48xf32>
    %668 = arith.mulf %663, %667 : vector<2x48xf32>
    %669 = arith.index_cast %c7_i32_411 : i32 to index
    %c0_420 = arith.constant 0 : index
    %c0_421 = arith.constant 0 : index
    %670 = vector.load %arg15[%669, %c0_420, %c0_421] : memref<16x2x48xf32, #tpu.memory_space<vmem>>, vector<1x2x48xf32>
    %671 = vector.shape_cast %670 : vector<1x2x48xf32> to vector<2x48xf32>
    %672 = vector.shape_cast %668 : vector<2x48xf32> to vector<1x2x48xf32>
    tpu.vector_store %arg15[%669, %c0_420, %c0_421], %672 {strides = array<i32>} : memref<16x2x48xf32, #tpu.memory_space<vmem>>, vector<1x2x48xf32>,
    %c8_i32_422 = arith.constant 8 : i32
    %673 = arith.index_cast %c8_i32_422 : i32 to index
    %c0_423 = arith.constant 0 : index
    %c0_424 = arith.constant 0 : index
    %674 = vector.load %arg15[%673, %c0_423, %c0_424] : memref<16x2x48xf32, #tpu.memory_space<vmem>>, vector<1x2x48xf32>
    %675 = vector.shape_cast %674 : vector<1x2x48xf32> to vector<2x48xf32>
    %c0_425 = arith.constant 0 : index
    %676 = arith.index_cast %c8_i32_422 : i32 to index
    %c0_426 = arith.constant 0 : index
    %c0_427 = arith.constant 0 : index
    %677 = vector.load %arg8[%c0_425, %676, %c0_426, %c0_427] : memref<1x16x1x48xf32, #tpu.memory_space<vmem>>, vector<1x1x1x48xf32>
    %678 = vector.shape_cast %677 : vector<1x1x1x48xf32> to vector<1x48xf32>
    %679 = vector.broadcast %678 : vector<1x48xf32> to vector<2x48xf32>
    %680 = arith.mulf %679, %668 : vector<2x48xf32>
    %681 = arith.subf %675, %680 : vector<2x48xf32>
    %c0_428 = arith.constant 0 : index
    %682 = arith.index_cast %c8_i32_422 : i32 to index
    %c0_429 = arith.constant 0 : index
    %c0_430 = arith.constant 0 : index
    %683 = vector.load %arg10[%c0_428, %682, %c0_429, %c0_430] : memref<1x16x1x48xf32, #tpu.memory_space<vmem>>, vector<1x1x1x48xf32>
    %684 = vector.shape_cast %683 : vector<1x1x1x48xf32> to vector<1x48xf32>
    %685 = vector.broadcast %684 : vector<1x48xf32> to vector<2x48xf32>
    %686 = arith.mulf %681, %685 : vector<2x48xf32>
    %687 = arith.index_cast %c8_i32_422 : i32 to index
    %c0_431 = arith.constant 0 : index
    %c0_432 = arith.constant 0 : index
    %688 = vector.load %arg15[%687, %c0_431, %c0_432] : memref<16x2x48xf32, #tpu.memory_space<vmem>>, vector<1x2x48xf32>
    %689 = vector.shape_cast %688 : vector<1x2x48xf32> to vector<2x48xf32>
    %690 = vector.shape_cast %686 : vector<2x48xf32> to vector<1x2x48xf32>
    tpu.vector_store %arg15[%687, %c0_431, %c0_432], %690 {strides = array<i32>} : memref<16x2x48xf32, #tpu.memory_space<vmem>>, vector<1x2x48xf32>,
    %c9_i32_433 = arith.constant 9 : i32
    %691 = arith.index_cast %c9_i32_433 : i32 to index
    %c0_434 = arith.constant 0 : index
    %c0_435 = arith.constant 0 : index
    %692 = vector.load %arg15[%691, %c0_434, %c0_435] : memref<16x2x48xf32, #tpu.memory_space<vmem>>, vector<1x2x48xf32>
    %693 = vector.shape_cast %692 : vector<1x2x48xf32> to vector<2x48xf32>
    %c0_436 = arith.constant 0 : index
    %694 = arith.index_cast %c9_i32_433 : i32 to index
    %c0_437 = arith.constant 0 : index
    %c0_438 = arith.constant 0 : index
    %695 = vector.load %arg8[%c0_436, %694, %c0_437, %c0_438] : memref<1x16x1x48xf32, #tpu.memory_space<vmem>>, vector<1x1x1x48xf32>
    %696 = vector.shape_cast %695 : vector<1x1x1x48xf32> to vector<1x48xf32>
    %697 = vector.broadcast %696 : vector<1x48xf32> to vector<2x48xf32>
    %698 = arith.mulf %697, %686 : vector<2x48xf32>
    %699 = arith.subf %693, %698 : vector<2x48xf32>
    %c0_439 = arith.constant 0 : index
    %700 = arith.index_cast %c9_i32_433 : i32 to index
    %c0_440 = arith.constant 0 : index
    %c0_441 = arith.constant 0 : index
    %701 = vector.load %arg10[%c0_439, %700, %c0_440, %c0_441] : memref<1x16x1x48xf32, #tpu.memory_space<vmem>>, vector<1x1x1x48xf32>
    %702 = vector.shape_cast %701 : vector<1x1x1x48xf32> to vector<1x48xf32>
    %703 = vector.broadcast %702 : vector<1x48xf32> to vector<2x48xf32>
    %704 = arith.mulf %699, %703 : vector<2x48xf32>
    %705 = arith.index_cast %c9_i32_433 : i32 to index
    %c0_442 = arith.constant 0 : index
    %c0_443 = arith.constant 0 : index
    %706 = vector.load %arg15[%705, %c0_442, %c0_443] : memref<16x2x48xf32, #tpu.memory_space<vmem>>, vector<1x2x48xf32>
    %707 = vector.shape_cast %706 : vector<1x2x48xf32> to vector<2x48xf32>
    %708 = vector.shape_cast %704 : vector<2x48xf32> to vector<1x2x48xf32>
    tpu.vector_store %arg15[%705, %c0_442, %c0_443], %708 {strides = array<i32>} : memref<16x2x48xf32, #tpu.memory_space<vmem>>, vector<1x2x48xf32>,
    %c10_i32_444 = arith.constant 10 : i32
    %709 = arith.index_cast %c10_i32_444 : i32 to index
    %c0_445 = arith.constant 0 : index
    %c0_446 = arith.constant 0 : index
    %710 = vector.load %arg15[%709, %c0_445, %c0_446] : memref<16x2x48xf32, #tpu.memory_space<vmem>>, vector<1x2x48xf32>
    %711 = vector.shape_cast %710 : vector<1x2x48xf32> to vector<2x48xf32>
    %c0_447 = arith.constant 0 : index
    %712 = arith.index_cast %c10_i32_444 : i32 to index
    %c0_448 = arith.constant 0 : index
    %c0_449 = arith.constant 0 : index
    %713 = vector.load %arg8[%c0_447, %712, %c0_448, %c0_449] : memref<1x16x1x48xf32, #tpu.memory_space<vmem>>, vector<1x1x1x48xf32>
    %714 = vector.shape_cast %713 : vector<1x1x1x48xf32> to vector<1x48xf32>
    %715 = vector.broadcast %714 : vector<1x48xf32> to vector<2x48xf32>
    %716 = arith.mulf %715, %704 : vector<2x48xf32>
    %717 = arith.subf %711, %716 : vector<2x48xf32>
    %c0_450 = arith.constant 0 : index
    %718 = arith.index_cast %c10_i32_444 : i32 to index
    %c0_451 = arith.constant 0 : index
    %c0_452 = arith.constant 0 : index
    %719 = vector.load %arg10[%c0_450, %718, %c0_451, %c0_452] : memref<1x16x1x48xf32, #tpu.memory_space<vmem>>, vector<1x1x1x48xf32>
    %720 = vector.shape_cast %719 : vector<1x1x1x48xf32> to vector<1x48xf32>
    %721 = vector.broadcast %720 : vector<1x48xf32> to vector<2x48xf32>
    %722 = arith.mulf %717, %721 : vector<2x48xf32>
    %723 = arith.index_cast %c10_i32_444 : i32 to index
    %c0_453 = arith.constant 0 : index
    %c0_454 = arith.constant 0 : index
    %724 = vector.load %arg15[%723, %c0_453, %c0_454] : memref<16x2x48xf32, #tpu.memory_space<vmem>>, vector<1x2x48xf32>
    %725 = vector.shape_cast %724 : vector<1x2x48xf32> to vector<2x48xf32>
    %726 = vector.shape_cast %722 : vector<2x48xf32> to vector<1x2x48xf32>
    tpu.vector_store %arg15[%723, %c0_453, %c0_454], %726 {strides = array<i32>} : memref<16x2x48xf32, #tpu.memory_space<vmem>>, vector<1x2x48xf32>,
    %c11_i32_455 = arith.constant 11 : i32
    %727 = arith.index_cast %c11_i32_455 : i32 to index
    %c0_456 = arith.constant 0 : index
    %c0_457 = arith.constant 0 : index
    %728 = vector.load %arg15[%727, %c0_456, %c0_457] : memref<16x2x48xf32, #tpu.memory_space<vmem>>, vector<1x2x48xf32>
    %729 = vector.shape_cast %728 : vector<1x2x48xf32> to vector<2x48xf32>
    %c0_458 = arith.constant 0 : index
    %730 = arith.index_cast %c11_i32_455 : i32 to index
    %c0_459 = arith.constant 0 : index
    %c0_460 = arith.constant 0 : index
    %731 = vector.load %arg8[%c0_458, %730, %c0_459, %c0_460] : memref<1x16x1x48xf32, #tpu.memory_space<vmem>>, vector<1x1x1x48xf32>
    %732 = vector.shape_cast %731 : vector<1x1x1x48xf32> to vector<1x48xf32>
    %733 = vector.broadcast %732 : vector<1x48xf32> to vector<2x48xf32>
    %734 = arith.mulf %733, %722 : vector<2x48xf32>
    %735 = arith.subf %729, %734 : vector<2x48xf32>
    %c0_461 = arith.constant 0 : index
    %736 = arith.index_cast %c11_i32_455 : i32 to index
    %c0_462 = arith.constant 0 : index
    %c0_463 = arith.constant 0 : index
    %737 = vector.load %arg10[%c0_461, %736, %c0_462, %c0_463] : memref<1x16x1x48xf32, #tpu.memory_space<vmem>>, vector<1x1x1x48xf32>
    %738 = vector.shape_cast %737 : vector<1x1x1x48xf32> to vector<1x48xf32>
    %739 = vector.broadcast %738 : vector<1x48xf32> to vector<2x48xf32>
    %740 = arith.mulf %735, %739 : vector<2x48xf32>
    %741 = arith.index_cast %c11_i32_455 : i32 to index
    %c0_464 = arith.constant 0 : index
    %c0_465 = arith.constant 0 : index
    %742 = vector.load %arg15[%741, %c0_464, %c0_465] : memref<16x2x48xf32, #tpu.memory_space<vmem>>, vector<1x2x48xf32>
    %743 = vector.shape_cast %742 : vector<1x2x48xf32> to vector<2x48xf32>
    %744 = vector.shape_cast %740 : vector<2x48xf32> to vector<1x2x48xf32>
    tpu.vector_store %arg15[%741, %c0_464, %c0_465], %744 {strides = array<i32>} : memref<16x2x48xf32, #tpu.memory_space<vmem>>, vector<1x2x48xf32>,
    %c12_i32_466 = arith.constant 12 : i32
    %745 = arith.index_cast %c12_i32_466 : i32 to index
    %c0_467 = arith.constant 0 : index
    %c0_468 = arith.constant 0 : index
    %746 = vector.load %arg15[%745, %c0_467, %c0_468] : memref<16x2x48xf32, #tpu.memory_space<vmem>>, vector<1x2x48xf32>
    %747 = vector.shape_cast %746 : vector<1x2x48xf32> to vector<2x48xf32>
    %c0_469 = arith.constant 0 : index
    %748 = arith.index_cast %c12_i32_466 : i32 to index
    %c0_470 = arith.constant 0 : index
    %c0_471 = arith.constant 0 : index
    %749 = vector.load %arg8[%c0_469, %748, %c0_470, %c0_471] : memref<1x16x1x48xf32, #tpu.memory_space<vmem>>, vector<1x1x1x48xf32>
    %750 = vector.shape_cast %749 : vector<1x1x1x48xf32> to vector<1x48xf32>
    %751 = vector.broadcast %750 : vector<1x48xf32> to vector<2x48xf32>
    %752 = arith.mulf %751, %740 : vector<2x48xf32>
    %753 = arith.subf %747, %752 : vector<2x48xf32>
    %c0_472 = arith.constant 0 : index
    %754 = arith.index_cast %c12_i32_466 : i32 to index
    %c0_473 = arith.constant 0 : index
    %c0_474 = arith.constant 0 : index
    %755 = vector.load %arg10[%c0_472, %754, %c0_473, %c0_474] : memref<1x16x1x48xf32, #tpu.memory_space<vmem>>, vector<1x1x1x48xf32>
    %756 = vector.shape_cast %755 : vector<1x1x1x48xf32> to vector<1x48xf32>
    %757 = vector.broadcast %756 : vector<1x48xf32> to vector<2x48xf32>
    %758 = arith.mulf %753, %757 : vector<2x48xf32>
    %759 = arith.index_cast %c12_i32_466 : i32 to index
    %c0_475 = arith.constant 0 : index
    %c0_476 = arith.constant 0 : index
    %760 = vector.load %arg15[%759, %c0_475, %c0_476] : memref<16x2x48xf32, #tpu.memory_space<vmem>>, vector<1x2x48xf32>
    %761 = vector.shape_cast %760 : vector<1x2x48xf32> to vector<2x48xf32>
    %762 = vector.shape_cast %758 : vector<2x48xf32> to vector<1x2x48xf32>
    tpu.vector_store %arg15[%759, %c0_475, %c0_476], %762 {strides = array<i32>} : memref<16x2x48xf32, #tpu.memory_space<vmem>>, vector<1x2x48xf32>,
    %c13_i32_477 = arith.constant 13 : i32
    %763 = arith.index_cast %c13_i32_477 : i32 to index
    %c0_478 = arith.constant 0 : index
    %c0_479 = arith.constant 0 : index
    %764 = vector.load %arg15[%763, %c0_478, %c0_479] : memref<16x2x48xf32, #tpu.memory_space<vmem>>, vector<1x2x48xf32>
    %765 = vector.shape_cast %764 : vector<1x2x48xf32> to vector<2x48xf32>
    %c0_480 = arith.constant 0 : index
    %766 = arith.index_cast %c13_i32_477 : i32 to index
    %c0_481 = arith.constant 0 : index
    %c0_482 = arith.constant 0 : index
    %767 = vector.load %arg8[%c0_480, %766, %c0_481, %c0_482] : memref<1x16x1x48xf32, #tpu.memory_space<vmem>>, vector<1x1x1x48xf32>
    %768 = vector.shape_cast %767 : vector<1x1x1x48xf32> to vector<1x48xf32>
    %769 = vector.broadcast %768 : vector<1x48xf32> to vector<2x48xf32>
    %770 = arith.mulf %769, %758 : vector<2x48xf32>
    %771 = arith.subf %765, %770 : vector<2x48xf32>
    %c0_483 = arith.constant 0 : index
    %772 = arith.index_cast %c13_i32_477 : i32 to index
    %c0_484 = arith.constant 0 : index
    %c0_485 = arith.constant 0 : index
    %773 = vector.load %arg10[%c0_483, %772, %c0_484, %c0_485] : memref<1x16x1x48xf32, #tpu.memory_space<vmem>>, vector<1x1x1x48xf32>
    %774 = vector.shape_cast %773 : vector<1x1x1x48xf32> to vector<1x48xf32>
    %775 = vector.broadcast %774 : vector<1x48xf32> to vector<2x48xf32>
    %776 = arith.mulf %771, %775 : vector<2x48xf32>
    %777 = arith.index_cast %c13_i32_477 : i32 to index
    %c0_486 = arith.constant 0 : index
    %c0_487 = arith.constant 0 : index
    %778 = vector.load %arg15[%777, %c0_486, %c0_487] : memref<16x2x48xf32, #tpu.memory_space<vmem>>, vector<1x2x48xf32>
    %779 = vector.shape_cast %778 : vector<1x2x48xf32> to vector<2x48xf32>
    %780 = vector.shape_cast %776 : vector<2x48xf32> to vector<1x2x48xf32>
    tpu.vector_store %arg15[%777, %c0_486, %c0_487], %780 {strides = array<i32>} : memref<16x2x48xf32, #tpu.memory_space<vmem>>, vector<1x2x48xf32>,
    %c14_i32_488 = arith.constant 14 : i32
    %781 = arith.index_cast %c14_i32_488 : i32 to index
    %c0_489 = arith.constant 0 : index
    %c0_490 = arith.constant 0 : index
    %782 = vector.load %arg15[%781, %c0_489, %c0_490] : memref<16x2x48xf32, #tpu.memory_space<vmem>>, vector<1x2x48xf32>
    %783 = vector.shape_cast %782 : vector<1x2x48xf32> to vector<2x48xf32>
    %c0_491 = arith.constant 0 : index
    %784 = arith.index_cast %c14_i32_488 : i32 to index
    %c0_492 = arith.constant 0 : index
    %c0_493 = arith.constant 0 : index
    %785 = vector.load %arg8[%c0_491, %784, %c0_492, %c0_493] : memref<1x16x1x48xf32, #tpu.memory_space<vmem>>, vector<1x1x1x48xf32>
    %786 = vector.shape_cast %785 : vector<1x1x1x48xf32> to vector<1x48xf32>
    %787 = vector.broadcast %786 : vector<1x48xf32> to vector<2x48xf32>
    %788 = arith.mulf %787, %776 : vector<2x48xf32>
    %789 = arith.subf %783, %788 : vector<2x48xf32>
    %c0_494 = arith.constant 0 : index
    %790 = arith.index_cast %c14_i32_488 : i32 to index
    %c0_495 = arith.constant 0 : index
    %c0_496 = arith.constant 0 : index
    %791 = vector.load %arg10[%c0_494, %790, %c0_495, %c0_496] : memref<1x16x1x48xf32, #tpu.memory_space<vmem>>, vector<1x1x1x48xf32>
    %792 = vector.shape_cast %791 : vector<1x1x1x48xf32> to vector<1x48xf32>
    %793 = vector.broadcast %792 : vector<1x48xf32> to vector<2x48xf32>
    %794 = arith.mulf %789, %793 : vector<2x48xf32>
    %795 = arith.index_cast %c14_i32_488 : i32 to index
    %c0_497 = arith.constant 0 : index
    %c0_498 = arith.constant 0 : index
    %796 = vector.load %arg15[%795, %c0_497, %c0_498] : memref<16x2x48xf32, #tpu.memory_space<vmem>>, vector<1x2x48xf32>
    %797 = vector.shape_cast %796 : vector<1x2x48xf32> to vector<2x48xf32>
    %798 = vector.shape_cast %794 : vector<2x48xf32> to vector<1x2x48xf32>
    tpu.vector_store %arg15[%795, %c0_497, %c0_498], %798 {strides = array<i32>} : memref<16x2x48xf32, #tpu.memory_space<vmem>>, vector<1x2x48xf32>,
    %c15_i32_499 = arith.constant 15 : i32
    %799 = arith.index_cast %c15_i32_499 : i32 to index
    %c0_500 = arith.constant 0 : index
    %c0_501 = arith.constant 0 : index
    %800 = vector.load %arg15[%799, %c0_500, %c0_501] : memref<16x2x48xf32, #tpu.memory_space<vmem>>, vector<1x2x48xf32>
    %801 = vector.shape_cast %800 : vector<1x2x48xf32> to vector<2x48xf32>
    %c0_502 = arith.constant 0 : index
    %802 = arith.index_cast %c15_i32_499 : i32 to index
    %c0_503 = arith.constant 0 : index
    %c0_504 = arith.constant 0 : index
    %803 = vector.load %arg8[%c0_502, %802, %c0_503, %c0_504] : memref<1x16x1x48xf32, #tpu.memory_space<vmem>>, vector<1x1x1x48xf32>
    %804 = vector.shape_cast %803 : vector<1x1x1x48xf32> to vector<1x48xf32>
    %805 = vector.broadcast %804 : vector<1x48xf32> to vector<2x48xf32>
    %806 = arith.mulf %805, %794 : vector<2x48xf32>
    %807 = arith.subf %801, %806 : vector<2x48xf32>
    %c0_505 = arith.constant 0 : index
    %808 = arith.index_cast %c15_i32_499 : i32 to index
    %c0_506 = arith.constant 0 : index
    %c0_507 = arith.constant 0 : index
    %809 = vector.load %arg10[%c0_505, %808, %c0_506, %c0_507] : memref<1x16x1x48xf32, #tpu.memory_space<vmem>>, vector<1x1x1x48xf32>
    %810 = vector.shape_cast %809 : vector<1x1x1x48xf32> to vector<1x48xf32>
    %811 = vector.broadcast %810 : vector<1x48xf32> to vector<2x48xf32>
    %812 = arith.mulf %807, %811 : vector<2x48xf32>
    %813 = arith.index_cast %c15_i32_499 : i32 to index
    %c0_508 = arith.constant 0 : index
    %c0_509 = arith.constant 0 : index
    %814 = vector.load %arg15[%813, %c0_508, %c0_509] : memref<16x2x48xf32, #tpu.memory_space<vmem>>, vector<1x2x48xf32>
    %815 = vector.shape_cast %814 : vector<1x2x48xf32> to vector<2x48xf32>
    %816 = vector.shape_cast %812 : vector<2x48xf32> to vector<1x2x48xf32>
    tpu.vector_store %arg15[%813, %c0_508, %c0_509], %816 {strides = array<i32>} : memref<16x2x48xf32, #tpu.memory_space<vmem>>, vector<1x2x48xf32>,
    %c15_i32_510 = arith.constant 15 : i32
    %c0_i32_511 = arith.constant 0 : i32
    %c14_i32_512 = arith.constant 14 : i32
    %817 = arith.subi %c14_i32_512, %c0_i32_511 : i32
    %818 = arith.index_cast %817 : i32 to index
    %c0_513 = arith.constant 0 : index
    %c0_514 = arith.constant 0 : index
    %819 = vector.load %arg15[%818, %c0_513, %c0_514] : memref<16x2x48xf32, #tpu.memory_space<vmem>>, vector<1x2x48xf32>
    %820 = vector.shape_cast %819 : vector<1x2x48xf32> to vector<2x48xf32>
    %c0_515 = arith.constant 0 : index
    %821 = arith.index_cast %817 : i32 to index
    %c0_516 = arith.constant 0 : index
    %c0_517 = arith.constant 0 : index
    %822 = vector.load %arg9[%c0_515, %821, %c0_516, %c0_517] : memref<1x16x1x48xf32, #tpu.memory_space<vmem>>, vector<1x1x1x48xf32>
    %823 = vector.shape_cast %822 : vector<1x1x1x48xf32> to vector<1x48xf32>
    %824 = vector.broadcast %823 : vector<1x48xf32> to vector<2x48xf32>
    %825 = arith.mulf %824, %812 : vector<2x48xf32>
    %826 = arith.subf %820, %825 : vector<2x48xf32>
    %827 = arith.index_cast %817 : i32 to index
    %c0_518 = arith.constant 0 : index
    %c0_519 = arith.constant 0 : index
    %828 = vector.load %arg15[%827, %c0_518, %c0_519] : memref<16x2x48xf32, #tpu.memory_space<vmem>>, vector<1x2x48xf32>
    %829 = vector.shape_cast %828 : vector<1x2x48xf32> to vector<2x48xf32>
    %830 = vector.shape_cast %826 : vector<2x48xf32> to vector<1x2x48xf32>
    tpu.vector_store %arg15[%827, %c0_518, %c0_519], %830 {strides = array<i32>} : memref<16x2x48xf32, #tpu.memory_space<vmem>>, vector<1x2x48xf32>,
    %c1_i32_520 = arith.constant 1 : i32
    %c14_i32_521 = arith.constant 14 : i32
    %831 = arith.subi %c14_i32_521, %c1_i32_520 : i32
    %832 = arith.index_cast %831 : i32 to index
    %c0_522 = arith.constant 0 : index
    %c0_523 = arith.constant 0 : index
    %833 = vector.load %arg15[%832, %c0_522, %c0_523] : memref<16x2x48xf32, #tpu.memory_space<vmem>>, vector<1x2x48xf32>
    %834 = vector.shape_cast %833 : vector<1x2x48xf32> to vector<2x48xf32>
    %c0_524 = arith.constant 0 : index
    %835 = arith.index_cast %831 : i32 to index
    %c0_525 = arith.constant 0 : index
    %c0_526 = arith.constant 0 : index
    %836 = vector.load %arg9[%c0_524, %835, %c0_525, %c0_526] : memref<1x16x1x48xf32, #tpu.memory_space<vmem>>, vector<1x1x1x48xf32>
    %837 = vector.shape_cast %836 : vector<1x1x1x48xf32> to vector<1x48xf32>
    %838 = vector.broadcast %837 : vector<1x48xf32> to vector<2x48xf32>
    %839 = arith.mulf %838, %826 : vector<2x48xf32>
    %840 = arith.subf %834, %839 : vector<2x48xf32>
    %841 = arith.index_cast %831 : i32 to index
    %c0_527 = arith.constant 0 : index
    %c0_528 = arith.constant 0 : index
    %842 = vector.load %arg15[%841, %c0_527, %c0_528] : memref<16x2x48xf32, #tpu.memory_space<vmem>>, vector<1x2x48xf32>
    %843 = vector.shape_cast %842 : vector<1x2x48xf32> to vector<2x48xf32>
    %844 = vector.shape_cast %840 : vector<2x48xf32> to vector<1x2x48xf32>
    tpu.vector_store %arg15[%841, %c0_527, %c0_528], %844 {strides = array<i32>} : memref<16x2x48xf32, #tpu.memory_space<vmem>>, vector<1x2x48xf32>,
    %c2_i32_529 = arith.constant 2 : i32
    %c14_i32_530 = arith.constant 14 : i32
    %845 = arith.subi %c14_i32_530, %c2_i32_529 : i32
    %846 = arith.index_cast %845 : i32 to index
    %c0_531 = arith.constant 0 : index
    %c0_532 = arith.constant 0 : index
    %847 = vector.load %arg15[%846, %c0_531, %c0_532] : memref<16x2x48xf32, #tpu.memory_space<vmem>>, vector<1x2x48xf32>
    %848 = vector.shape_cast %847 : vector<1x2x48xf32> to vector<2x48xf32>
    %c0_533 = arith.constant 0 : index
    %849 = arith.index_cast %845 : i32 to index
    %c0_534 = arith.constant 0 : index
    %c0_535 = arith.constant 0 : index
    %850 = vector.load %arg9[%c0_533, %849, %c0_534, %c0_535] : memref<1x16x1x48xf32, #tpu.memory_space<vmem>>, vector<1x1x1x48xf32>
    %851 = vector.shape_cast %850 : vector<1x1x1x48xf32> to vector<1x48xf32>
    %852 = vector.broadcast %851 : vector<1x48xf32> to vector<2x48xf32>
    %853 = arith.mulf %852, %840 : vector<2x48xf32>
    %854 = arith.subf %848, %853 : vector<2x48xf32>
    %855 = arith.index_cast %845 : i32 to index
    %c0_536 = arith.constant 0 : index
    %c0_537 = arith.constant 0 : index
    %856 = vector.load %arg15[%855, %c0_536, %c0_537] : memref<16x2x48xf32, #tpu.memory_space<vmem>>, vector<1x2x48xf32>
    %857 = vector.shape_cast %856 : vector<1x2x48xf32> to vector<2x48xf32>
    %858 = vector.shape_cast %854 : vector<2x48xf32> to vector<1x2x48xf32>
    tpu.vector_store %arg15[%855, %c0_536, %c0_537], %858 {strides = array<i32>} : memref<16x2x48xf32, #tpu.memory_space<vmem>>, vector<1x2x48xf32>,
    %c3_i32_538 = arith.constant 3 : i32
    %c14_i32_539 = arith.constant 14 : i32
    %859 = arith.subi %c14_i32_539, %c3_i32_538 : i32
    %860 = arith.index_cast %859 : i32 to index
    %c0_540 = arith.constant 0 : index
    %c0_541 = arith.constant 0 : index
    %861 = vector.load %arg15[%860, %c0_540, %c0_541] : memref<16x2x48xf32, #tpu.memory_space<vmem>>, vector<1x2x48xf32>
    %862 = vector.shape_cast %861 : vector<1x2x48xf32> to vector<2x48xf32>
    %c0_542 = arith.constant 0 : index
    %863 = arith.index_cast %859 : i32 to index
    %c0_543 = arith.constant 0 : index
    %c0_544 = arith.constant 0 : index
    %864 = vector.load %arg9[%c0_542, %863, %c0_543, %c0_544] : memref<1x16x1x48xf32, #tpu.memory_space<vmem>>, vector<1x1x1x48xf32>
    %865 = vector.shape_cast %864 : vector<1x1x1x48xf32> to vector<1x48xf32>
    %866 = vector.broadcast %865 : vector<1x48xf32> to vector<2x48xf32>
    %867 = arith.mulf %866, %854 : vector<2x48xf32>
    %868 = arith.subf %862, %867 : vector<2x48xf32>
    %869 = arith.index_cast %859 : i32 to index
    %c0_545 = arith.constant 0 : index
    %c0_546 = arith.constant 0 : index
    %870 = vector.load %arg15[%869, %c0_545, %c0_546] : memref<16x2x48xf32, #tpu.memory_space<vmem>>, vector<1x2x48xf32>
    %871 = vector.shape_cast %870 : vector<1x2x48xf32> to vector<2x48xf32>
    %872 = vector.shape_cast %868 : vector<2x48xf32> to vector<1x2x48xf32>
    tpu.vector_store %arg15[%869, %c0_545, %c0_546], %872 {strides = array<i32>} : memref<16x2x48xf32, #tpu.memory_space<vmem>>, vector<1x2x48xf32>,
    %c4_i32_547 = arith.constant 4 : i32
    %c14_i32_548 = arith.constant 14 : i32
    %873 = arith.subi %c14_i32_548, %c4_i32_547 : i32
    %874 = arith.index_cast %873 : i32 to index
    %c0_549 = arith.constant 0 : index
    %c0_550 = arith.constant 0 : index
    %875 = vector.load %arg15[%874, %c0_549, %c0_550] : memref<16x2x48xf32, #tpu.memory_space<vmem>>, vector<1x2x48xf32>
    %876 = vector.shape_cast %875 : vector<1x2x48xf32> to vector<2x48xf32>
    %c0_551 = arith.constant 0 : index
    %877 = arith.index_cast %873 : i32 to index
    %c0_552 = arith.constant 0 : index
    %c0_553 = arith.constant 0 : index
    %878 = vector.load %arg9[%c0_551, %877, %c0_552, %c0_553] : memref<1x16x1x48xf32, #tpu.memory_space<vmem>>, vector<1x1x1x48xf32>
    %879 = vector.shape_cast %878 : vector<1x1x1x48xf32> to vector<1x48xf32>
    %880 = vector.broadcast %879 : vector<1x48xf32> to vector<2x48xf32>
    %881 = arith.mulf %880, %868 : vector<2x48xf32>
    %882 = arith.subf %876, %881 : vector<2x48xf32>
    %883 = arith.index_cast %873 : i32 to index
    %c0_554 = arith.constant 0 : index
    %c0_555 = arith.constant 0 : index
    %884 = vector.load %arg15[%883, %c0_554, %c0_555] : memref<16x2x48xf32, #tpu.memory_space<vmem>>, vector<1x2x48xf32>
    %885 = vector.shape_cast %884 : vector<1x2x48xf32> to vector<2x48xf32>
    %886 = vector.shape_cast %882 : vector<2x48xf32> to vector<1x2x48xf32>
    tpu.vector_store %arg15[%883, %c0_554, %c0_555], %886 {strides = array<i32>} : memref<16x2x48xf32, #tpu.memory_space<vmem>>, vector<1x2x48xf32>,
    %c5_i32_556 = arith.constant 5 : i32
    %c14_i32_557 = arith.constant 14 : i32
    %887 = arith.subi %c14_i32_557, %c5_i32_556 : i32
    %888 = arith.index_cast %887 : i32 to index
    %c0_558 = arith.constant 0 : index
    %c0_559 = arith.constant 0 : index
    %889 = vector.load %arg15[%888, %c0_558, %c0_559] : memref<16x2x48xf32, #tpu.memory_space<vmem>>, vector<1x2x48xf32>
    %890 = vector.shape_cast %889 : vector<1x2x48xf32> to vector<2x48xf32>
    %c0_560 = arith.constant 0 : index
    %891 = arith.index_cast %887 : i32 to index
    %c0_561 = arith.constant 0 : index
    %c0_562 = arith.constant 0 : index
    %892 = vector.load %arg9[%c0_560, %891, %c0_561, %c0_562] : memref<1x16x1x48xf32, #tpu.memory_space<vmem>>, vector<1x1x1x48xf32>
    %893 = vector.shape_cast %892 : vector<1x1x1x48xf32> to vector<1x48xf32>
    %894 = vector.broadcast %893 : vector<1x48xf32> to vector<2x48xf32>
    %895 = arith.mulf %894, %882 : vector<2x48xf32>
    %896 = arith.subf %890, %895 : vector<2x48xf32>
    %897 = arith.index_cast %887 : i32 to index
    %c0_563 = arith.constant 0 : index
    %c0_564 = arith.constant 0 : index
    %898 = vector.load %arg15[%897, %c0_563, %c0_564] : memref<16x2x48xf32, #tpu.memory_space<vmem>>, vector<1x2x48xf32>
    %899 = vector.shape_cast %898 : vector<1x2x48xf32> to vector<2x48xf32>
    %900 = vector.shape_cast %896 : vector<2x48xf32> to vector<1x2x48xf32>
    tpu.vector_store %arg15[%897, %c0_563, %c0_564], %900 {strides = array<i32>} : memref<16x2x48xf32, #tpu.memory_space<vmem>>, vector<1x2x48xf32>,
    %c6_i32_565 = arith.constant 6 : i32
    %c14_i32_566 = arith.constant 14 : i32
    %901 = arith.subi %c14_i32_566, %c6_i32_565 : i32
    %902 = arith.index_cast %901 : i32 to index
    %c0_567 = arith.constant 0 : index
    %c0_568 = arith.constant 0 : index
    %903 = vector.load %arg15[%902, %c0_567, %c0_568] : memref<16x2x48xf32, #tpu.memory_space<vmem>>, vector<1x2x48xf32>
    %904 = vector.shape_cast %903 : vector<1x2x48xf32> to vector<2x48xf32>
    %c0_569 = arith.constant 0 : index
    %905 = arith.index_cast %901 : i32 to index
    %c0_570 = arith.constant 0 : index
    %c0_571 = arith.constant 0 : index
    %906 = vector.load %arg9[%c0_569, %905, %c0_570, %c0_571] : memref<1x16x1x48xf32, #tpu.memory_space<vmem>>, vector<1x1x1x48xf32>
    %907 = vector.shape_cast %906 : vector<1x1x1x48xf32> to vector<1x48xf32>
    %908 = vector.broadcast %907 : vector<1x48xf32> to vector<2x48xf32>
    %909 = arith.mulf %908, %896 : vector<2x48xf32>
    %910 = arith.subf %904, %909 : vector<2x48xf32>
    %911 = arith.index_cast %901 : i32 to index
    %c0_572 = arith.constant 0 : index
    %c0_573 = arith.constant 0 : index
    %912 = vector.load %arg15[%911, %c0_572, %c0_573] : memref<16x2x48xf32, #tpu.memory_space<vmem>>, vector<1x2x48xf32>
    %913 = vector.shape_cast %912 : vector<1x2x48xf32> to vector<2x48xf32>
    %914 = vector.shape_cast %910 : vector<2x48xf32> to vector<1x2x48xf32>
    tpu.vector_store %arg15[%911, %c0_572, %c0_573], %914 {strides = array<i32>} : memref<16x2x48xf32, #tpu.memory_space<vmem>>, vector<1x2x48xf32>,
    %c7_i32_574 = arith.constant 7 : i32
    %c14_i32_575 = arith.constant 14 : i32
    %915 = arith.subi %c14_i32_575, %c7_i32_574 : i32
    %916 = arith.index_cast %915 : i32 to index
    %c0_576 = arith.constant 0 : index
    %c0_577 = arith.constant 0 : index
    %917 = vector.load %arg15[%916, %c0_576, %c0_577] : memref<16x2x48xf32, #tpu.memory_space<vmem>>, vector<1x2x48xf32>
    %918 = vector.shape_cast %917 : vector<1x2x48xf32> to vector<2x48xf32>
    %c0_578 = arith.constant 0 : index
    %919 = arith.index_cast %915 : i32 to index
    %c0_579 = arith.constant 0 : index
    %c0_580 = arith.constant 0 : index
    %920 = vector.load %arg9[%c0_578, %919, %c0_579, %c0_580] : memref<1x16x1x48xf32, #tpu.memory_space<vmem>>, vector<1x1x1x48xf32>
    %921 = vector.shape_cast %920 : vector<1x1x1x48xf32> to vector<1x48xf32>
    %922 = vector.broadcast %921 : vector<1x48xf32> to vector<2x48xf32>
    %923 = arith.mulf %922, %910 : vector<2x48xf32>
    %924 = arith.subf %918, %923 : vector<2x48xf32>
    %925 = arith.index_cast %915 : i32 to index
    %c0_581 = arith.constant 0 : index
    %c0_582 = arith.constant 0 : index
    %926 = vector.load %arg15[%925, %c0_581, %c0_582] : memref<16x2x48xf32, #tpu.memory_space<vmem>>, vector<1x2x48xf32>
    %927 = vector.shape_cast %926 : vector<1x2x48xf32> to vector<2x48xf32>
    %928 = vector.shape_cast %924 : vector<2x48xf32> to vector<1x2x48xf32>
    tpu.vector_store %arg15[%925, %c0_581, %c0_582], %928 {strides = array<i32>} : memref<16x2x48xf32, #tpu.memory_space<vmem>>, vector<1x2x48xf32>,
    %c8_i32_583 = arith.constant 8 : i32
    %c14_i32_584 = arith.constant 14 : i32
    %929 = arith.subi %c14_i32_584, %c8_i32_583 : i32
    %930 = arith.index_cast %929 : i32 to index
    %c0_585 = arith.constant 0 : index
    %c0_586 = arith.constant 0 : index
    %931 = vector.load %arg15[%930, %c0_585, %c0_586] : memref<16x2x48xf32, #tpu.memory_space<vmem>>, vector<1x2x48xf32>
    %932 = vector.shape_cast %931 : vector<1x2x48xf32> to vector<2x48xf32>
    %c0_587 = arith.constant 0 : index
    %933 = arith.index_cast %929 : i32 to index
    %c0_588 = arith.constant 0 : index
    %c0_589 = arith.constant 0 : index
    %934 = vector.load %arg9[%c0_587, %933, %c0_588, %c0_589] : memref<1x16x1x48xf32, #tpu.memory_space<vmem>>, vector<1x1x1x48xf32>
    %935 = vector.shape_cast %934 : vector<1x1x1x48xf32> to vector<1x48xf32>
    %936 = vector.broadcast %935 : vector<1x48xf32> to vector<2x48xf32>
    %937 = arith.mulf %936, %924 : vector<2x48xf32>
    %938 = arith.subf %932, %937 : vector<2x48xf32>
    %939 = arith.index_cast %929 : i32 to index
    %c0_590 = arith.constant 0 : index
    %c0_591 = arith.constant 0 : index
    %940 = vector.load %arg15[%939, %c0_590, %c0_591] : memref<16x2x48xf32, #tpu.memory_space<vmem>>, vector<1x2x48xf32>
    %941 = vector.shape_cast %940 : vector<1x2x48xf32> to vector<2x48xf32>
    %942 = vector.shape_cast %938 : vector<2x48xf32> to vector<1x2x48xf32>
    tpu.vector_store %arg15[%939, %c0_590, %c0_591], %942 {strides = array<i32>} : memref<16x2x48xf32, #tpu.memory_space<vmem>>, vector<1x2x48xf32>,
    %c9_i32_592 = arith.constant 9 : i32
    %c14_i32_593 = arith.constant 14 : i32
    %943 = arith.subi %c14_i32_593, %c9_i32_592 : i32
    %944 = arith.index_cast %943 : i32 to index
    %c0_594 = arith.constant 0 : index
    %c0_595 = arith.constant 0 : index
    %945 = vector.load %arg15[%944, %c0_594, %c0_595] : memref<16x2x48xf32, #tpu.memory_space<vmem>>, vector<1x2x48xf32>
    %946 = vector.shape_cast %945 : vector<1x2x48xf32> to vector<2x48xf32>
    %c0_596 = arith.constant 0 : index
    %947 = arith.index_cast %943 : i32 to index
    %c0_597 = arith.constant 0 : index
    %c0_598 = arith.constant 0 : index
    %948 = vector.load %arg9[%c0_596, %947, %c0_597, %c0_598] : memref<1x16x1x48xf32, #tpu.memory_space<vmem>>, vector<1x1x1x48xf32>
    %949 = vector.shape_cast %948 : vector<1x1x1x48xf32> to vector<1x48xf32>
    %950 = vector.broadcast %949 : vector<1x48xf32> to vector<2x48xf32>
    %951 = arith.mulf %950, %938 : vector<2x48xf32>
    %952 = arith.subf %946, %951 : vector<2x48xf32>
    %953 = arith.index_cast %943 : i32 to index
    %c0_599 = arith.constant 0 : index
    %c0_600 = arith.constant 0 : index
    %954 = vector.load %arg15[%953, %c0_599, %c0_600] : memref<16x2x48xf32, #tpu.memory_space<vmem>>, vector<1x2x48xf32>
    %955 = vector.shape_cast %954 : vector<1x2x48xf32> to vector<2x48xf32>
    %956 = vector.shape_cast %952 : vector<2x48xf32> to vector<1x2x48xf32>
    tpu.vector_store %arg15[%953, %c0_599, %c0_600], %956 {strides = array<i32>} : memref<16x2x48xf32, #tpu.memory_space<vmem>>, vector<1x2x48xf32>,
    %c10_i32_601 = arith.constant 10 : i32
    %c14_i32_602 = arith.constant 14 : i32
    %957 = arith.subi %c14_i32_602, %c10_i32_601 : i32
    %958 = arith.index_cast %957 : i32 to index
    %c0_603 = arith.constant 0 : index
    %c0_604 = arith.constant 0 : index
    %959 = vector.load %arg15[%958, %c0_603, %c0_604] : memref<16x2x48xf32, #tpu.memory_space<vmem>>, vector<1x2x48xf32>
    %960 = vector.shape_cast %959 : vector<1x2x48xf32> to vector<2x48xf32>
    %c0_605 = arith.constant 0 : index
    %961 = arith.index_cast %957 : i32 to index
    %c0_606 = arith.constant 0 : index
    %c0_607 = arith.constant 0 : index
    %962 = vector.load %arg9[%c0_605, %961, %c0_606, %c0_607] : memref<1x16x1x48xf32, #tpu.memory_space<vmem>>, vector<1x1x1x48xf32>
    %963 = vector.shape_cast %962 : vector<1x1x1x48xf32> to vector<1x48xf32>
    %964 = vector.broadcast %963 : vector<1x48xf32> to vector<2x48xf32>
    %965 = arith.mulf %964, %952 : vector<2x48xf32>
    %966 = arith.subf %960, %965 : vector<2x48xf32>
    %967 = arith.index_cast %957 : i32 to index
    %c0_608 = arith.constant 0 : index
    %c0_609 = arith.constant 0 : index
    %968 = vector.load %arg15[%967, %c0_608, %c0_609] : memref<16x2x48xf32, #tpu.memory_space<vmem>>, vector<1x2x48xf32>
    %969 = vector.shape_cast %968 : vector<1x2x48xf32> to vector<2x48xf32>
    %970 = vector.shape_cast %966 : vector<2x48xf32> to vector<1x2x48xf32>
    tpu.vector_store %arg15[%967, %c0_608, %c0_609], %970 {strides = array<i32>} : memref<16x2x48xf32, #tpu.memory_space<vmem>>, vector<1x2x48xf32>,
    %c11_i32_610 = arith.constant 11 : i32
    %c14_i32_611 = arith.constant 14 : i32
    %971 = arith.subi %c14_i32_611, %c11_i32_610 : i32
    %972 = arith.index_cast %971 : i32 to index
    %c0_612 = arith.constant 0 : index
    %c0_613 = arith.constant 0 : index
    %973 = vector.load %arg15[%972, %c0_612, %c0_613] : memref<16x2x48xf32, #tpu.memory_space<vmem>>, vector<1x2x48xf32>
    %974 = vector.shape_cast %973 : vector<1x2x48xf32> to vector<2x48xf32>
    %c0_614 = arith.constant 0 : index
    %975 = arith.index_cast %971 : i32 to index
    %c0_615 = arith.constant 0 : index
    %c0_616 = arith.constant 0 : index
    %976 = vector.load %arg9[%c0_614, %975, %c0_615, %c0_616] : memref<1x16x1x48xf32, #tpu.memory_space<vmem>>, vector<1x1x1x48xf32>
    %977 = vector.shape_cast %976 : vector<1x1x1x48xf32> to vector<1x48xf32>
    %978 = vector.broadcast %977 : vector<1x48xf32> to vector<2x48xf32>
    %979 = arith.mulf %978, %966 : vector<2x48xf32>
    %980 = arith.subf %974, %979 : vector<2x48xf32>
    %981 = arith.index_cast %971 : i32 to index
    %c0_617 = arith.constant 0 : index
    %c0_618 = arith.constant 0 : index
    %982 = vector.load %arg15[%981, %c0_617, %c0_618] : memref<16x2x48xf32, #tpu.memory_space<vmem>>, vector<1x2x48xf32>
    %983 = vector.shape_cast %982 : vector<1x2x48xf32> to vector<2x48xf32>
    %984 = vector.shape_cast %980 : vector<2x48xf32> to vector<1x2x48xf32>
    tpu.vector_store %arg15[%981, %c0_617, %c0_618], %984 {strides = array<i32>} : memref<16x2x48xf32, #tpu.memory_space<vmem>>, vector<1x2x48xf32>,
    %c12_i32_619 = arith.constant 12 : i32
    %c14_i32_620 = arith.constant 14 : i32
    %985 = arith.subi %c14_i32_620, %c12_i32_619 : i32
    %986 = arith.index_cast %985 : i32 to index
    %c0_621 = arith.constant 0 : index
    %c0_622 = arith.constant 0 : index
    %987 = vector.load %arg15[%986, %c0_621, %c0_622] : memref<16x2x48xf32, #tpu.memory_space<vmem>>, vector<1x2x48xf32>
    %988 = vector.shape_cast %987 : vector<1x2x48xf32> to vector<2x48xf32>
    %c0_623 = arith.constant 0 : index
    %989 = arith.index_cast %985 : i32 to index
    %c0_624 = arith.constant 0 : index
    %c0_625 = arith.constant 0 : index
    %990 = vector.load %arg9[%c0_623, %989, %c0_624, %c0_625] : memref<1x16x1x48xf32, #tpu.memory_space<vmem>>, vector<1x1x1x48xf32>
    %991 = vector.shape_cast %990 : vector<1x1x1x48xf32> to vector<1x48xf32>
    %992 = vector.broadcast %991 : vector<1x48xf32> to vector<2x48xf32>
    %993 = arith.mulf %992, %980 : vector<2x48xf32>
    %994 = arith.subf %988, %993 : vector<2x48xf32>
    %995 = arith.index_cast %985 : i32 to index
    %c0_626 = arith.constant 0 : index
    %c0_627 = arith.constant 0 : index
    %996 = vector.load %arg15[%995, %c0_626, %c0_627] : memref<16x2x48xf32, #tpu.memory_space<vmem>>, vector<1x2x48xf32>
    %997 = vector.shape_cast %996 : vector<1x2x48xf32> to vector<2x48xf32>
    %998 = vector.shape_cast %994 : vector<2x48xf32> to vector<1x2x48xf32>
    tpu.vector_store %arg15[%995, %c0_626, %c0_627], %998 {strides = array<i32>} : memref<16x2x48xf32, #tpu.memory_space<vmem>>, vector<1x2x48xf32>,
    %c13_i32_628 = arith.constant 13 : i32
    %c14_i32_629 = arith.constant 14 : i32
    %999 = arith.subi %c14_i32_629, %c13_i32_628 : i32
    %1000 = arith.index_cast %999 : i32 to index
    %c0_630 = arith.constant 0 : index
    %c0_631 = arith.constant 0 : index
    %1001 = vector.load %arg15[%1000, %c0_630, %c0_631] : memref<16x2x48xf32, #tpu.memory_space<vmem>>, vector<1x2x48xf32>
    %1002 = vector.shape_cast %1001 : vector<1x2x48xf32> to vector<2x48xf32>
    %c0_632 = arith.constant 0 : index
    %1003 = arith.index_cast %999 : i32 to index
    %c0_633 = arith.constant 0 : index
    %c0_634 = arith.constant 0 : index
    %1004 = vector.load %arg9[%c0_632, %1003, %c0_633, %c0_634] : memref<1x16x1x48xf32, #tpu.memory_space<vmem>>, vector<1x1x1x48xf32>
    %1005 = vector.shape_cast %1004 : vector<1x1x1x48xf32> to vector<1x48xf32>
    %1006 = vector.broadcast %1005 : vector<1x48xf32> to vector<2x48xf32>
    %1007 = arith.mulf %1006, %994 : vector<2x48xf32>
    %1008 = arith.subf %1002, %1007 : vector<2x48xf32>
    %1009 = arith.index_cast %999 : i32 to index
    %c0_635 = arith.constant 0 : index
    %c0_636 = arith.constant 0 : index
    %1010 = vector.load %arg15[%1009, %c0_635, %c0_636] : memref<16x2x48xf32, #tpu.memory_space<vmem>>, vector<1x2x48xf32>
    %1011 = vector.shape_cast %1010 : vector<1x2x48xf32> to vector<2x48xf32>
    %1012 = vector.shape_cast %1008 : vector<2x48xf32> to vector<1x2x48xf32>
    tpu.vector_store %arg15[%1009, %c0_635, %c0_636], %1012 {strides = array<i32>} : memref<16x2x48xf32, #tpu.memory_space<vmem>>, vector<1x2x48xf32>,
    %c14_i32_637 = arith.constant 14 : i32
    %c14_i32_638 = arith.constant 14 : i32
    %1013 = arith.subi %c14_i32_638, %c14_i32_637 : i32
    %1014 = arith.index_cast %1013 : i32 to index
    %c0_639 = arith.constant 0 : index
    %c0_640 = arith.constant 0 : index
    %1015 = vector.load %arg15[%1014, %c0_639, %c0_640] : memref<16x2x48xf32, #tpu.memory_space<vmem>>, vector<1x2x48xf32>
    %1016 = vector.shape_cast %1015 : vector<1x2x48xf32> to vector<2x48xf32>
    %c0_641 = arith.constant 0 : index
    %1017 = arith.index_cast %1013 : i32 to index
    %c0_642 = arith.constant 0 : index
    %c0_643 = arith.constant 0 : index
    %1018 = vector.load %arg9[%c0_641, %1017, %c0_642, %c0_643] : memref<1x16x1x48xf32, #tpu.memory_space<vmem>>, vector<1x1x1x48xf32>
    %1019 = vector.shape_cast %1018 : vector<1x1x1x48xf32> to vector<1x48xf32>
    %1020 = vector.broadcast %1019 : vector<1x48xf32> to vector<2x48xf32>
    %1021 = arith.mulf %1020, %1008 : vector<2x48xf32>
    %1022 = arith.subf %1016, %1021 : vector<2x48xf32>
    %1023 = arith.index_cast %1013 : i32 to index
    %c0_644 = arith.constant 0 : index
    %c0_645 = arith.constant 0 : index
    %1024 = vector.load %arg15[%1023, %c0_644, %c0_645] : memref<16x2x48xf32, #tpu.memory_space<vmem>>, vector<1x2x48xf32>
    %1025 = vector.shape_cast %1024 : vector<1x2x48xf32> to vector<2x48xf32>
    %1026 = vector.shape_cast %1022 : vector<2x48xf32> to vector<1x2x48xf32>
    tpu.vector_store %arg15[%1023, %c0_644, %c0_645], %1026 {strides = array<i32>} : memref<16x2x48xf32, #tpu.memory_space<vmem>>, vector<1x2x48xf32>,
    %c15_i32_646 = arith.constant 15 : i32
    %c0_647 = arith.constant 0 : index
    %c0_648 = arith.constant 0 : index
    %c0_649 = arith.constant 0 : index
    %1027 = vector.load %arg15[%c0_647, %c0_648, %c0_649] : memref<16x2x48xf32, #tpu.memory_space<vmem>>, vector<16x1x16xf32>
    %1028 = vector.shape_cast %1027 : vector<16x1x16xf32> to vector<16x16xf32>
    %cst_650 = arith.constant dense<0.000000e+00> : vector<16x16xf32>
    %1029 = tpu.matmul %12, %1028, %cst_650 {dimension_numbers = #tpu.dot_dimension_numbers<[1], [1], [0], [0], [0, 0, 1, 0], [], []>, precision = #tpu.contract_precision<fp32>} : vector<16x16xf32>, vector<16x16xf32>, vector<16x16xf32> -> vector<16x16xf32>
    %c0_651 = arith.constant 0 : index
    %c0_652 = arith.constant 0 : index
    %c0_653 = arith.constant 0 : index
    %1030 = vector.load %arg14[%c0_651, %c0_652, %c0_653] : memref<16x2x48xf32, #tpu.memory_space<vmem>>, vector<16x1x16xf32>
    %1031 = vector.shape_cast %1030 : vector<16x1x16xf32> to vector<16x16xf32>
    %1032 = vector.shape_cast %1029 : vector<16x16xf32> to vector<16x1x16xf32>
    tpu.vector_store %arg14[%c0_651, %c0_652, %c0_653], %1032 {strides = array<i32>} : memref<16x2x48xf32, #tpu.memory_space<vmem>>, vector<16x1x16xf32>,
    %c0_654 = arith.constant 0 : index
    %c0_655 = arith.constant 0 : index
    %c16_656 = arith.constant 16 : index
    %1033 = vector.load %arg15[%c0_654, %c0_655, %c16_656] : memref<16x2x48xf32, #tpu.memory_space<vmem>>, vector<16x1x16xf32>
    %1034 = vector.shape_cast %1033 : vector<16x1x16xf32> to vector<16x16xf32>
    %cst_657 = arith.constant dense<0.000000e+00> : vector<16x16xf32>
    %1035 = tpu.matmul %12, %1034, %cst_657 {dimension_numbers = #tpu.dot_dimension_numbers<[1], [1], [0], [0], [0, 0, 1, 0], [], []>, precision = #tpu.contract_precision<fp32>} : vector<16x16xf32>, vector<16x16xf32>, vector<16x16xf32> -> vector<16x16xf32>
    %c0_658 = arith.constant 0 : index
    %c0_659 = arith.constant 0 : index
    %c16_660 = arith.constant 16 : index
    %1036 = vector.load %arg14[%c0_658, %c0_659, %c16_660] : memref<16x2x48xf32, #tpu.memory_space<vmem>>, vector<16x1x16xf32>
    %1037 = vector.shape_cast %1036 : vector<16x1x16xf32> to vector<16x16xf32>
    %1038 = vector.shape_cast %1035 : vector<16x16xf32> to vector<16x1x16xf32>
    tpu.vector_store %arg14[%c0_658, %c0_659, %c16_660], %1038 {strides = array<i32>} : memref<16x2x48xf32, #tpu.memory_space<vmem>>, vector<16x1x16xf32>,
    %c0_661 = arith.constant 0 : index
    %c0_662 = arith.constant 0 : index
    %c32_663 = arith.constant 32 : index
    %1039 = vector.load %arg15[%c0_661, %c0_662, %c32_663] : memref<16x2x48xf32, #tpu.memory_space<vmem>>, vector<16x1x16xf32>
    %1040 = vector.shape_cast %1039 : vector<16x1x16xf32> to vector<16x16xf32>
    %cst_664 = arith.constant dense<0.000000e+00> : vector<16x16xf32>
    %1041 = tpu.matmul %12, %1040, %cst_664 {dimension_numbers = #tpu.dot_dimension_numbers<[1], [1], [0], [0], [0, 0, 1, 0], [], []>, precision = #tpu.contract_precision<fp32>} : vector<16x16xf32>, vector<16x16xf32>, vector<16x16xf32> -> vector<16x16xf32>
    %c0_665 = arith.constant 0 : index
    %c0_666 = arith.constant 0 : index
    %c32_667 = arith.constant 32 : index
    %1042 = vector.load %arg14[%c0_665, %c0_666, %c32_667] : memref<16x2x48xf32, #tpu.memory_space<vmem>>, vector<16x1x16xf32>
    %1043 = vector.shape_cast %1042 : vector<16x1x16xf32> to vector<16x16xf32>
    %1044 = vector.shape_cast %1041 : vector<16x16xf32> to vector<16x1x16xf32>
    tpu.vector_store %arg14[%c0_665, %c0_666, %c32_667], %1044 {strides = array<i32>} : memref<16x2x48xf32, #tpu.memory_space<vmem>>, vector<16x1x16xf32>,
    %c0_668 = arith.constant 0 : index
    %c1_669 = arith.constant 1 : index
    %c0_670 = arith.constant 0 : index
    %1045 = vector.load %arg15[%c0_668, %c1_669, %c0_670] : memref<16x2x48xf32, #tpu.memory_space<vmem>>, vector<16x1x16xf32>
    %1046 = vector.shape_cast %1045 : vector<16x1x16xf32> to vector<16x16xf32>
    %cst_671 = arith.constant dense<0.000000e+00> : vector<16x16xf32>
    %1047 = tpu.matmul %12, %1046, %cst_671 {dimension_numbers = #tpu.dot_dimension_numbers<[1], [1], [0], [0], [0, 0, 1, 0], [], []>, precision = #tpu.contract_precision<fp32>} : vector<16x16xf32>, vector<16x16xf32>, vector<16x16xf32> -> vector<16x16xf32>
    %c0_672 = arith.constant 0 : index
    %c1_673 = arith.constant 1 : index
    %c0_674 = arith.constant 0 : index
    %1048 = vector.load %arg14[%c0_672, %c1_673, %c0_674] : memref<16x2x48xf32, #tpu.memory_space<vmem>>, vector<16x1x16xf32>
    %1049 = vector.shape_cast %1048 : vector<16x1x16xf32> to vector<16x16xf32>
    %1050 = vector.shape_cast %1047 : vector<16x16xf32> to vector<16x1x16xf32>
    tpu.vector_store %arg14[%c0_672, %c1_673, %c0_674], %1050 {strides = array<i32>} : memref<16x2x48xf32, #tpu.memory_space<vmem>>, vector<16x1x16xf32>,
    %c0_675 = arith.constant 0 : index
    %c1_676 = arith.constant 1 : index
    %c16_677 = arith.constant 16 : index
    %1051 = vector.load %arg15[%c0_675, %c1_676, %c16_677] : memref<16x2x48xf32, #tpu.memory_space<vmem>>, vector<16x1x16xf32>
    %1052 = vector.shape_cast %1051 : vector<16x1x16xf32> to vector<16x16xf32>
    %cst_678 = arith.constant dense<0.000000e+00> : vector<16x16xf32>
    %1053 = tpu.matmul %12, %1052, %cst_678 {dimension_numbers = #tpu.dot_dimension_numbers<[1], [1], [0], [0], [0, 0, 1, 0], [], []>, precision = #tpu.contract_precision<fp32>} : vector<16x16xf32>, vector<16x16xf32>, vector<16x16xf32> -> vector<16x16xf32>
    %c0_679 = arith.constant 0 : index
    %c1_680 = arith.constant 1 : index
    %c16_681 = arith.constant 16 : index
    %1054 = vector.load %arg14[%c0_679, %c1_680, %c16_681] : memref<16x2x48xf32, #tpu.memory_space<vmem>>, vector<16x1x16xf32>
    %1055 = vector.shape_cast %1054 : vector<16x1x16xf32> to vector<16x16xf32>
    %1056 = vector.shape_cast %1053 : vector<16x16xf32> to vector<16x1x16xf32>
    tpu.vector_store %arg14[%c0_679, %c1_680, %c16_681], %1056 {strides = array<i32>} : memref<16x2x48xf32, #tpu.memory_space<vmem>>, vector<16x1x16xf32>,
    %c0_682 = arith.constant 0 : index
    %c1_683 = arith.constant 1 : index
    %c32_684 = arith.constant 32 : index
    %1057 = vector.load %arg15[%c0_682, %c1_683, %c32_684] : memref<16x2x48xf32, #tpu.memory_space<vmem>>, vector<16x1x16xf32>
    %1058 = vector.shape_cast %1057 : vector<16x1x16xf32> to vector<16x16xf32>
    %cst_685 = arith.constant dense<0.000000e+00> : vector<16x16xf32>
    %1059 = tpu.matmul %12, %1058, %cst_685 {dimension_numbers = #tpu.dot_dimension_numbers<[1], [1], [0], [0], [0, 0, 1, 0], [], []>, precision = #tpu.contract_precision<fp32>} : vector<16x16xf32>, vector<16x16xf32>, vector<16x16xf32> -> vector<16x16xf32>
    %c0_686 = arith.constant 0 : index
    %c1_687 = arith.constant 1 : index
    %c32_688 = arith.constant 32 : index
    %1060 = vector.load %arg14[%c0_686, %c1_687, %c32_688] : memref<16x2x48xf32, #tpu.memory_space<vmem>>, vector<16x1x16xf32>
    %1061 = vector.shape_cast %1060 : vector<16x1x16xf32> to vector<16x16xf32>
    %1062 = vector.shape_cast %1059 : vector<16x16xf32> to vector<16x1x16xf32>
    tpu.vector_store %arg14[%c0_686, %c1_687, %c32_688], %1062 {strides = array<i32>} : memref<16x2x48xf32, #tpu.memory_space<vmem>>, vector<16x1x16xf32>,
    %c0_689 = arith.constant 0 : index
    %c0_690 = arith.constant 0 : index
    %c0_691 = arith.constant 0 : index
    %1063 = vector.load %arg14[%c0_689, %c0_690, %c0_691] : memref<16x2x48xf32, #tpu.memory_space<vmem>>, vector<1x2x48xf32>
    %1064 = vector.shape_cast %1063 : vector<1x2x48xf32> to vector<2x48xf32>
    %c0_692 = arith.constant 0 : index
    %c0_693 = arith.constant 0 : index
    %c0_694 = arith.constant 0 : index
    %c0_695 = arith.constant 0 : index
    %1065 = vector.load %arg7[%c0_692, %c0_693, %c0_694, %c0_695] : memref<1x16x1x48xf32, #tpu.memory_space<vmem>>, vector<1x1x1x48xf32>
    %1066 = vector.shape_cast %1065 : vector<1x1x1x48xf32> to vector<1x48xf32>
    %1067 = vector.broadcast %1066 : vector<1x48xf32> to vector<2x48xf32>
    %1068 = arith.mulf %1064, %1067 : vector<2x48xf32>
    %c0_696 = arith.constant 0 : index
    %c0_697 = arith.constant 0 : index
    %c0_698 = arith.constant 0 : index
    %1069 = vector.load %arg14[%c0_696, %c0_697, %c0_698] : memref<16x2x48xf32, #tpu.memory_space<vmem>>, vector<1x2x48xf32>
    %1070 = vector.shape_cast %1069 : vector<1x2x48xf32> to vector<2x48xf32>
    %1071 = vector.shape_cast %1068 : vector<2x48xf32> to vector<1x2x48xf32>
    tpu.vector_store %arg14[%c0_696, %c0_697, %c0_698], %1071 {strides = array<i32>} : memref<16x2x48xf32, #tpu.memory_space<vmem>>, vector<1x2x48xf32>,
    %c1_i32_699 = arith.constant 1 : i32
    %1072 = arith.index_cast %c1_i32_699 : i32 to index
    %c0_700 = arith.constant 0 : index
    %c0_701 = arith.constant 0 : index
    %1073 = vector.load %arg14[%1072, %c0_700, %c0_701] : memref<16x2x48xf32, #tpu.memory_space<vmem>>, vector<1x2x48xf32>
    %1074 = vector.shape_cast %1073 : vector<1x2x48xf32> to vector<2x48xf32>
    %c0_702 = arith.constant 0 : index
    %1075 = arith.index_cast %c1_i32_699 : i32 to index
    %c0_703 = arith.constant 0 : index
    %c0_704 = arith.constant 0 : index
    %1076 = vector.load %arg5[%c0_702, %1075, %c0_703, %c0_704] : memref<1x16x1x48xf32, #tpu.memory_space<vmem>>, vector<1x1x1x48xf32>
    %1077 = vector.shape_cast %1076 : vector<1x1x1x48xf32> to vector<1x48xf32>
    %1078 = vector.broadcast %1077 : vector<1x48xf32> to vector<2x48xf32>
    %1079 = arith.mulf %1078, %1068 : vector<2x48xf32>
    %1080 = arith.subf %1074, %1079 : vector<2x48xf32>
    %c0_705 = arith.constant 0 : index
    %1081 = arith.index_cast %c1_i32_699 : i32 to index
    %c0_706 = arith.constant 0 : index
    %c0_707 = arith.constant 0 : index
    %1082 = vector.load %arg7[%c0_705, %1081, %c0_706, %c0_707] : memref<1x16x1x48xf32, #tpu.memory_space<vmem>>, vector<1x1x1x48xf32>
    %1083 = vector.shape_cast %1082 : vector<1x1x1x48xf32> to vector<1x48xf32>
    %1084 = vector.broadcast %1083 : vector<1x48xf32> to vector<2x48xf32>
    %1085 = arith.mulf %1080, %1084 : vector<2x48xf32>
    %1086 = arith.index_cast %c1_i32_699 : i32 to index
    %c0_708 = arith.constant 0 : index
    %c0_709 = arith.constant 0 : index
    %1087 = vector.load %arg14[%1086, %c0_708, %c0_709] : memref<16x2x48xf32, #tpu.memory_space<vmem>>, vector<1x2x48xf32>
    %1088 = vector.shape_cast %1087 : vector<1x2x48xf32> to vector<2x48xf32>
    %1089 = vector.shape_cast %1085 : vector<2x48xf32> to vector<1x2x48xf32>
    tpu.vector_store %arg14[%1086, %c0_708, %c0_709], %1089 {strides = array<i32>} : memref<16x2x48xf32, #tpu.memory_space<vmem>>, vector<1x2x48xf32>,
    %c2_i32_710 = arith.constant 2 : i32
    %1090 = arith.index_cast %c2_i32_710 : i32 to index
    %c0_711 = arith.constant 0 : index
    %c0_712 = arith.constant 0 : index
    %1091 = vector.load %arg14[%1090, %c0_711, %c0_712] : memref<16x2x48xf32, #tpu.memory_space<vmem>>, vector<1x2x48xf32>
    %1092 = vector.shape_cast %1091 : vector<1x2x48xf32> to vector<2x48xf32>
    %c0_713 = arith.constant 0 : index
    %1093 = arith.index_cast %c2_i32_710 : i32 to index
    %c0_714 = arith.constant 0 : index
    %c0_715 = arith.constant 0 : index
    %1094 = vector.load %arg5[%c0_713, %1093, %c0_714, %c0_715] : memref<1x16x1x48xf32, #tpu.memory_space<vmem>>, vector<1x1x1x48xf32>
    %1095 = vector.shape_cast %1094 : vector<1x1x1x48xf32> to vector<1x48xf32>
    %1096 = vector.broadcast %1095 : vector<1x48xf32> to vector<2x48xf32>
    %1097 = arith.mulf %1096, %1085 : vector<2x48xf32>
    %1098 = arith.subf %1092, %1097 : vector<2x48xf32>
    %c0_716 = arith.constant 0 : index
    %1099 = arith.index_cast %c2_i32_710 : i32 to index
    %c0_717 = arith.constant 0 : index
    %c0_718 = arith.constant 0 : index
    %1100 = vector.load %arg7[%c0_716, %1099, %c0_717, %c0_718] : memref<1x16x1x48xf32, #tpu.memory_space<vmem>>, vector<1x1x1x48xf32>
    %1101 = vector.shape_cast %1100 : vector<1x1x1x48xf32> to vector<1x48xf32>
    %1102 = vector.broadcast %1101 : vector<1x48xf32> to vector<2x48xf32>
    %1103 = arith.mulf %1098, %1102 : vector<2x48xf32>
    %1104 = arith.index_cast %c2_i32_710 : i32 to index
    %c0_719 = arith.constant 0 : index
    %c0_720 = arith.constant 0 : index
    %1105 = vector.load %arg14[%1104, %c0_719, %c0_720] : memref<16x2x48xf32, #tpu.memory_space<vmem>>, vector<1x2x48xf32>
    %1106 = vector.shape_cast %1105 : vector<1x2x48xf32> to vector<2x48xf32>
    %1107 = vector.shape_cast %1103 : vector<2x48xf32> to vector<1x2x48xf32>
    tpu.vector_store %arg14[%1104, %c0_719, %c0_720], %1107 {strides = array<i32>} : memref<16x2x48xf32, #tpu.memory_space<vmem>>, vector<1x2x48xf32>,
    %c3_i32_721 = arith.constant 3 : i32
    %1108 = arith.index_cast %c3_i32_721 : i32 to index
    %c0_722 = arith.constant 0 : index
    %c0_723 = arith.constant 0 : index
    %1109 = vector.load %arg14[%1108, %c0_722, %c0_723] : memref<16x2x48xf32, #tpu.memory_space<vmem>>, vector<1x2x48xf32>
    %1110 = vector.shape_cast %1109 : vector<1x2x48xf32> to vector<2x48xf32>
    %c0_724 = arith.constant 0 : index
    %1111 = arith.index_cast %c3_i32_721 : i32 to index
    %c0_725 = arith.constant 0 : index
    %c0_726 = arith.constant 0 : index
    %1112 = vector.load %arg5[%c0_724, %1111, %c0_725, %c0_726] : memref<1x16x1x48xf32, #tpu.memory_space<vmem>>, vector<1x1x1x48xf32>
    %1113 = vector.shape_cast %1112 : vector<1x1x1x48xf32> to vector<1x48xf32>
    %1114 = vector.broadcast %1113 : vector<1x48xf32> to vector<2x48xf32>
    %1115 = arith.mulf %1114, %1103 : vector<2x48xf32>
    %1116 = arith.subf %1110, %1115 : vector<2x48xf32>
    %c0_727 = arith.constant 0 : index
    %1117 = arith.index_cast %c3_i32_721 : i32 to index
    %c0_728 = arith.constant 0 : index
    %c0_729 = arith.constant 0 : index
    %1118 = vector.load %arg7[%c0_727, %1117, %c0_728, %c0_729] : memref<1x16x1x48xf32, #tpu.memory_space<vmem>>, vector<1x1x1x48xf32>
    %1119 = vector.shape_cast %1118 : vector<1x1x1x48xf32> to vector<1x48xf32>
    %1120 = vector.broadcast %1119 : vector<1x48xf32> to vector<2x48xf32>
    %1121 = arith.mulf %1116, %1120 : vector<2x48xf32>
    %1122 = arith.index_cast %c3_i32_721 : i32 to index
    %c0_730 = arith.constant 0 : index
    %c0_731 = arith.constant 0 : index
    %1123 = vector.load %arg14[%1122, %c0_730, %c0_731] : memref<16x2x48xf32, #tpu.memory_space<vmem>>, vector<1x2x48xf32>
    %1124 = vector.shape_cast %1123 : vector<1x2x48xf32> to vector<2x48xf32>
    %1125 = vector.shape_cast %1121 : vector<2x48xf32> to vector<1x2x48xf32>
    tpu.vector_store %arg14[%1122, %c0_730, %c0_731], %1125 {strides = array<i32>} : memref<16x2x48xf32, #tpu.memory_space<vmem>>, vector<1x2x48xf32>,
    %c4_i32_732 = arith.constant 4 : i32
    %1126 = arith.index_cast %c4_i32_732 : i32 to index
    %c0_733 = arith.constant 0 : index
    %c0_734 = arith.constant 0 : index
    %1127 = vector.load %arg14[%1126, %c0_733, %c0_734] : memref<16x2x48xf32, #tpu.memory_space<vmem>>, vector<1x2x48xf32>
    %1128 = vector.shape_cast %1127 : vector<1x2x48xf32> to vector<2x48xf32>
    %c0_735 = arith.constant 0 : index
    %1129 = arith.index_cast %c4_i32_732 : i32 to index
    %c0_736 = arith.constant 0 : index
    %c0_737 = arith.constant 0 : index
    %1130 = vector.load %arg5[%c0_735, %1129, %c0_736, %c0_737] : memref<1x16x1x48xf32, #tpu.memory_space<vmem>>, vector<1x1x1x48xf32>
    %1131 = vector.shape_cast %1130 : vector<1x1x1x48xf32> to vector<1x48xf32>
    %1132 = vector.broadcast %1131 : vector<1x48xf32> to vector<2x48xf32>
    %1133 = arith.mulf %1132, %1121 : vector<2x48xf32>
    %1134 = arith.subf %1128, %1133 : vector<2x48xf32>
    %c0_738 = arith.constant 0 : index
    %1135 = arith.index_cast %c4_i32_732 : i32 to index
    %c0_739 = arith.constant 0 : index
    %c0_740 = arith.constant 0 : index
    %1136 = vector.load %arg7[%c0_738, %1135, %c0_739, %c0_740] : memref<1x16x1x48xf32, #tpu.memory_space<vmem>>, vector<1x1x1x48xf32>
    %1137 = vector.shape_cast %1136 : vector<1x1x1x48xf32> to vector<1x48xf32>
    %1138 = vector.broadcast %1137 : vector<1x48xf32> to vector<2x48xf32>
    %1139 = arith.mulf %1134, %1138 : vector<2x48xf32>
    %1140 = arith.index_cast %c4_i32_732 : i32 to index
    %c0_741 = arith.constant 0 : index
    %c0_742 = arith.constant 0 : index
    %1141 = vector.load %arg14[%1140, %c0_741, %c0_742] : memref<16x2x48xf32, #tpu.memory_space<vmem>>, vector<1x2x48xf32>
    %1142 = vector.shape_cast %1141 : vector<1x2x48xf32> to vector<2x48xf32>
    %1143 = vector.shape_cast %1139 : vector<2x48xf32> to vector<1x2x48xf32>
    tpu.vector_store %arg14[%1140, %c0_741, %c0_742], %1143 {strides = array<i32>} : memref<16x2x48xf32, #tpu.memory_space<vmem>>, vector<1x2x48xf32>,
    %c5_i32_743 = arith.constant 5 : i32
    %1144 = arith.index_cast %c5_i32_743 : i32 to index
    %c0_744 = arith.constant 0 : index
    %c0_745 = arith.constant 0 : index
    %1145 = vector.load %arg14[%1144, %c0_744, %c0_745] : memref<16x2x48xf32, #tpu.memory_space<vmem>>, vector<1x2x48xf32>
    %1146 = vector.shape_cast %1145 : vector<1x2x48xf32> to vector<2x48xf32>
    %c0_746 = arith.constant 0 : index
    %1147 = arith.index_cast %c5_i32_743 : i32 to index
    %c0_747 = arith.constant 0 : index
    %c0_748 = arith.constant 0 : index
    %1148 = vector.load %arg5[%c0_746, %1147, %c0_747, %c0_748] : memref<1x16x1x48xf32, #tpu.memory_space<vmem>>, vector<1x1x1x48xf32>
    %1149 = vector.shape_cast %1148 : vector<1x1x1x48xf32> to vector<1x48xf32>
    %1150 = vector.broadcast %1149 : vector<1x48xf32> to vector<2x48xf32>
    %1151 = arith.mulf %1150, %1139 : vector<2x48xf32>
    %1152 = arith.subf %1146, %1151 : vector<2x48xf32>
    %c0_749 = arith.constant 0 : index
    %1153 = arith.index_cast %c5_i32_743 : i32 to index
    %c0_750 = arith.constant 0 : index
    %c0_751 = arith.constant 0 : index
    %1154 = vector.load %arg7[%c0_749, %1153, %c0_750, %c0_751] : memref<1x16x1x48xf32, #tpu.memory_space<vmem>>, vector<1x1x1x48xf32>
    %1155 = vector.shape_cast %1154 : vector<1x1x1x48xf32> to vector<1x48xf32>
    %1156 = vector.broadcast %1155 : vector<1x48xf32> to vector<2x48xf32>
    %1157 = arith.mulf %1152, %1156 : vector<2x48xf32>
    %1158 = arith.index_cast %c5_i32_743 : i32 to index
    %c0_752 = arith.constant 0 : index
    %c0_753 = arith.constant 0 : index
    %1159 = vector.load %arg14[%1158, %c0_752, %c0_753] : memref<16x2x48xf32, #tpu.memory_space<vmem>>, vector<1x2x48xf32>
    %1160 = vector.shape_cast %1159 : vector<1x2x48xf32> to vector<2x48xf32>
    %1161 = vector.shape_cast %1157 : vector<2x48xf32> to vector<1x2x48xf32>
    tpu.vector_store %arg14[%1158, %c0_752, %c0_753], %1161 {strides = array<i32>} : memref<16x2x48xf32, #tpu.memory_space<vmem>>, vector<1x2x48xf32>,
    %c6_i32_754 = arith.constant 6 : i32
    %1162 = arith.index_cast %c6_i32_754 : i32 to index
    %c0_755 = arith.constant 0 : index
    %c0_756 = arith.constant 0 : index
    %1163 = vector.load %arg14[%1162, %c0_755, %c0_756] : memref<16x2x48xf32, #tpu.memory_space<vmem>>, vector<1x2x48xf32>
    %1164 = vector.shape_cast %1163 : vector<1x2x48xf32> to vector<2x48xf32>
    %c0_757 = arith.constant 0 : index
    %1165 = arith.index_cast %c6_i32_754 : i32 to index
    %c0_758 = arith.constant 0 : index
    %c0_759 = arith.constant 0 : index
    %1166 = vector.load %arg5[%c0_757, %1165, %c0_758, %c0_759] : memref<1x16x1x48xf32, #tpu.memory_space<vmem>>, vector<1x1x1x48xf32>
    %1167 = vector.shape_cast %1166 : vector<1x1x1x48xf32> to vector<1x48xf32>
    %1168 = vector.broadcast %1167 : vector<1x48xf32> to vector<2x48xf32>
    %1169 = arith.mulf %1168, %1157 : vector<2x48xf32>
    %1170 = arith.subf %1164, %1169 : vector<2x48xf32>
    %c0_760 = arith.constant 0 : index
    %1171 = arith.index_cast %c6_i32_754 : i32 to index
    %c0_761 = arith.constant 0 : index
    %c0_762 = arith.constant 0 : index
    %1172 = vector.load %arg7[%c0_760, %1171, %c0_761, %c0_762] : memref<1x16x1x48xf32, #tpu.memory_space<vmem>>, vector<1x1x1x48xf32>
    %1173 = vector.shape_cast %1172 : vector<1x1x1x48xf32> to vector<1x48xf32>
    %1174 = vector.broadcast %1173 : vector<1x48xf32> to vector<2x48xf32>
    %1175 = arith.mulf %1170, %1174 : vector<2x48xf32>
    %1176 = arith.index_cast %c6_i32_754 : i32 to index
    %c0_763 = arith.constant 0 : index
    %c0_764 = arith.constant 0 : index
    %1177 = vector.load %arg14[%1176, %c0_763, %c0_764] : memref<16x2x48xf32, #tpu.memory_space<vmem>>, vector<1x2x48xf32>
    %1178 = vector.shape_cast %1177 : vector<1x2x48xf32> to vector<2x48xf32>
    %1179 = vector.shape_cast %1175 : vector<2x48xf32> to vector<1x2x48xf32>
    tpu.vector_store %arg14[%1176, %c0_763, %c0_764], %1179 {strides = array<i32>} : memref<16x2x48xf32, #tpu.memory_space<vmem>>, vector<1x2x48xf32>,
    %c7_i32_765 = arith.constant 7 : i32
    %1180 = arith.index_cast %c7_i32_765 : i32 to index
    %c0_766 = arith.constant 0 : index
    %c0_767 = arith.constant 0 : index
    %1181 = vector.load %arg14[%1180, %c0_766, %c0_767] : memref<16x2x48xf32, #tpu.memory_space<vmem>>, vector<1x2x48xf32>
    %1182 = vector.shape_cast %1181 : vector<1x2x48xf32> to vector<2x48xf32>
    %c0_768 = arith.constant 0 : index
    %1183 = arith.index_cast %c7_i32_765 : i32 to index
    %c0_769 = arith.constant 0 : index
    %c0_770 = arith.constant 0 : index
    %1184 = vector.load %arg5[%c0_768, %1183, %c0_769, %c0_770] : memref<1x16x1x48xf32, #tpu.memory_space<vmem>>, vector<1x1x1x48xf32>
    %1185 = vector.shape_cast %1184 : vector<1x1x1x48xf32> to vector<1x48xf32>
    %1186 = vector.broadcast %1185 : vector<1x48xf32> to vector<2x48xf32>
    %1187 = arith.mulf %1186, %1175 : vector<2x48xf32>
    %1188 = arith.subf %1182, %1187 : vector<2x48xf32>
    %c0_771 = arith.constant 0 : index
    %1189 = arith.index_cast %c7_i32_765 : i32 to index
    %c0_772 = arith.constant 0 : index
    %c0_773 = arith.constant 0 : index
    %1190 = vector.load %arg7[%c0_771, %1189, %c0_772, %c0_773] : memref<1x16x1x48xf32, #tpu.memory_space<vmem>>, vector<1x1x1x48xf32>
    %1191 = vector.shape_cast %1190 : vector<1x1x1x48xf32> to vector<1x48xf32>
    %1192 = vector.broadcast %1191 : vector<1x48xf32> to vector<2x48xf32>
    %1193 = arith.mulf %1188, %1192 : vector<2x48xf32>
    %1194 = arith.index_cast %c7_i32_765 : i32 to index
    %c0_774 = arith.constant 0 : index
    %c0_775 = arith.constant 0 : index
    %1195 = vector.load %arg14[%1194, %c0_774, %c0_775] : memref<16x2x48xf32, #tpu.memory_space<vmem>>, vector<1x2x48xf32>
    %1196 = vector.shape_cast %1195 : vector<1x2x48xf32> to vector<2x48xf32>
    %1197 = vector.shape_cast %1193 : vector<2x48xf32> to vector<1x2x48xf32>
    tpu.vector_store %arg14[%1194, %c0_774, %c0_775], %1197 {strides = array<i32>} : memref<16x2x48xf32, #tpu.memory_space<vmem>>, vector<1x2x48xf32>,
    %c8_i32_776 = arith.constant 8 : i32
    %1198 = arith.index_cast %c8_i32_776 : i32 to index
    %c0_777 = arith.constant 0 : index
    %c0_778 = arith.constant 0 : index
    %1199 = vector.load %arg14[%1198, %c0_777, %c0_778] : memref<16x2x48xf32, #tpu.memory_space<vmem>>, vector<1x2x48xf32>
    %1200 = vector.shape_cast %1199 : vector<1x2x48xf32> to vector<2x48xf32>
    %c0_779 = arith.constant 0 : index
    %1201 = arith.index_cast %c8_i32_776 : i32 to index
    %c0_780 = arith.constant 0 : index
    %c0_781 = arith.constant 0 : index
    %1202 = vector.load %arg5[%c0_779, %1201, %c0_780, %c0_781] : memref<1x16x1x48xf32, #tpu.memory_space<vmem>>, vector<1x1x1x48xf32>
    %1203 = vector.shape_cast %1202 : vector<1x1x1x48xf32> to vector<1x48xf32>
    %1204 = vector.broadcast %1203 : vector<1x48xf32> to vector<2x48xf32>
    %1205 = arith.mulf %1204, %1193 : vector<2x48xf32>
    %1206 = arith.subf %1200, %1205 : vector<2x48xf32>
    %c0_782 = arith.constant 0 : index
    %1207 = arith.index_cast %c8_i32_776 : i32 to index
    %c0_783 = arith.constant 0 : index
    %c0_784 = arith.constant 0 : index
    %1208 = vector.load %arg7[%c0_782, %1207, %c0_783, %c0_784] : memref<1x16x1x48xf32, #tpu.memory_space<vmem>>, vector<1x1x1x48xf32>
    %1209 = vector.shape_cast %1208 : vector<1x1x1x48xf32> to vector<1x48xf32>
    %1210 = vector.broadcast %1209 : vector<1x48xf32> to vector<2x48xf32>
    %1211 = arith.mulf %1206, %1210 : vector<2x48xf32>
    %1212 = arith.index_cast %c8_i32_776 : i32 to index
    %c0_785 = arith.constant 0 : index
    %c0_786 = arith.constant 0 : index
    %1213 = vector.load %arg14[%1212, %c0_785, %c0_786] : memref<16x2x48xf32, #tpu.memory_space<vmem>>, vector<1x2x48xf32>
    %1214 = vector.shape_cast %1213 : vector<1x2x48xf32> to vector<2x48xf32>
    %1215 = vector.shape_cast %1211 : vector<2x48xf32> to vector<1x2x48xf32>
    tpu.vector_store %arg14[%1212, %c0_785, %c0_786], %1215 {strides = array<i32>} : memref<16x2x48xf32, #tpu.memory_space<vmem>>, vector<1x2x48xf32>,
    %c9_i32_787 = arith.constant 9 : i32
    %1216 = arith.index_cast %c9_i32_787 : i32 to index
    %c0_788 = arith.constant 0 : index
    %c0_789 = arith.constant 0 : index
    %1217 = vector.load %arg14[%1216, %c0_788, %c0_789] : memref<16x2x48xf32, #tpu.memory_space<vmem>>, vector<1x2x48xf32>
    %1218 = vector.shape_cast %1217 : vector<1x2x48xf32> to vector<2x48xf32>
    %c0_790 = arith.constant 0 : index
    %1219 = arith.index_cast %c9_i32_787 : i32 to index
    %c0_791 = arith.constant 0 : index
    %c0_792 = arith.constant 0 : index
    %1220 = vector.load %arg5[%c0_790, %1219, %c0_791, %c0_792] : memref<1x16x1x48xf32, #tpu.memory_space<vmem>>, vector<1x1x1x48xf32>
    %1221 = vector.shape_cast %1220 : vector<1x1x1x48xf32> to vector<1x48xf32>
    %1222 = vector.broadcast %1221 : vector<1x48xf32> to vector<2x48xf32>
    %1223 = arith.mulf %1222, %1211 : vector<2x48xf32>
    %1224 = arith.subf %1218, %1223 : vector<2x48xf32>
    %c0_793 = arith.constant 0 : index
    %1225 = arith.index_cast %c9_i32_787 : i32 to index
    %c0_794 = arith.constant 0 : index
    %c0_795 = arith.constant 0 : index
    %1226 = vector.load %arg7[%c0_793, %1225, %c0_794, %c0_795] : memref<1x16x1x48xf32, #tpu.memory_space<vmem>>, vector<1x1x1x48xf32>
    %1227 = vector.shape_cast %1226 : vector<1x1x1x48xf32> to vector<1x48xf32>
    %1228 = vector.broadcast %1227 : vector<1x48xf32> to vector<2x48xf32>
    %1229 = arith.mulf %1224, %1228 : vector<2x48xf32>
    %1230 = arith.index_cast %c9_i32_787 : i32 to index
    %c0_796 = arith.constant 0 : index
    %c0_797 = arith.constant 0 : index
    %1231 = vector.load %arg14[%1230, %c0_796, %c0_797] : memref<16x2x48xf32, #tpu.memory_space<vmem>>, vector<1x2x48xf32>
    %1232 = vector.shape_cast %1231 : vector<1x2x48xf32> to vector<2x48xf32>
    %1233 = vector.shape_cast %1229 : vector<2x48xf32> to vector<1x2x48xf32>
    tpu.vector_store %arg14[%1230, %c0_796, %c0_797], %1233 {strides = array<i32>} : memref<16x2x48xf32, #tpu.memory_space<vmem>>, vector<1x2x48xf32>,
    %c10_i32_798 = arith.constant 10 : i32
    %1234 = arith.index_cast %c10_i32_798 : i32 to index
    %c0_799 = arith.constant 0 : index
    %c0_800 = arith.constant 0 : index
    %1235 = vector.load %arg14[%1234, %c0_799, %c0_800] : memref<16x2x48xf32, #tpu.memory_space<vmem>>, vector<1x2x48xf32>
    %1236 = vector.shape_cast %1235 : vector<1x2x48xf32> to vector<2x48xf32>
    %c0_801 = arith.constant 0 : index
    %1237 = arith.index_cast %c10_i32_798 : i32 to index
    %c0_802 = arith.constant 0 : index
    %c0_803 = arith.constant 0 : index
    %1238 = vector.load %arg5[%c0_801, %1237, %c0_802, %c0_803] : memref<1x16x1x48xf32, #tpu.memory_space<vmem>>, vector<1x1x1x48xf32>
    %1239 = vector.shape_cast %1238 : vector<1x1x1x48xf32> to vector<1x48xf32>
    %1240 = vector.broadcast %1239 : vector<1x48xf32> to vector<2x48xf32>
    %1241 = arith.mulf %1240, %1229 : vector<2x48xf32>
    %1242 = arith.subf %1236, %1241 : vector<2x48xf32>
    %c0_804 = arith.constant 0 : index
    %1243 = arith.index_cast %c10_i32_798 : i32 to index
    %c0_805 = arith.constant 0 : index
    %c0_806 = arith.constant 0 : index
    %1244 = vector.load %arg7[%c0_804, %1243, %c0_805, %c0_806] : memref<1x16x1x48xf32, #tpu.memory_space<vmem>>, vector<1x1x1x48xf32>
    %1245 = vector.shape_cast %1244 : vector<1x1x1x48xf32> to vector<1x48xf32>
    %1246 = vector.broadcast %1245 : vector<1x48xf32> to vector<2x48xf32>
    %1247 = arith.mulf %1242, %1246 : vector<2x48xf32>
    %1248 = arith.index_cast %c10_i32_798 : i32 to index
    %c0_807 = arith.constant 0 : index
    %c0_808 = arith.constant 0 : index
    %1249 = vector.load %arg14[%1248, %c0_807, %c0_808] : memref<16x2x48xf32, #tpu.memory_space<vmem>>, vector<1x2x48xf32>
    %1250 = vector.shape_cast %1249 : vector<1x2x48xf32> to vector<2x48xf32>
    %1251 = vector.shape_cast %1247 : vector<2x48xf32> to vector<1x2x48xf32>
    tpu.vector_store %arg14[%1248, %c0_807, %c0_808], %1251 {strides = array<i32>} : memref<16x2x48xf32, #tpu.memory_space<vmem>>, vector<1x2x48xf32>,
    %c11_i32_809 = arith.constant 11 : i32
    %1252 = arith.index_cast %c11_i32_809 : i32 to index
    %c0_810 = arith.constant 0 : index
    %c0_811 = arith.constant 0 : index
    %1253 = vector.load %arg14[%1252, %c0_810, %c0_811] : memref<16x2x48xf32, #tpu.memory_space<vmem>>, vector<1x2x48xf32>
    %1254 = vector.shape_cast %1253 : vector<1x2x48xf32> to vector<2x48xf32>
    %c0_812 = arith.constant 0 : index
    %1255 = arith.index_cast %c11_i32_809 : i32 to index
    %c0_813 = arith.constant 0 : index
    %c0_814 = arith.constant 0 : index
    %1256 = vector.load %arg5[%c0_812, %1255, %c0_813, %c0_814] : memref<1x16x1x48xf32, #tpu.memory_space<vmem>>, vector<1x1x1x48xf32>
    %1257 = vector.shape_cast %1256 : vector<1x1x1x48xf32> to vector<1x48xf32>
    %1258 = vector.broadcast %1257 : vector<1x48xf32> to vector<2x48xf32>
    %1259 = arith.mulf %1258, %1247 : vector<2x48xf32>
    %1260 = arith.subf %1254, %1259 : vector<2x48xf32>
    %c0_815 = arith.constant 0 : index
    %1261 = arith.index_cast %c11_i32_809 : i32 to index
    %c0_816 = arith.constant 0 : index
    %c0_817 = arith.constant 0 : index
    %1262 = vector.load %arg7[%c0_815, %1261, %c0_816, %c0_817] : memref<1x16x1x48xf32, #tpu.memory_space<vmem>>, vector<1x1x1x48xf32>
    %1263 = vector.shape_cast %1262 : vector<1x1x1x48xf32> to vector<1x48xf32>
    %1264 = vector.broadcast %1263 : vector<1x48xf32> to vector<2x48xf32>
    %1265 = arith.mulf %1260, %1264 : vector<2x48xf32>
    %1266 = arith.index_cast %c11_i32_809 : i32 to index
    %c0_818 = arith.constant 0 : index
    %c0_819 = arith.constant 0 : index
    %1267 = vector.load %arg14[%1266, %c0_818, %c0_819] : memref<16x2x48xf32, #tpu.memory_space<vmem>>, vector<1x2x48xf32>
    %1268 = vector.shape_cast %1267 : vector<1x2x48xf32> to vector<2x48xf32>
    %1269 = vector.shape_cast %1265 : vector<2x48xf32> to vector<1x2x48xf32>
    tpu.vector_store %arg14[%1266, %c0_818, %c0_819], %1269 {strides = array<i32>} : memref<16x2x48xf32, #tpu.memory_space<vmem>>, vector<1x2x48xf32>,
    %c12_i32_820 = arith.constant 12 : i32
    %1270 = arith.index_cast %c12_i32_820 : i32 to index
    %c0_821 = arith.constant 0 : index
    %c0_822 = arith.constant 0 : index
    %1271 = vector.load %arg14[%1270, %c0_821, %c0_822] : memref<16x2x48xf32, #tpu.memory_space<vmem>>, vector<1x2x48xf32>
    %1272 = vector.shape_cast %1271 : vector<1x2x48xf32> to vector<2x48xf32>
    %c0_823 = arith.constant 0 : index
    %1273 = arith.index_cast %c12_i32_820 : i32 to index
    %c0_824 = arith.constant 0 : index
    %c0_825 = arith.constant 0 : index
    %1274 = vector.load %arg5[%c0_823, %1273, %c0_824, %c0_825] : memref<1x16x1x48xf32, #tpu.memory_space<vmem>>, vector<1x1x1x48xf32>
    %1275 = vector.shape_cast %1274 : vector<1x1x1x48xf32> to vector<1x48xf32>
    %1276 = vector.broadcast %1275 : vector<1x48xf32> to vector<2x48xf32>
    %1277 = arith.mulf %1276, %1265 : vector<2x48xf32>
    %1278 = arith.subf %1272, %1277 : vector<2x48xf32>
    %c0_826 = arith.constant 0 : index
    %1279 = arith.index_cast %c12_i32_820 : i32 to index
    %c0_827 = arith.constant 0 : index
    %c0_828 = arith.constant 0 : index
    %1280 = vector.load %arg7[%c0_826, %1279, %c0_827, %c0_828] : memref<1x16x1x48xf32, #tpu.memory_space<vmem>>, vector<1x1x1x48xf32>
    %1281 = vector.shape_cast %1280 : vector<1x1x1x48xf32> to vector<1x48xf32>
    %1282 = vector.broadcast %1281 : vector<1x48xf32> to vector<2x48xf32>
    %1283 = arith.mulf %1278, %1282 : vector<2x48xf32>
    %1284 = arith.index_cast %c12_i32_820 : i32 to index
    %c0_829 = arith.constant 0 : index
    %c0_830 = arith.constant 0 : index
    %1285 = vector.load %arg14[%1284, %c0_829, %c0_830] : memref<16x2x48xf32, #tpu.memory_space<vmem>>, vector<1x2x48xf32>
    %1286 = vector.shape_cast %1285 : vector<1x2x48xf32> to vector<2x48xf32>
    %1287 = vector.shape_cast %1283 : vector<2x48xf32> to vector<1x2x48xf32>
    tpu.vector_store %arg14[%1284, %c0_829, %c0_830], %1287 {strides = array<i32>} : memref<16x2x48xf32, #tpu.memory_space<vmem>>, vector<1x2x48xf32>,
    %c13_i32_831 = arith.constant 13 : i32
    %1288 = arith.index_cast %c13_i32_831 : i32 to index
    %c0_832 = arith.constant 0 : index
    %c0_833 = arith.constant 0 : index
    %1289 = vector.load %arg14[%1288, %c0_832, %c0_833] : memref<16x2x48xf32, #tpu.memory_space<vmem>>, vector<1x2x48xf32>
    %1290 = vector.shape_cast %1289 : vector<1x2x48xf32> to vector<2x48xf32>
    %c0_834 = arith.constant 0 : index
    %1291 = arith.index_cast %c13_i32_831 : i32 to index
    %c0_835 = arith.constant 0 : index
    %c0_836 = arith.constant 0 : index
    %1292 = vector.load %arg5[%c0_834, %1291, %c0_835, %c0_836] : memref<1x16x1x48xf32, #tpu.memory_space<vmem>>, vector<1x1x1x48xf32>
    %1293 = vector.shape_cast %1292 : vector<1x1x1x48xf32> to vector<1x48xf32>
    %1294 = vector.broadcast %1293 : vector<1x48xf32> to vector<2x48xf32>
    %1295 = arith.mulf %1294, %1283 : vector<2x48xf32>
    %1296 = arith.subf %1290, %1295 : vector<2x48xf32>
    %c0_837 = arith.constant 0 : index
    %1297 = arith.index_cast %c13_i32_831 : i32 to index
    %c0_838 = arith.constant 0 : index
    %c0_839 = arith.constant 0 : index
    %1298 = vector.load %arg7[%c0_837, %1297, %c0_838, %c0_839] : memref<1x16x1x48xf32, #tpu.memory_space<vmem>>, vector<1x1x1x48xf32>
    %1299 = vector.shape_cast %1298 : vector<1x1x1x48xf32> to vector<1x48xf32>
    %1300 = vector.broadcast %1299 : vector<1x48xf32> to vector<2x48xf32>
    %1301 = arith.mulf %1296, %1300 : vector<2x48xf32>
    %1302 = arith.index_cast %c13_i32_831 : i32 to index
    %c0_840 = arith.constant 0 : index
    %c0_841 = arith.constant 0 : index
    %1303 = vector.load %arg14[%1302, %c0_840, %c0_841] : memref<16x2x48xf32, #tpu.memory_space<vmem>>, vector<1x2x48xf32>
    %1304 = vector.shape_cast %1303 : vector<1x2x48xf32> to vector<2x48xf32>
    %1305 = vector.shape_cast %1301 : vector<2x48xf32> to vector<1x2x48xf32>
    tpu.vector_store %arg14[%1302, %c0_840, %c0_841], %1305 {strides = array<i32>} : memref<16x2x48xf32, #tpu.memory_space<vmem>>, vector<1x2x48xf32>,
    %c14_i32_842 = arith.constant 14 : i32
    %1306 = arith.index_cast %c14_i32_842 : i32 to index
    %c0_843 = arith.constant 0 : index
    %c0_844 = arith.constant 0 : index
    %1307 = vector.load %arg14[%1306, %c0_843, %c0_844] : memref<16x2x48xf32, #tpu.memory_space<vmem>>, vector<1x2x48xf32>
    %1308 = vector.shape_cast %1307 : vector<1x2x48xf32> to vector<2x48xf32>
    %c0_845 = arith.constant 0 : index
    %1309 = arith.index_cast %c14_i32_842 : i32 to index
    %c0_846 = arith.constant 0 : index
    %c0_847 = arith.constant 0 : index
    %1310 = vector.load %arg5[%c0_845, %1309, %c0_846, %c0_847] : memref<1x16x1x48xf32, #tpu.memory_space<vmem>>, vector<1x1x1x48xf32>
    %1311 = vector.shape_cast %1310 : vector<1x1x1x48xf32> to vector<1x48xf32>
    %1312 = vector.broadcast %1311 : vector<1x48xf32> to vector<2x48xf32>
    %1313 = arith.mulf %1312, %1301 : vector<2x48xf32>
    %1314 = arith.subf %1308, %1313 : vector<2x48xf32>
    %c0_848 = arith.constant 0 : index
    %1315 = arith.index_cast %c14_i32_842 : i32 to index
    %c0_849 = arith.constant 0 : index
    %c0_850 = arith.constant 0 : index
    %1316 = vector.load %arg7[%c0_848, %1315, %c0_849, %c0_850] : memref<1x16x1x48xf32, #tpu.memory_space<vmem>>, vector<1x1x1x48xf32>
    %1317 = vector.shape_cast %1316 : vector<1x1x1x48xf32> to vector<1x48xf32>
    %1318 = vector.broadcast %1317 : vector<1x48xf32> to vector<2x48xf32>
    %1319 = arith.mulf %1314, %1318 : vector<2x48xf32>
    %1320 = arith.index_cast %c14_i32_842 : i32 to index
    %c0_851 = arith.constant 0 : index
    %c0_852 = arith.constant 0 : index
    %1321 = vector.load %arg14[%1320, %c0_851, %c0_852] : memref<16x2x48xf32, #tpu.memory_space<vmem>>, vector<1x2x48xf32>
    %1322 = vector.shape_cast %1321 : vector<1x2x48xf32> to vector<2x48xf32>
    %1323 = vector.shape_cast %1319 : vector<2x48xf32> to vector<1x2x48xf32>
    tpu.vector_store %arg14[%1320, %c0_851, %c0_852], %1323 {strides = array<i32>} : memref<16x2x48xf32, #tpu.memory_space<vmem>>, vector<1x2x48xf32>,
    %c15_i32_853 = arith.constant 15 : i32
    %1324 = arith.index_cast %c15_i32_853 : i32 to index
    %c0_854 = arith.constant 0 : index
    %c0_855 = arith.constant 0 : index
    %1325 = vector.load %arg14[%1324, %c0_854, %c0_855] : memref<16x2x48xf32, #tpu.memory_space<vmem>>, vector<1x2x48xf32>
    %1326 = vector.shape_cast %1325 : vector<1x2x48xf32> to vector<2x48xf32>
    %c0_856 = arith.constant 0 : index
    %1327 = arith.index_cast %c15_i32_853 : i32 to index
    %c0_857 = arith.constant 0 : index
    %c0_858 = arith.constant 0 : index
    %1328 = vector.load %arg5[%c0_856, %1327, %c0_857, %c0_858] : memref<1x16x1x48xf32, #tpu.memory_space<vmem>>, vector<1x1x1x48xf32>
    %1329 = vector.shape_cast %1328 : vector<1x1x1x48xf32> to vector<1x48xf32>
    %1330 = vector.broadcast %1329 : vector<1x48xf32> to vector<2x48xf32>
    %1331 = arith.mulf %1330, %1319 : vector<2x48xf32>
    %1332 = arith.subf %1326, %1331 : vector<2x48xf32>
    %c0_859 = arith.constant 0 : index
    %1333 = arith.index_cast %c15_i32_853 : i32 to index
    %c0_860 = arith.constant 0 : index
    %c0_861 = arith.constant 0 : index
    %1334 = vector.load %arg7[%c0_859, %1333, %c0_860, %c0_861] : memref<1x16x1x48xf32, #tpu.memory_space<vmem>>, vector<1x1x1x48xf32>
    %1335 = vector.shape_cast %1334 : vector<1x1x1x48xf32> to vector<1x48xf32>
    %1336 = vector.broadcast %1335 : vector<1x48xf32> to vector<2x48xf32>
    %1337 = arith.mulf %1332, %1336 : vector<2x48xf32>
    %1338 = arith.index_cast %c15_i32_853 : i32 to index
    %c0_862 = arith.constant 0 : index
    %c0_863 = arith.constant 0 : index
    %1339 = vector.load %arg14[%1338, %c0_862, %c0_863] : memref<16x2x48xf32, #tpu.memory_space<vmem>>, vector<1x2x48xf32>
    %1340 = vector.shape_cast %1339 : vector<1x2x48xf32> to vector<2x48xf32>
    %1341 = vector.shape_cast %1337 : vector<2x48xf32> to vector<1x2x48xf32>
    tpu.vector_store %arg14[%1338, %c0_862, %c0_863], %1341 {strides = array<i32>} : memref<16x2x48xf32, #tpu.memory_space<vmem>>, vector<1x2x48xf32>,
    %c15_i32_864 = arith.constant 15 : i32
    %c0_i32_865 = arith.constant 0 : i32
    %c14_i32_866 = arith.constant 14 : i32
    %1342 = arith.subi %c14_i32_866, %c0_i32_865 : i32
    %1343 = arith.index_cast %1342 : i32 to index
    %c0_867 = arith.constant 0 : index
    %c0_868 = arith.constant 0 : index
    %1344 = vector.load %arg14[%1343, %c0_867, %c0_868] : memref<16x2x48xf32, #tpu.memory_space<vmem>>, vector<1x2x48xf32>
    %1345 = vector.shape_cast %1344 : vector<1x2x48xf32> to vector<2x48xf32>
    %c0_869 = arith.constant 0 : index
    %1346 = arith.index_cast %1342 : i32 to index
    %c0_870 = arith.constant 0 : index
    %c0_871 = arith.constant 0 : index
    %1347 = vector.load %arg6[%c0_869, %1346, %c0_870, %c0_871] : memref<1x16x1x48xf32, #tpu.memory_space<vmem>>, vector<1x1x1x48xf32>
    %1348 = vector.shape_cast %1347 : vector<1x1x1x48xf32> to vector<1x48xf32>
    %1349 = vector.broadcast %1348 : vector<1x48xf32> to vector<2x48xf32>
    %1350 = arith.mulf %1349, %1337 : vector<2x48xf32>
    %1351 = arith.subf %1345, %1350 : vector<2x48xf32>
    %1352 = arith.index_cast %1342 : i32 to index
    %c0_872 = arith.constant 0 : index
    %c0_873 = arith.constant 0 : index
    %1353 = vector.load %arg14[%1352, %c0_872, %c0_873] : memref<16x2x48xf32, #tpu.memory_space<vmem>>, vector<1x2x48xf32>
    %1354 = vector.shape_cast %1353 : vector<1x2x48xf32> to vector<2x48xf32>
    %1355 = vector.shape_cast %1351 : vector<2x48xf32> to vector<1x2x48xf32>
    tpu.vector_store %arg14[%1352, %c0_872, %c0_873], %1355 {strides = array<i32>} : memref<16x2x48xf32, #tpu.memory_space<vmem>>, vector<1x2x48xf32>,
    %c1_i32_874 = arith.constant 1 : i32
    %c14_i32_875 = arith.constant 14 : i32
    %1356 = arith.subi %c14_i32_875, %c1_i32_874 : i32
    %1357 = arith.index_cast %1356 : i32 to index
    %c0_876 = arith.constant 0 : index
    %c0_877 = arith.constant 0 : index
    %1358 = vector.load %arg14[%1357, %c0_876, %c0_877] : memref<16x2x48xf32, #tpu.memory_space<vmem>>, vector<1x2x48xf32>
    %1359 = vector.shape_cast %1358 : vector<1x2x48xf32> to vector<2x48xf32>
    %c0_878 = arith.constant 0 : index
    %1360 = arith.index_cast %1356 : i32 to index
    %c0_879 = arith.constant 0 : index
    %c0_880 = arith.constant 0 : index
    %1361 = vector.load %arg6[%c0_878, %1360, %c0_879, %c0_880] : memref<1x16x1x48xf32, #tpu.memory_space<vmem>>, vector<1x1x1x48xf32>
    %1362 = vector.shape_cast %1361 : vector<1x1x1x48xf32> to vector<1x48xf32>
    %1363 = vector.broadcast %1362 : vector<1x48xf32> to vector<2x48xf32>
    %1364 = arith.mulf %1363, %1351 : vector<2x48xf32>
    %1365 = arith.subf %1359, %1364 : vector<2x48xf32>
    %1366 = arith.index_cast %1356 : i32 to index
    %c0_881 = arith.constant 0 : index
    %c0_882 = arith.constant 0 : index
    %1367 = vector.load %arg14[%1366, %c0_881, %c0_882] : memref<16x2x48xf32, #tpu.memory_space<vmem>>, vector<1x2x48xf32>
    %1368 = vector.shape_cast %1367 : vector<1x2x48xf32> to vector<2x48xf32>
    %1369 = vector.shape_cast %1365 : vector<2x48xf32> to vector<1x2x48xf32>
    tpu.vector_store %arg14[%1366, %c0_881, %c0_882], %1369 {strides = array<i32>} : memref<16x2x48xf32, #tpu.memory_space<vmem>>, vector<1x2x48xf32>,
    %c2_i32_883 = arith.constant 2 : i32
    %c14_i32_884 = arith.constant 14 : i32
    %1370 = arith.subi %c14_i32_884, %c2_i32_883 : i32
    %1371 = arith.index_cast %1370 : i32 to index
    %c0_885 = arith.constant 0 : index
    %c0_886 = arith.constant 0 : index
    %1372 = vector.load %arg14[%1371, %c0_885, %c0_886] : memref<16x2x48xf32, #tpu.memory_space<vmem>>, vector<1x2x48xf32>
    %1373 = vector.shape_cast %1372 : vector<1x2x48xf32> to vector<2x48xf32>
    %c0_887 = arith.constant 0 : index
    %1374 = arith.index_cast %1370 : i32 to index
    %c0_888 = arith.constant 0 : index
    %c0_889 = arith.constant 0 : index
    %1375 = vector.load %arg6[%c0_887, %1374, %c0_888, %c0_889] : memref<1x16x1x48xf32, #tpu.memory_space<vmem>>, vector<1x1x1x48xf32>
    %1376 = vector.shape_cast %1375 : vector<1x1x1x48xf32> to vector<1x48xf32>
    %1377 = vector.broadcast %1376 : vector<1x48xf32> to vector<2x48xf32>
    %1378 = arith.mulf %1377, %1365 : vector<2x48xf32>
    %1379 = arith.subf %1373, %1378 : vector<2x48xf32>
    %1380 = arith.index_cast %1370 : i32 to index
    %c0_890 = arith.constant 0 : index
    %c0_891 = arith.constant 0 : index
    %1381 = vector.load %arg14[%1380, %c0_890, %c0_891] : memref<16x2x48xf32, #tpu.memory_space<vmem>>, vector<1x2x48xf32>
    %1382 = vector.shape_cast %1381 : vector<1x2x48xf32> to vector<2x48xf32>
    %1383 = vector.shape_cast %1379 : vector<2x48xf32> to vector<1x2x48xf32>
    tpu.vector_store %arg14[%1380, %c0_890, %c0_891], %1383 {strides = array<i32>} : memref<16x2x48xf32, #tpu.memory_space<vmem>>, vector<1x2x48xf32>,
    %c3_i32_892 = arith.constant 3 : i32
    %c14_i32_893 = arith.constant 14 : i32
    %1384 = arith.subi %c14_i32_893, %c3_i32_892 : i32
    %1385 = arith.index_cast %1384 : i32 to index
    %c0_894 = arith.constant 0 : index
    %c0_895 = arith.constant 0 : index
    %1386 = vector.load %arg14[%1385, %c0_894, %c0_895] : memref<16x2x48xf32, #tpu.memory_space<vmem>>, vector<1x2x48xf32>
    %1387 = vector.shape_cast %1386 : vector<1x2x48xf32> to vector<2x48xf32>
    %c0_896 = arith.constant 0 : index
    %1388 = arith.index_cast %1384 : i32 to index
    %c0_897 = arith.constant 0 : index
    %c0_898 = arith.constant 0 : index
    %1389 = vector.load %arg6[%c0_896, %1388, %c0_897, %c0_898] : memref<1x16x1x48xf32, #tpu.memory_space<vmem>>, vector<1x1x1x48xf32>
    %1390 = vector.shape_cast %1389 : vector<1x1x1x48xf32> to vector<1x48xf32>
    %1391 = vector.broadcast %1390 : vector<1x48xf32> to vector<2x48xf32>
    %1392 = arith.mulf %1391, %1379 : vector<2x48xf32>
    %1393 = arith.subf %1387, %1392 : vector<2x48xf32>
    %1394 = arith.index_cast %1384 : i32 to index
    %c0_899 = arith.constant 0 : index
    %c0_900 = arith.constant 0 : index
    %1395 = vector.load %arg14[%1394, %c0_899, %c0_900] : memref<16x2x48xf32, #tpu.memory_space<vmem>>, vector<1x2x48xf32>
    %1396 = vector.shape_cast %1395 : vector<1x2x48xf32> to vector<2x48xf32>
    %1397 = vector.shape_cast %1393 : vector<2x48xf32> to vector<1x2x48xf32>
    tpu.vector_store %arg14[%1394, %c0_899, %c0_900], %1397 {strides = array<i32>} : memref<16x2x48xf32, #tpu.memory_space<vmem>>, vector<1x2x48xf32>,
    %c4_i32_901 = arith.constant 4 : i32
    %c14_i32_902 = arith.constant 14 : i32
    %1398 = arith.subi %c14_i32_902, %c4_i32_901 : i32
    %1399 = arith.index_cast %1398 : i32 to index
    %c0_903 = arith.constant 0 : index
    %c0_904 = arith.constant 0 : index
    %1400 = vector.load %arg14[%1399, %c0_903, %c0_904] : memref<16x2x48xf32, #tpu.memory_space<vmem>>, vector<1x2x48xf32>
    %1401 = vector.shape_cast %1400 : vector<1x2x48xf32> to vector<2x48xf32>
    %c0_905 = arith.constant 0 : index
    %1402 = arith.index_cast %1398 : i32 to index
    %c0_906 = arith.constant 0 : index
    %c0_907 = arith.constant 0 : index
    %1403 = vector.load %arg6[%c0_905, %1402, %c0_906, %c0_907] : memref<1x16x1x48xf32, #tpu.memory_space<vmem>>, vector<1x1x1x48xf32>
    %1404 = vector.shape_cast %1403 : vector<1x1x1x48xf32> to vector<1x48xf32>
    %1405 = vector.broadcast %1404 : vector<1x48xf32> to vector<2x48xf32>
    %1406 = arith.mulf %1405, %1393 : vector<2x48xf32>
    %1407 = arith.subf %1401, %1406 : vector<2x48xf32>
    %1408 = arith.index_cast %1398 : i32 to index
    %c0_908 = arith.constant 0 : index
    %c0_909 = arith.constant 0 : index
    %1409 = vector.load %arg14[%1408, %c0_908, %c0_909] : memref<16x2x48xf32, #tpu.memory_space<vmem>>, vector<1x2x48xf32>
    %1410 = vector.shape_cast %1409 : vector<1x2x48xf32> to vector<2x48xf32>
    %1411 = vector.shape_cast %1407 : vector<2x48xf32> to vector<1x2x48xf32>
    tpu.vector_store %arg14[%1408, %c0_908, %c0_909], %1411 {strides = array<i32>} : memref<16x2x48xf32, #tpu.memory_space<vmem>>, vector<1x2x48xf32>,
    %c5_i32_910 = arith.constant 5 : i32
    %c14_i32_911 = arith.constant 14 : i32
    %1412 = arith.subi %c14_i32_911, %c5_i32_910 : i32
    %1413 = arith.index_cast %1412 : i32 to index
    %c0_912 = arith.constant 0 : index
    %c0_913 = arith.constant 0 : index
    %1414 = vector.load %arg14[%1413, %c0_912, %c0_913] : memref<16x2x48xf32, #tpu.memory_space<vmem>>, vector<1x2x48xf32>
    %1415 = vector.shape_cast %1414 : vector<1x2x48xf32> to vector<2x48xf32>
    %c0_914 = arith.constant 0 : index
    %1416 = arith.index_cast %1412 : i32 to index
    %c0_915 = arith.constant 0 : index
    %c0_916 = arith.constant 0 : index
    %1417 = vector.load %arg6[%c0_914, %1416, %c0_915, %c0_916] : memref<1x16x1x48xf32, #tpu.memory_space<vmem>>, vector<1x1x1x48xf32>
    %1418 = vector.shape_cast %1417 : vector<1x1x1x48xf32> to vector<1x48xf32>
    %1419 = vector.broadcast %1418 : vector<1x48xf32> to vector<2x48xf32>
    %1420 = arith.mulf %1419, %1407 : vector<2x48xf32>
    %1421 = arith.subf %1415, %1420 : vector<2x48xf32>
    %1422 = arith.index_cast %1412 : i32 to index
    %c0_917 = arith.constant 0 : index
    %c0_918 = arith.constant 0 : index
    %1423 = vector.load %arg14[%1422, %c0_917, %c0_918] : memref<16x2x48xf32, #tpu.memory_space<vmem>>, vector<1x2x48xf32>
    %1424 = vector.shape_cast %1423 : vector<1x2x48xf32> to vector<2x48xf32>
    %1425 = vector.shape_cast %1421 : vector<2x48xf32> to vector<1x2x48xf32>
    tpu.vector_store %arg14[%1422, %c0_917, %c0_918], %1425 {strides = array<i32>} : memref<16x2x48xf32, #tpu.memory_space<vmem>>, vector<1x2x48xf32>,
    %c6_i32_919 = arith.constant 6 : i32
    %c14_i32_920 = arith.constant 14 : i32
    %1426 = arith.subi %c14_i32_920, %c6_i32_919 : i32
    %1427 = arith.index_cast %1426 : i32 to index
    %c0_921 = arith.constant 0 : index
    %c0_922 = arith.constant 0 : index
    %1428 = vector.load %arg14[%1427, %c0_921, %c0_922] : memref<16x2x48xf32, #tpu.memory_space<vmem>>, vector<1x2x48xf32>
    %1429 = vector.shape_cast %1428 : vector<1x2x48xf32> to vector<2x48xf32>
    %c0_923 = arith.constant 0 : index
    %1430 = arith.index_cast %1426 : i32 to index
    %c0_924 = arith.constant 0 : index
    %c0_925 = arith.constant 0 : index
    %1431 = vector.load %arg6[%c0_923, %1430, %c0_924, %c0_925] : memref<1x16x1x48xf32, #tpu.memory_space<vmem>>, vector<1x1x1x48xf32>
    %1432 = vector.shape_cast %1431 : vector<1x1x1x48xf32> to vector<1x48xf32>
    %1433 = vector.broadcast %1432 : vector<1x48xf32> to vector<2x48xf32>
    %1434 = arith.mulf %1433, %1421 : vector<2x48xf32>
    %1435 = arith.subf %1429, %1434 : vector<2x48xf32>
    %1436 = arith.index_cast %1426 : i32 to index
    %c0_926 = arith.constant 0 : index
    %c0_927 = arith.constant 0 : index
    %1437 = vector.load %arg14[%1436, %c0_926, %c0_927] : memref<16x2x48xf32, #tpu.memory_space<vmem>>, vector<1x2x48xf32>
    %1438 = vector.shape_cast %1437 : vector<1x2x48xf32> to vector<2x48xf32>
    %1439 = vector.shape_cast %1435 : vector<2x48xf32> to vector<1x2x48xf32>
    tpu.vector_store %arg14[%1436, %c0_926, %c0_927], %1439 {strides = array<i32>} : memref<16x2x48xf32, #tpu.memory_space<vmem>>, vector<1x2x48xf32>,
    %c7_i32_928 = arith.constant 7 : i32
    %c14_i32_929 = arith.constant 14 : i32
    %1440 = arith.subi %c14_i32_929, %c7_i32_928 : i32
    %1441 = arith.index_cast %1440 : i32 to index
    %c0_930 = arith.constant 0 : index
    %c0_931 = arith.constant 0 : index
    %1442 = vector.load %arg14[%1441, %c0_930, %c0_931] : memref<16x2x48xf32, #tpu.memory_space<vmem>>, vector<1x2x48xf32>
    %1443 = vector.shape_cast %1442 : vector<1x2x48xf32> to vector<2x48xf32>
    %c0_932 = arith.constant 0 : index
    %1444 = arith.index_cast %1440 : i32 to index
    %c0_933 = arith.constant 0 : index
    %c0_934 = arith.constant 0 : index
    %1445 = vector.load %arg6[%c0_932, %1444, %c0_933, %c0_934] : memref<1x16x1x48xf32, #tpu.memory_space<vmem>>, vector<1x1x1x48xf32>
    %1446 = vector.shape_cast %1445 : vector<1x1x1x48xf32> to vector<1x48xf32>
    %1447 = vector.broadcast %1446 : vector<1x48xf32> to vector<2x48xf32>
    %1448 = arith.mulf %1447, %1435 : vector<2x48xf32>
    %1449 = arith.subf %1443, %1448 : vector<2x48xf32>
    %1450 = arith.index_cast %1440 : i32 to index
    %c0_935 = arith.constant 0 : index
    %c0_936 = arith.constant 0 : index
    %1451 = vector.load %arg14[%1450, %c0_935, %c0_936] : memref<16x2x48xf32, #tpu.memory_space<vmem>>, vector<1x2x48xf32>
    %1452 = vector.shape_cast %1451 : vector<1x2x48xf32> to vector<2x48xf32>
    %1453 = vector.shape_cast %1449 : vector<2x48xf32> to vector<1x2x48xf32>
    tpu.vector_store %arg14[%1450, %c0_935, %c0_936], %1453 {strides = array<i32>} : memref<16x2x48xf32, #tpu.memory_space<vmem>>, vector<1x2x48xf32>,
    %c8_i32_937 = arith.constant 8 : i32
    %c14_i32_938 = arith.constant 14 : i32
    %1454 = arith.subi %c14_i32_938, %c8_i32_937 : i32
    %1455 = arith.index_cast %1454 : i32 to index
    %c0_939 = arith.constant 0 : index
    %c0_940 = arith.constant 0 : index
    %1456 = vector.load %arg14[%1455, %c0_939, %c0_940] : memref<16x2x48xf32, #tpu.memory_space<vmem>>, vector<1x2x48xf32>
    %1457 = vector.shape_cast %1456 : vector<1x2x48xf32> to vector<2x48xf32>
    %c0_941 = arith.constant 0 : index
    %1458 = arith.index_cast %1454 : i32 to index
    %c0_942 = arith.constant 0 : index
    %c0_943 = arith.constant 0 : index
    %1459 = vector.load %arg6[%c0_941, %1458, %c0_942, %c0_943] : memref<1x16x1x48xf32, #tpu.memory_space<vmem>>, vector<1x1x1x48xf32>
    %1460 = vector.shape_cast %1459 : vector<1x1x1x48xf32> to vector<1x48xf32>
    %1461 = vector.broadcast %1460 : vector<1x48xf32> to vector<2x48xf32>
    %1462 = arith.mulf %1461, %1449 : vector<2x48xf32>
    %1463 = arith.subf %1457, %1462 : vector<2x48xf32>
    %1464 = arith.index_cast %1454 : i32 to index
    %c0_944 = arith.constant 0 : index
    %c0_945 = arith.constant 0 : index
    %1465 = vector.load %arg14[%1464, %c0_944, %c0_945] : memref<16x2x48xf32, #tpu.memory_space<vmem>>, vector<1x2x48xf32>
    %1466 = vector.shape_cast %1465 : vector<1x2x48xf32> to vector<2x48xf32>
    %1467 = vector.shape_cast %1463 : vector<2x48xf32> to vector<1x2x48xf32>
    tpu.vector_store %arg14[%1464, %c0_944, %c0_945], %1467 {strides = array<i32>} : memref<16x2x48xf32, #tpu.memory_space<vmem>>, vector<1x2x48xf32>,
    %c9_i32_946 = arith.constant 9 : i32
    %c14_i32_947 = arith.constant 14 : i32
    %1468 = arith.subi %c14_i32_947, %c9_i32_946 : i32
    %1469 = arith.index_cast %1468 : i32 to index
    %c0_948 = arith.constant 0 : index
    %c0_949 = arith.constant 0 : index
    %1470 = vector.load %arg14[%1469, %c0_948, %c0_949] : memref<16x2x48xf32, #tpu.memory_space<vmem>>, vector<1x2x48xf32>
    %1471 = vector.shape_cast %1470 : vector<1x2x48xf32> to vector<2x48xf32>
    %c0_950 = arith.constant 0 : index
    %1472 = arith.index_cast %1468 : i32 to index
    %c0_951 = arith.constant 0 : index
    %c0_952 = arith.constant 0 : index
    %1473 = vector.load %arg6[%c0_950, %1472, %c0_951, %c0_952] : memref<1x16x1x48xf32, #tpu.memory_space<vmem>>, vector<1x1x1x48xf32>
    %1474 = vector.shape_cast %1473 : vector<1x1x1x48xf32> to vector<1x48xf32>
    %1475 = vector.broadcast %1474 : vector<1x48xf32> to vector<2x48xf32>
    %1476 = arith.mulf %1475, %1463 : vector<2x48xf32>
    %1477 = arith.subf %1471, %1476 : vector<2x48xf32>
    %1478 = arith.index_cast %1468 : i32 to index
    %c0_953 = arith.constant 0 : index
    %c0_954 = arith.constant 0 : index
    %1479 = vector.load %arg14[%1478, %c0_953, %c0_954] : memref<16x2x48xf32, #tpu.memory_space<vmem>>, vector<1x2x48xf32>
    %1480 = vector.shape_cast %1479 : vector<1x2x48xf32> to vector<2x48xf32>
    %1481 = vector.shape_cast %1477 : vector<2x48xf32> to vector<1x2x48xf32>
    tpu.vector_store %arg14[%1478, %c0_953, %c0_954], %1481 {strides = array<i32>} : memref<16x2x48xf32, #tpu.memory_space<vmem>>, vector<1x2x48xf32>,
    %c10_i32_955 = arith.constant 10 : i32
    %c14_i32_956 = arith.constant 14 : i32
    %1482 = arith.subi %c14_i32_956, %c10_i32_955 : i32
    %1483 = arith.index_cast %1482 : i32 to index
    %c0_957 = arith.constant 0 : index
    %c0_958 = arith.constant 0 : index
    %1484 = vector.load %arg14[%1483, %c0_957, %c0_958] : memref<16x2x48xf32, #tpu.memory_space<vmem>>, vector<1x2x48xf32>
    %1485 = vector.shape_cast %1484 : vector<1x2x48xf32> to vector<2x48xf32>
    %c0_959 = arith.constant 0 : index
    %1486 = arith.index_cast %1482 : i32 to index
    %c0_960 = arith.constant 0 : index
    %c0_961 = arith.constant 0 : index
    %1487 = vector.load %arg6[%c0_959, %1486, %c0_960, %c0_961] : memref<1x16x1x48xf32, #tpu.memory_space<vmem>>, vector<1x1x1x48xf32>
    %1488 = vector.shape_cast %1487 : vector<1x1x1x48xf32> to vector<1x48xf32>
    %1489 = vector.broadcast %1488 : vector<1x48xf32> to vector<2x48xf32>
    %1490 = arith.mulf %1489, %1477 : vector<2x48xf32>
    %1491 = arith.subf %1485, %1490 : vector<2x48xf32>
    %1492 = arith.index_cast %1482 : i32 to index
    %c0_962 = arith.constant 0 : index
    %c0_963 = arith.constant 0 : index
    %1493 = vector.load %arg14[%1492, %c0_962, %c0_963] : memref<16x2x48xf32, #tpu.memory_space<vmem>>, vector<1x2x48xf32>
    %1494 = vector.shape_cast %1493 : vector<1x2x48xf32> to vector<2x48xf32>
    %1495 = vector.shape_cast %1491 : vector<2x48xf32> to vector<1x2x48xf32>
    tpu.vector_store %arg14[%1492, %c0_962, %c0_963], %1495 {strides = array<i32>} : memref<16x2x48xf32, #tpu.memory_space<vmem>>, vector<1x2x48xf32>,
    %c11_i32_964 = arith.constant 11 : i32
    %c14_i32_965 = arith.constant 14 : i32
    %1496 = arith.subi %c14_i32_965, %c11_i32_964 : i32
    %1497 = arith.index_cast %1496 : i32 to index
    %c0_966 = arith.constant 0 : index
    %c0_967 = arith.constant 0 : index
    %1498 = vector.load %arg14[%1497, %c0_966, %c0_967] : memref<16x2x48xf32, #tpu.memory_space<vmem>>, vector<1x2x48xf32>
    %1499 = vector.shape_cast %1498 : vector<1x2x48xf32> to vector<2x48xf32>
    %c0_968 = arith.constant 0 : index
    %1500 = arith.index_cast %1496 : i32 to index
    %c0_969 = arith.constant 0 : index
    %c0_970 = arith.constant 0 : index
    %1501 = vector.load %arg6[%c0_968, %1500, %c0_969, %c0_970] : memref<1x16x1x48xf32, #tpu.memory_space<vmem>>, vector<1x1x1x48xf32>
    %1502 = vector.shape_cast %1501 : vector<1x1x1x48xf32> to vector<1x48xf32>
    %1503 = vector.broadcast %1502 : vector<1x48xf32> to vector<2x48xf32>
    %1504 = arith.mulf %1503, %1491 : vector<2x48xf32>
    %1505 = arith.subf %1499, %1504 : vector<2x48xf32>
    %1506 = arith.index_cast %1496 : i32 to index
    %c0_971 = arith.constant 0 : index
    %c0_972 = arith.constant 0 : index
    %1507 = vector.load %arg14[%1506, %c0_971, %c0_972] : memref<16x2x48xf32, #tpu.memory_space<vmem>>, vector<1x2x48xf32>
    %1508 = vector.shape_cast %1507 : vector<1x2x48xf32> to vector<2x48xf32>
    %1509 = vector.shape_cast %1505 : vector<2x48xf32> to vector<1x2x48xf32>
    tpu.vector_store %arg14[%1506, %c0_971, %c0_972], %1509 {strides = array<i32>} : memref<16x2x48xf32, #tpu.memory_space<vmem>>, vector<1x2x48xf32>,
    %c12_i32_973 = arith.constant 12 : i32
    %c14_i32_974 = arith.constant 14 : i32
    %1510 = arith.subi %c14_i32_974, %c12_i32_973 : i32
    %1511 = arith.index_cast %1510 : i32 to index
    %c0_975 = arith.constant 0 : index
    %c0_976 = arith.constant 0 : index
    %1512 = vector.load %arg14[%1511, %c0_975, %c0_976] : memref<16x2x48xf32, #tpu.memory_space<vmem>>, vector<1x2x48xf32>
    %1513 = vector.shape_cast %1512 : vector<1x2x48xf32> to vector<2x48xf32>
    %c0_977 = arith.constant 0 : index
    %1514 = arith.index_cast %1510 : i32 to index
    %c0_978 = arith.constant 0 : index
    %c0_979 = arith.constant 0 : index
    %1515 = vector.load %arg6[%c0_977, %1514, %c0_978, %c0_979] : memref<1x16x1x48xf32, #tpu.memory_space<vmem>>, vector<1x1x1x48xf32>
    %1516 = vector.shape_cast %1515 : vector<1x1x1x48xf32> to vector<1x48xf32>
    %1517 = vector.broadcast %1516 : vector<1x48xf32> to vector<2x48xf32>
    %1518 = arith.mulf %1517, %1505 : vector<2x48xf32>
    %1519 = arith.subf %1513, %1518 : vector<2x48xf32>
    %1520 = arith.index_cast %1510 : i32 to index
    %c0_980 = arith.constant 0 : index
    %c0_981 = arith.constant 0 : index
    %1521 = vector.load %arg14[%1520, %c0_980, %c0_981] : memref<16x2x48xf32, #tpu.memory_space<vmem>>, vector<1x2x48xf32>
    %1522 = vector.shape_cast %1521 : vector<1x2x48xf32> to vector<2x48xf32>
    %1523 = vector.shape_cast %1519 : vector<2x48xf32> to vector<1x2x48xf32>
    tpu.vector_store %arg14[%1520, %c0_980, %c0_981], %1523 {strides = array<i32>} : memref<16x2x48xf32, #tpu.memory_space<vmem>>, vector<1x2x48xf32>,
    %c13_i32_982 = arith.constant 13 : i32
    %c14_i32_983 = arith.constant 14 : i32
    %1524 = arith.subi %c14_i32_983, %c13_i32_982 : i32
    %1525 = arith.index_cast %1524 : i32 to index
    %c0_984 = arith.constant 0 : index
    %c0_985 = arith.constant 0 : index
    %1526 = vector.load %arg14[%1525, %c0_984, %c0_985] : memref<16x2x48xf32, #tpu.memory_space<vmem>>, vector<1x2x48xf32>
    %1527 = vector.shape_cast %1526 : vector<1x2x48xf32> to vector<2x48xf32>
    %c0_986 = arith.constant 0 : index
    %1528 = arith.index_cast %1524 : i32 to index
    %c0_987 = arith.constant 0 : index
    %c0_988 = arith.constant 0 : index
    %1529 = vector.load %arg6[%c0_986, %1528, %c0_987, %c0_988] : memref<1x16x1x48xf32, #tpu.memory_space<vmem>>, vector<1x1x1x48xf32>
    %1530 = vector.shape_cast %1529 : vector<1x1x1x48xf32> to vector<1x48xf32>
    %1531 = vector.broadcast %1530 : vector<1x48xf32> to vector<2x48xf32>
    %1532 = arith.mulf %1531, %1519 : vector<2x48xf32>
    %1533 = arith.subf %1527, %1532 : vector<2x48xf32>
    %1534 = arith.index_cast %1524 : i32 to index
    %c0_989 = arith.constant 0 : index
    %c0_990 = arith.constant 0 : index
    %1535 = vector.load %arg14[%1534, %c0_989, %c0_990] : memref<16x2x48xf32, #tpu.memory_space<vmem>>, vector<1x2x48xf32>
    %1536 = vector.shape_cast %1535 : vector<1x2x48xf32> to vector<2x48xf32>
    %1537 = vector.shape_cast %1533 : vector<2x48xf32> to vector<1x2x48xf32>
    tpu.vector_store %arg14[%1534, %c0_989, %c0_990], %1537 {strides = array<i32>} : memref<16x2x48xf32, #tpu.memory_space<vmem>>, vector<1x2x48xf32>,
    %c14_i32_991 = arith.constant 14 : i32
    %c14_i32_992 = arith.constant 14 : i32
    %1538 = arith.subi %c14_i32_992, %c14_i32_991 : i32
    %1539 = arith.index_cast %1538 : i32 to index
    %c0_993 = arith.constant 0 : index
    %c0_994 = arith.constant 0 : index
    %1540 = vector.load %arg14[%1539, %c0_993, %c0_994] : memref<16x2x48xf32, #tpu.memory_space<vmem>>, vector<1x2x48xf32>
    %1541 = vector.shape_cast %1540 : vector<1x2x48xf32> to vector<2x48xf32>
    %c0_995 = arith.constant 0 : index
    %1542 = arith.index_cast %1538 : i32 to index
    %c0_996 = arith.constant 0 : index
    %c0_997 = arith.constant 0 : index
    %1543 = vector.load %arg6[%c0_995, %1542, %c0_996, %c0_997] : memref<1x16x1x48xf32, #tpu.memory_space<vmem>>, vector<1x1x1x48xf32>
    %1544 = vector.shape_cast %1543 : vector<1x1x1x48xf32> to vector<1x48xf32>
    %1545 = vector.broadcast %1544 : vector<1x48xf32> to vector<2x48xf32>
    %1546 = arith.mulf %1545, %1533 : vector<2x48xf32>
    %1547 = arith.subf %1541, %1546 : vector<2x48xf32>
    %1548 = arith.index_cast %1538 : i32 to index
    %c0_998 = arith.constant 0 : index
    %c0_999 = arith.constant 0 : index
    %1549 = vector.load %arg14[%1548, %c0_998, %c0_999] : memref<16x2x48xf32, #tpu.memory_space<vmem>>, vector<1x2x48xf32>
    %1550 = vector.shape_cast %1549 : vector<1x2x48xf32> to vector<2x48xf32>
    %1551 = vector.shape_cast %1547 : vector<2x48xf32> to vector<1x2x48xf32>
    tpu.vector_store %arg14[%1548, %c0_998, %c0_999], %1551 {strides = array<i32>} : memref<16x2x48xf32, #tpu.memory_space<vmem>>, vector<1x2x48xf32>,
    %c15_i32_1000 = arith.constant 15 : i32
    %c0_1001 = arith.constant 0 : index
    %c0_1002 = arith.constant 0 : index
    %c0_1003 = arith.constant 0 : index
    %1552 = vector.load %arg14[%c0_1001, %c0_1002, %c0_1003] : memref<16x2x48xf32, #tpu.memory_space<vmem>>, vector<16x2x16xf32>
    %c0_1004 = arith.constant 0 : index
    %c0_1005 = arith.constant 0 : index
    %c16_1006 = arith.constant 16 : index
    %1553 = vector.load %arg14[%c0_1004, %c0_1005, %c16_1006] : memref<16x2x48xf32, #tpu.memory_space<vmem>>, vector<16x2x16xf32>
    %c0_1007 = arith.constant 0 : index
    %c0_1008 = arith.constant 0 : index
    %c32_1009 = arith.constant 32 : index
    %1554 = vector.load %arg14[%c0_1007, %c0_1008, %c32_1009] : memref<16x2x48xf32, #tpu.memory_space<vmem>>, vector<16x2x16xf32>
    %c0_1010 = arith.constant 0 : index
    %c0_1011 = arith.constant 0 : index
    %1555 = memref.load %arg11[%c0_1010, %c0_1011] : memref<3x3xf32, #tpu.memory_space<smem>>
    %1556 = vector.broadcast %1555 : f32 to vector<16x2x16xf32>
    %1557 = arith.mulf %1556, %1552 : vector<16x2x16xf32>
    %c0_1012 = arith.constant 0 : index
    %c1_1013 = arith.constant 1 : index
    %1558 = memref.load %arg11[%c0_1012, %c1_1013] : memref<3x3xf32, #tpu.memory_space<smem>>
    %1559 = vector.broadcast %1558 : f32 to vector<16x2x16xf32>
    %1560 = arith.mulf %1559, %1553 : vector<16x2x16xf32>
    %1561 = arith.addf %1557, %1560 : vector<16x2x16xf32>
    %c0_1014 = arith.constant 0 : index
    %c2 = arith.constant 2 : index
    %1562 = memref.load %arg11[%c0_1014, %c2] : memref<3x3xf32, #tpu.memory_space<smem>>
    %1563 = vector.broadcast %1562 : f32 to vector<16x2x16xf32>
    %1564 = arith.mulf %1563, %1554 : vector<16x2x16xf32>
    %1565 = arith.addf %1561, %1564 : vector<16x2x16xf32>
    %c0_1015 = arith.constant 0 : index
    %c0_1016 = arith.constant 0 : index
    %c0_1017 = arith.constant 0 : index
    %1566 = vector.load %arg14[%c0_1015, %c0_1016, %c0_1017] : memref<16x2x48xf32, #tpu.memory_space<vmem>>, vector<16x2x16xf32>
    tpu.vector_store %arg14[%c0_1015, %c0_1016, %c0_1017], %1565 {strides = array<i32>} : memref<16x2x48xf32, #tpu.memory_space<vmem>>, vector<16x2x16xf32>,
    %c1_1018 = arith.constant 1 : index
    %c0_1019 = arith.constant 0 : index
    %1567 = memref.load %arg11[%c1_1018, %c0_1019] : memref<3x3xf32, #tpu.memory_space<smem>>
    %1568 = vector.broadcast %1567 : f32 to vector<16x2x16xf32>
    %1569 = arith.mulf %1568, %1552 : vector<16x2x16xf32>
    %c1_1020 = arith.constant 1 : index
    %c1_1021 = arith.constant 1 : index
    %1570 = memref.load %arg11[%c1_1020, %c1_1021] : memref<3x3xf32, #tpu.memory_space<smem>>
    %1571 = vector.broadcast %1570 : f32 to vector<16x2x16xf32>
    %1572 = arith.mulf %1571, %1553 : vector<16x2x16xf32>
    %1573 = arith.addf %1569, %1572 : vector<16x2x16xf32>
    %c1_1022 = arith.constant 1 : index
    %c2_1023 = arith.constant 2 : index
    %1574 = memref.load %arg11[%c1_1022, %c2_1023] : memref<3x3xf32, #tpu.memory_space<smem>>
    %1575 = vector.broadcast %1574 : f32 to vector<16x2x16xf32>
    %1576 = arith.mulf %1575, %1554 : vector<16x2x16xf32>
    %1577 = arith.addf %1573, %1576 : vector<16x2x16xf32>
    %c0_1024 = arith.constant 0 : index
    %c0_1025 = arith.constant 0 : index
    %c16_1026 = arith.constant 16 : index
    %1578 = vector.load %arg14[%c0_1024, %c0_1025, %c16_1026] : memref<16x2x48xf32, #tpu.memory_space<vmem>>, vector<16x2x16xf32>
    tpu.vector_store %arg14[%c0_1024, %c0_1025, %c16_1026], %1577 {strides = array<i32>} : memref<16x2x48xf32, #tpu.memory_space<vmem>>, vector<16x2x16xf32>,
    %c2_1027 = arith.constant 2 : index
    %c0_1028 = arith.constant 0 : index
    %1579 = memref.load %arg11[%c2_1027, %c0_1028] : memref<3x3xf32, #tpu.memory_space<smem>>
    %1580 = vector.broadcast %1579 : f32 to vector<16x2x16xf32>
    %1581 = arith.mulf %1580, %1552 : vector<16x2x16xf32>
    %c2_1029 = arith.constant 2 : index
    %c1_1030 = arith.constant 1 : index
    %1582 = memref.load %arg11[%c2_1029, %c1_1030] : memref<3x3xf32, #tpu.memory_space<smem>>
    %1583 = vector.broadcast %1582 : f32 to vector<16x2x16xf32>
    %1584 = arith.mulf %1583, %1553 : vector<16x2x16xf32>
    %1585 = arith.addf %1581, %1584 : vector<16x2x16xf32>
    %c2_1031 = arith.constant 2 : index
    %c2_1032 = arith.constant 2 : index
    %1586 = memref.load %arg11[%c2_1031, %c2_1032] : memref<3x3xf32, #tpu.memory_space<smem>>
    %1587 = vector.broadcast %1586 : f32 to vector<16x2x16xf32>
    %1588 = arith.mulf %1587, %1554 : vector<16x2x16xf32>
    %1589 = arith.addf %1585, %1588 : vector<16x2x16xf32>
    %c0_1033 = arith.constant 0 : index
    %c0_1034 = arith.constant 0 : index
    %c32_1035 = arith.constant 32 : index
    %1590 = vector.load %arg14[%c0_1033, %c0_1034, %c32_1035] : memref<16x2x48xf32, #tpu.memory_space<vmem>>, vector<16x2x16xf32>
    tpu.vector_store %arg14[%c0_1033, %c0_1034, %c32_1035], %1589 {strides = array<i32>} : memref<16x2x48xf32, #tpu.memory_space<vmem>>, vector<16x2x16xf32>,
    %c2_i32_1036 = arith.constant 2 : i32
    %1591 = arith.cmpi eq, %arg0, %c2_i32_1036 : i32
    %1592 = arith.extui %1591 : i1 to i32
    %c0_i32_1037 = arith.constant 0 : i32
    %1593 = arith.cmpi ne, %1592, %c0_i32_1037 : i32
    scf.if %1593 {
      %c0_1038 = arith.constant 0 : index
      %c0_1039 = arith.constant 0 : index
      %1594 = memref.load %arg12[%c0_1038, %c0_1039] : memref<1x1xf32, #tpu.memory_space<smem>>
      %c0_1040 = arith.constant 0 : index
      %c0_1041 = arith.constant 0 : index
      %c0_1042 = arith.constant 0 : index
      %1595 = vector.load %arg1[%c0_1040, %c0_1041, %c0_1042] : memref<16x2x48xf32, #tpu.memory_space<vmem>>, vector<16x2x48xf32>
      %1596 = vector.broadcast %1594 : f32 to vector<16x2x48xf32>
      %1597 = arith.mulf %1596, %1595 : vector<16x2x48xf32>
      %cst_1043 = arith.constant 1.000000e+00 : f32
      %1598 = arith.subf %cst_1043, %1594 : f32
      %c0_1044 = arith.constant 0 : index
      %c0_1045 = arith.constant 0 : index
      %c0_1046 = arith.constant 0 : index
      %1599 = vector.load %arg14[%c0_1044, %c0_1045, %c0_1046] : memref<16x2x48xf32, #tpu.memory_space<vmem>>, vector<16x2x48xf32>
      %1600 = vector.broadcast %1598 : f32 to vector<16x2x48xf32>
      %1601 = arith.mulf %1600, %1599 : vector<16x2x48xf32>
      %1602 = arith.addf %1597, %1601 : vector<16x2x48xf32>
      %c0_1047 = arith.constant 0 : index
      %c0_1048 = arith.constant 0 : index
      %c0_1049 = arith.constant 0 : index
      %1603 = vector.load %arg13[%c0_1047, %c0_1048, %c0_1049] : memref<16x2x48xf32, #tpu.memory_space<vmem>>, vector<16x2x48xf32>
      tpu.vector_store %arg13[%c0_1047, %c0_1048, %c0_1049], %1602 {strides = array<i32>} : memref<16x2x48xf32, #tpu.memory_space<vmem>>, vector<16x2x48xf32>,
    } else {
    }
    return
  }
  func.func @transform_0(%arg0: i32) -> (i32, i32, i32) {
    %c0_i32 = arith.constant 0 : i32
    %c0_i32_0 = arith.constant 0 : i32
    %c0_i32_1 = arith.constant 0 : i32
    %c0_i32_2 = arith.constant 0 : i32
    return %c0_i32, %c0_i32_0, %c0_i32_1 : i32, i32, i32
  }
  func.func @transform_1(%arg0: i32) -> (i32, i32, i32, i32) {
    %c0_i32 = arith.constant 0 : i32
    %c0_i32_0 = arith.constant 0 : i32
    %c0_i32_1 = arith.constant 0 : i32
    %c0_i32_2 = arith.constant 0 : i32
    return %arg0, %c0_i32, %c0_i32_0, %c0_i32_1 : i32, i32, i32, i32
  }
  func.func @transform_2(%arg0: i32) -> (i32, i32, i32, i32) {
    %c0_i32 = arith.constant 0 : i32
    %c0_i32_0 = arith.constant 0 : i32
    %c0_i32_1 = arith.constant 0 : i32
    %c0_i32_2 = arith.constant 0 : i32
    return %arg0, %c0_i32, %c0_i32_0, %c0_i32_1 : i32, i32, i32, i32
  }
  func.func @transform_3(%arg0: i32) -> (i32, i32, i32, i32) {
    %c0_i32 = arith.constant 0 : i32
    %c0_i32_0 = arith.constant 0 : i32
    %c0_i32_1 = arith.constant 0 : i32
    %c0_i32_2 = arith.constant 0 : i32
    return %arg0, %c0_i32, %c0_i32_0, %c0_i32_1 : i32, i32, i32, i32
  }
  func.func @transform_4(%arg0: i32) -> (i32, i32, i32, i32) {
    %c1_i32 = arith.constant 1 : i32
    %0 = arith.addi %arg0, %c1_i32 : i32
    %c0_i32 = arith.constant 0 : i32
    %c0_i32_0 = arith.constant 0 : i32
    %c0_i32_1 = arith.constant 0 : i32
    %c0_i32_2 = arith.constant 0 : i32
    return %0, %c0_i32, %c0_i32_0, %c0_i32_1 : i32, i32, i32, i32
  }
  func.func @transform_5(%arg0: i32) -> (i32, i32, i32, i32) {
    %c1_i32 = arith.constant 1 : i32
    %0 = arith.addi %arg0, %c1_i32 : i32
    %c0_i32 = arith.constant 0 : i32
    %c0_i32_0 = arith.constant 0 : i32
    %c0_i32_1 = arith.constant 0 : i32
    %c0_i32_2 = arith.constant 0 : i32
    return %0, %c0_i32, %c0_i32_0, %c0_i32_1 : i32, i32, i32, i32
  }
  func.func @transform_6(%arg0: i32) -> (i32, i32, i32, i32) {
    %c1_i32 = arith.constant 1 : i32
    %0 = arith.addi %arg0, %c1_i32 : i32
    %c0_i32 = arith.constant 0 : i32
    %c0_i32_0 = arith.constant 0 : i32
    %c0_i32_1 = arith.constant 0 : i32
    %c0_i32_2 = arith.constant 0 : i32
    return %0, %c0_i32, %c0_i32_0, %c0_i32_1 : i32, i32, i32, i32
  }
  func.func @transform_7(%arg0: i32) -> (i32, i32, i32, i32) {
    %c0_i32 = arith.constant 0 : i32
    %c0_i32_0 = arith.constant 0 : i32
    %c0_i32_1 = arith.constant 0 : i32
    %c0_i32_2 = arith.constant 0 : i32
    return %arg0, %c0_i32, %c0_i32_0, %c0_i32_1 : i32, i32, i32, i32
  }
  func.func @transform_8(%arg0: i32) -> (i32, i32, i32, i32) {
    %c0_i32 = arith.constant 0 : i32
    %c0_i32_0 = arith.constant 0 : i32
    %c0_i32_1 = arith.constant 0 : i32
    %c0_i32_2 = arith.constant 0 : i32
    return %arg0, %c0_i32, %c0_i32_0, %c0_i32_1 : i32, i32, i32, i32
  }
  func.func @transform_9(%arg0: i32) -> (i32, i32, i32, i32) {
    %c0_i32 = arith.constant 0 : i32
    %c0_i32_0 = arith.constant 0 : i32
    %c0_i32_1 = arith.constant 0 : i32
    %c0_i32_2 = arith.constant 0 : i32
    return %arg0, %c0_i32, %c0_i32_0, %c0_i32_1 : i32, i32, i32, i32
  }
  func.func @transform_10(%arg0: i32) -> (i32, i32) {
    %c0_i32 = arith.constant 0 : i32
    %c0_i32_0 = arith.constant 0 : i32
    %c0_i32_1 = arith.constant 0 : i32
    return %c0_i32, %c0_i32_0 : i32, i32
  }
  func.func @transform_11(%arg0: i32) -> (i32, i32) {
    %c0_i32 = arith.constant 0 : i32
    %c0_i32_0 = arith.constant 0 : i32
    %c0_i32_1 = arith.constant 0 : i32
    return %c0_i32, %c0_i32_0 : i32, i32
  }
  func.func @transform_12(%arg0: i32) -> (i32, i32, i32) {
    %c0_i32 = arith.constant 0 : i32
    %c0_i32_0 = arith.constant 0 : i32
    %c0_i32_1 = arith.constant 0 : i32
    %c0_i32_2 = arith.constant 0 : i32
    return %c0_i32, %c0_i32_0, %c0_i32_1 : i32, i32, i32
  }
}

</mosaic_0001>

<bundles_post_ra>
// kernel: diffusion_layer.1
= control target key start
LH: loop header
LB: loop body
LE: loop exit
PB: predicated region body
PF: predicated region fallthrough
CT: control target
= control target key end

     0   :  { %s9588_s0 = inlined_call_operand.vmem [shape: f32[16,2,48], index: 0, kind: input, shape index: {}]   ;;  %s9589_s1 = inlined_call_operand.vmem [shape: f32[4,16,1,48], index: 1, kind: input, shape index: {}, may-alias: {1,4}]   ;;  %s9590_s2 = inlined_call_operand.vmem [shape: f32[4,16,1,48], index: 2, kind: input, shape index: {}, may-alias: {2,5}]   ;;  %s9591_s3 = inlined_call_operand.vmem [shape: f32[4,16,1,48], index: 3, kind: input, shape index: {}, may-alias: {3,6}]   ;;  %s9592_s4 = inlined_call_operand.vmem [shape: f32[4,16,1,48], index: 4, kind: input, shape index: {}, may-alias: {1,4}]   ;;  %s9593_s5 = inlined_call_operand.vmem [shape: f32[4,16,1,48], index: 5, kind: input, shape index: {}, may-alias: {2,5}]   ;;  %s9594_s6 = inlined_call_operand.vmem [shape: f32[4,16,1,48], index: 6, kind: input, shape index: {}, may-alias: {3,6}]   ;;  %s9595_s7 = inlined_call_operand.vmem [shape: f32[3,16,1,48], index: 7, kind: input, shape index: {}]   ;;  %s9596_s8 = inlined_call_operand.vmem [shape: f32[3,16,1,48], index: 8, kind: input, shape index: {}]   ;;  %s9597_s9 = inlined_call_operand.vmem [shape: f32[3,16,1,48], index: 9, kind: input, shape index: {}]   ;;  %s9598_s10 = inlined_call_operand.vmem [shape: f32[3,3], index: 10, kind: input, shape index: {}]   ;;  %s9599_s11 = inlined_call_operand.<no memory space> [shape: f32[1,1], index: 11, kind: input, shape index: {}]   ;;  %s9600_s12 = inlined_call_operand.vmem [shape: f32[16,2,48], index: 12, kind: output, shape index: {}]  }
   0x1   :  { %9601 = sst [smem:[#allocation8_spill]] %s9589_s1 }
   0x2   :  { %9602 = sst [smem:[#allocation9_spill]] %s9590_s2 }
   0x3   :  { %9603 = sst [smem:[#allocation10_spill]] %s9591_s3 }
   0x4   :  { %17 = sst [smem:[#allocation4]] %s9599_s11 }
   0x5   :  { %18 = vsyncpa [#allocation6], 0  ;;  %s7367_s23 = smov 0  }
   0x6 LB: > { %s7373_s24 = sadd.s32 4294967295, %s7291_s23   ;;  %p6872_p0 = scmp.ge.s32.totalorder %s7291_s23, 1  ;;  %s7291_s23 = sphi %s7367_s23, %s24_s23  }
   0x7   : > { %p353_p1 = scmp.lt.s32.totalorder %s7291_s23, 4  ;;  %p6873_p2 = scmp.ne.s32.totalorder %s7373_s24, 0 }
   0x8   : > { %s368_s26 = sshll.u32 %s9598_s10, 4  ;;  %p7112_p4 = scmp.eq.s32.totalorder %s7373_s24, 0  ;;  %s369_s26 = int_to_ptr.vmem [resolvable:$true] %s368_s26 }
   0x9   : > { %p354_p3 = pnand %p6872_p0, %p353_p1  ;;  %s7293_s27 = smov [#allocation5]  }
   0xb   : > { %p7108_p5 = pneg %p354_p3  ;;  %453 = sbr.rel (%p354_p3) target bundleno = 2054 (0x806), region = 68 }
   0xd   : > { %p7109_p6 = pnand %p7112_p4, %p7108_p5 }
   0xf   : > { %7111 = dma.vmem_to_smem (!%p7109_p6), %s369_s26, 64, %s7293_s27, [#allocation6]  }
  0x10   : > { %7286 = dma.done.wait (%p7112_p4), [#allocation6], 64  }
  0x11   : > { %7288 = vsyncadd (%p7112_p4), [#allocation6], 4294967232 }
  0x12   : > { %460 = sfence }
  0x13   : > { %p526_p7 = scmp.lt.s32.totalorder %s7373_s24, 3  ;;  %s538_s28 = sadd.s32 1, %s7373_s24 }
  0x14   : > { %p539_p8 = scmp.lt.s32.totalorder %s538_s28, 3  ;;  %p556_p9 = scmp.lt.s32.totalorder %s7373_s24, 2 }
  0x15   : > { %s527_s29 = scalar_select %p526_p7, %s7373_s24, 3 }
  0x16   : > { %s9608_s28 = smov (!%p539_p8, %s538_s28), 3  ;;  %s9604_s1 = sld [smem:[#allocation8_spill]] }
  0x17   : > { %s6877_s30 = sshll.u32 %s527_s29, 4  ;;  %s9605_s2 = sld [smem:[#allocation9_spill]] }
  0x18   : > { %s9606_s3 = sld [smem:[#allocation10_spill]]  ;;  %s6880_s22 = sshll.u32 %s9608_s28, 4 }
  0x19   : > { %s7404_s26 = scalar_lea.vmem %s9592_s4, %s6880_s22  ;;  %s7409_s13 = scalar_lea.vmem %s9593_s5, %s6880_s22 }
  0x1a   : > { %s7414_s17 = scalar_lea.vmem %s9594_s6, %s6880_s22 }
  0x1c   : > { %s7389_s15 = scalar_lea.vmem %s9604_s1, %s6877_s30 }
  0x1d   : > { %s7394_s18 = scalar_lea.vmem %s9605_s2, %s6877_s30 }
  0x1e   : > { %s7399_s21 = scalar_lea.vmem %s9606_s3, %s6877_s30 }
  0x1f   : > { %s557_s1 = scalar_select %p556_p9, %s7373_s24, 2 }
  0x20   : > { %571 = sbr.rel (%p6873_p2) target bundleno = 54 (0x36), region = 76 }
  0x21   : > { %s6883_s19 = sshll.u32 %s557_s1, 4 }
  0x22   : > { %s7420_s28 = scalar_lea.vmem %s9595_s7, %s6883_s19  ;;  %s7425_s2 = scalar_lea.vmem %s9596_s8, %s6883_s19 }
  0x23   : > { %s7430_s3 = scalar_lea.vmem %s9597_s9, %s6883_s19 }
  0x25   : > { %v572_v0 = vld [vmem:[%s9588_s0] sm:$0x3]  ;;  %vm588_vm0 = vcmask 386048   ;;  %v573_v1 = vld [vmem:[%s9588_s0 + $0x2] sm:$0x3] }
  0x26   : > { %589 = vst.msk [vmem:[#allocation2] sm:$0x3] %vm588_vm0, %v572_v0  ;;  %v574_v2 = vld [vmem:[%s9588_s0 + $0x4] sm:$0x3]  ;;  %v575_v3 = vld [vmem:[%s9588_s0 + $0x6] sm:$0x3] }
  0x27   : > { %590 = vst.msk [vmem:[#allocation2 + $0x2] sm:$0x3] %vm588_vm0, %v573_v1  ;;  %v576_v4 = vld [vmem:[%s9588_s0 + $0x8] sm:$0x3]  ;;  %v577_v5 = vld [vmem:[%s9588_s0 + $0xa] sm:$0x3] }
  0x28   : > { %591 = vst.msk [vmem:[#allocation2 + $0x4] sm:$0x3] %vm588_vm0, %v574_v2  ;;  %v578_v6 = vld [vmem:[%s9588_s0 + $0xc] sm:$0x3]  ;;  %v579_v7 = vld [vmem:[%s9588_s0 + $0xe] sm:$0x3] }
  0x29   : > { %592 = vst.msk [vmem:[#allocation2 + $0x6] sm:$0x3] %vm588_vm0, %v575_v3  ;;  %v580_v8 = vld [vmem:[%s9588_s0 + $0x10] sm:$0x3]  ;;  %v581_v9 = vld [vmem:[%s9588_s0 + $0x12] sm:$0x3] }
  0x2a   : > { %593 = vst.msk [vmem:[#allocation2 + $0x8] sm:$0x3] %vm588_vm0, %v576_v4  ;;  %v582_v10 = vld [vmem:[%s9588_s0 + $0x14] sm:$0x3]  ;;  %v583_v11 = vld [vmem:[%s9588_s0 + $0x16] sm:$0x3] }
  0x2b   : > { %594 = vst.msk [vmem:[#allocation2 + $0xa] sm:$0x3] %vm588_vm0, %v577_v5  ;;  %v584_v12 = vld [vmem:[%s9588_s0 + $0x18] sm:$0x3]  ;;  %v585_v13 = vld [vmem:[%s9588_s0 + $0x1a] sm:$0x3] }
  0x2c   : > { %595 = vst.msk [vmem:[#allocation2 + $0xc] sm:$0x3] %vm588_vm0, %v578_v6  ;;  %v586_v14 = vld [vmem:[%s9588_s0 + $0x1c] sm:$0x3]  ;;  %v587_v15 = vld [vmem:[%s9588_s0 + $0x1e] sm:$0x3] }
  0x2d   : > { %596 = vst.msk [vmem:[#allocation2 + $0xe] sm:$0x3] %vm588_vm0, %v579_v7 }
  0x2e   : > { %597 = vst.msk [vmem:[#allocation2 + $0x10] sm:$0x3] %vm588_vm0, %v580_v8 }
  0x2f   : > { %598 = vst.msk [vmem:[#allocation2 + $0x12] sm:$0x3] %vm588_vm0, %v581_v9 }
  0x30   : > { %599 = vst.msk [vmem:[#allocation2 + $0x14] sm:$0x3] %vm588_vm0, %v582_v10 }
  0x31   : > { %600 = vst.msk [vmem:[#allocation2 + $0x16] sm:$0x3] %vm588_vm0, %v583_v11 }
  0x32   : > { %601 = vst.msk [vmem:[#allocation2 + $0x18] sm:$0x3] %vm588_vm0, %v584_v12 }
  0x33   : > { %602 = vst.msk [vmem:[#allocation2 + $0x1a] sm:$0x3] %vm588_vm0, %v585_v13 }
  0x34   : > { %603 = vst.msk [vmem:[#allocation2 + $0x1c] sm:$0x3] %vm588_vm0, %v586_v14 }
  0x35   : > { %604 = vst.msk [vmem:[#allocation2 + $0x1e] sm:$0x3] %vm588_vm0, %v587_v15 }
  0x36 PF: > { %v616_v16 = vld [vmem:[#allocation2] sm:$0x3]  ;;  %v625_v20 = vld [vmem:[#allocation2 + $0x2] sm:$0x3]  ;;  %v641_v26 = vld [vmem:[#allocation2 + $0x4] sm:$0x3] }
  0x37   : > { %v7128_v17 = vld [vmem:[%s7399_s21] ss:$0 sm:$0xff]  ;;  %v7129_v19 = vld [vmem:[%s7389_s15 + $0x1] ss:$0 sm:$0xff]  ;;  %v7131_v24 = vld [vmem:[%s7389_s15 + $0x2] ss:$0 sm:$0xff] }
  0x38   : > { %v621_v18 = vmul.f32 %v7128_v17, %v616_v16  ;;  %v7130_v22 = vld [vmem:[%s7399_s21 + $0x1] ss:$0 sm:$0xff]  ;;  %v7132_v28 = vld [vmem:[%s7399_s21 + $0x2] ss:$0 sm:$0xff]  ;;  %v7133_v30 = vld [vmem:[%s7389_s15 + $0x3] ss:$0 sm:$0xff] }
  0x39   : > { %v657_v31 = vld [vmem:[#allocation2 + $0x6] sm:$0x3]  ;;  %v7134_v34 = vld [vmem:[%s7399_s21 + $0x3] ss:$0 sm:$0xff]  ;;  %v7135_v36 = vld [vmem:[%s7389_s15 + $0x4] ss:$0 sm:$0xff] }
  0x3a   : > { %v631_v21 = vmul.f32 %v7129_v19, %v621_v18  ;;  %v673_v38 = vld [vmem:[#allocation2 + $0x8] sm:$0x3]  ;;  %vm622_vm1 = vcmask 386048   ;;  %v7136_v40 = vld [vmem:[%s7399_s21 + $0x4] ss:$0 sm:$0xff]  ;;  %vm1031_vm2 = vcmask 1041409  }
  0x3b   : > { %623 = vst.msk [vmem:[#allocation2] sm:$0x3] %vm622_vm1, %v621_v18  ;;  %v7137_v42 = vld [vmem:[%s7389_s15 + $0x5] ss:$0 sm:$0xff]  ;;  %v689_v44 = vld [vmem:[#allocation2 + $0xa] sm:$0x3] }
  0x3c   : > { %v632_v23 = vsub.f32 %v625_v20, %v631_v21  ;;  %v7138_v46 = vld [vmem:[%s7399_s21 + $0x5] ss:$0 sm:$0xff]  ;;  %v7139_v48 = vld [vmem:[%s7389_s15 + $0x6] ss:$0 sm:$0xff]  ;;  %v705_v50 = vld [vmem:[#allocation2 + $0xc] sm:$0x3] }
  0x3d   : > { %v7140_v52 = vld [vmem:[%s7399_s21 + $0x6] ss:$0 sm:$0xff]  ;;  %v7141_v54 = vld [vmem:[%s7389_s15 + $0x7] ss:$0 sm:$0xff]  ;;  %v721_v56 = vld [vmem:[#allocation2 + $0xe] sm:$0x3] }
  0x3e   : > { %v638_v25 = vmul.f32 %v7130_v22, %v632_v23  ;;  %v7142_v58 = vld [vmem:[%s7399_s21 + $0x7] ss:$0 sm:$0xff]  ;;  %v7143_v60 = vld [vmem:[%s7389_s15 + $0x8] ss:$0 sm:$0xff]  ;;  %v737_v62 = vld [vmem:[#allocation2 + $0x10] sm:$0x3] }
  0x3f   : > { %v7144_v0 = vld [vmem:[%s7399_s21 + $0x8] ss:$0 sm:$0xff]  ;;  %v7145_v2 = vld [vmem:[%s7389_s15 + $0x9] ss:$0 sm:$0xff]  ;;  %v753_v4 = vld [vmem:[#allocation2 + $0x12] sm:$0x3] }
  0x40   : > { %v647_v27 = vmul.f32 %v7131_v24, %v638_v25  ;;  %639 = vst.msk [vmem:[#allocation2 + $0x2] sm:$0x3] %vm622_vm1, %v638_v25  ;;  %v7146_v6 = vld [vmem:[%s7399_s21 + $0x9] ss:$0 sm:$0xff]  ;;  %v7147_v8 = vld [vmem:[%s7389_s15 + $0xa] ss:$0 sm:$0xff] }
  0x41   : > { %v769_v10 = vld [vmem:[#allocation2 + $0x14] sm:$0x3]  ;;  %v7148_v12 = vld [vmem:[%s7399_s21 + $0xa] ss:$0 sm:$0xff]  ;;  %v7149_v14 = vld [vmem:[%s7389_s15 + $0xb] ss:$0 sm:$0xff] }
  0x42   : > { %v648_v29 = vsub.f32 %v641_v26, %v647_v27  ;;  %v785_v15 = vld [vmem:[#allocation2 + $0x16] sm:$0x3]  ;;  %v7150_v17 = vld [vmem:[%s7399_s21 + $0xb] ss:$0 sm:$0xff]  ;;  %v7151_v19 = vld [vmem:[%s7389_s15 + $0xc] ss:$0 sm:$0xff] }
  0x43   : > { %v801_v22 = vld [vmem:[#allocation2 + $0x18] sm:$0x3]  ;;  %v7152_v24 = vld [vmem:[%s7399_s21 + $0xc] ss:$0 sm:$0xff]  ;;  %v7153_v26 = vld [vmem:[%s7389_s15 + $0xd] ss:$0 sm:$0xff] }
  0x44   : > { %v654_v32 = vmul.f32 %v7132_v28, %v648_v29  ;;  %v817_v28 = vld [vmem:[#allocation2 + $0x1a] sm:$0x3]  ;;  %vm1034_vm3 = vcmask 1042434   ;;  %vm1037_vm4 = vcmask 1043459   ;;  %vm1040_vm5 = vcmask 1044484   ;;  %s7298_s29 = smov 32  }
  0x45   : > { %vm1043_vm6 = vcmask 1045509   ;;  %vm1046_vm7 = vcmask 1046534   ;;  %vm1049_vm8 = vcmask 1047559   ;;  %vm1065_vm9 = vcmask 130048   ;;  %s7100_s22 = sld [smem:[#allocation5 + $0x102]]  ;;  %p7101_p10 = scmp.ne.s32.totalorder %s7373_s24, 2 }
  0x46   : > { %v663_v33 = vmul.f32 %v7133_v30, %v654_v32  ;;  %655 = vst.msk [vmem:[#allocation2 + $0x4] sm:$0x3] %vm622_vm1, %v654_v32  ;;  %v7154_v30 = vld [vmem:[%s7399_s21 + $0xd] ss:$0 sm:$0xff]  ;;  %v7155_v32 = vld [vmem:[%s7389_s15 + $0xe] ss:$0 sm:$0xff] }
  0x47   : > { %vm1296_vm12 = vcmask 122880   ;;  %vm1651_vm13 = vcmask 254080   ;;  %vm2006_vm14 = vcmask 385280   ;;  %s5810_s1 = sld [smem:[#allocation5]]  ;;  %vm6024_vm15 = vcmask 123904  }
  0x48   : > { %v664_v35 = vsub.f32 %v657_v31, %v663_v33  ;;  %s7095_s14 = sld [smem:[#allocation5 + $0x80]]  ;;  %vm6319_vm0 = vcmask 255104  }
  0x49   : > { %s6635_s16 = sld [smem:[#allocation4]] (!%p7101_p10) }
  0x4a   : > { %v670_v37 = vmul.f32 %v7134_v34, %v664_v35  ;;  %v833_v34 = vld [vmem:[#allocation2 + $0x1c] sm:$0x3] }
  0x4c   : > { %v679_v39 = vmul.f32 %v7135_v36, %v670_v37  ;;  %671 = vst.msk [vmem:[#allocation2 + $0x6] sm:$0x3] %vm622_vm1, %v670_v37  ;;  %v7156_v36 = vld [vmem:[%s7399_s21 + $0xe] ss:$0 sm:$0xff] }
  0x4e   : > { %v680_v41 = vsub.f32 %v673_v38, %v679_v39  ;;  %v7157_v38 = vld [vmem:[%s7389_s15 + $0xf] ss:$0 sm:$0xff]  ;;  %s7294_s15 = smov 112  }
  0x50   : > { %v686_v43 = vmul.f32 %v7136_v40, %v680_v41  ;;  %v849_v40 = vld [vmem:[#allocation2 + $0x1e] sm:$0x3] }
  0x52   : > { %v695_v45 = vmul.f32 %v7137_v42, %v686_v43  ;;  %687 = vst.msk [vmem:[#allocation2 + $0x8] sm:$0x3] %vm622_vm1, %v686_v43  ;;  %v7158_v42 = vld [vmem:[%s7399_s21 + $0xf] ss:$0 sm:$0xff]  ;;  %s7295_s21 = smov 96  }
  0x54   : > { %v696_v47 = vsub.f32 %v689_v44, %v695_v45  ;;  %v7159_v44 = vld [vmem:[%s7394_s18 + $0xe] ss:$0 sm:$0xff] }
  0x56   : > { %v702_v49 = vmul.f32 %v7138_v46, %v696_v47  ;;  %v7160_v47 = vld [vmem:[%s7394_s18 + $0xd] ss:$0 sm:$0xff] }
  0x58   : > { %v711_v51 = vmul.f32 %v7139_v48, %v702_v49  ;;  %703 = vst.msk [vmem:[#allocation2 + $0xa] sm:$0x3] %vm622_vm1, %v702_v49 }
  0x5a   : > { %v712_v53 = vsub.f32 %v705_v50, %v711_v51 }
  0x5c   : > { %v718_v55 = vmul.f32 %v7140_v52, %v712_v53  ;;  %v7161_v52 = vld [vmem:[%s7394_s18 + $0xc] ss:$0 sm:$0xff] }
  0x5e   : > { %v727_v57 = vmul.f32 %v7141_v54, %v718_v55  ;;  %719 = vst.msk [vmem:[#allocation2 + $0xc] sm:$0x3] %vm622_vm1, %v718_v55 }
  0x60   : > { %v728_v59 = vsub.f32 %v721_v56, %v727_v57  ;;  %v7162_v56 = vld [vmem:[%s7394_s18 + $0xb] ss:$0 sm:$0xff] }
  0x62   : > { %v734_v61 = vmul.f32 %v7142_v58, %v728_v59 }
  0x64   : > { %v743_v63 = vmul.f32 %v7143_v60, %v734_v61  ;;  %735 = vst.msk [vmem:[#allocation2 + $0xe] sm:$0x3] %vm622_vm1, %v734_v61  ;;  %v7163_v60 = vld [vmem:[%s7394_s18 + $0xa] ss:$0 sm:$0xff] }
  0x66   : > { %v744_v1 = vsub.f32 %v737_v62, %v743_v63 }
  0x68   : > { %v750_v3 = vmul.f32 %v7144_v0, %v744_v1  ;;  %v7164_v0 = vld [vmem:[%s7394_s18 + $0x9] ss:$0 sm:$0xff] }
  0x6a   : > { %751 = vst.msk [vmem:[#allocation2 + $0x10] sm:$0x3] %vm622_vm1, %v750_v3  ;;  %v759_v5 = vmul.f32 %v7145_v2, %v750_v3 }
  0x6c   : > { %v760_v7 = vsub.f32 %v753_v4, %v759_v5  ;;  %v7165_v4 = vld [vmem:[%s7394_s18 + $0x8] ss:$0 sm:$0xff] }
  0x6e   : > { %v766_v9 = vmul.f32 %v7146_v6, %v760_v7 }
  0x70   : > { %767 = vst.msk [vmem:[#allocation2 + $0x12] sm:$0x3] %vm622_vm1, %v766_v9  ;;  %v775_v11 = vmul.f32 %v7147_v8, %v766_v9  ;;  %v7166_v8 = vld [vmem:[%s7394_s18 + $0x7] ss:$0 sm:$0xff] }
  0x71   : > { %v918_v6 = vld [vmem:[#allocation2 + $0x10] sm:$0x3] }
  0x72   : > { %v776_v13 = vsub.f32 %v769_v10, %v775_v11  ;;  %v927_v10 = vld [vmem:[#allocation2 + $0xe] sm:$0x3] }
  0x74   : > { %v782_v16 = vmul.f32 %v7148_v12, %v776_v13  ;;  %v7167_v12 = vld [vmem:[%s7394_s18 + $0x6] ss:$0 sm:$0xff] }
  0x76   : > { %783 = vst.msk [vmem:[#allocation2 + $0x14] sm:$0x3] %vm622_vm1, %v782_v16  ;;  %v791_v18 = vmul.f32 %v7149_v14, %v782_v16 }
  0x77   : > { %v909_v2 = vld [vmem:[#allocation2 + $0x12] sm:$0x3] }
  0x78   : > { %v792_v20 = vsub.f32 %v785_v15, %v791_v18  ;;  %v936_v15 = vld [vmem:[#allocation2 + $0xc] sm:$0x3]  ;;  %v7168_v18 = vld [vmem:[%s7394_s18 + $0x5] ss:$0 sm:$0xff] }
  0x7a   : > { %v798_v21 = vmul.f32 %v7150_v17, %v792_v20 }
  0x7c   : > { %799 = vst.msk [vmem:[#allocation2 + $0x16] sm:$0x3] %vm622_vm1, %v798_v21  ;;  %v807_v23 = vmul.f32 %v7151_v19, %v798_v21 }
  0x7d   : > { %v900_v62 = vld [vmem:[#allocation2 + $0x14] sm:$0x3] }
  0x7e   : > { %v808_v25 = vsub.f32 %v801_v22, %v807_v23 }
  0x80   : > { %v814_v27 = vmul.f32 %v7152_v24, %v808_v25 }
  0x82   : > { %815 = vst.msk [vmem:[#allocation2 + $0x18] sm:$0x3] %vm622_vm1, %v814_v27  ;;  %v823_v29 = vmul.f32 %v7153_v26, %v814_v27  ;;  %v945_v27 = vld [vmem:[#allocation2 + $0xa] sm:$0x3] }
  0x83   : > { %v891_v58 = vld [vmem:[#allocation2 + $0x16] sm:$0x3] }
  0x84   : > { %v824_v31 = vsub.f32 %v817_v28, %v823_v29 }
  0x86   : > { %v830_v33 = vmul.f32 %v7154_v30, %v824_v31 }
  0x88   : > { %831 = vst.msk [vmem:[#allocation2 + $0x1a] sm:$0x3] %vm622_vm1, %v830_v33  ;;  %v839_v35 = vmul.f32 %v7155_v32, %v830_v33 }
  0x89   : > { %v882_v54 = vld [vmem:[#allocation2 + $0x18] sm:$0x3] }
  0x8a   : > { %v840_v37 = vsub.f32 %v833_v34, %v839_v35  ;;  %v7169_v34 = vld [vmem:[%s7394_s18 + $0x4] ss:$0 sm:$0xff] }
  0x8c   : > { %v846_v39 = vmul.f32 %v7156_v36, %v840_v37 }
  0x8e   : > { %847 = vst.msk [vmem:[#allocation2 + $0x1c] sm:$0x3] %vm622_vm1, %v846_v39  ;;  %v855_v41 = vmul.f32 %v7157_v38, %v846_v39 }
  0x8f   : > { %v873_v50 = vld [vmem:[#allocation2 + $0x1a] sm:$0x3] }
  0x90   : > { %v856_v43 = vsub.f32 %v849_v40, %v855_v41  ;;  %v954_v41 = vld [vmem:[#allocation2 + $0x8] sm:$0x3] }
  0x92   : > { %v862_v45 = vmul.f32 %v7158_v42, %v856_v43  ;;  %v7170_v42 = vld [vmem:[%s7394_s18 + $0x3] ss:$0 sm:$0xff] }
  0x94   : > { %863 = vst.msk [vmem:[#allocation2 + $0x1e] sm:$0x3] %vm622_vm1, %v862_v45  ;;  %v870_v46 = vmul.f32 %v7159_v44, %v862_v45 }
  0x95   : > { %v864_v48 = vld [vmem:[#allocation2 + $0x1c] sm:$0x3] }
  0x96   : > { %v871_v49 = vsub.f32 %v864_v48, %v870_v46 }
  0x98   : > { %872 = vst.msk [vmem:[#allocation2 + $0x1c] sm:$0x3] %vm622_vm1, %v871_v49  ;;  %v879_v51 = vmul.f32 %v7160_v47, %v871_v49  ;;  %v963_v49 = vld [vmem:[#allocation2 + $0x6] sm:$0x3] }
  0x9a   : > { %v880_v53 = vsub.f32 %v873_v50, %v879_v51 }
  0x9b   : > { %v1328_v29 = vld [vmem:[#allocation2 + $0x1e] sm:$0x1] }
  0x9c   : > { %881 = vst.msk [vmem:[#allocation2 + $0x1a] sm:$0x3] %vm622_vm1, %v880_v53  ;;  %v888_v55 = vmul.f32 %v7161_v52, %v880_v53  ;;  %v1371_v38 = vrot.slane %v1328_v29, 1 }
  0x9e   : > { %v889_v57 = vsub.f32 %v882_v54, %v888_v55  ;;  %v7171_v55 = vld [vmem:[%s7394_s18 + $0x2] ss:$0 sm:$0xff] }
  0x9f   : > { %v1327_v24 = vld [vmem:[#allocation2 + $0x1c] sm:$0x1] }
  0xa0   : > { %890 = vst.msk [vmem:[#allocation2 + $0x18] sm:$0x3] %vm622_vm1, %v889_v57  ;;  %v897_v59 = vmul.f32 %v7162_v56, %v889_v57  ;;  %v1369_v36 = vrot.slane %v1327_v24, 2 }
  0xa2   : > { %v898_v61 = vsub.f32 %v891_v58, %v897_v59 }
  0xa3   : > { %v1326_v22 = vld [vmem:[#allocation2 + $0x1a] sm:$0x1] }
  0xa4   : > { %899 = vst.msk [vmem:[#allocation2 + $0x16] sm:$0x3] %vm622_vm1, %v898_v61  ;;  %v906_v63 = vmul.f32 %v7163_v60, %v898_v61  ;;  %v1367_v32 = vrot.slane %v1326_v22, 3  ;;  %v1681_v61 = vld [vmem:[#allocation2 + $0x1a] sm:$0x1] }
  0xa6   : > { %v907_v1 = vsub.f32 %v900_v62, %v906_v63  ;;  %v1682_v62 = vld [vmem:[#allocation2 + $0x1c] sm:$0x1] }
  0xa7   : > { %v1325_v19 = vld [vmem:[#allocation2 + $0x18] sm:$0x1]  ;;  %v2335_v29 = vld [vmem:[#allocation2 + $0x19] sm:$0x1] }
  0xa8   : > { %908 = vst.msk [vmem:[#allocation2 + $0x14] sm:$0x3] %vm622_vm1, %v907_v1  ;;  %v915_v3 = vmul.f32 %v7164_v0, %v907_v1  ;;  %v1365_v30 = vrot.slane %v1325_v19, 4  ;;  %v1680_v57 = vld [vmem:[#allocation2 + $0x18] sm:$0x1] }
  0xa9   : > { %v1683_v1 = vld [vmem:[#allocation2 + $0x1e] sm:$0x1] }
  0xaa   : > { %v916_v5 = vsub.f32 %v909_v2, %v915_v3  ;;  %v1720_v3 = vrot.slane %v1680_v57, 4 }
  0xab   : > { %v1324_v17 = vld [vmem:[#allocation2 + $0x16] sm:$0x1] }
  0xac   : > { %917 = vst.msk [vmem:[#allocation2 + $0x12] sm:$0x3] %vm622_vm1, %v916_v5  ;;  %v924_v7 = vmul.f32 %v7165_v4, %v916_v5  ;;  %v1363_v25 = vrot.slane %v1324_v17, 5  ;;  %v1679_v51 = vld [vmem:[#allocation2 + $0x16] sm:$0x1]  ;;  %v1722_v5 = vrot.slane %v1681_v61, 3 }
  0xad   : > { %v1718_v59 = vrot.slane %v1679_v51, 5  ;;  %v972_v4 = vld [vmem:[#allocation2 + $0x4] sm:$0x3]  ;;  %v2688_v61 = vld [vmem:[#allocation2 + $0x17] sm:$0x1] }
  0xae   : > { %v925_v9 = vsub.f32 %v918_v6, %v924_v7  ;;  %v1724_v6 = vrot.slane %v1682_v62, 2  ;;  %v1726_v7 = vrot.slane %v1683_v1, 1  ;;  %v2689_v62 = vld [vmem:[#allocation2 + $0x19] sm:$0x1] }
  0xaf   : > { %v1323_v13 = vld [vmem:[#allocation2 + $0x14] sm:$0x1]  ;;  %v2687_v57 = vld [vmem:[#allocation2 + $0x15] sm:$0x1] }
  0xb0   : > { %926 = vst.msk [vmem:[#allocation2 + $0x10] sm:$0x3] %vm622_vm1, %v925_v9  ;;  %v933_v11 = vmul.f32 %v7166_v8, %v925_v9  ;;  %v1361_v23 = vrot.slane %v1323_v13, 6  ;;  %v1678_v46 = vld [vmem:[#allocation2 + $0x14] sm:$0x1] }
  0xb1   : > { %v1716_v52 = vrot.slane %v1678_v46, 6 }
  0xb2   : > { %v934_v14 = vsub.f32 %v927_v10, %v933_v11  ;;  %v7172_v10 = vld [vmem:[%s7394_s18 + $0x1] ss:$0 sm:$0xff] }
  0xb3   : > { %v1322_v16 = vld [vmem:[#allocation2 + $0x12] sm:$0x1]  ;;  %v2332_v24 = vld [vmem:[#allocation2 + $0x13] sm:$0x1] }
  0xb4   : > { %v1359_v20 = vrot.slane %v1322_v16, 7  ;;  %935 = vst.msk [vmem:[#allocation2 + $0xe] sm:$0x3] %vm622_vm1, %v934_v14  ;;  %v942_v21 = vmul.f32 %v7167_v12, %v934_v14  ;;  %v1677_v43 = vld [vmem:[#allocation2 + $0x12] sm:$0x1] }
  0xb5   : > { %v1714_v47 = vrot.slane %v1677_v43, 7 }
  0xb6   : > { %v943_v26 = vsub.f32 %v936_v15, %v942_v21 }
  0xb7   : > { %v1321_v28 = vld [vmem:[#allocation2 + $0x10] sm:$0x1] }
  0xb8   : > { %v1360_v31 = vsel %vm1031_vm2, %v1359_v20, %v1321_v28  ;;  %944 = vst.msk [vmem:[#allocation2 + $0xc] sm:$0x3] %vm622_vm1, %v943_v26  ;;  %v951_v33 = vmul.f32 %v7168_v18, %v943_v26  ;;  %v1676_v50 = vld [vmem:[#allocation2 + $0x10] sm:$0x1]  ;;  %v2334_v28 = vld [vmem:[#allocation2 + $0x17] sm:$0x1] }
  0xb9   : > { %v1362_v35 = vsel %vm1034_vm3, %v1361_v23, %v1360_v31  ;;  %v1715_v58 = vsel %vm1031_vm2, %v1714_v47, %v1676_v50  ;;  %v2331_v23 = vld [vmem:[#allocation2 + $0x11] sm:$0x1]  ;;  %v7173_v31 = vld [vmem:[%s7394_s18] ss:$0 sm:$0xff]  ;;  %s7297_s18 = smov 16  }
  0xba   : > { %v1364_v37 = vsel %vm1037_vm4, %v1363_v25, %v1362_v35  ;;  %v952_v39 = vsub.f32 %v945_v27, %v951_v33  ;;  %v1717_v63 = vsel %vm1034_vm3, %v1716_v52, %v1715_v58  ;;  %v981_v25 = vld [vmem:[#allocation2 + $0x2] sm:$0x3]  ;;  %v2333_v27 = vld [vmem:[#allocation2 + $0x15] sm:$0x1]  ;;  %v2337_v33 = vld [vmem:[#allocation2 + $0x1d] sm:$0x1] }
  0xbb   : > { %v1366_v40 = vsel %vm1040_vm5, %v1365_v30, %v1364_v37  ;;  %v7575_v56 = vld [vmem:[#allocation2 + $0xe] sm:$0x1]  ;;  %v1719_v2 = vsel %vm1037_vm4, %v1718_v59, %v1717_v63  ;;  %v2369_v37 = vrot.slane %v2332_v24, 7  ;;  %v2379_v50 = vrot.slane %v2337_v33, 2  ;;  %v2686_v52 = vld [vmem:[#allocation2 + $0x13] sm:$0x1] }
  0xbc   : > { %v1368_v44 = vsel %vm1043_vm6, %v1367_v32, %v1366_v40  ;;  %953 = vst.msk [vmem:[#allocation2 + $0xa] sm:$0x3] %vm622_vm1, %v952_v39  ;;  %v960_v45 = vmul.f32 %v7169_v34, %v952_v39  ;;  %v1357_v11 = vrot.slane %v7575_v56, 1  ;;  %v1721_v12 = vsel %vm1040_vm5, %v1720_v3, %v1719_v2  ;;  %v7589_v13 = vld [vmem:[#allocation2 + $0xe] sm:$0x1] }
  0xbd   : > { %v1370_v48 = vsel %vm1046_vm7, %v1369_v36, %v1368_v44  ;;  %v1723_v16 = vsel %vm1043_vm6, %v1722_v5, %v1721_v12  ;;  %v1712_v22 = vrot.slane %v7589_v13, 1  ;;  %v2336_v32 = vld [vmem:[#allocation2 + $0x1b] sm:$0x1]  ;;  %v2338_v34 = vld [vmem:[#allocation2 + $0x1f] sm:$0x1]  ;;  %v2370_v44 = vsel %vm1031_vm2, %v2369_v37, %v2331_v23 }
  0xbe   : > { %v1372_v53 = vsel %vm1049_vm8, %v1371_v38, %v1370_v48  ;;  %v961_v54 = vsub.f32 %v954_v41, %v960_v45  ;;  %v1725_v21 = vsel %vm1046_vm7, %v1724_v6, %v1723_v16  ;;  %v2371_v38 = vrot.slane %v2333_v27, 6  ;;  %v990_v48 = vld [vmem:[#allocation2] sm:$0x3]  ;;  %v2685_v2 = vld [vmem:[#allocation2 + $0x11] sm:$0x1] }
  0xbf   : > { %1375 = vrot.lane.b32.xlu0 %v1372_v53, %s7294_s15  ;;  %v7579_v60 = vld [vmem:[#allocation2 + $0xc] sm:$0x1]  ;;  %v1727_v26 = vsel %vm1049_vm8, %v1726_v7, %v1725_v21  ;;  %v2375_v45 = vrot.slane %v2335_v29, 4  ;;  %v2377_v46 = vrot.slane %v2336_v32, 3  ;;  %v2381_v51 = vrot.slane %v2338_v34, 1 }
  0xc0   : > { %962 = vst.msk [vmem:[#allocation2 + $0x8] sm:$0x3] %vm622_vm1, %v961_v54  ;;  %v969_v0 = vmul.f32 %v7170_v42, %v961_v54  ;;  %v7584_v8 = vld [vmem:[#allocation2 + $0xc] sm:$0x1]  ;;  %v1355_v15 = vrot.slane %v7579_v60, 2  ;;  %1730 = vrot.lane.b32.xlu1 %v1727_v26, %s7295_s21  ;;  %v2373_v42 = vrot.slane %v2334_v28, 5 }
  0xc1   : > { %v1710_v18 = vrot.slane %v7584_v8, 2  ;;  %v2690_v3 = vld [vmem:[#allocation2 + $0x1b] sm:$0x1]  ;;  %v2691_v6 = vld [vmem:[#allocation2 + $0x1d] sm:$0x1]  ;;  %v2727_v21 = vrot.slane %v2688_v61, 5 }
  0xc2   : > { %v970_v9 = vsub.f32 %v963_v49, %v969_v0  ;;  %v2372_v49 = vsel %vm1034_vm3, %v2371_v38, %v2370_v44  ;;  %v2692_v7 = vld [vmem:[#allocation2 + $0x1f] sm:$0x1]  ;;  %v2729_v23 = vrot.slane %v2689_v62, 4  ;;  %v2731_v26 = vrot.slane %v2690_v3, 3  ;;  %v2683_v38 = vld [vmem:[#allocation2 + $0xd] sm:$0x1] }
  0xc3   : > { %v7591_v14 = vld [vmem:[#allocation2 + $0xa] sm:$0x1]  ;;  %v2735_v32 = vrot.slane %v2692_v7, 1  ;;  %v2682_v37 = vld [vmem:[#allocation2 + $0xb] sm:$0x1]  ;;  %v2719_v61 = vrot.slane %v2683_v38, 2 }
  0xc4   : > { %v7595_v17 = vld [vmem:[#allocation2 + $0xa] sm:$0x1]  ;;  %971 = vst.msk [vmem:[#allocation2 + $0x6] sm:$0x3] %vm622_vm1, %v970_v9  ;;  %v978_v19 = vmul.f32 %v7171_v55, %v970_v9  ;;  %v1353_v20 = vrot.slane %v7591_v14, 3  ;;  %v2374_v55 = vsel %vm1037_vm4, %v2373_v42, %v2372_v49  ;;  %v2723_v9 = vrot.slane %v2686_v52, 7 }
  0xc5   : > { %v1708_v41 = vrot.slane %v7595_v17, 3  ;;  %v2376_v59 = vsel %vm1040_vm5, %v2375_v45, %v2374_v55  ;;  %v1007_v38 = vld [vmem:[#allocation2 + $0x12] sm:$0x1] }
  0xc6   : > { %v979_v30 = vsub.f32 %v972_v4, %v978_v19  ;;  %v2378_v1 = vsel %vm1043_vm6, %v2377_v46, %v2376_v59  ;;  %v2717_v59 = vrot.slane %v2682_v37, 3 }
  0xc7   : > { %v7605_v35 = vld [vmem:[#allocation2 + $0x8] sm:$0x1]  ;;  %v2380_v5 = vsel %vm1046_vm7, %v2379_v50, %v2378_v1  ;;  %v2681_v28 = vld [vmem:[#allocation2 + $0x9] sm:$0x1] }
  0xc8   : > { %v7607_v36 = vld [vmem:[#allocation2 + $0x8] sm:$0x1]  ;;  %980 = vst.msk [vmem:[#allocation2 + $0x4] sm:$0x3] %vm622_vm1, %v979_v30  ;;  %v987_v39 = vmul.f32 %v7172_v10, %v979_v30  ;;  %v1351_v40 = vrot.slane %v7605_v35, 4  ;;  %v2725_v10 = vrot.slane %v2687_v57, 6  ;;  %v2382_v19 = vsel %vm1049_vm8, %v2381_v51, %v2380_v5 }
  0xc9   : > { %v1706_v43 = vrot.slane %v7607_v36, 4  ;;  %2385 = vrot.lane.b32.xlu2 %v2382_v19, %s7294_s15  ;;  %v605_v19 = vlaneseq  ;;  %v1006_v36 = vld [vmem:[#allocation2 + $0x10] sm:$0x1] }
  0xca   : > { %v988_v47 = vsub.f32 %v981_v25, %v987_v39  ;;  %v2724_v25 = vsel %vm1031_vm2, %v2723_v9, %v2685_v2  ;;  %v7632_v39 = vld [vmem:[#allocation2 + $0xf] sm:$0x1] }
  0xcb   : > { %v7615_v53 = vld [vmem:[#allocation2 + $0x6] sm:$0x1]  ;;  %v2680_v27 = vld [vmem:[#allocation2 + $0x7] sm:$0x1]  ;;  %v2726_v30 = vsel %vm1034_vm3, %v2725_v10, %v2724_v25  ;;  %v2721_v62 = vrot.slane %v7632_v39, 1 }
  0xcc   : > { %v7617_v54 = vld [vmem:[#allocation2 + $0x6] sm:$0x1]  ;;  %989 = vst.msk [vmem:[#allocation2 + $0x2] sm:$0x3] %vm622_vm1, %v988_v47  ;;  %v995_v58 = vmul.f32 %v7173_v31, %v988_v47  ;;  %v1349_v63 = vrot.slane %v7615_v53, 5  ;;  %v2733_v31 = vrot.slane %v2691_v6, 2  ;;  %v2728_v34 = vsel %vm1037_vm4, %v2727_v21, %v2726_v30 }
  0xcd   : > { %v1704_v0 = vrot.slane %v7617_v54, 5  ;;  %v2730_v45 = vsel %vm1040_vm5, %v2729_v23, %v2728_v34  ;;  %v2713_v57 = vrot.slane %v2680_v27, 5  ;;  %v2330_v34 = vld [vmem:[#allocation2 + $0xf] sm:$0x1]  ;;  %v1009_v39 = vld [vmem:[#allocation2 + $0x16] sm:$0x1] }
  0xce   : > { %v996_v4 = vsub.f32 %v990_v48, %v995_v58  ;;  %v2732_v49 = vsel %vm1043_vm6, %v2731_v26, %v2730_v45  ;;  %v2715_v58 = vrot.slane %v2681_v28, 4  ;;  %v1012_v45 = vld [vmem:[#allocation2 + $0x1c] sm:$0x1] }
  0xcf   : > { %v1315_v12 = vld [vmem:[#allocation2 + $0x4] sm:$0x1]  ;;  %v2679_v33 = vld [vmem:[#allocation2 + $0x5] sm:$0x1]  ;;  %v2734_v52 = vsel %vm1046_vm7, %v2733_v31, %v2732_v49  ;;  %v2327_v31 = vld [vmem:[#allocation2 + $0x9] sm:$0x1] }
  0xd0   : > { %v1670_v16 = vld [vmem:[#allocation2 + $0x4] sm:$0x1]  ;;  %997 = vst.msk [vmem:[#allocation2] sm:$0x3] %vm622_vm1, %v996_v4  ;;  %v1347_v24 = vrot.slane %v1315_v12, 6  ;;  %v2711_v55 = vrot.slane %v2679_v33, 6  ;;  %v7639_v5 = vsel %vm1049_vm8, %v2735_v32, %v2734_v52 }
  0xd1   : > { %v1702_v29 = vrot.slane %v1670_v16, 6  ;;  %v2325_v1 = vld [vmem:[#allocation2 + $0x5] sm:$0x1]  ;;  %v2326_v16 = vld [vmem:[#allocation2 + $0x7] sm:$0x1] }
  0xd2   : > { %v2328_v32 = vld [vmem:[#allocation2 + $0xb] sm:$0x1]  ;;  %v2357_v33 = vrot.slane %v2325_v1, 6  ;;  %v2359_v54 = vrot.slane %v2326_v16, 5  ;;  %v1000_v52 = vld [vmem:[#allocation2 + $0x4] sm:$0x1] }
  0xd3   : > { %v1314_v42 = vld [vmem:[#allocation2 + $0x2] sm:$0x1]  ;;  %v2678_v46 = vld [vmem:[#allocation2 + $0x3] sm:$0x1]  ;;  %v1002_v1 = vld [vmem:[#allocation2 + $0x8] sm:$0x1] }
  0xd4   : > { %v1669_v44 = vld [vmem:[#allocation2 + $0x2] sm:$0x1]  ;;  %v1345_v47 = vrot.slane %v1314_v42, 7  ;;  %v2709_v50 = vrot.slane %v2678_v46, 7  ;;  %v2324_v51 = vld [vmem:[#allocation2 + $0x3] sm:$0x1] }
  0xd5   : > { %v1700_v48 = vrot.slane %v1669_v44, 7  ;;  %v2355_v2 = vrot.slane %v2324_v51, 7  ;;  %v1011_v44 = vld [vmem:[#allocation2 + $0x1a] sm:$0x1]  ;;  %v1051_v51 = vrot.slane %v1007_v38, 7 }
  0xd7   : > { %v1313_v3 = vld [vmem:[#allocation2] sm:$0x1]  ;;  %v2677_v6 = vld [vmem:[#allocation2 + $0x1] sm:$0x1] }
  0xd8   : > { %v1668_v4 = vld [vmem:[#allocation2] sm:$0x1]  ;;  %v1346_v7 = vsel %vm1031_vm2, %v1345_v47, %v1313_v3  ;;  %v2710_v10 = vsel %vm1031_vm2, %v2709_v50, %v2677_v6  ;;  %v2323_v12 = vld [vmem:[#allocation2 + $0x1] sm:$0x1]  ;;  %v999_v47 = vld [vmem:[#allocation2 + $0x2] sm:$0x1] }
  0xd9   : > { %v1701_v9 = vsel %vm1031_vm2, %v1700_v48, %v1668_v4  ;;  %v1348_v21 = vsel %vm1034_vm3, %v1347_v24, %v1346_v7  ;;  %v2712_v25 = vsel %vm1034_vm3, %v2711_v55, %v2710_v10  ;;  %v2356_v26 = vsel %vm1031_vm2, %v2355_v2, %v2323_v12  ;;  %v998_v56 = vld [vmem:[#allocation2] sm:$0x1]  ;;  %v1003_v2 = vld [vmem:[#allocation2 + $0xa] sm:$0x1]  ;;  %v1004_v7 = vld [vmem:[#allocation2 + $0xc] sm:$0x1] }
  0xda   : > { %v1703_v23 = vsel %vm1034_vm3, %v1702_v29, %v1701_v9  ;;  %v1350_v27 = vsel %vm1037_vm4, %v1349_v63, %v1348_v21  ;;  %v2714_v30 = vsel %vm1037_vm4, %v2713_v57, %v2712_v25  ;;  %v2329_v63 = vld [vmem:[#allocation2 + $0xd] sm:$0x1]  ;;  %v2363_v48 = vrot.slane %v2328_v32, 3  ;;  %v1001_v57 = vld [vmem:[#allocation2 + $0x6] sm:$0x1] }
  0xdb   : > { %v1705_v28 = vsel %vm1037_vm4, %v1704_v0, %v1703_v23  ;;  %v1352_v24 = vsel %vm1040_vm5, %v1351_v40, %v1350_v27  ;;  %v2716_v53 = vsel %vm1040_vm5, %v2715_v58, %v2714_v30  ;;  %v2358_v40 = vsel %vm1034_vm3, %v2357_v33, %v2356_v26  ;;  %v1005_v9 = vld [vmem:[#allocation2 + $0xe] sm:$0x1] }
  0xdc   : > { %v1707_v29 = vsel %vm1040_vm5, %v1706_v43, %v1705_v28  ;;  %v1354_v0 = vsel %vm1043_vm6, %v1353_v20, %v1352_v24  ;;  %v2718_v35 = vsel %vm1043_vm6, %v2717_v59, %v2716_v53  ;;  %v1008_v43 = vld [vmem:[#allocation2 + $0x14] sm:$0x1]  ;;  %v2360_v20 = vsel %vm1037_vm4, %v2359_v54, %v2358_v40 }
  0xdd   : > { %v1709_v37 = vsel %vm1043_vm6, %v1708_v41, %v1707_v29  ;;  %v1356_v42 = vsel %vm1046_vm7, %v1355_v15, %v1354_v0  ;;  %v2720_v17 = vsel %vm1046_vm7, %v2719_v61, %v2718_v35  ;;  %v1010_v41 = vld [vmem:[#allocation2 + $0x18] sm:$0x1]  ;;  %v2361_v15 = vrot.slane %v2327_v31, 4 }
  0xde   : > { %v1711_v14 = vsel %vm1046_vm7, %v1710_v18, %v1709_v37  ;;  %v1358_v46 = vsel %vm1049_vm8, %v1357_v11, %v1356_v42  ;;  %v2722_v8 = vsel %vm1049_vm8, %v2721_v62, %v2720_v17  ;;  %v1013_v18 = vld [vmem:[#allocation2 + $0x1e] sm:$0x1]  ;;  %v2365_v49 = vrot.slane %v2329_v63, 2 }
  0xdf   : > { %v1713_v60 = vsel %vm1049_vm8, %v1712_v22, %v1711_v14  ;;  %1373 = vrot.lane.b32.xlu0 %v1358_v46, %s7294_s15  ;;  %v2367_v50 = vrot.slane %v2330_v34, 1  ;;  %v2362_v11 = vsel %vm1040_vm5, %v2361_v15, %v2360_v20  ;;  %v1053_v13 = vrot.slane %v1008_v43, 6 }
  0xe0   : > { %1728 = vrot.lane.b32.xlu1 %v1713_v60, %s7295_s21  ;;  %v1055_v55 = vrot.slane %v1009_v39, 5  ;;  %v1057_v22 = vrot.slane %v1010_v41, 4  ;;  %v2364_v58 = vsel %vm1043_vm6, %v2363_v48, %v2362_v11  ;;  %v1052_v59 = vsel %vm1031_vm2, %v1051_v51, %v1006_v36 }
  0xe1   : > { %v1059_v61 = vrot.slane %v1011_v44, 3  ;;  %v1061_v62 = vrot.slane %v1012_v45, 2  ;;  %v2366_v3 = vsel %vm1046_vm7, %v2365_v49, %v2364_v58  ;;  %v1054_v4 = vsel %vm1034_vm3, %v1053_v13, %v1052_v59 }
  0xe2   : > { %v1063_v6 = vrot.slane %v1013_v18, 1  ;;  %v1030_v10 = vrot.slane %v999_v47, 7  ;;  %v2368_v12 = vsel %vm1049_vm8, %v2367_v50, %v2366_v3  ;;  %v1056_v16 = vsel %vm1037_vm4, %v1055_v55, %v1054_v4 }
  0xe3   : > { %v1033_v21 = vrot.slane %v1000_v52, 6  ;;  %v1036_v23 = vrot.slane %v1001_v57, 5  ;;  %2383 = vrot.lane.b32.xlu2 %v2368_v12, %s7294_s15  ;;  %v1058_v25 = vsel %vm1040_vm5, %v1057_v22, %v1056_v16  ;;  %v1039_v27 = vrot.slane %v1002_v1, 4 }
  0xe4   : > { %v1032_v26 = vsel %vm1031_vm2, %v1030_v10, %v998_v56  ;;  %v1042_v28 = vrot.slane %v1003_v2, 3  ;;  %v1060_v30 = vsel %vm1043_vm6, %v1059_v61, %v1058_v25  ;;  %v1045_v32 = vrot.slane %v1004_v7, 2 }
  0xe5   : > { %v1035_v31 = vsel %vm1034_vm3, %v1033_v21, %v1032_v26  ;;  %v1048_v33 = vrot.slane %v1005_v9, 1  ;;  %v1062_v24 = vsel %vm1046_vm7, %v1061_v62, %v1060_v30  ;;  %v606_v53 = vshrl.u32 %v605_v19, 7  ;;  %v2031_v30 = vld [vmem:[#allocation2 + $0x11] sm:$0x1] }
  0xe6   : > { %v1038_v29 = vsel %vm1037_vm4, %v1036_v23, %v1035_v31  ;;  %v609_v63 = vand.u32 127, %v605_v19  ;;  %v1064_v34 = vsel %vm1049_vm8, %v1063_v6, %v1062_v24  ;;  %v7296_v36 = vmov 0.0   ;;  %v2032_v23 = vld [vmem:[#allocation2 + $0x13] sm:$0x1]  ;;  %v2034_v31 = vld [vmem:[#allocation2 + $0x17] sm:$0x1] }
  0xe7   : > { %2739 = vrot.lane.b32.xlu0 %v7639_v5, %s7295_s21  ;;  %v1041_v54 = vsel %vm1040_vm5, %v1039_v27, %v1038_v29  ;;  %v1074_v0 = vsel %vm1065_vm9, %v1064_v34, 0  ;;  %v607_v47 = vadd.s32 8, %v606_v53  ;;  %v2033_v27 = vld [vmem:[#allocation2 + $0x15] sm:$0x1]  ;;  %v2035_v29 = vld [vmem:[#allocation2 + $0x19] sm:$0x1] }
  0xe8   : > { %2737 = vrot.lane.b32.xlu1 %v2722_v8, %s7295_s21  ;;  %v1044_v37 = vsel %vm1043_vm6, %v1042_v28, %v1041_v54  ;;  %vm610_vm10 = vcmp.eq.s32.totalorder %v606_v53, %v609_v63  ;;  %v1090_v35 = vand.u32 4294901760, %v1074_v0  ;;  %v2069_v28 = vrot.slane %v2032_v23, 7  ;;  %v2036_v34 = vld [vmem:[#allocation2 + $0x1b] sm:$0x1] }
  0xe9   : > { %v1047_v40 = vsel %vm1046_vm7, %v1045_v32, %v1044_v37  ;;  %v7711_v38 = vsel %vm610_vm10, 1.0, %v7296_v36  ;;  %vm611_vm11 = vcmp.eq.s32.totalorder %v607_v47, %v609_v63  ;;  %v2071_v32 = vrot.slane %v2033_v27, 6  ;;  %v2024_v37 = vld [vmem:[#allocation2 + $0x3] sm:$0x1] }
  0xea   : > { %v1050_v19 = vsel %vm1049_vm8, %v1048_v33, %v1047_v40  ;;  %v1067_v5 = vsel %vm1065_vm9, %v7711_v38, 0  ;;  %1091 = vmatpush.xpose.msra.mxu0 %v1090_v35  ;;  %v1126_v43 = vsub.f32 %v1074_v0, %v1090_v35  ;;  %1192 = vmatpush.xpose.msra.mxu3 %v1090_v35  ;;  %v7731_v48 = vsel %vm611_vm11, 1.0, %v7296_v36  ;;  %v2037_v36 = vld [vmem:[#allocation2 + $0x1d] sm:$0x1] }
  0xeb   : > { %v1072_v39 = vsel %vm1065_vm9, %v1050_v19, 0  ;;  %v7717_v42 = vsub.f32 %v1067_v5, %v1067_v5  ;;  %v1070_v49 = vsel %vm1065_vm9, %v7731_v48, 0  ;;  %v2070_v53 = vsel %vm1031_vm2, %v2069_v28, %v2031_v30 }
  0xec   : > { %v1092_v14 = vand.u32 4294901760, %v1072_v39  ;;  %v1127_v17 = vand.u32 4294901760, %v1126_v43  ;;  %1162 = vmatpush.xpose.msra.mxu2 %v1126_v43  ;;  %v7737_v50 = vsub.f32 %v1070_v49, %v1070_v49  ;;  %v2073_v63 = vrot.slane %v2034_v31, 5  ;;  %v2027_v49 = vld [vmem:[#allocation2 + $0x9] sm:$0x1] }
  0xed   : > { %v7720_v20 = vand.u32 4294901760, %v7717_v42  ;;  %v2072_v54 = vsel %vm1034_vm3, %v2071_v32, %v2070_v53  ;;  %v2075_v0 = vrot.slane %v2035_v29, 4  ;;  %v2077_v5 = vrot.slane %v2036_v34, 3 }
  0xee   : > { %v1132_v41 = vsub.f32 %v1072_v39, %v1092_v14  ;;  %v1128_v44 = vsub.f32 %v1126_v43, %v1127_v17  ;;  %1093 = vmatpush.xpose.msra.mxu0 %v1092_v14  ;;  %1194 = vmatpush.xpose.msra.mxu3 %v1092_v14  ;;  %v7740_v51 = vand.u32 4294901760, %v7737_v50  ;;  %v2074_v19 = vsel %vm1037_vm4, %v2073_v63, %v2072_v54  ;;  %v2025_v43 = vld [vmem:[#allocation2 + $0x5] sm:$0x1]  ;;  %v2038_v39 = vld [vmem:[#allocation2 + $0x1f] sm:$0x1] }
  0xef   : > { %v1097_v45 = vsub.f32 %v7717_v42, %v7720_v20 }
  0xf0   : > { %v1133_v46 = vand.u32 4294901760, %v1132_v41  ;;  %v1129_v60 = vand.u32 4294901760, %v1128_v44  ;;  %1165 = vmatpush.xpose.msra.mxu2 %v1132_v41  ;;  %v1105_v56 = vsub.f32 %v7737_v50, %v7740_v51  ;;  %v2055_v44 = vrot.slane %v2024_v37, 7 }
  0xf1   : > { %v7724_v8 = vand.u32 4294901760, %v1097_v45  ;;  %1198 = vmatmul.f32.vlgmr.msra.gmra.mxu3 %v7720_v20 }
  0xf2   : > { %1225 = vmatpush.xpose.msrb.mxu0 %v1127_v17  ;;  %v1134_v15 = vsub.f32 %v1132_v41, %v1133_v46  ;;  %1130 = vmatpush.xpose.msra.mxu1 %v1129_v60  ;;  %v7746_v52 = vand.u32 4294901760, %v1105_v56  ;;  %v2079_v17 = vrot.slane %v2037_v36, 2  ;;  %v2023_v41 = vld [vmem:[#allocation2 + $0x1] sm:$0x1]  ;;  %v2028_v56 = vld [vmem:[#allocation2 + $0xb] sm:$0x1] }
  0xf3   : > { %1099 = vmatmul.f32.vlgmr.msra.gmra.mxu0 %v7724_v8  ;;  %1168 = vmatmul.f32.vlgmr.msra.gmra.mxu2 %v7717_v42 }
  0xf4   : > { %v1135_v18 = vand.u32 4294901760, %v1134_v15  ;;  %v2081_v15 = vrot.slane %v2038_v39, 1 }
  0xf6   : > { %1229 = vmatpush.xpose.msrb.mxu0 %v1133_v46  ;;  %1136 = vmatpush.xpose.msra.mxu1 %v1135_v18  ;;  %v2026_v18 = vld [vmem:[#allocation2 + $0x7] sm:$0x1] }
  0xf9   : > { %6933 = vmatmul.msk.f32.vlgmr.msra.gmra.mxu1 %vm1065_vm9, %v7711_v38  ;;  %1204 = vmatmul.f32.gmra.mxu3 %v7740_v51 }
  0xfa   : > { %1254 = vmatpush.xpose.msrb.mxu1 %v1090_v35 }
  0xfb   : > { %1173 = vmatmul.f32.gmra.mxu2 %v7737_v50  ;;  %1107 = vmatmul.f32.gmra.mxu0 %v7746_v52 }
  0xfe   : > { %1256 = vmatpush.xpose.msrb.mxu1 %v1092_v14  ;;  %v2076_v14 = vsel %vm1040_vm5, %v2075_v0, %v2074_v19 }
  0xff   : > { %v2078_v60 = vsel %vm1043_vm6, %v2077_v5, %v2076_v14 }
 0x100   : > { %v2080_v47 = vsel %vm1046_vm7, %v2079_v17, %v2078_v60 }
 0x101   : > { %6934 = vmatmul.msk.f32.gmra.mxu1 %vm1065_vm9, %v7731_v48 }
 0x103   : > { %6935 = vmatmul.msk.f32.vlgmr.msrb.gmra.mxu0 %vm1065_vm9, %v7711_v38 }
 0x109   : > { %6937 = vmatmul.msk.f32.vlgmr.msrb.gmra.mxu1 %vm1065_vm9, %v7711_v38 }
 0x10b   : > { %6936 = vmatmul.msk.f32.gmra.mxu0 %vm1065_vm9, %v7731_v48 }
 0x111   : > { %6938 = vmatmul.msk.f32.gmra.mxu1 %vm1065_vm9, %v7731_v48 }
 0x123   : > { %v2386_v23 = vpop.permute.xlu2 %2385 }
 0x124   : > { %v2389_v28 = vsel %vm1065_vm9, %v2386_v23, 0 }
 0x131   : > { %v1376_v11 = vpop.permute.xlu0 %1375 }
 0x132   : > { %v1379_v13 = vsel %vm1065_vm9, %v1376_v11, 0  ;;  %v1731_v61 = vpop.permute.xlu1 %1730  ;;  %v2056_v11 = vsel %vm1031_vm2, %v2055_v44, %v2023_v41 }
 0x133   : > { %v7758_v55 = vand.u32 4294901760, %v1379_v13  ;;  %v1734_v62 = vsel %vm1065_vm9, %v1731_v61, 0  ;;  %v2063_v61 = vrot.slane %v2028_v56, 3 }
 0x134   : > { %v7764_v1 = vand.u32 4294901760, %v1734_v62 }
 0x135   : > { %v1431_v22 = vsub.f32 %v1379_v13, %v7758_v55  ;;  %1396 = vmatpush.xpose.msrb.mxu2 %v7758_v55  ;;  %1497 = vmatpush.xpose.msra.mxu1 %v7758_v55  ;;  %v2057_v13 = vrot.slane %v2025_v43, 6 }
 0x136   : > { %v7767_v2 = vsub.f32 %v1734_v62, %v7764_v1 }
 0x137   : > { %1467 = vmatpush.xpose.msra.mxu0 %v1431_v22  ;;  %v1432_v57 = vand.u32 4294901760, %v1431_v22 }
 0x138   : > { %v1787_v3 = vand.u32 4294901760, %v7767_v2 }
 0x139   : > { %v1433_v58 = vsub.f32 %v1431_v22, %v1432_v57  ;;  %v2059_v22 = vrot.slane %v2026_v18, 5 }
 0x13a   : > { %v1788_v4 = vsub.f32 %v7767_v2, %v1787_v3 }
 0x13b   : > { %v1434_v59 = vand.u32 4294901760, %v1433_v58  ;;  %v2029_v58 = vld [vmem:[#allocation2 + $0xd] sm:$0x1] }
 0x13c   : > { %v1789_v12 = vand.u32 4294901760, %v1788_v4  ;;  %v2030_v4 = vld [vmem:[#allocation2 + $0xf] sm:$0x1] }
 0x13d   : > { %1435 = vmatpush.xpose.msrb.mxu3 %v1434_v59  ;;  %v2061_v59 = vrot.slane %v2027_v49, 4 }
 0x151   : > { %v1374_v6 = vpop.permute.xlu0 %1373 }
 0x152   : > { %v1729_v7 = vpop.permute.xlu1 %1728  ;;  %v1377_v9 = vsel %vm1065_vm9, %v1374_v6, 0  ;;  %v2058_v6 = vsel %vm1034_vm3, %v2057_v13, %v2056_v11 }
 0x153   : > { %v1732_v10 = vsel %vm1065_vm9, %v1729_v7, 0  ;;  %v7775_v16 = vand.u32 4294901760, %v1377_v9  ;;  %v2065_v7 = vrot.slane %v2029_v58, 2 }
 0x154   : > { %v7777_v21 = vand.u32 4294901760, %v1732_v10 }
 0x155   : > { %v1437_v25 = vsub.f32 %v1377_v9, %v7775_v16  ;;  %1398 = vmatpush.xpose.msrb.mxu2 %v7775_v16  ;;  %1499 = vmatpush.xpose.msra.mxu1 %v7775_v16 }
 0x156   : > { %v7783_v26 = vsub.f32 %v1732_v10, %v7777_v21  ;;  %v2060_v10 = vsel %vm1037_vm4, %v2059_v22, %v2058_v6 }
 0x157   : > { %1470 = vmatpush.xpose.msra.mxu0 %v1437_v25  ;;  %v1438_v33 = vand.u32 4294901760, %v1437_v25 }
 0x158   : > { %v1793_v24 = vand.u32 4294901760, %v7783_v26  ;;  %1404 = vmatmul.f32.vlgmr.msrb.gmra.mxu2 %v7724_v8  ;;  %1503 = vmatmul.f32.vlgmr.msra.gmra.mxu1 %v7720_v20 }
 0x159   : > { %1530 = vmatpush.xpose.msra.mxu2 %v1432_v57  ;;  %1790 = vmatpush.xpose.msrb.mxu1 %v1789_v12  ;;  %v1439_v35 = vsub.f32 %v1437_v25, %v1438_v33  ;;  %v2082_v57 = vsel %vm1049_vm8, %v2081_v15, %v2080_v47  ;;  %v2067_v12 = vrot.slane %v2030_v4, 1  ;;  %v2740_v43 = vpop.permute.xlu0 %2739 }
 0x15a   : > { %v1794_v40 = vsub.f32 %v7783_v26, %v1793_v24  ;;  %1473 = vmatmul.f32.vlgmr.msra.gmra.mxu0 %v7717_v42  ;;  %v2085_v62 = vsel %vm1065_vm9, %v2082_v57, 0  ;;  %v2743_v39 = vsel %vm1065_vm9, %v2740_v43, 0  ;;  %v2738_v14 = vpop.permute.xlu1 %2737 }
 0x15b   : > { %1751 = vmatpush.xpose.msrb.mxu0 %v7764_v1  ;;  %v1440_v45 = vand.u32 4294901760, %v1439_v35  ;;  %v7810_v9 = vand.u32 4294901760, %v2085_v62  ;;  %v2759_v17 = vand.u32 4294901760, %v2743_v39  ;;  %v2741_v41 = vsel %vm1065_vm9, %v2738_v14, 0 }
 0x15c   : > { %v1795_v46 = vand.u32 4294901760, %v1794_v40 }
 0x15d   : > { %1534 = vmatpush.xpose.msra.mxu2 %v1438_v33  ;;  %1441 = vmatpush.xpose.msrb.mxu3 %v1440_v45  ;;  %v2795_v44 = vsub.f32 %v2743_v39, %v2759_v17  ;;  %v2761_v45 = vand.u32 4294901760, %v2741_v41 }
 0x15e   : > { %1796 = vmatpush.xpose.msrb.mxu1 %v1795_v46 }
 0x15f   : > { %1753 = vmatpush.xpose.msrb.mxu0 %v7777_v21  ;;  %v2796_v46 = vand.u32 4294901760, %v2795_v44  ;;  %v2801_v60 = vsub.f32 %v2741_v41, %v2761_v45 }
 0x160   : > { %1412 = vmatmul.f32.gmra.mxu2 %v7746_v52  ;;  %6939 = vmatmul.msk.f32.vlgmr.msrb.gmra.mxu3 %vm1065_vm9, %v7711_v38 }
 0x161   : > { %1822 = vmatpush.xpose.msrb.mxu2 %v7767_v2  ;;  %1559 = vmatpush.xpose.msra.mxu3 %v7758_v55  ;;  %v2062_v55 = vsel %vm1040_vm5, %v2061_v59, %v2060_v10  ;;  %v2137_v2 = vsub.f32 %v2085_v62, %v7810_v9  ;;  %v2797_v18 = vsub.f32 %v2795_v44, %v2796_v46  ;;  %v2802_v47 = vand.u32 4294901760, %v2801_v60 }
 0x162   : > { %1914 = vmatpush.xpose.msra.mxu1 %v7764_v1  ;;  %1478 = vmatmul.f32.gmra.mxu0 %v7737_v50 }
 0x163   : > { %1885 = vmatpush.xpose.msra.mxu0 %v1787_v3  ;;  %1509 = vmatmul.f32.gmra.mxu1 %v7740_v51  ;;  %v2064_v3 = vsel %vm1043_vm6, %v2063_v61, %v2062_v55  ;;  %v2138_v32 = vand.u32 4294901760, %v2137_v2  ;;  %v2798_v49 = vand.u32 4294901760, %v2797_v18  ;;  %v2803_v56 = vsub.f32 %v2801_v60, %v2802_v47 }
 0x164   : > { %v2066_v25 = vsel %vm1046_vm7, %v2065_v7, %v2064_v3 }
 0x165   : > { %1825 = vmatpush.xpose.msrb.mxu2 %v7783_v26  ;;  %1561 = vmatpush.xpose.msra.mxu3 %v7775_v16  ;;  %v2068_v27 = vsel %vm1049_vm8, %v2067_v12, %v2066_v25  ;;  %v7830_v16 = vand.u32 4294901760, %v2389_v28  ;;  %v2139_v26 = vsub.f32 %v2137_v2, %v2138_v32  ;;  %v2804_v22 = vand.u32 4294901760, %v2803_v56 }
 0x166   : > { %1916 = vmatpush.xpose.msra.mxu1 %v7777_v21  ;;  %v2083_v30 = vsel %vm1065_vm9, %v2068_v27, 0 }
 0x167   : > { %1889 = vmatpush.xpose.msra.mxu0 %v1793_v24  ;;  %v2103_v31 = vand.u32 4294901760, %v2083_v30  ;;  %v2441_v29 = vsub.f32 %v2389_v28, %v7830_v16  ;;  %v2140_v53 = vand.u32 4294901760, %v2139_v26 }
 0x168   : > { %6940 = vmatmul.msk.f32.gmra.mxu3 %vm1065_vm9, %v7731_v48  ;;  %6941 = vmatmul.msk.f32.vlgmr.msra.gmra.mxu2 %vm1065_vm9, %v7711_v38 }
 0x169   : > { %1852 = vmatpush.xpose.msrb.mxu3 %v7764_v1  ;;  %v2143_v33 = vsub.f32 %v2083_v30, %v2103_v31  ;;  %v2384_v1 = vpop.permute.xlu2 %2383  ;;  %2102 = vmatpush.xpose.msra.mxu2 %v7810_v9  ;;  %v2442_v54 = vand.u32 4294901760, %v2441_v29 }
 0x16a   : > { %1759 = vmatmul.f32.vlgmr.msrb.gmra.mxu0 %v7724_v8 }
 0x16b   : > { %6945 = vmatmul.msk.f32.vlgmr.msrb.gmra.mxu1 %vm1065_vm9, %v7711_v38  ;;  %v2144_v24 = vand.u32 4294901760, %v2143_v33  ;;  %2173 = vmatpush.xpose.msrb.mxu0 %v2137_v2  ;;  %v2443_v35 = vsub.f32 %v2441_v29, %v2442_v54 }
 0x16c   : > { %2203 = vmatpush.xpose.msrb.mxu1 %v7810_v9 }
 0x16d   : > { %1854 = vmatpush.xpose.msrb.mxu3 %v7777_v21  ;;  %v2387_v21 = vsel %vm1065_vm9, %v2384_v1, 0  ;;  %2104 = vmatpush.xpose.msra.mxu2 %v2103_v31  ;;  %v2145_v63 = vsub.f32 %v2143_v33, %v2144_v24  ;;  %v2444_v36 = vand.u32 4294901760, %v2443_v35 }
 0x16e   : > { %v2407_v34 = vand.u32 4294901760, %v2387_v21 }
 0x16f   : > { %2176 = vmatpush.xpose.msrb.mxu0 %v2143_v33  ;;  %v2146_v0 = vand.u32 4294901760, %v2145_v63 }
 0x170   : > { %2205 = vmatpush.xpose.msrb.mxu1 %v2103_v31  ;;  %6942 = vmatmul.msk.f32.gmra.mxu2 %vm1065_vm9, %v7731_v48  ;;  %v2447_v37 = vsub.f32 %v2387_v21, %v2407_v34  ;;  %v1100_v15 = vpop.f32.mrf.mxu0 }
 0x171   : > { %6943 = vmatmul.msk.f32.vlgmr.msra.gmra.mxu3 %vm1065_vm9, %v7711_v38 }
 0x172   : > { %2141 = vmatpush.xpose.msra.mxu3 %v2140_v53  ;;  %1767 = vmatmul.f32.gmra.mxu0 %v7746_v52  ;;  %v2448_v40 = vand.u32 4294901760, %v2447_v37 }
 0x173   : > { %6946 = vmatmul.msk.f32.gmra.mxu1 %vm1065_vm9, %v7731_v48 }
 0x174   : > { %v2449_v19 = vsub.f32 %v2447_v37, %v2448_v40  ;;  %v1199_v62 = vpop.f32.mrf.mxu3 }
 0x176   : > { %2147 = vmatpush.xpose.msra.mxu3 %v2146_v0  ;;  %v2450_v5 = vand.u32 4294901760, %v2449_v19  ;;  %v1139_v11 = vpop.f32.mrf.mxu1  ;;  %v1169_v59 = vpop.f32.mrf.mxu2 }
 0x177   : > { %v1140_v57 = vadd.f32 %v1139_v11, %v1100_v15 }
 0x178   : > { %1828 = vmatmul.f32.vlgmr.msrb.gmra.mxu2 %v7717_v42  ;;  %v1108_v13 = vpop.f32.mrf.mxu0 }
 0x179   : > { %6944 = vmatmul.msk.f32.gmra.mxu3 %vm1065_vm9, %v7731_v48  ;;  %2236 = vmatpush.xpose.msrb.mxu2 %v2138_v32  ;;  %v1170_v61 = vadd.f32 %v1169_v59, %v1140_v57 }
 0x17a   : > { %6947 = vmatmul.msk.f32.vlgmr.msra.gmra.mxu0 %vm1065_vm9, %v7711_v38 }
 0x17b   : > { %6949 = vmatmul.msk.f32.vlgmr.msra.gmra.mxu1 %vm1065_vm9, %v7711_v38  ;;  %2406 = vmatpush.xpose.msra.mxu0 %v7830_v16  ;;  %v1200_v6 = vadd.f32 %v1199_v62, %v1170_v61 }
 0x17c   : > { %2445 = vmatpush.xpose.msra.mxu1 %v2444_v36  ;;  %v1205_v23 = vpop.f32.mrf.mxu3 }
 0x17d   : > { %2240 = vmatpush.xpose.msrb.mxu2 %v2144_v24 }
 0x17e   : > { %v1143_v58 = vpop.f32.mrf.mxu1  ;;  %v1174_v12 = vpop.f32.mrf.mxu2 }
 0x17f   : > { %2408 = vmatpush.xpose.msra.mxu0 %v2407_v34  ;;  %v1144_v7 = vadd.f32 %v1143_v58, %v1108_v13 }
 0x180   : > { %2451 = vmatpush.xpose.msra.mxu1 %v2450_v5  ;;  %1833 = vmatmul.f32.gmra.mxu2 %v7737_v50  ;;  %v1232_v4 = vpop.f32.mrf.mxu0 }
 0x181   : > { %1858 = vmatmul.f32.vlgmr.msrb.gmra.mxu3 %v7720_v20  ;;  %v1175_v55 = vadd.f32 %v1174_v12, %v1144_v7 }
 0x182   : > { %2265 = vmatpush.xpose.msrb.mxu3 %v7810_v9  ;;  %6948 = vmatmul.msk.f32.gmra.mxu0 %vm1065_vm9, %v7731_v48  ;;  %v1233_v9 = vadd.f32 %v1232_v4, %v1200_v6 }
 0x183   : > { %6950 = vmatmul.msk.f32.gmra.mxu1 %vm1065_vm9, %v7731_v48  ;;  %v1206_v25 = vadd.f32 %v1205_v23, %v1175_v55 }
 0x186   : > { %2267 = vmatpush.xpose.msrb.mxu3 %v2103_v31  ;;  %v1259_v10 = vpop.f32.mrf.mxu1 }
 0x187   : > { %v1260_v2 = vadd.f32 %v1259_v10, %v1233_v9 }
 0x188   : > { %2110 = vmatmul.f32.vlgmr.msra.gmra.mxu2 %v7724_v8  ;;  %v1236_v3 = vpop.f32.mrf.mxu0 }
 0x189   : > { %1864 = vmatmul.f32.gmra.mxu3 %v7740_v51  ;;  %2477 = vmatpush.xpose.msra.mxu2 %v2441_v29  ;;  %v1237_v27 = vadd.f32 %v1236_v3, %v1206_v25  ;;  %1297 = vst.msk [vmem:[#allocation3] sm:$0x1] %vm1296_vm12, %v1260_v2  ;;  %v1270_v28 = vrot.slane %v1260_v2, 3  ;;  %v1273_v30 = vrot.slane %v1260_v2, 6  ;;  %v1269_v31 = vrot.slane %v1260_v2, 2 }
 0x18a   : > { %2179 = vmatmul.f32.vlgmr.msrb.gmra.mxu0 %v7717_v42  ;;  %v1272_v1 = vrot.slane %v1260_v2, 5  ;;  %v1271_v26 = vrot.slane %v1260_v2, 4  ;;  %v1274_v24 = vrot.slane %v1260_v2, 7 }
 0x18b   : > { %2209 = vmatmul.f32.vlgmr.msrb.gmra.mxu1 %v7720_v20  ;;  %2540 = vmatpush.xpose.msrb.mxu0 %v2442_v54  ;;  %1300 = vst.msk [vmem:[#allocation3 + $0x6] sm:$0x1] %vm1296_vm12, %v1270_v28 }
 0x18c   : > { %2569 = vmatpush.xpose.msrb.mxu1 %v7830_v16  ;;  %1303 = vst.msk [vmem:[#allocation3 + $0xc] sm:$0x1] %vm1296_vm12, %v1273_v30 }
 0x18d   : > { %2480 = vmatpush.xpose.msra.mxu2 %v2447_v37  ;;  %1299 = vst.msk [vmem:[#allocation3 + $0x4] sm:$0x1] %vm1296_vm12, %v1269_v31 }
 0x18e   : > { %v1263_v32 = vpop.f32.mrf.mxu1  ;;  %1302 = vst.msk [vmem:[#allocation3 + $0xa] sm:$0x1] %vm1296_vm12, %v1272_v1 }
 0x18f   : > { %2544 = vmatpush.xpose.msrb.mxu0 %v2448_v40  ;;  %v1264_v33 = vadd.f32 %v1263_v32, %v1237_v27  ;;  %1301 = vst.msk [vmem:[#allocation3 + $0x8] sm:$0x1] %vm1296_vm12, %v1271_v26 }
 0x190   : > { %2571 = vmatpush.xpose.msrb.mxu1 %v2407_v34  ;;  %2118 = vmatmul.f32.gmra.mxu2 %v7746_v52  ;;  %1304 = vst.msk [vmem:[#allocation3 + $0xe] sm:$0x1] %vm1296_vm12, %v1274_v24 }
 0x191   : > { %6951 = vmatmul.msk.f32.vlgmr.msra.gmra.mxu3 %vm1065_vm9, %v7711_v38  ;;  %1305 = vst.msk [vmem:[#allocation3 + $0x10] sm:$0x1] %vm1296_vm12, %v1264_v33  ;;  %v1275_v29 = vrot.slane %v1264_v33, 1  ;;  %v1278_v21 = vrot.slane %v1264_v33, 4  ;;  %v1276_v53 = vrot.slane %v1264_v33, 2  ;;  %v1277_v63 = vrot.slane %v1264_v33, 3 }
 0x192   : > { %2507 = vmatpush.xpose.msra.mxu3 %v7830_v16  ;;  %2184 = vmatmul.f32.gmra.mxu0 %v7737_v50  ;;  %v1268_v16 = vrot.slane %v1260_v2, 1  ;;  %v1279_v54 = vrot.slane %v1264_v33, 5  ;;  %v1280_v0 = vrot.slane %v1264_v33, 6 }
 0x193   : > { %2215 = vmatmul.f32.gmra.mxu1 %v7740_v51  ;;  %1306 = vst.msk [vmem:[#allocation3 + $0x12] sm:$0x1] %vm1296_vm12, %v1275_v29 }
 0x194   : > { %1298 = vst.msk [vmem:[#allocation3 + $0x2] sm:$0x1] %vm1296_vm12, %v1268_v16 }
 0x195   : > { %1309 = vst.msk [vmem:[#allocation3 + $0x18] sm:$0x1] %vm1296_vm12, %v1278_v21 }
 0x196   : > { %2509 = vmatpush.xpose.msra.mxu3 %v2407_v34  ;;  %v1281_v34 = vrot.slane %v1264_v33, 7  ;;  %1307 = vst.msk [vmem:[#allocation3 + $0x14] sm:$0x1] %vm1296_vm12, %v1276_v53 }
 0x197   : > { %1308 = vst.msk [vmem:[#allocation3 + $0x16] sm:$0x1] %vm1296_vm12, %v1277_v63 }
 0x198   : > { %6953 = vmatmul.msk.f32.vlgmr.msrb.gmra.mxu2 %vm1065_vm9, %v7711_v38  ;;  %1312 = vst.msk [vmem:[#allocation3 + $0x1e] sm:$0x1] %vm1296_vm12, %v1281_v34 }
 0x199   : > { %6952 = vmatmul.msk.f32.gmra.mxu3 %vm1065_vm9, %v7731_v48  ;;  %2760 = vmatpush.xpose.msrb.mxu2 %v2759_v17  ;;  %1310 = vst.msk [vmem:[#allocation3 + $0x1a] sm:$0x1] %vm1296_vm12, %v1279_v54 }
 0x19a   : > { %2414 = vmatmul.f32.vlgmr.msra.gmra.mxu0 %v7724_v8  ;;  %1311 = vst.msk [vmem:[#allocation3 + $0x1c] sm:$0x1] %vm1296_vm12, %v1280_v0 }
 0x19b   : > { %6957 = vmatmul.msk.f32.vlgmr.msra.gmra.mxu1 %vm1065_vm9, %v7711_v38  ;;  %2831 = vmatpush.xpose.msra.mxu0 %v2795_v44 }
 0x19c   : > { %2861 = vmatpush.xpose.msra.mxu1 %v2759_v17 }
 0x19d   : > { %2762 = vmatpush.xpose.msrb.mxu2 %v2761_v45 }
 0x19f   : > { %2834 = vmatpush.xpose.msra.mxu0 %v2801_v60 }
 0x1a0   : > { %2863 = vmatpush.xpose.msra.mxu1 %v2761_v45  ;;  %6954 = vmatmul.msk.f32.gmra.mxu2 %vm1065_vm9, %v7731_v48 }
 0x1a1   : > { %6955 = vmatmul.msk.f32.vlgmr.msrb.gmra.mxu3 %vm1065_vm9, %v7711_v38 }
 0x1a2   : > { %2799 = vmatpush.xpose.msrb.mxu3 %v2798_v49  ;;  %2422 = vmatmul.f32.gmra.mxu0 %v7746_v52 }
 0x1a3   : > { %6958 = vmatmul.msk.f32.gmra.mxu1 %vm1065_vm9, %v7731_v48 }
 0x1a6   : > { %2805 = vmatpush.xpose.msrb.mxu3 %v2804_v22 }
 0x1a8   : > { %2483 = vmatmul.f32.vlgmr.msra.gmra.mxu2 %v7717_v42 }
 0x1a9   : > { %6956 = vmatmul.msk.f32.gmra.mxu3 %vm1065_vm9, %v7731_v48  ;;  %2894 = vmatpush.xpose.msra.mxu2 %v2796_v46 }
 0x1aa   : > { %6959 = vmatmul.msk.f32.vlgmr.msrb.gmra.mxu0 %vm1065_vm9, %v7711_v38 }
 0x1ab   : > { %6961 = vmatmul.msk.f32.vlgmr.msrb.gmra.mxu1 %vm1065_vm9, %v7711_v38 }
 0x1ad   : > { %2898 = vmatpush.xpose.msra.mxu2 %v2802_v47 }
 0x1b0   : > { %2488 = vmatmul.f32.gmra.mxu2 %v7737_v50 }
 0x1b1   : > { %2513 = vmatmul.f32.vlgmr.msra.gmra.mxu3 %v7720_v20 }
 0x1b2   : > { %2923 = vmatpush.xpose.msra.mxu3 %v2759_v17  ;;  %6960 = vmatmul.msk.f32.gmra.mxu0 %vm1065_vm9, %v7731_v48 }
 0x1b3   : > { %6962 = vmatmul.msk.f32.gmra.mxu1 %vm1065_vm9, %v7731_v48 }
 0x1b6   : > { %2925 = vmatpush.xpose.msra.mxu3 %v2761_v45 }
 0x1b8   : > { %2768 = vmatmul.f32.vlgmr.msrb.gmra.mxu2 %v7724_v8 }
 0x1b9   : > { %2519 = vmatmul.f32.gmra.mxu3 %v7740_v51 }
 0x1ba   : > { %2837 = vmatmul.f32.vlgmr.msra.gmra.mxu0 %v7717_v42 }
 0x1bb   : > { %2867 = vmatmul.f32.vlgmr.msra.gmra.mxu1 %v7720_v20 }
 0x1c0   : > { %2776 = vmatmul.f32.gmra.mxu2 %v7746_v52 }
 0x1c1   : > { %6963 = vmatmul.msk.f32.vlgmr.msrb.gmra.mxu3 %vm1065_vm9, %v7711_v38 }
 0x1c2   : > { %2842 = vmatmul.f32.gmra.mxu0 %v7737_v50 }
 0x1c3   : > { %2873 = vmatmul.f32.gmra.mxu1 %v7740_v51 }
 0x1c8   : > { %6965 = vmatmul.msk.f32.vlgmr.msra.gmra.mxu2 %vm1065_vm9, %v7711_v38 }
 0x1c9   : > { %6964 = vmatmul.msk.f32.gmra.mxu3 %vm1065_vm9, %v7731_v48 }
 0x1d0   : > { %6966 = vmatmul.msk.f32.gmra.mxu2 %vm1065_vm9, %v7731_v48 }
 0x1d1   : > { %6967 = vmatmul.msk.f32.vlgmr.msra.gmra.mxu3 %vm1065_vm9, %v7711_v38 }
 0x1d5   : > { %v1504_v37 = vpop.f32.mrf.mxu1 }
 0x1d7   : > { %v1474_v35 = vpop.f32.mrf.mxu0 }
 0x1d9   : > { %6968 = vmatmul.msk.f32.gmra.mxu3 %vm1065_vm9, %v7731_v48 }
 0x1db   : > { %v1405_v40 = vpop.f32.mrf.mxu2 }
 0x1df   : > { %v1479_v19 = vpop.f32.mrf.mxu0 }
 0x1e0   : > { %v1510_v36 = vpop.f32.mrf.mxu1 }
 0x1e3   : > { %v1413_v5 = vpop.f32.mrf.mxu2  ;;  %v1444_v43 = vpop.f32.mrf.mxu3 }
 0x1e4   : > { %v1445_v17 = vadd.f32 %v1444_v43, %v1405_v40 }
 0x1e6   : > { %v1475_v45 = vadd.f32 %v1474_v35, %v1445_v17 }
 0x1e7   : > { %v1760_v14 = vpop.f32.mrf.mxu0 }
 0x1e8   : > { %v1799_v39 = vpop.f32.mrf.mxu1  ;;  %v1505_v15 = vadd.f32 %v1504_v37, %v1475_v45 }
 0x1e9   : > { %v1800_v55 = vadd.f32 %v1799_v39, %v1760_v14 }
 0x1eb   : > { %v1448_v41 = vpop.f32.mrf.mxu3  ;;  %v1537_v44 = vpop.f32.mrf.mxu2 }
 0x1ec   : > { %v1538_v18 = vadd.f32 %v1537_v44, %v1505_v15  ;;  %v1449_v58 = vadd.f32 %v1448_v41, %v1413_v5 }
 0x1ee   : > { %v1480_v9 = vadd.f32 %v1479_v19, %v1449_v58 }
 0x1ef   : > { %v1768_v60 = vpop.f32.mrf.mxu0 }
 0x1f0   : > { %v1803_v46 = vpop.f32.mrf.mxu1  ;;  %v1511_v2 = vadd.f32 %v1510_v36, %v1480_v9 }
 0x1f1   : > { %v1804_v19 = vadd.f32 %v1803_v46, %v1768_v60 }
 0x1f3   : > { %v1541_v47 = vpop.f32.mrf.mxu2 }
 0x1f4   : > { %v1564_v49 = vpop.f32.mrf.mxu3  ;;  %v1542_v28 = vadd.f32 %v1541_v47, %v1511_v2 }
 0x1f5   : > { %v1565_v56 = vadd.f32 %v1564_v49, %v1538_v18 }
 0x1f7   : > { %v1587_v11 = vperm.slane %v1565_v56, 0  ;;  %v1574_v13 = vrot.slane %v1565_v56, 2  ;;  %v1573_v22 = vrot.slane %v1565_v56, 1  ;;  %v1892_v57 = vpop.f32.mrf.mxu0  ;;  %v1575_v4 = vrot.slane %v1565_v56, 3 }
 0x1f8   : > { %v1919_v62 = vpop.f32.mrf.mxu1  ;;  %v1577_v10 = vrot.slane %v1565_v56, 5  ;;  %v1576_v12 = vrot.slane %v1565_v56, 4  ;;  %v1578_v31 = vrot.slane %v1565_v56, 6  ;;  %v1579_v24 = vrot.slane %v1565_v56, 7 }
 0x1f9   : > { %1603 = vrot.lane.b32.xlu2 %v1587_v11, %s7297_s18  ;;  %v1589_v59 = vperm.slane %v1574_v13, 0  ;;  %v1588_v61 = vperm.slane %v1573_v22, 0  ;;  %v1590_v23 = vperm.slane %v1575_v4, 0 }
 0x1fa   : > { %v1592_v3 = vperm.slane %v1577_v10, 0  ;;  %v1591_v25 = vperm.slane %v1576_v12, 0  ;;  %v1593_v21 = vperm.slane %v1578_v31, 0  ;;  %v1594_v34 = vperm.slane %v1579_v24, 0 }
 0x1fb   : > { %1607 = vrot.lane.b32.xlu1 %v1589_v59, %s7297_s18  ;;  %1605 = vrot.lane.b32.xlu0 %v1588_v61, %s7297_s18  ;;  %v1829_v7 = vpop.f32.mrf.mxu2 }
 0x1fc   : > { %v1568_v6 = vpop.f32.mrf.mxu3  ;;  %v1830_v30 = vadd.f32 %v1829_v7, %v1800_v55 }
 0x1fd   : > { %v7947_v1 = vadd.f32 %v1568_v6, %v1542_v28 }
 0x1ff   : > { %v1896_v27 = vpop.f32.mrf.mxu0  ;;  %v1595_v63 = vperm.slane %v7947_v1, 0  ;;  %v1580_v54 = vrot.slane %v7947_v1, 1 }
 0x200   : > { %v1923_v32 = vpop.f32.mrf.mxu1 }
 0x201   : > { %1609 = vrot.lane.b32.xlu2 %v1590_v23, %s7297_s18  ;;  %v1596_v5 = vperm.slane %v1580_v54, 0 }
 0x203   : > { %1613 = vrot.lane.b32.xlu1 %v1592_v3, %s7297_s18  ;;  %1611 = vrot.lane.b32.xlu0 %v1591_v25, %s7297_s18  ;;  %v1834_v16 = vpop.f32.mrf.mxu2 }
 0x204   : > { %v1859_v33 = vpop.f32.mrf.mxu3  ;;  %v1835_v14 = vadd.f32 %v1834_v16, %v1804_v19 }
 0x205   : > { %v1860_v26 = vadd.f32 %v1859_v33, %v1830_v30 }
 0x207   : > { %v1893_v29 = vadd.f32 %v1892_v57, %v1860_v26  ;;  %v2180_v0 = vpop.f32.mrf.mxu0 }
 0x208   : > { %v2210_v36 = vpop.f32.mrf.mxu1 }
 0x209   : > { %v1920_v53 = vadd.f32 %v1919_v62, %v1893_v29  ;;  %1615 = vrot.lane.b32.xlu2 %v1593_v21, %s7297_s18 }
 0x20b   : > { %1619 = vrot.lane.b32.xlu1 %v1595_v63, %s7297_s18  ;;  %1617 = vrot.lane.b32.xlu0 %v1594_v34, %s7297_s18  ;;  %v2111_v35 = vpop.f32.mrf.mxu2  ;;  %v1929_v40 = vrot.slane %v1920_v53, 2  ;;  %v1942_v43 = vperm.slane %v1920_v53, 0  ;;  %v1928_v17 = vrot.slane %v1920_v53, 1  ;;  %v1930_v15 = vrot.slane %v1920_v53, 3 }
 0x20c   : > { %v1865_v37 = vpop.f32.mrf.mxu3  ;;  %v1932_v18 = vrot.slane %v1920_v53, 5  ;;  %v1931_v22 = vrot.slane %v1920_v53, 4  ;;  %v1933_v62 = vrot.slane %v1920_v53, 6  ;;  %v1934_v2 = vrot.slane %v1920_v53, 7 }
 0x20d   : > { %v1944_v39 = vperm.slane %v1929_v40, 0  ;;  %v1866_v45 = vadd.f32 %v1865_v37, %v1835_v14  ;;  %v1943_v49 = vperm.slane %v1928_v17, 0  ;;  %v1945_v11 = vperm.slane %v1930_v15, 0 }
 0x20e   : > { %v1947_v13 = vperm.slane %v1932_v18, 0  ;;  %v1946_v4 = vperm.slane %v1931_v22, 0  ;;  %v1948_v10 = vperm.slane %v1933_v62, 0  ;;  %v1949_v30 = vperm.slane %v1934_v2, 0 }
 0x20f   : > { %v2185_v47 = vpop.f32.mrf.mxu0  ;;  %v1897_v60 = vadd.f32 %v1896_v27, %v1866_v45 }
 0x210   : > { %v2216_v46 = vpop.f32.mrf.mxu1 }
 0x211   : > { %1621 = vrot.lane.b32.xlu2 %v1596_v5, %s7297_s18  ;;  %v7960_v59 = vadd.f32 %v1923_v32, %v1897_v60 }
 0x213   : > { %1958 = vrot.lane.b32.xlu1 %v1942_v43, %s7298_s29  ;;  %1962 = vrot.lane.b32.xlu0 %v1944_v39, %s7298_s29  ;;  %v2119_v41 = vpop.f32.mrf.mxu2  ;;  %v1950_v12 = vperm.slane %v7960_v59, 0 }
 0x214   : > { %v2150_v44 = vpop.f32.mrf.mxu3 }
 0x215   : > { %v2151_v56 = vadd.f32 %v2150_v44, %v2111_v35 }
 0x217   : > { %v2181_v61 = vadd.f32 %v2180_v0, %v2151_v56  ;;  %v2415_v6 = vpop.f32.mrf.mxu0 }
 0x218   : > { %v2454_v55 = vpop.f32.mrf.mxu1 }
 0x219   : > { %1960 = vrot.lane.b32.xlu2 %v1943_v49, %s7298_s29  ;;  %v2211_v7 = vadd.f32 %v2210_v36, %v2181_v61  ;;  %v2455_v35 = vadd.f32 %v2454_v55, %v2415_v6 }
 0x21b   : > { %1964 = vrot.lane.b32.xlu1 %v1945_v11, %s7298_s29  ;;  %1968 = vrot.lane.b32.xlu0 %v1947_v13, %s7298_s29  ;;  %v2243_v58 = vpop.f32.mrf.mxu2 }
 0x21c   : > { %v2154_v57 = vpop.f32.mrf.mxu3  ;;  %v2244_v23 = vadd.f32 %v2243_v58, %v2211_v7 }
 0x21d   : > { %v2155_v9 = vadd.f32 %v2154_v57, %v2119_v41 }
 0x21f   : > { %v2186_v27 = vadd.f32 %v2185_v47, %v2155_v9  ;;  %v2423_v24 = vpop.f32.mrf.mxu0 }
 0x220   : > { %v2458_v63 = vpop.f32.mrf.mxu1 }
 0x221   : > { %1966 = vrot.lane.b32.xlu2 %v1946_v4, %s7298_s29  ;;  %v2217_v26 = vadd.f32 %v2216_v46, %v2186_v27  ;;  %v2459_v46 = vadd.f32 %v2458_v63, %v2423_v24 }
 0x223   : > { %1970 = vrot.lane.b32.xlu1 %v1948_v10, %s7298_s29  ;;  %1974 = vrot.lane.b32.xlu0 %v1950_v12, %s7298_s29  ;;  %v2247_v3 = vpop.f32.mrf.mxu2 }
 0x224   : > { %v2270_v25 = vpop.f32.mrf.mxu3  ;;  %v2248_v53 = vadd.f32 %v2247_v3, %v2217_v26 }
 0x225   : > { %v2271_v28 = vadd.f32 %v2270_v25, %v2244_v23 }
 0x227   : > { %2307 = vst.msk [vmem:[#allocation3 + $0x1] sm:$0x1] %vm1296_vm12, %v2271_v28  ;;  %v2280_v31 = vrot.slane %v2271_v28, 2  ;;  %v2283_v32 = vrot.slane %v2271_v28, 5  ;;  %v2279_v16 = vrot.slane %v2271_v28, 1  ;;  %v2281_v33 = vrot.slane %v2271_v28, 3  ;;  %v2547_v17 = vpop.f32.mrf.mxu0 }
 0x228   : > { %v2282_v29 = vrot.slane %v2271_v28, 4  ;;  %v2284_v21 = vrot.slane %v2271_v28, 6  ;;  %v2285_v0 = vrot.slane %v2271_v28, 7  ;;  %v2574_v18 = vpop.f32.mrf.mxu1 }
 0x229   : > { %1972 = vrot.lane.b32.xlu2 %v1949_v30, %s7298_s29  ;;  %2309 = vst.msk [vmem:[#allocation3 + $0x5] sm:$0x1] %vm1296_vm12, %v2280_v31 }
 0x22a   : > { %2312 = vst.msk [vmem:[#allocation3 + $0xb] sm:$0x1] %vm1296_vm12, %v2283_v32 }
 0x22b   : > { %2308 = vst.msk [vmem:[#allocation3 + $0x3] sm:$0x1] %vm1296_vm12, %v2279_v16  ;;  %v2484_v54 = vpop.f32.mrf.mxu2 }
 0x22c   : > { %v2274_v34 = vpop.f32.mrf.mxu3  ;;  %2310 = vst.msk [vmem:[#allocation3 + $0x7] sm:$0x1] %vm1296_vm12, %v2281_v33  ;;  %v2485_v14 = vadd.f32 %v2484_v54, %v2455_v35 }
 0x22d   : > { %v2275_v37 = vadd.f32 %v2274_v34, %v2248_v53  ;;  %2311 = vst.msk [vmem:[#allocation3 + $0x9] sm:$0x1] %vm1296_vm12, %v2282_v29  ;;  %v1935_v34 = vrot.slane %v7960_v59, 1 }
 0x22e   : > { %2313 = vst.msk [vmem:[#allocation3 + $0xd] sm:$0x1] %vm1296_vm12, %v2284_v21 }
 0x22f   : > { %2315 = vst.msk [vmem:[#allocation3 + $0x11] sm:$0x1] %vm1296_vm12, %v2275_v37  ;;  %v2288_v40 = vrot.slane %v2275_v37, 3  ;;  %v2286_v36 = vrot.slane %v2275_v37, 1  ;;  %v2287_v19 = vrot.slane %v2275_v37, 2  ;;  %v2291_v5 = vrot.slane %v2275_v37, 6  ;;  %v2551_v4 = vpop.f32.mrf.mxu0 }
 0x230   : > { %2314 = vst.msk [vmem:[#allocation3 + $0xf] sm:$0x1] %vm1296_vm12, %v2285_v0  ;;  %v2289_v43 = vrot.slane %v2275_v37, 4  ;;  %v2290_v39 = vrot.slane %v2275_v37, 5  ;;  %v2292_v41 = vrot.slane %v2275_v37, 7  ;;  %v2578_v12 = vpop.f32.mrf.mxu1 }
 0x231   : > { %2318 = vst.msk [vmem:[#allocation3 + $0x17] sm:$0x1] %vm1296_vm12, %v2288_v40  ;;  %v1951_v40 = vperm.slane %v1935_v34, 0 }
 0x232   : > { %2316 = vst.msk [vmem:[#allocation3 + $0x13] sm:$0x1] %vm1296_vm12, %v2286_v36 }
 0x233   : > { %2317 = vst.msk [vmem:[#allocation3 + $0x15] sm:$0x1] %vm1296_vm12, %v2287_v19  ;;  %v2489_v44 = vpop.f32.mrf.mxu2 }
 0x234   : > { %v2514_v45 = vpop.f32.mrf.mxu3  ;;  %2321 = vst.msk [vmem:[#allocation3 + $0x1d] sm:$0x1] %vm1296_vm12, %v2291_v5  ;;  %v2490_v61 = vadd.f32 %v2489_v44, %v2459_v46 }
 0x235   : > { %v2515_v15 = vadd.f32 %v2514_v45, %v2485_v14  ;;  %2319 = vst.msk [vmem:[#allocation3 + $0x19] sm:$0x1] %vm1296_vm12, %v2289_v43 }
 0x236   : > { %2320 = vst.msk [vmem:[#allocation3 + $0x1b] sm:$0x1] %vm1296_vm12, %v2290_v39 }
 0x237   : > { %v2548_v47 = vadd.f32 %v2547_v17, %v2515_v15  ;;  %2322 = vst.msk [vmem:[#allocation3 + $0x1f] sm:$0x1] %vm1296_vm12, %v2292_v41  ;;  %v2838_v32 = vpop.f32.mrf.mxu0 }
 0x238   : > { %v2868_v21 = vpop.f32.mrf.mxu1 }
 0x239   : > { %v2575_v49 = vadd.f32 %v2574_v18, %v2548_v47  ;;  %v1936_v47 = vrot.slane %v7960_v59, 2 }
 0x23b   : > { %v2597_v60 = vperm.slane %v2575_v49, 0  ;;  %v2584_v56 = vrot.slane %v2575_v49, 2  ;;  %v2583_v11 = vrot.slane %v2575_v49, 1  ;;  %v2769_v22 = vpop.f32.mrf.mxu2  ;;  %v2585_v62 = vrot.slane %v2575_v49, 3 }
 0x23c   : > { %v2520_v13 = vpop.f32.mrf.mxu3  ;;  %v2587_v7 = vrot.slane %v2575_v49, 5  ;;  %v2586_v9 = vrot.slane %v2575_v49, 4  ;;  %v2588_v27 = vrot.slane %v2575_v49, 6  ;;  %v2589_v31 = vrot.slane %v2575_v49, 7 }
 0x23d   : > { %2613 = vrot.lane.b32.xlu0 %v2597_v60, %s7297_s18  ;;  %v2599_v57 = vperm.slane %v2584_v56, 0  ;;  %v2598_v58 = vperm.slane %v2583_v11, 0  ;;  %v2521_v6 = vadd.f32 %v2520_v13, %v2490_v61  ;;  %v2600_v10 = vperm.slane %v2585_v62, 0 }
 0x23e   : > { %v2602_v2 = vperm.slane %v2587_v7, 0  ;;  %v2601_v3 = vperm.slane %v2586_v9, 0  ;;  %v2603_v16 = vperm.slane %v2588_v27, 0  ;;  %v2604_v29 = vperm.slane %v2589_v31, 0 }
 0x23f   : > { %2617 = vrot.lane.b32.xlu2 %v2599_v57, %s7297_s18  ;;  %2615 = vrot.lane.b32.xlu1 %v2598_v58, %s7297_s18  ;;  %v2552_v23 = vadd.f32 %v2551_v4, %v2521_v6  ;;  %v1952_v60 = vperm.slane %v1936_v47, 0  ;;  %v1581_v4 = vrot.slane %v7947_v1, 2  ;;  %v2843_v6 = vpop.f32.mrf.mxu0 }
 0x241   : > { %v7989_v28 = vadd.f32 %v2578_v12, %v2552_v23  ;;  %v1582_v12 = vrot.slane %v7947_v1, 3 }
 0x243   : > { %v2777_v25 = vpop.f32.mrf.mxu2  ;;  %v2605_v24 = vperm.slane %v7989_v28, 0  ;;  %v2590_v41 = vrot.slane %v7989_v28, 1  ;;  %v2591_v15 = vrot.slane %v7989_v28, 2  ;;  %v1598_v31 = vperm.slane %v1582_v12, 0 }
 0x244   : > { %v2808_v55 = vpop.f32.mrf.mxu3 }
 0x245   : > { %2619 = vrot.lane.b32.xlu0 %v2600_v10, %s7297_s18  ;;  %v2809_v30 = vadd.f32 %v2808_v55, %v2769_v22  ;;  %v2606_v45 = vperm.slane %v2590_v41, 0  ;;  %v2607_v49 = vperm.slane %v2591_v15, 0  ;;  %v2592_v22 = vrot.slane %v7989_v28, 3  ;;  %v2874_v55 = vpop.f32.mrf.mxu1 }
 0x246   : > { %v1597_v10 = vperm.slane %v1581_v4, 0 }
 0x247   : > { %2623 = vrot.lane.b32.xlu2 %v2602_v2, %s7297_s18  ;;  %2621 = vrot.lane.b32.xlu1 %v2601_v3, %s7297_s18  ;;  %v2839_v26 = vadd.f32 %v2838_v32, %v2809_v30  ;;  %v2608_v7 = vperm.slane %v2592_v22, 0  ;;  %v1937_v32 = vrot.slane %v7960_v59, 3 }
 0x249   : > { %v2869_v63 = vadd.f32 %v2868_v21, %v2839_v26 }
 0x24b   : > { %v2901_v53 = vpop.f32.mrf.mxu2 }
 0x24c   : > { %v2812_v33 = vpop.f32.mrf.mxu3  ;;  %v2902_v54 = vadd.f32 %v2901_v53, %v2869_v63  ;;  %v1583_v53 = vrot.slane %v7947_v1, 4 }
 0x24d   : > { %2625 = vrot.lane.b32.xlu0 %v2603_v16, %s7297_s18  ;;  %v2813_v57 = vadd.f32 %v2812_v33, %v2777_v25 }
 0x24f   : > { %2629 = vrot.lane.b32.xlu2 %v2605_v24, %s7297_s18  ;;  %2627 = vrot.lane.b32.xlu1 %v2604_v29, %s7297_s18  ;;  %v2844_v9 = vadd.f32 %v2843_v6, %v2813_v57  ;;  %v1953_v29 = vperm.slane %v1937_v32, 0  ;;  %v1585_v6 = vrot.slane %v7947_v1, 6 }
 0x251   : > { %v2875_v25 = vadd.f32 %v2874_v55, %v2844_v9  ;;  %v1601_v9 = vperm.slane %v1585_v6, 0 }
 0x253   : > { %v1604_v0 = vpop.permute.xlu2 %1603  ;;  %v2905_v3 = vpop.f32.mrf.mxu2 }
 0x254   : > { %1652 = vst.msk [vmem:[#allocation3] sm:$0x1] %vm1651_vm13, %v1604_v0  ;;  %v2928_v37 = vpop.f32.mrf.mxu3  ;;  %v2906_v33 = vadd.f32 %v2905_v3, %v2875_v25  ;;  %v1586_v3 = vrot.slane %v7947_v1, 7 }
 0x255   : > { %v7997_v35 = vadd.f32 %v2928_v37, %v2902_v54  ;;  %v1599_v37 = vperm.slane %v1583_v53, 0 }
 0x257   : > { %1976 = vrot.lane.b32.xlu1 %v1951_v40, %s7298_s29  ;;  %v2951_v36 = vperm.slane %v7997_v35, 0  ;;  %v2937_v19 = vrot.slane %v7997_v35, 1  ;;  %v2938_v43 = vrot.slane %v7997_v35, 2  ;;  %v2939_v14 = vrot.slane %v7997_v35, 3 }
 0x258   : > { %v2940_v46 = vrot.slane %v7997_v35, 4  ;;  %v2941_v11 = vrot.slane %v7997_v35, 5  ;;  %v2942_v2 = vrot.slane %v7997_v35, 6  ;;  %v2943_v0 = vrot.slane %v7997_v35, 7 }
 0x259   : > { %2967 = vrot.lane.b32.xlu2 %v2951_v36, %s7298_s29  ;;  %v2952_v5 = vperm.slane %v2937_v19, 0  ;;  %v2953_v17 = vperm.slane %v2938_v43, 0  ;;  %v2954_v44 = vperm.slane %v2939_v14, 0  ;;  %v1938_v36 = vrot.slane %v7960_v59, 4 }
 0x25a   : > { %v2955_v56 = vperm.slane %v2940_v46, 0  ;;  %v2956_v62 = vperm.slane %v2941_v11, 0  ;;  %v2957_v26 = vperm.slane %v2942_v2, 0  ;;  %v2958_v40 = vperm.slane %v2943_v0, 0 }
 0x25b   : > { %v1610_v39 = vpop.permute.xlu2 %1609  ;;  %2969 = vrot.lane.b32.xlu0 %v2952_v5, %s7298_s29  ;;  %v2593_v14 = vrot.slane %v7989_v28, 4 }
 0x25c   : > { %1655 = vst.msk [vmem:[#allocation3 + $0x6] sm:$0x1] %vm1651_vm13, %v1610_v39  ;;  %v2932_v16 = vpop.f32.mrf.mxu3  ;;  %v1954_v39 = vperm.slane %v1938_v36, 0 }
 0x25d   : > { %v8034_v24 = vadd.f32 %v2932_v16, %v2906_v33  ;;  %v2609_v41 = vperm.slane %v2593_v14, 0  ;;  %v1941_v16 = vrot.slane %v7960_v59, 7 }
 0x25f   : > { %2971 = vrot.lane.b32.xlu1 %v2953_v17, %s7298_s29  ;;  %v2959_v54 = vperm.slane %v8034_v24, 0  ;;  %v2944_v5 = vrot.slane %v8034_v24, 1  ;;  %v2947_v11 = vrot.slane %v8034_v24, 4  ;;  %v2949_v2 = vrot.slane %v8034_v24, 6 }
 0x260   : > { %v2950_v33 = vrot.slane %v8034_v24, 7 }
 0x261   : > { %2973 = vrot.lane.b32.xlu2 %v2954_v44, %s7298_s29  ;;  %v2960_v17 = vperm.slane %v2944_v5, 0  ;;  %v2594_v44 = vrot.slane %v7989_v28, 5  ;;  %v2965_v25 = vperm.slane %v2949_v2, 0  ;;  %v7182_v2 = vld [vmem:[%s7430_s3 + $0x4] ss:$0 sm:$0xff] }
 0x263   : > { %v1616_v18 = vpop.permute.xlu2 %1615  ;;  %2631 = vrot.lane.b32.xlu0 %v2606_v45, %s7297_s18  ;;  %v1939_v45 = vrot.slane %v7960_v59, 5  ;;  %v2610_v47 = vperm.slane %v2594_v44, 0 }
 0x264   : > { %1658 = vst.msk [vmem:[#allocation3 + $0xc] sm:$0x1] %vm1651_vm13, %v1616_v18 }
 0x265   : > { %v1955_v46 = vperm.slane %v1939_v45, 0 }
 0x267   : > { %2633 = vrot.lane.b32.xlu1 %v2607_v49, %s7297_s18  ;;  %v2945_v49 = vrot.slane %v8034_v24, 2 }
 0x269   : > { %1978 = vrot.lane.b32.xlu2 %v1952_v60, %s7298_s29  ;;  %v2961_v60 = vperm.slane %v2945_v49, 0 }
 0x26b   : > { %v1622_v13 = vpop.permute.xlu2 %1621  ;;  %2975 = vrot.lane.b32.xlu0 %v2955_v56, %s7298_s29  ;;  %v2946_v56 = vrot.slane %v8034_v24, 3 }
 0x26c   : > { %1661 = vst.msk [vmem:[#allocation3 + $0x12] sm:$0x1] %vm1651_vm13, %v1622_v13 }
 0x26d   : > { %v1608_v58 = vpop.permute.xlu1 %1607  ;;  %v1606_v61 = vpop.permute.xlu0 %1605  ;;  %v2962_v57 = vperm.slane %v2946_v56, 0 }
 0x26e   : > { %1654 = vst.msk [vmem:[#allocation3 + $0x4] sm:$0x1] %vm1651_vm13, %v1608_v58  ;;  %v1584_v58 = vrot.slane %v7947_v1, 5  ;;  %v1957_v1 = vperm.slane %v1941_v16, 0 }
 0x26f   : > { %1653 = vst.msk [vmem:[#allocation3 + $0x2] sm:$0x1] %vm1651_vm13, %v1606_v61  ;;  %2977 = vrot.lane.b32.xlu1 %v2956_v62, %s7298_s29  ;;  %v2963_v61 = vperm.slane %v2947_v11, 0 }
 0x270   : > { %v1600_v4 = vperm.slane %v1584_v58, 0 }
 0x271   : > { %2635 = vrot.lane.b32.xlu2 %v2608_v7, %s7297_s18  ;;  %v2595_v7 = vrot.slane %v7989_v28, 6 }
 0x273   : > { %v1961_v23 = vpop.permute.xlu2 %1960  ;;  %1623 = vrot.lane.b32.xlu0 %v1597_v10, %s7297_s18  ;;  %v2948_v10 = vrot.slane %v8034_v24, 5  ;;  %v2611_v12 = vperm.slane %v2595_v7, 0 }
 0x274   : > { %2008 = vst.msk [vmem:[#allocation3 + $0x2] sm:$0x1] %vm2006_vm14, %v1961_v23 }
 0x275   : > { %v1614_v27 = vpop.permute.xlu1 %1613  ;;  %v1612_v30 = vpop.permute.xlu0 %1611  ;;  %v2964_v23 = vperm.slane %v2948_v10, 0 }
 0x276   : > { %1657 = vst.msk [vmem:[#allocation3 + $0xa] sm:$0x1] %vm1651_vm13, %v1614_v27  ;;  %v1940_v27 = vrot.slane %v7960_v59, 6 }
 0x277   : > { %1656 = vst.msk [vmem:[#allocation3 + $0x8] sm:$0x1] %vm1651_vm13, %v1612_v30  ;;  %1625 = vrot.lane.b32.xlu1 %v1598_v31, %s7297_s18  ;;  %v1602_v30 = vperm.slane %v1586_v3, 0 }
 0x278   : > { %v1956_v32 = vperm.slane %v1940_v27, 0 }
 0x279   : > { %2979 = vrot.lane.b32.xlu2 %v2957_v26, %s7298_s29  ;;  %v2596_v26 = vrot.slane %v7989_v28, 7 }
 0x27b   : > { %v1967_v21 = vpop.permute.xlu2 %1966  ;;  %1980 = vrot.lane.b32.xlu0 %v1953_v29, %s7298_s29  ;;  %v2612_v59 = vperm.slane %v2596_v26, 0 }
 0x27c   : > { %2011 = vst.msk [vmem:[#allocation3 + $0x8] sm:$0x1] %vm2006_vm14, %v1967_v21  ;;  %v2966_v21 = vperm.slane %v2950_v33, 0  ;;  %v7184_v33 = vld [vmem:[%s7430_s3 + $0x5] ss:$0 sm:$0xff] }
 0x27d   : > { %v1620_v63 = vpop.permute.xlu1 %1619  ;;  %v1618_v34 = vpop.permute.xlu0 %1617 }
 0x27e   : > { %1660 = vst.msk [vmem:[#allocation3 + $0x10] sm:$0x1] %vm1651_vm13, %v1620_v63 }
 0x27f   : > { %1659 = vst.msk [vmem:[#allocation3 + $0xe] sm:$0x1] %vm1651_vm13, %v1618_v34  ;;  %2983 = vrot.lane.b32.xlu1 %v2959_v54, %s7298_s29  ;;  %v7174_v34 = vld [vmem:[%s7430_s3] ss:$0 sm:$0xff] }
 0x281   : > { %1627 = vrot.lane.b32.xlu2 %v1599_v37, %s7297_s18 }
 0x283   : > { %v1973_v19 = vpop.permute.xlu2 %1972  ;;  %2981 = vrot.lane.b32.xlu0 %v2958_v40, %s7298_s29 }
 0x284   : > { %2014 = vst.msk [vmem:[#allocation3 + $0xe] sm:$0x1] %vm2006_vm14, %v1973_v19 }
 0x285   : > { %v1959_v35 = vpop.permute.xlu1 %1958  ;;  %v1963_v43 = vpop.permute.xlu0 %1962 }
 0x286   : > { %2007 = vst.msk [vmem:[#allocation3] sm:$0x1] %vm2006_vm14, %v1959_v35 }
 0x287   : > { %2009 = vst.msk [vmem:[#allocation3 + $0x4] sm:$0x1] %vm2006_vm14, %v1963_v43  ;;  %1982 = vrot.lane.b32.xlu1 %v1954_v39, %s7298_s29  ;;  %v7175_v39 = vld [vmem:[%s7420_s28 + $0x1] ss:$0 sm:$0xff] }
 0x289   : > { %2985 = vrot.lane.b32.xlu2 %v2960_v17, %s7298_s29 }
 0x28b   : > { %2637 = vrot.lane.b32.xlu0 %v2609_v41, %s7297_s18  ;;  %v7176_v41 = vld [vmem:[%s7430_s3 + $0x1] ss:$0 sm:$0xff] }
 0x28d   : > { %v1965_v15 = vpop.permute.xlu1 %1964  ;;  %v1969_v18 = vpop.permute.xlu0 %1968 }
 0x28e   : > { %2010 = vst.msk [vmem:[#allocation3 + $0x6] sm:$0x1] %vm2006_vm14, %v1965_v15 }
 0x28f   : > { %2012 = vst.msk [vmem:[#allocation3 + $0xa] sm:$0x1] %vm2006_vm14, %v1969_v18  ;;  %2639 = vrot.lane.b32.xlu1 %v2610_v47, %s7297_s18  ;;  %v7177_v47 = vld [vmem:[%s7420_s28 + $0x2] ss:$0 sm:$0xff] }
 0x291   : > { %1984 = vrot.lane.b32.xlu2 %v1955_v46, %s7298_s29 }
 0x293   : > { %2987 = vrot.lane.b32.xlu0 %v2961_v60, %s7298_s29  ;;  %v7178_v60 = vld [vmem:[%s7430_s3 + $0x2] ss:$0 sm:$0xff] }
 0x295   : > { %v1971_v13 = vpop.permute.xlu1 %1970  ;;  %v1975_v22 = vpop.permute.xlu0 %1974 }
 0x296   : > { %2013 = vst.msk [vmem:[#allocation3 + $0xc] sm:$0x1] %vm2006_vm14, %v1971_v13 }
 0x297   : > { %2015 = vst.msk [vmem:[#allocation3 + $0x10] sm:$0x1] %vm2006_vm14, %v1975_v22  ;;  %2989 = vrot.lane.b32.xlu1 %v2962_v57, %s7298_s29  ;;  %v7179_v22 = vld [vmem:[%s7420_s28 + $0x3] ss:$0 sm:$0xff] }
 0x299   : > { %2991 = vrot.lane.b32.xlu2 %v2963_v61, %s7298_s29  ;;  %v2618_v62 = vpop.permute.xlu2 %2617 }
 0x29a   : > { %2663 = vst.msk [vmem:[#allocation3 + $0x5] sm:$0x1] %vm1651_vm13, %v2618_v62 }
 0x29b   : > { %1629 = vrot.lane.b32.xlu0 %v1600_v4, %s7297_s18  ;;  %v7180_v4 = vld [vmem:[%s7430_s3 + $0x3] ss:$0 sm:$0xff] }
 0x29f   : > { %1631 = vrot.lane.b32.xlu1 %v1601_v9, %s7297_s18  ;;  %v7181_v9 = vld [vmem:[%s7420_s28 + $0x4] ss:$0 sm:$0xff] }
 0x2a1   : > { %2641 = vrot.lane.b32.xlu2 %v2611_v12, %s7297_s18  ;;  %v2624_v55 = vpop.permute.xlu2 %2623 }
 0x2a2   : > { %2666 = vst.msk [vmem:[#allocation3 + $0xb] sm:$0x1] %vm1651_vm13, %v2624_v55 }
 0x2a3   : > { %2993 = vrot.lane.b32.xlu0 %v2964_v23, %s7298_s29 }
 0x2a7   : > { %2995 = vrot.lane.b32.xlu1 %v2965_v25, %s7298_s29 }
 0x2a9   : > { %1633 = vrot.lane.b32.xlu2 %v1602_v30, %s7297_s18  ;;  %v2630_v31 = vpop.permute.xlu2 %2629  ;;  %v7183_v30 = vld [vmem:[%s7420_s28 + $0x5] ss:$0 sm:$0xff] }
 0x2aa   : > { %2669 = vst.msk [vmem:[#allocation3 + $0x11] sm:$0x1] %vm1651_vm13, %v2630_v31 }
 0x2ab   : > { %1986 = vrot.lane.b32.xlu0 %v1956_v32, %s7298_s29 }
 0x2af   : > { %1988 = vrot.lane.b32.xlu1 %v1957_v1, %s7298_s29  ;;  %v2614_v29 = vpop.permute.xlu0 %2613 }
 0x2b0   : > { %2661 = vst.msk [vmem:[#allocation3 + $0x1] sm:$0x1] %vm1651_vm13, %v2614_v29 }
 0x2b1   : > { %2997 = vrot.lane.b32.xlu2 %v2966_v21, %s7298_s29  ;;  %v2616_v53 = vpop.permute.xlu1 %2615  ;;  %v7185_v21 = vld [vmem:[%s7420_s28 + $0x6] ss:$0 sm:$0xff] }
 0x2b2   : > { %2662 = vst.msk [vmem:[#allocation3 + $0x3] sm:$0x1] %vm1651_vm13, %v2616_v53 }
 0x2b3   : > { %v2968_v63 = vpop.permute.xlu2 %2967  ;;  %2643 = vrot.lane.b32.xlu0 %v2612_v59, %s7297_s18 }
 0x2b4   : > { %3015 = vst.msk [vmem:[#allocation3 + $0x1] sm:$0x1] %vm2006_vm14, %v2968_v63 }
 0x2b7   : > { %v2620_v24 = vpop.permute.xlu0 %2619 }
 0x2b8   : > { %2664 = vst.msk [vmem:[#allocation3 + $0x7] sm:$0x1] %vm1651_vm13, %v2620_v24 }
 0x2b9   : > { %v2622_v28 = vpop.permute.xlu1 %2621 }
 0x2ba   : > { %2665 = vst.msk [vmem:[#allocation3 + $0x9] sm:$0x1] %vm1651_vm13, %v2622_v28 }
 0x2bb   : > { %v3031_v54 = vld [vmem:[#allocation3] sm:$0x3]  ;;  %v2974_v0 = vpop.permute.xlu2 %2973 }
 0x2bc   : > { %v3036_v37 = vmul.f32 %v7174_v34, %v3031_v54  ;;  %3018 = vst.msk [vmem:[#allocation3 + $0x7] sm:$0x1] %vm2006_vm14, %v2974_v0  ;;  %v7186_v34 = vld [vmem:[%s7430_s3 + $0x6] ss:$0 sm:$0xff] }
 0x2be   : > { %3037 = vst.msk [vmem:[#allocation3] sm:$0x3] %vm622_vm1, %v3036_v37  ;;  %v3045_v44 = vmul.f32 %v7175_v39, %v3036_v37 }
 0x2bf   : > { %v2626_v40 = vpop.permute.xlu0 %2625 }
 0x2c0   : > { %2667 = vst.msk [vmem:[#allocation3 + $0xd] sm:$0x1] %vm1651_vm13, %v2626_v40 }
 0x2c1   : > { %v2628_v36 = vpop.permute.xlu1 %2627 }
 0x2c2   : > { %2668 = vst.msk [vmem:[#allocation3 + $0xf] sm:$0x1] %vm1651_vm13, %v2628_v36  ;;  %v7187_v36 = vld [vmem:[%s7420_s28 + $0x7] ss:$0 sm:$0xff] }
 0x2c3   : > { %v1979_v19 = vpop.permute.xlu2 %1978  ;;  %v3071_v6 = vld [vmem:[#allocation3 + $0x6] sm:$0x3] }
 0x2c9   : > { %v1977_v5 = vpop.permute.xlu1 %1976 }
 0x2ca   : > { %2016 = vst.msk [vmem:[#allocation3 + $0x12] sm:$0x1] %vm2006_vm14, %v1977_v5 }
 0x2cb   : > { %v2636_v35 = vpop.permute.xlu2 %2635 }
 0x2cc   : > { %2672 = vst.msk [vmem:[#allocation3 + $0x17] sm:$0x1] %vm1651_vm13, %v2636_v35  ;;  %v7188_v35 = vld [vmem:[%s7430_s3 + $0x7] ss:$0 sm:$0xff] }
 0x2cd   : > { %v2970_v43 = vpop.permute.xlu0 %2969 }
 0x2ce   : > { %3016 = vst.msk [vmem:[#allocation3 + $0x3] sm:$0x1] %vm2006_vm14, %v2970_v43 }
 0x2d1   : > { %v2972_v14 = vpop.permute.xlu1 %2971 }
 0x2d2   : > { %3017 = vst.msk [vmem:[#allocation3 + $0x5] sm:$0x1] %vm2006_vm14, %v2972_v14 }
 0x2d3   : > { %v2980_v17 = vpop.permute.xlu2 %2979 }
 0x2d4   : > { %3021 = vst.msk [vmem:[#allocation3 + $0xd] sm:$0x1] %vm2006_vm14, %v2980_v17  ;;  %v7189_v17 = vld [vmem:[%s7420_s28 + $0x8] ss:$0 sm:$0xff] }
 0x2d5   : > { %v3039_v45 = vld [vmem:[#allocation3 + $0x2] sm:$0x3]  ;;  %v2632_v15 = vpop.permute.xlu0 %2631 }
 0x2d6   : > { %v3046_v18 = vsub.f32 %v3039_v45, %v3045_v44  ;;  %2670 = vst.msk [vmem:[#allocation3 + $0x13] sm:$0x1] %vm1651_vm13, %v2632_v15  ;;  %v7190_v15 = vld [vmem:[%s7430_s3 + $0x8] ss:$0 sm:$0xff] }
 0x2d8   : > { %v3052_v49 = vmul.f32 %v7176_v41, %v3046_v18 }
 0x2d9   : > { %v2634_v46 = vpop.permute.xlu1 %2633  ;;  %v3055_v11 = vld [vmem:[#allocation3 + $0x4] sm:$0x3] }
 0x2da   : > { %3053 = vst.msk [vmem:[#allocation3 + $0x2] sm:$0x3] %vm622_vm1, %v3052_v49  ;;  %v3061_v56 = vmul.f32 %v7177_v47, %v3052_v49 }
 0x2db   : > { %2671 = vst.msk [vmem:[#allocation3 + $0x15] sm:$0x1] %vm1651_vm13, %v2634_v46  ;;  %v1628_v13 = vpop.permute.xlu2 %1627  ;;  %v3119_v54 = vld [vmem:[#allocation3 + $0xc] sm:$0x3] }
 0x2dc   : > { %v3062_v57 = vsub.f32 %v3055_v11, %v3061_v56  ;;  %1664 = vst.msk [vmem:[#allocation3 + $0x18] sm:$0x1] %vm1651_vm13, %v1628_v13  ;;  %v7192_v13 = vld [vmem:[%s7430_s3 + $0x9] ss:$0 sm:$0xff] }
 0x2dd   : > { %v2976_v58 = vpop.permute.xlu0 %2975 }
 0x2de   : > { %v3068_v61 = vmul.f32 %v7178_v60, %v3062_v57  ;;  %3019 = vst.msk [vmem:[#allocation3 + $0x9] sm:$0x1] %vm2006_vm14, %v2976_v58  ;;  %v7191_v60 = vld [vmem:[%s7420_s28 + $0x9] ss:$0 sm:$0xff] }
 0x2e0   : > { %3069 = vst.msk [vmem:[#allocation3 + $0x4] sm:$0x3] %vm622_vm1, %v3068_v61  ;;  %v3077_v62 = vmul.f32 %v7179_v22, %v3068_v61  ;;  %v7193_v61 = vld [vmem:[%s7420_s28 + $0xa] ss:$0 sm:$0xff] }
 0x2e1   : > { %v2978_v7 = vpop.permute.xlu1 %2977 }
 0x2e2   : > { %v3078_v10 = vsub.f32 %v3071_v6, %v3077_v62  ;;  %3020 = vst.msk [vmem:[#allocation3 + $0xb] sm:$0x1] %vm2006_vm14, %v2978_v7  ;;  %v7194_v7 = vld [vmem:[%s7430_s3 + $0xa] ss:$0 sm:$0xff] }
 0x2e3   : > { %v2986_v12 = vpop.permute.xlu2 %2985 }
 0x2e4   : > { %v3084_v55 = vmul.f32 %v7180_v4, %v3078_v10  ;;  %3024 = vst.msk [vmem:[#allocation3 + $0x13] sm:$0x1] %vm2006_vm14, %v2986_v12 }
 0x2e5   : > { %v1624_v23 = vpop.permute.xlu0 %1623  ;;  %v3087_v25 = vld [vmem:[#allocation3 + $0x8] sm:$0x3] }
 0x2e6   : > { %3085 = vst.msk [vmem:[#allocation3 + $0x6] sm:$0x3] %vm622_vm1, %v3084_v55  ;;  %v3093_v3 = vmul.f32 %v7181_v9, %v3084_v55  ;;  %v7195_v55 = vld [vmem:[%s7420_s28 + $0xb] ss:$0 sm:$0xff] }
 0x2e7   : > { %1662 = vst.msk [vmem:[#allocation3 + $0x14] sm:$0x1] %vm1651_vm13, %v1624_v23 }
 0x2e8   : > { %v3094_v27 = vsub.f32 %v3087_v25, %v3093_v3  ;;  %2017 = vst.msk [vmem:[#allocation3 + $0x14] sm:$0x1] %vm2006_vm14, %v1979_v19  ;;  %v7196_v3 = vld [vmem:[%s7430_s3 + $0xb] ss:$0 sm:$0xff] }
 0x2e9   : > { %v1626_v31 = vpop.permute.xlu1 %1625  ;;  %v3103_v26 = vld [vmem:[#allocation3 + $0xa] sm:$0x3] }
 0x2ea   : > { %v3100_v32 = vmul.f32 %v7182_v2, %v3094_v27  ;;  %1663 = vst.msk [vmem:[#allocation3 + $0x16] sm:$0x1] %vm1651_vm13, %v1626_v31  ;;  %v7197_v31 = vld [vmem:[%s7420_s28 + $0xc] ss:$0 sm:$0xff] }
 0x2eb   : > { %v8129_v16 = vpop.permute.xlu2 %1984  ;;  %v3167_v57 = vld [vmem:[#allocation3 + $0x12] sm:$0x3] }
 0x2ec   : > { %3101 = vst.msk [vmem:[#allocation3 + $0x8] sm:$0x3] %vm622_vm1, %v3100_v32  ;;  %v3109_v1 = vmul.f32 %v7183_v30, %v3100_v32 }
 0x2ed   : > { %v1981_v29 = vpop.permute.xlu0 %1980 }
 0x2ee   : > { %v3110_v53 = vsub.f32 %v3103_v26, %v3109_v1  ;;  %2018 = vst.msk [vmem:[#allocation3 + $0x16] sm:$0x1] %vm2006_vm14, %v1981_v29  ;;  %v7198_v26 = vld [vmem:[%s7430_s3 + $0xc] ss:$0 sm:$0xff] }
 0x2f0   : > { %v3116_v59 = vmul.f32 %v7184_v33, %v3110_v53 }
 0x2f1   : > { %v2984_v63 = vpop.permute.xlu1 %2983 }
 0x2f2   : > { %3117 = vst.msk [vmem:[#allocation3 + $0xa] sm:$0x3] %vm622_vm1, %v3116_v59  ;;  %v3125_v24 = vmul.f32 %v7185_v21, %v3116_v59  ;;  %v7199_v21 = vld [vmem:[%s7420_s28 + $0xd] ss:$0 sm:$0xff] }
 0x2f3   : > { %3023 = vst.msk [vmem:[#allocation3 + $0x11] sm:$0x1] %vm2006_vm14, %v2984_v63  ;;  %v2992_v28 = vpop.permute.xlu2 %2991 }
 0x2f4   : > { %v3126_v0 = vsub.f32 %v3119_v54, %v3125_v24  ;;  %v7200_v24 = vld [vmem:[%s7430_s3 + $0xd] ss:$0 sm:$0xff] }
 0x2f5   : > { %v2982_v37 = vpop.permute.xlu0 %2981 }
 0x2f6   : > { %3022 = vst.msk [vmem:[#allocation3 + $0xf] sm:$0x1] %vm2006_vm14, %v2982_v37  ;;  %v3132_v40 = vmul.f32 %v7186_v34, %v3126_v0  ;;  %v7201_v37 = vld [vmem:[%s7420_s28 + $0xe] ss:$0 sm:$0xff] }
 0x2f8   : > { %3133 = vst.msk [vmem:[#allocation3 + $0xc] sm:$0x3] %vm622_vm1, %v3132_v40  ;;  %v3141_v43 = vmul.f32 %v7187_v36, %v3132_v40 }
 0x2f9   : > { %v1983_v19 = vpop.permute.xlu1 %1982 }
 0x2fa   : > { %2019 = vst.msk [vmem:[#allocation3 + $0x18] sm:$0x1] %vm2006_vm14, %v1983_v19  ;;  %v3151_v47 = vld [vmem:[#allocation3 + $0x10] sm:$0x3]  ;;  %v7202_v19 = vld [vmem:[%s7430_s3 + $0xe] ss:$0 sm:$0xff] }
 0x2fb   : > { %v2642_v5 = vpop.permute.xlu2 %2641 }
 0x2fc   : > { %2675 = vst.msk [vmem:[#allocation3 + $0x1d] sm:$0x1] %vm1651_vm13, %v2642_v5 }
 0x2fd   : > { %v3135_v39 = vld [vmem:[#allocation3 + $0xe] sm:$0x3]  ;;  %v2638_v14 = vpop.permute.xlu0 %2637 }
 0x2fe   : > { %v3142_v41 = vsub.f32 %v3135_v39, %v3141_v43  ;;  %2673 = vst.msk [vmem:[#allocation3 + $0x19] sm:$0x1] %vm1651_vm13, %v2638_v14  ;;  %v7203_v14 = vld [vmem:[%s7420_s28 + $0xf] ss:$0 sm:$0xff]  ;;  %s7097_s28 = sld [smem:[#allocation5 + $0x82]] }
 0x2ff   : > { %3027 = vst.msk [vmem:[#allocation3 + $0x19] sm:$0x1] %vm2006_vm14, %v2992_v28 }
 0x300   : > { %v3148_v44 = vmul.f32 %v7188_v35, %v3142_v41 }
 0x301   : > { %v2640_v45 = vpop.permute.xlu1 %2639 }
 0x302   : > { %3149 = vst.msk [vmem:[#allocation3 + $0xe] sm:$0x3] %vm622_vm1, %v3148_v44  ;;  %v3157_v18 = vmul.f32 %v7189_v17, %v3148_v44  ;;  %v7204_v44 = vld [vmem:[%s7430_s3 + $0xf] ss:$0 sm:$0xff]  ;;  %s7094_s3 = sld [smem:[#allocation5 + $0x2]] }
 0x303   : > { %2674 = vst.msk [vmem:[#allocation3 + $0x1b] sm:$0x1] %vm1651_vm13, %v2640_v45  ;;  %v1634_v49 = vpop.permute.xlu2 %1633 }
 0x304   : > { %v3158_v46 = vsub.f32 %v3151_v47, %v3157_v18  ;;  %1667 = vst.msk [vmem:[#allocation3 + $0x1e] sm:$0x1] %vm1651_vm13, %v1634_v49 }
 0x305   : > { %v2988_v56 = vpop.permute.xlu0 %2987 }
 0x306   : > { %v3164_v11 = vmul.f32 %v7190_v15, %v3158_v46  ;;  %3025 = vst.msk [vmem:[#allocation3 + $0x15] sm:$0x1] %vm2006_vm14, %v2988_v56  ;;  %v3215_v29 = vld [vmem:[#allocation3 + $0x18] sm:$0x3]  ;;  %v7205_v15 = vld [vmem:[%s7425_s2 + $0xe] ss:$0 sm:$0xff] }
 0x307   : > { %v7206_v46 = vld [vmem:[%s7425_s2 + $0xd] ss:$0 sm:$0xff] }
 0x308   : > { %3165 = vst.msk [vmem:[#allocation3 + $0x10] sm:$0x3] %vm622_vm1, %v3164_v11  ;;  %v3173_v22 = vmul.f32 %v7191_v60, %v3164_v11  ;;  %v7207_v11 = vld [vmem:[%s7425_s2 + $0xc] ss:$0 sm:$0xff] }
 0x309   : > { %v2990_v58 = vpop.permute.xlu1 %2989 }
 0x30a   : > { %v3174_v62 = vsub.f32 %v3167_v57, %v3173_v22  ;;  %3026 = vst.msk [vmem:[#allocation3 + $0x17] sm:$0x1] %vm2006_vm14, %v2990_v58  ;;  %v7208_v58 = vld [vmem:[%s7425_s2 + $0xb] ss:$0 sm:$0xff] }
 0x30b   : > { %v2998_v35 = vpop.permute.xlu2 %2997 }
 0x30c   : > { %v3180_v4 = vmul.f32 %v7192_v13, %v3174_v62 }
 0x30d   : > { %v1630_v6 = vpop.permute.xlu0 %1629  ;;  %v3183_v10 = vld [vmem:[#allocation3 + $0x14] sm:$0x3] }
 0x30e   : > { %3181 = vst.msk [vmem:[#allocation3 + $0x12] sm:$0x3] %vm622_vm1, %v3180_v4  ;;  %v3189_v9 = vmul.f32 %v7193_v61, %v3180_v4 }
 0x30f   : > { %1665 = vst.msk [vmem:[#allocation3 + $0x1a] sm:$0x1] %vm1651_vm13, %v1630_v6  ;;  %v7209_v6 = vld [vmem:[%s7425_s2 + $0xa] ss:$0 sm:$0xff] }
 0x310   : > { %v3190_v12 = vsub.f32 %v3183_v10, %v3189_v9  ;;  %2020 = vst.msk [vmem:[#allocation3 + $0x1a] sm:$0x1] %vm2006_vm14, %v8129_v16 }
 0x311   : > { %v1632_v23 = vpop.permute.xlu1 %1631  ;;  %v3199_v27 = vld [vmem:[#allocation3 + $0x16] sm:$0x3] }
 0x312   : > { %v3196_v2 = vmul.f32 %v7194_v7, %v3190_v12  ;;  %1666 = vst.msk [vmem:[#allocation3 + $0x1c] sm:$0x1] %vm1651_vm13, %v1632_v23  ;;  %v7210_v12 = vld [vmem:[%s7425_s2 + $0x9] ss:$0 sm:$0xff] }
 0x314   : > { %3197 = vst.msk [vmem:[#allocation3 + $0x14] sm:$0x3] %vm622_vm1, %v3196_v2  ;;  %v3205_v25 = vmul.f32 %v7195_v55, %v3196_v2 }
 0x315   : > { %v2994_v30 = vpop.permute.xlu0 %2993 }
 0x316   : > { %v3206_v32 = vsub.f32 %v3199_v27, %v3205_v25  ;;  %3028 = vst.msk [vmem:[#allocation3 + $0x1b] sm:$0x1] %vm2006_vm14, %v2994_v30  ;;  %v3323_v27 = vld [vmem:[#allocation3 + $0x12] sm:$0x3] }
 0x318   : > { %v3212_v33 = vmul.f32 %v7196_v3, %v3206_v32  ;;  %v7211_v3 = vld [vmem:[%s7425_s2 + $0x8] ss:$0 sm:$0xff] }
 0x319   : > { %v2996_v1 = vpop.permute.xlu1 %2995 }
 0x31a   : > { %3213 = vst.msk [vmem:[#allocation3 + $0x16] sm:$0x3] %vm622_vm1, %v3212_v33  ;;  %v3221_v16 = vmul.f32 %v7197_v31, %v3212_v33  ;;  %v7212_v31 = vld [vmem:[%s7425_s2 + $0x7] ss:$0 sm:$0xff] }
 0x31b   : > { %3029 = vst.msk [vmem:[#allocation3 + $0x1d] sm:$0x1] %vm2006_vm14, %v2996_v1  ;;  %v3314_v23 = vld [vmem:[#allocation3 + $0x14] sm:$0x3] }
 0x31c   : > { %v3222_v53 = vsub.f32 %v3215_v29, %v3221_v16  ;;  %v3332_v16 = vld [vmem:[#allocation3 + $0x10] sm:$0x3] }
 0x31d   : > { %v1987_v59 = vpop.permute.xlu0 %1986  ;;  %v3231_v28 = vld [vmem:[#allocation3 + $0x1a] sm:$0x3] }
 0x31e   : > { %v3228_v63 = vmul.f32 %v7198_v26, %v3222_v53  ;;  %2021 = vst.msk [vmem:[#allocation3 + $0x1c] sm:$0x1] %vm2006_vm14, %v1987_v59  ;;  %v3341_v53 = vld [vmem:[#allocation3 + $0xe] sm:$0x3] }
 0x320   : > { %3229 = vst.msk [vmem:[#allocation3 + $0x18] sm:$0x3] %vm622_vm1, %v3228_v63  ;;  %v3237_v34 = vmul.f32 %v7199_v21, %v3228_v63 }
 0x321   : > { %v1989_v54 = vpop.permute.xlu1 %1988  ;;  %v3305_v9 = vld [vmem:[#allocation3 + $0x16] sm:$0x3] }
 0x322   : > { %v3238_v0 = vsub.f32 %v3231_v28, %v3237_v34  ;;  %2022 = vst.msk [vmem:[#allocation3 + $0x1e] sm:$0x1] %vm2006_vm14, %v1989_v54 }
 0x324   : > { %v3244_v40 = vmul.f32 %v7200_v24, %v3238_v0  ;;  %v7213_v24 = vld [vmem:[%s7425_s2 + $0x6] ss:$0 sm:$0xff] }
 0x325   : > { %v2644_v36 = vpop.permute.xlu0 %2643  ;;  %v3247_v43 = vld [vmem:[#allocation3 + $0x1c] sm:$0x3] }
 0x326   : > { %3245 = vst.msk [vmem:[#allocation3 + $0x1a] sm:$0x3] %vm622_vm1, %v3244_v40  ;;  %v3253_v5 = vmul.f32 %v7201_v37, %v3244_v40 }
 0x327   : > { %2676 = vst.msk [vmem:[#allocation3 + $0x1f] sm:$0x1] %vm1651_vm13, %v2644_v36  ;;  %v3296_v62 = vld [vmem:[#allocation3 + $0x18] sm:$0x3] }
 0x328   : > { %v3254_v39 = vsub.f32 %v3247_v43, %v3253_v5  ;;  %3030 = vst.msk [vmem:[#allocation3 + $0x1f] sm:$0x1] %vm2006_vm14, %v2998_v35 }
 0x32a   : > { %v3260_v17 = vmul.f32 %v7202_v19, %v3254_v39  ;;  %v7214_v39 = vld [vmem:[%s7425_s2 + $0x5] ss:$0 sm:$0xff] }
 0x32c   : > { %3261 = vst.msk [vmem:[#allocation3 + $0x1c] sm:$0x3] %vm622_vm1, %v3260_v17  ;;  %v3269_v41 = vmul.f32 %v7203_v14, %v3260_v17 }
 0x32d   : > { %v3287_v22 = vld [vmem:[#allocation3 + $0x1a] sm:$0x3] }
 0x32f   : > { %v3263_v45 = vld [vmem:[#allocation3 + $0x1e] sm:$0x3] }
 0x330   : > { %v3270_v18 = vsub.f32 %v3263_v45, %v3269_v41 }
 0x332   : > { %v3276_v47 = vmul.f32 %v7204_v44, %v3270_v18 }
 0x333   : > { %v3278_v49 = vld [vmem:[#allocation3 + $0x1c] sm:$0x3] }
 0x334   : > { %3277 = vst.msk [vmem:[#allocation3 + $0x1e] sm:$0x3] %vm622_vm1, %v3276_v47  ;;  %v3284_v60 = vmul.f32 %v7205_v15, %v3276_v47 }
 0x336   : > { %v3285_v56 = vsub.f32 %v3278_v49, %v3284_v60 }
 0x338   : > { %3286 = vst.msk [vmem:[#allocation3 + $0x1c] sm:$0x3] %vm622_vm1, %v3285_v56  ;;  %v3293_v13 = vmul.f32 %v7206_v46, %v3285_v56  ;;  %v3350_v56 = vld [vmem:[#allocation3 + $0xc] sm:$0x3] }
 0x33a   : > { %v3294_v57 = vsub.f32 %v3287_v22, %v3293_v13 }
 0x33b   : > { %v8201_v1 = vld [vmem:[#allocation3 + $0x1e] sm:$0x1] }
 0x33c   : > { %3295 = vst.msk [vmem:[#allocation3 + $0x1a] sm:$0x3] %vm622_vm1, %v3294_v57  ;;  %v3302_v61 = vmul.f32 %v7207_v11, %v3294_v57  ;;  %v3770_v63 = vrot.slane %v8201_v1, 1  ;;  %v4081_v1 = vld [vmem:[#allocation3 + $0x1e] sm:$0x1] }
 0x33e   : > { %v3303_v4 = vsub.f32 %v3296_v62, %v3302_v61 }
 0x33f   : > { %v8199_v33 = vld [vmem:[#allocation3 + $0x1c] sm:$0x1] }
 0x340   : > { %3304 = vst.msk [vmem:[#allocation3 + $0x18] sm:$0x3] %vm622_vm1, %v3303_v4  ;;  %v3311_v7 = vmul.f32 %v7208_v58, %v3303_v4  ;;  %v3768_v59 = vrot.slane %v8199_v33, 2  ;;  %v3426_v22 = vld [vmem:[#allocation3 + $0x1c] sm:$0x1] }
 0x342   : > { %v3312_v10 = vsub.f32 %v3305_v9, %v3311_v7 }
 0x343   : > { %v8203_v26 = vld [vmem:[#allocation3 + $0x1a] sm:$0x1] }
 0x344   : > { %3313 = vst.msk [vmem:[#allocation3 + $0x16] sm:$0x3] %vm622_vm1, %v3312_v10  ;;  %v3320_v55 = vmul.f32 %v7209_v6, %v3312_v10  ;;  %v8205_v29 = vld [vmem:[#allocation3 + $0x1a] sm:$0x1]  ;;  %v3766_v54 = vrot.slane %v8203_v26, 3 }
 0x345   : > { %v3466_v0 = vrot.slane %v8205_v29, 3 }
 0x346   : > { %v3321_v2 = vsub.f32 %v3314_v23, %v3320_v55  ;;  %v7215_v23 = vld [vmem:[%s7425_s2 + $0x4] ss:$0 sm:$0xff] }
 0x347   : > { %v3724_v28 = vld [vmem:[#allocation3 + $0x18] sm:$0x1] }
 0x348   : > { %v3329_v25 = vmul.f32 %v7210_v12, %v3321_v2  ;;  %3322 = vst.msk [vmem:[#allocation3 + $0x14] sm:$0x3] %vm622_vm1, %v3321_v2  ;;  %v3764_v45 = vrot.slane %v3724_v28, 4  ;;  %v3424_v13 = vld [vmem:[#allocation3 + $0x18] sm:$0x1] }
 0x349   : > { %v4078_v10 = vld [vmem:[#allocation3 + $0x18] sm:$0x1]  ;;  %v3359_v2 = vld [vmem:[#allocation3 + $0xa] sm:$0x3] }
 0x34a   : > { %v3330_v30 = vsub.f32 %v3323_v27, %v3329_v25  ;;  %v3427_v25 = vld [vmem:[#allocation3 + $0x1e] sm:$0x1]  ;;  %v4118_v28 = vrot.slane %v4078_v10, 4 }
 0x34b   : > { %v3723_v37 = vld [vmem:[#allocation3 + $0x16] sm:$0x1] }
 0x34c   : > { %3331 = vst.msk [vmem:[#allocation3 + $0x12] sm:$0x3] %vm622_vm1, %v3330_v30  ;;  %v3338_v32 = vmul.f32 %v7211_v3, %v3330_v30  ;;  %v3423_v40 = vld [vmem:[#allocation3 + $0x16] sm:$0x1]  ;;  %v3762_v44 = vrot.slane %v3723_v37, 5  ;;  %v3464_v30 = vrot.slane %v3424_v13, 4 }
 0x34d   : > { %v4077_v36 = vld [vmem:[#allocation3 + $0x16] sm:$0x1]  ;;  %v3462_v15 = vrot.slane %v3423_v40, 5 }
 0x34e   : > { %v3339_v21 = vsub.f32 %v3332_v16, %v3338_v32  ;;  %v4116_v60 = vrot.slane %v4077_v36, 5  ;;  %v3470_v36 = vrot.slane %v3427_v25, 1 }
 0x34f   : > { %v3722_v19 = vld [vmem:[#allocation3 + $0x14] sm:$0x1] }
 0x350   : > { %v3347_v34 = vmul.f32 %v7212_v31, %v3339_v21  ;;  %3340 = vst.msk [vmem:[#allocation3 + $0x10] sm:$0x3] %vm622_vm1, %v3339_v21  ;;  %v3422_v5 = vld [vmem:[#allocation3 + $0x14] sm:$0x1]  ;;  %v3760_v47 = vrot.slane %v3722_v19, 6 }
 0x351   : > { %v4076_v35 = vld [vmem:[#allocation3 + $0x14] sm:$0x1]  ;;  %v3460_v49 = vrot.slane %v3422_v5, 6  ;;  %v7216_v5 = vld [vmem:[%s7425_s2 + $0x3] ss:$0 sm:$0xff] }
 0x352   : > { %v3348_v43 = vsub.f32 %v3341_v53, %v3347_v34  ;;  %v4114_v46 = vrot.slane %v4076_v35, 6  ;;  %v4079_v34 = vld [vmem:[#allocation3 + $0x1a] sm:$0x1]  ;;  %v3368_v35 = vld [vmem:[#allocation3 + $0x8] sm:$0x3] }
 0x353   : > { %v3721_v14 = vld [vmem:[#allocation3 + $0x12] sm:$0x1] }
 0x354   : > { %v3421_v17 = vld [vmem:[#allocation3 + $0x12] sm:$0x1]  ;;  %3349 = vst.msk [vmem:[#allocation3 + $0xe] sm:$0x3] %vm622_vm1, %v3348_v43  ;;  %v3356_v18 = vmul.f32 %v7213_v24, %v3348_v43  ;;  %v3758_v11 = vrot.slane %v3721_v14, 7  ;;  %v3468_v24 = vrot.slane %v3426_v22, 2 }
 0x355   : > { %v4075_v41 = vld [vmem:[#allocation3 + $0x12] sm:$0x1]  ;;  %v3458_v57 = vrot.slane %v3421_v17, 7  ;;  %v4080_v17 = vld [vmem:[#allocation3 + $0x1c] sm:$0x1]  ;;  %v4124_v22 = vrot.slane %v4081_v1, 1 }
 0x356   : > { %v4112_v58 = vrot.slane %v4075_v41, 7  ;;  %v3357_v61 = vsub.f32 %v3350_v56, %v3356_v18  ;;  %v4120_v41 = vrot.slane %v4079_v34, 3  ;;  %v7217_v18 = vld [vmem:[%s7425_s2 + $0x2] ss:$0 sm:$0xff]  ;;  %v8255_v56 = vld [vmem:[#allocation3 + $0x1d] sm:$0x1] }
 0x357   : > { %v3720_v62 = vld [vmem:[#allocation3 + $0x10] sm:$0x1]  ;;  %v5082_v25 = vld [vmem:[#allocation3 + $0x11] sm:$0x1] }
 0x358   : > { %v3420_v4 = vld [vmem:[#allocation3 + $0x10] sm:$0x1]  ;;  %v3759_v7 = vsel %vm1031_vm2, %v3758_v11, %v3720_v62  ;;  %3358 = vst.msk [vmem:[#allocation3 + $0xc] sm:$0x3] %vm622_vm1, %v3357_v61  ;;  %v3365_v55 = vmul.f32 %v7214_v39, %v3357_v61  ;;  %v3386_v11 = vld [vmem:[#allocation3 + $0x4] sm:$0x3] }
 0x359   : > { %v4074_v6 = vld [vmem:[#allocation3 + $0x10] sm:$0x1]  ;;  %v3459_v9 = vsel %vm1031_vm2, %v3458_v57, %v3420_v4  ;;  %v3761_v3 = vsel %vm1034_vm3, %v3760_v47, %v3759_v7  ;;  %v3377_v47 = vld [vmem:[#allocation3 + $0x6] sm:$0x3]  ;;  %v7218_v61 = vld [vmem:[%s7425_s2 + $0x1] ss:$0 sm:$0xff] }
 0x35a   : > { %v4113_v12 = vsel %vm1031_vm2, %v4112_v58, %v4074_v6  ;;  %v3461_v27 = vsel %vm1034_vm3, %v3460_v49, %v3459_v9  ;;  %v3763_v32 = vsel %vm1037_vm4, %v3762_v44, %v3761_v3  ;;  %v3366_v29 = vsub.f32 %v3359_v2, %v3365_v55  ;;  %v5083_v62 = vld [vmem:[#allocation3 + $0x13] sm:$0x1]  ;;  %v8264_v7 = vld [vmem:[#allocation3 + $0x1b] sm:$0x1]  ;;  %v5085_v55 = vld [vmem:[#allocation3 + $0x17] sm:$0x1] }
 0x35b   : > { %v4115_v31 = vsel %vm1034_vm3, %v4114_v46, %v4113_v12  ;;  %v3463_v16 = vsel %vm1037_vm4, %v3462_v15, %v3461_v27  ;;  %v3765_v21 = vsel %vm1040_vm5, %v3764_v45, %v3763_v32  ;;  %v5130_v6 = vrot.slane %v8255_v56, 2  ;;  %v8272_v2 = vld [vmem:[#allocation3 + $0x19] sm:$0x1]  ;;  %v3395_v3 = vld [vmem:[#allocation3 + $0x2] sm:$0x3] }
 0x35c   : > { %v4117_v26 = vsel %vm1037_vm4, %v4116_v60, %v4115_v31  ;;  %v3465_v53 = vsel %vm1040_vm5, %v3464_v30, %v3463_v16  ;;  %v3767_v37 = vsel %vm1043_vm6, %v3766_v54, %v3765_v21  ;;  %3367 = vst.msk [vmem:[#allocation3 + $0xa] sm:$0x3] %vm622_vm1, %v3366_v29  ;;  %v3374_v19 = vmul.f32 %v7215_v23, %v3366_v29  ;;  %v8253_v60 = vld [vmem:[#allocation3 + $0x1b] sm:$0x1]  ;;  %v8270_v23 = vld [vmem:[#allocation3 + $0x19] sm:$0x1] }
 0x35d   : > { %v3467_v40 = vsel %vm1043_vm6, %v3466_v0, %v3465_v53  ;;  %v3769_v43 = vsel %vm1046_vm7, %v3768_v59, %v3767_v37  ;;  %v4119_v14 = vsel %vm1040_vm5, %v4118_v28, %v4117_v26  ;;  %v5128_v4 = vrot.slane %v8253_v60, 3  ;;  %v5084_v27 = vld [vmem:[#allocation3 + $0x15] sm:$0x1]  ;;  %v4729_v30 = vld [vmem:[#allocation3 + $0x13] sm:$0x1] }
 0x35e   : > { %v3469_v39 = vsel %vm1046_vm7, %v3468_v24, %v3467_v40  ;;  %v3771_v54 = vsel %vm1049_vm8, %v3770_v63, %v3769_v43  ;;  %v3375_v44 = vsub.f32 %v3368_v35, %v3374_v19  ;;  %v4121_v59 = vsel %vm1043_vm6, %v4120_v41, %v4119_v14  ;;  %v7219_v16 = vld [vmem:[%s7425_s2] ss:$0 sm:$0xff]  ;;  %v4731_v53 = vld [vmem:[#allocation3 + $0x17] sm:$0x1]  ;;  %v4730_v19 = vld [vmem:[#allocation3 + $0x15] sm:$0x1] }
 0x35f   : > { %v3471_v0 = vsel %vm1049_vm8, %v3470_v36, %v3469_v39  ;;  %3774 = vrot.lane.b32.xlu1 %v3771_v54, %s7294_s15  ;;  %v4122_v63 = vrot.slane %v4080_v17, 2  ;;  %v5120_v26 = vrot.slane %v5083_v62, 7  ;;  %v5124_v29 = vrot.slane %v5085_v55, 5  ;;  %v4728_v36 = vld [vmem:[#allocation3 + $0x11] sm:$0x1]  ;;  %s7096_s2 = sld [smem:[#allocation5 + $0x81]] }
 0x360   : > { %v3474_v45 = vsel %vm1065_vm9, %v3471_v0, 0  ;;  %3376 = vst.msk [vmem:[#allocation3 + $0x8] sm:$0x3] %vm622_vm1, %v3375_v44  ;;  %v3383_v15 = vmul.f32 %v7216_v5, %v3375_v44  ;;  %v5126_v21 = vrot.slane %v8270_v23, 4  ;;  %v4772_v24 = vrot.slane %v8272_v2, 4 }
 0x361   : > { %v8243_v33 = vand.u32 4294901760, %v3474_v45  ;;  %v4123_v13 = vsel %vm1046_vm7, %v4122_v63, %v4121_v59  ;;  %v4774_v34 = vrot.slane %v8264_v7, 3  ;;  %v5121_v37 = vsel %vm1031_vm2, %v5120_v26, %v5082_v25  ;;  %v3404_v35 = vld [vmem:[#allocation3] sm:$0x3]  ;;  %v8281_v43 = vld [vmem:[#allocation3 + $0xc] sm:$0x1] }
 0x362   : > { %v3384_v46 = vsub.f32 %v3377_v47, %v3383_v15  ;;  %v4125_v9 = vsel %vm1049_vm8, %v4124_v22, %v4123_v13  ;;  %v5122_v40 = vrot.slane %v5084_v27, 6  ;;  %v4766_v5 = vrot.slane %v4729_v30, 7  ;;  %v8283_v39 = vld [vmem:[#allocation3 + $0xe] sm:$0x1]  ;;  %v8288_v0 = vld [vmem:[#allocation3 + $0xc] sm:$0x1] }
 0x363   : > { %3491 = vmatpush.xpose.msrb.mxu0 %v8243_v33  ;;  %3592 = vmatpush.xpose.msrb.mxu3 %v8243_v33  ;;  %v8251_v49 = vsub.f32 %v3474_v45, %v8243_v33  ;;  %v8285_v14 = vld [vmem:[#allocation3 + $0xe] sm:$0x1]  ;;  %v8292_v41 = vld [vmem:[#allocation3 + $0xa] sm:$0x1]  ;;  %v8294_v44 = vld [vmem:[#allocation3 + $0xc] sm:$0x1] }
 0x364   : > { %3385 = vst.msk [vmem:[#allocation3 + $0x6] sm:$0x3] %vm622_vm1, %v3384_v46  ;;  %v3392_v58 = vmul.f32 %v7217_v18, %v3384_v46  ;;  %v8290_v17 = vld [vmem:[#allocation3 + $0xe] sm:$0x1]  ;;  %v5123_v45 = vsel %vm1034_vm3, %v5122_v40, %v5121_v37  ;;  %v4767_v59 = vsel %vm1031_vm2, %v4766_v5, %v4728_v36  ;;  %v4768_v15 = vrot.slane %v4730_v19, 6 }
 0x365   : > { %3562 = vmatpush.xpose.msrb.mxu2 %v8251_v49  ;;  %v3527_v57 = vand.u32 4294901760, %v8251_v49  ;;  %v4770_v18 = vrot.slane %v4731_v53, 5  ;;  %v4108_v63 = vrot.slane %v8281_v43, 2  ;;  %v4110_v47 = vrot.slane %v8283_v39, 1  ;;  %v8304_v22 = vld [vmem:[#allocation3 + $0xa] sm:$0x1] }
 0x366   : > { %v3393_v12 = vsub.f32 %v3386_v11, %v3392_v58  ;;  %v3756_v46 = vrot.slane %v8285_v14, 1  ;;  %v8301_v11 = vld [vmem:[#allocation3 + $0xa] sm:$0x1]  ;;  %v3754_v13 = vrot.slane %v8288_v0, 2  ;;  %v3456_v58 = vrot.slane %v8290_v17, 1 }
 0x367   : > { %v3528_v10 = vsub.f32 %v8251_v49, %v3527_v57  ;;  %4128 = vrot.lane.b32.xlu1 %v4125_v9, %s7295_s21  ;;  %v4106_v62 = vrot.slane %v8292_v41, 3  ;;  %v3454_v9 = vrot.slane %v8294_v44, 2  ;;  %v3752_v40 = vrot.slane %v8301_v11, 3  ;;  %v4734_v0 = vld [vmem:[#allocation3 + $0x1d] sm:$0x1] }
 0x368   : > { %3394 = vst.msk [vmem:[#allocation3 + $0x4] sm:$0x3] %vm622_vm1, %v3393_v12  ;;  %v3401_v32 = vmul.f32 %v7218_v61, %v3393_v12  ;;  %v4070_v61 = vld [vmem:[#allocation3 + $0x8] sm:$0x1]  ;;  %v4769_v12 = vsel %vm1034_vm3, %v4768_v15, %v4767_v59  ;;  %v3452_v36 = vrot.slane %v8304_v22, 3 }
 0x369   : > { %v3529_v31 = vand.u32 4294901760, %v3528_v10  ;;  %v5125_v10 = vsel %vm1037_vm4, %v5124_v29, %v5123_v45  ;;  %v4771_v53 = vsel %vm1037_vm4, %v4770_v18, %v4769_v12  ;;  %v3416_v29 = vld [vmem:[#allocation3 + $0x8] sm:$0x1]  ;;  %v4724_v14 = vld [vmem:[#allocation3 + $0x9] sm:$0x1] }
 0x36a   : > { %v3402_v28 = vsub.f32 %v3395_v3, %v3401_v32  ;;  %v3716_v3 = vld [vmem:[#allocation3 + $0x8] sm:$0x1]  ;;  %v5127_v26 = vsel %vm1040_vm5, %v5126_v21, %v5125_v10  ;;  %v4773_v22 = vsel %vm1040_vm5, %v4772_v24, %v4771_v53  ;;  %v5079_v56 = vld [vmem:[#allocation3 + $0xb] sm:$0x1] }
 0x36b   : > { %3530 = vmatpush.xpose.msrb.mxu1 %v3529_v31  ;;  %v4069_v55 = vld [vmem:[#allocation3 + $0x6] sm:$0x1]  ;;  %v3750_v37 = vrot.slane %v3716_v3, 4  ;;  %v5129_v11 = vsel %vm1043_vm6, %v5128_v4, %v5127_v26  ;;  %v4775_v39 = vsel %vm1043_vm6, %v4774_v34, %v4773_v22 }
 0x36c   : > { %3403 = vst.msk [vmem:[#allocation3 + $0x2] sm:$0x3] %vm622_vm1, %v3402_v28  ;;  %v3409_v54 = vmul.f32 %v7219_v16, %v3402_v28  ;;  %v3715_v23 = vld [vmem:[#allocation3 + $0x6] sm:$0x1]  ;;  %v4104_v28 = vrot.slane %v4070_v61, 4  ;;  %v4102_v5 = vrot.slane %v4069_v55, 5 }
 0x36d   : > { %v3415_v41 = vld [vmem:[#allocation3 + $0x6] sm:$0x1] }
 0x36e   : > { %v3410_v1 = vsub.f32 %v3404_v35, %v3409_v54  ;;  %v3748_v54 = vrot.slane %v3715_v23, 5  ;;  %v3448_v23 = vrot.slane %v3415_v41, 5 }
 0x36f   : > { %v4068_v25 = vld [vmem:[#allocation3 + $0x4] sm:$0x1]  ;;  %v4722_v3 = vld [vmem:[#allocation3 + $0x5] sm:$0x1] }
 0x370   : > { %3411 = vst.msk [vmem:[#allocation3] sm:$0x3] %vm622_vm1, %v3410_v1  ;;  %v3714_v27 = vld [vmem:[#allocation3 + $0x4] sm:$0x1]  ;;  %v4100_v19 = vrot.slane %v4068_v25, 6  ;;  %v4754_v41 = vrot.slane %v4722_v3, 6 }
 0x371   : > { %v3414_v30 = vld [vmem:[#allocation3 + $0x4] sm:$0x1]  ;;  %v3746_v35 = vrot.slane %v3714_v27, 6 }
 0x372   : > { %v3446_v15 = vrot.slane %v3414_v30, 6  ;;  %v3450_v30 = vrot.slane %v3416_v29, 4 }
 0x373   : > { %v4067_v31 = vld [vmem:[#allocation3 + $0x2] sm:$0x1]  ;;  %v4721_v1 = vld [vmem:[#allocation3 + $0x3] sm:$0x1] }
 0x374   : > { %v3713_v32 = vld [vmem:[#allocation3 + $0x2] sm:$0x1]  ;;  %v4098_v44 = vrot.slane %v4067_v31, 7 }
 0x375   : > { %v3413_v16 = vld [vmem:[#allocation3 + $0x2] sm:$0x1]  ;;  %v3744_v45 = vrot.slane %v3713_v32, 7  ;;  %v4752_v32 = vrot.slane %v4721_v1, 7  ;;  %v5077_v1 = vld [vmem:[#allocation3 + $0x7] sm:$0x1] }
 0x376   : > { %v3444_v59 = vrot.slane %v3413_v16, 7  ;;  %v5075_v16 = vld [vmem:[#allocation3 + $0x3] sm:$0x1] }
 0x377   : > { %v4066_v21 = vld [vmem:[#allocation3] sm:$0x1]  ;;  %v4720_v4 = vld [vmem:[#allocation3 + $0x1] sm:$0x1] }
 0x378   : > { %v3712_v10 = vld [vmem:[#allocation3] sm:$0x1]  ;;  %v4099_v61 = vsel %vm1031_vm2, %v4098_v44, %v4066_v21  ;;  %v5078_v21 = vld [vmem:[#allocation3 + $0x9] sm:$0x1] }
 0x379   : > { %v3412_v18 = vld [vmem:[#allocation3] sm:$0x1]  ;;  %v3745_v12 = vsel %vm1031_vm2, %v3744_v45, %v3712_v10  ;;  %v4101_v25 = vsel %vm1034_vm3, %v4100_v19, %v4099_v61  ;;  %v5074_v45 = vld [vmem:[#allocation3 + $0x1] sm:$0x1]  ;;  %v5131_v61 = vsel %vm1046_vm7, %v5130_v6, %v5129_v11 }
 0x37a   : > { %v3445_v55 = vsel %vm1031_vm2, %v3444_v59, %v3412_v18  ;;  %v3747_v27 = vsel %vm1034_vm3, %v3746_v35, %v3745_v12  ;;  %v4103_v2 = vsel %vm1037_vm4, %v4102_v5, %v4101_v25  ;;  %v5076_v35 = vld [vmem:[#allocation3 + $0x5] sm:$0x1]  ;;  %v5110_v18 = vrot.slane %v5077_v1, 5  ;;  %v4735_v12 = vld [vmem:[#allocation3 + $0x1f] sm:$0x1] }
 0x37b   : > { %v3447_v60 = vsel %vm1034_vm3, %v3446_v15, %v3445_v55  ;;  %v3749_v24 = vsel %vm1037_vm4, %v3748_v54, %v3747_v27  ;;  %v4105_v26 = vsel %vm1040_vm5, %v4104_v28, %v4103_v2  ;;  %v4753_v54 = vsel %vm1031_vm2, %v4752_v32, %v4720_v4  ;;  %v4723_v15 = vld [vmem:[#allocation3 + $0x7] sm:$0x1]  ;;  %v4725_v25 = vld [vmem:[#allocation3 + $0xb] sm:$0x1]  ;;  %v5080_v32 = vld [vmem:[#allocation3 + $0xd] sm:$0x1] }
 0x37c   : > { %v3449_v31 = vsel %vm1037_vm4, %v3448_v23, %v3447_v60  ;;  %v3751_v53 = vsel %vm1040_vm5, %v3750_v37, %v3749_v24  ;;  %v4107_v44 = vsel %vm1043_vm6, %v4106_v62, %v4105_v26  ;;  %v5106_v62 = vrot.slane %v5075_v16, 7  ;;  %v4726_v24 = vld [vmem:[#allocation3 + $0xd] sm:$0x1] }
 0x37d   : > { %v3451_v19 = vsel %vm1040_vm5, %v3450_v30, %v3449_v31  ;;  %v3753_v29 = vsel %vm1043_vm6, %v3752_v40, %v3751_v53  ;;  %v4109_v59 = vsel %vm1046_vm7, %v4108_v63, %v4107_v44  ;;  %v5108_v63 = vrot.slane %v5076_v35, 6  ;;  %v5081_v44 = vld [vmem:[#allocation3 + $0xf] sm:$0x1] }
 0x37e   : > { %v3453_v5 = vsel %vm1043_vm6, %v3452_v36, %v3451_v19  ;;  %v3755_v28 = vsel %vm1046_vm7, %v3754_v13, %v3753_v29  ;;  %v4111_v40 = vsel %vm1049_vm8, %v4110_v47, %v4109_v59  ;;  %v4755_v47 = vsel %vm1034_vm3, %v4754_v41, %v4753_v54  ;;  %v4727_v41 = vld [vmem:[#allocation3 + $0xf] sm:$0x1] }
 0x37f   : > { %v3455_v37 = vsel %vm1046_vm7, %v3454_v9, %v3453_v5  ;;  %v3757_v36 = vsel %vm1049_vm8, %v3756_v46, %v3755_v28  ;;  %4126 = vrot.lane.b32.xlu2 %v4111_v40, %s7295_s21  ;;  %v5089_v9 = vld [vmem:[#allocation3 + $0x1f] sm:$0x1]  ;;  %v5107_v17 = vsel %vm1031_vm2, %v5106_v62, %v5074_v45  ;;  %v4776_v55 = vrot.slane %v4734_v0, 2 }
 0x380   : > { %v3457_v43 = vsel %vm1049_vm8, %v3456_v58, %v3455_v37  ;;  %3772 = vrot.lane.b32.xlu0 %v3757_v36, %s7294_s15  ;;  %v4756_v58 = vrot.slane %v4723_v15, 5  ;;  %v5109_v10 = vsel %vm1034_vm3, %v5108_v63, %v5107_v17  ;;  %v5132_v34 = vrot.slane %v5089_v9, 1  ;;  %v4429_v9 = vld [vmem:[#allocation3 + $0x13] sm:$0x1]  ;;  %v4430_v17 = vld [vmem:[#allocation3 + $0x15] sm:$0x1] }
 0x381   : > { %v3472_v13 = vsel %vm1065_vm9, %v3457_v43, 0  ;;  %v5111_v23 = vsel %vm1037_vm4, %v5110_v18, %v5109_v10  ;;  %v4777_v3 = vsel %vm1046_vm7, %v4776_v55, %v4775_v39  ;;  %v4758_v27 = vrot.slane %v4724_v14, 4  ;;  %v4428_v14 = vld [vmem:[#allocation3 + $0x11] sm:$0x1]  ;;  %v4420_v55 = vld [vmem:[#allocation3 + $0x1] sm:$0x1] }
 0x382   : > { %v3492_v46 = vand.u32 4294901760, %v3472_v13  ;;  %v4757_v22 = vsel %vm1037_vm4, %v4756_v58, %v4755_v47  ;;  %v5112_v60 = vrot.slane %v5078_v21, 4  ;;  %v4778_v6 = vrot.slane %v4735_v12, 1  ;;  %v4421_v58 = vld [vmem:[#allocation3 + $0x3] sm:$0x1] }
 0x383   : > { %v5133_v30 = vsel %vm1049_vm8, %v5132_v34, %v5131_v61  ;;  %v4759_v4 = vsel %vm1040_vm5, %v4758_v27, %v4757_v22  ;;  %v4760_v31 = vrot.slane %v4725_v25, 3  ;;  %v5114_v16 = vrot.slane %v5079_v56, 3  ;;  %v4431_v61 = vld [vmem:[#allocation3 + $0x17] sm:$0x1] }
 0x384   : > { %3493 = vmatpush.xpose.msrb.mxu0 %v3492_v46  ;;  %3594 = vmatpush.xpose.msrb.mxu3 %v3492_v46  ;;  %v3532_v7 = vsub.f32 %v3472_v13, %v3492_v46  ;;  %v5113_v2 = vsel %vm1040_vm5, %v5112_v60, %v5111_v23  ;;  %v4779_v49 = vsel %vm1049_vm8, %v4778_v6, %v4777_v3  ;;  %v4762_v35 = vrot.slane %v4726_v24, 2  ;;  %v4432_v3 = vld [vmem:[#allocation3 + $0x19] sm:$0x1]  ;;  %v4423_v60 = vld [vmem:[#allocation3 + $0x7] sm:$0x1] }
 0x385   : > { %v4761_v53 = vsel %vm1043_vm6, %v4760_v31, %v4759_v4  ;;  %v5115_v19 = vsel %vm1043_vm6, %v5114_v16, %v5113_v2  ;;  %v5116_v29 = vrot.slane %v5080_v32, 2  ;;  %v4764_v45 = vrot.slane %v4727_v41, 1 }
 0x386   : > { %3565 = vmatpush.xpose.msrb.mxu2 %v3532_v7  ;;  %v3533_v11 = vand.u32 4294901760, %v3532_v7  ;;  %v4763_v5 = vsel %vm1046_vm7, %v4762_v35, %v4761_v53  ;;  %v5118_v59 = vrot.slane %v5081_v44, 1  ;;  %v4468_v12 = vrot.slane %v4430_v17, 6  ;;  %v4434_v53 = vld [vmem:[#allocation3 + $0x1d] sm:$0x1] }
 0x387   : > { %3499 = vmatmul.f32.vlgmr.msrb.gmra.mxu0 %v7724_v8  ;;  %3598 = vmatmul.f32.vlgmr.msrb.gmra.mxu3 %v7720_v20  ;;  %v5117_v54 = vsel %vm1046_vm7, %v5116_v29, %v5115_v19  ;;  %v4765_v28 = vsel %vm1049_vm8, %v4764_v45, %v4763_v5  ;;  %v4452_v34 = vrot.slane %v4421_v58, 7  ;;  %v4470_v25 = vrot.slane %v4431_v61, 5  ;;  %v4425_v44 = vld [vmem:[#allocation3 + $0xb] sm:$0x1] }
 0x388   : > { %3625 = vmatpush.xpose.msra.mxu0 %v3527_v57  ;;  %v3534_v57 = vsub.f32 %v3532_v7, %v3533_v11  ;;  %5136 = vrot.lane.b32.xlu0 %v5133_v30, %s7295_s21  ;;  %v5119_v37 = vsel %vm1049_vm8, %v5118_v59, %v5117_v54  ;;  %v4422_v7 = vld [vmem:[#allocation3 + $0x5] sm:$0x1]  ;;  %v4433_v30 = vld [vmem:[#allocation3 + $0x1b] sm:$0x1]  ;;  %v4472_v4 = vrot.slane %v4432_v3, 4  ;;  %v4456_v24 = vrot.slane %v4423_v60, 5 }
 0x389   : > { %4782 = vrot.lane.b32.xlu2 %v4779_v49, %s7294_s15  ;;  %3568 = vmatmul.f32.vlgmr.msrb.gmra.mxu2 %v7717_v42  ;;  %v4453_v27 = vsel %vm1031_vm2, %v4452_v34, %v4420_v55  ;;  %v4454_v6 = vrot.slane %v4422_v7, 6  ;;  %v4474_v19 = vrot.slane %v4433_v30, 3 }
 0x38a   : > { %v3535_v26 = vand.u32 4294901760, %v3534_v57  ;;  %v4424_v57 = vld [vmem:[#allocation3 + $0x9] sm:$0x1] }
 0x38b   : > { %v4455_v2 = vsel %vm1034_vm3, %v4454_v6, %v4453_v27  ;;  %v4458_v29 = vrot.slane %v4424_v57, 4 }
 0x38c   : > { %3629 = vmatpush.xpose.msra.mxu0 %v3533_v11  ;;  %3536 = vmatpush.xpose.msrb.mxu1 %v3535_v26  ;;  %v4457_v41 = vsel %vm1037_vm4, %v4456_v24, %v4455_v2 }
 0x38f   : > { %7013 = vmatmul.msk.f32.vlgmr.msrb.gmra.mxu1 %vm1065_vm9, %v7711_v38  ;;  %3507 = vmatmul.f32.gmra.mxu0 %v7746_v52 }
 0x390   : > { %3654 = vmatpush.xpose.msra.mxu1 %v8243_v33  ;;  %3604 = vmatmul.f32.gmra.mxu3 %v7740_v51 }
 0x391   : > { %4780 = vrot.lane.b32.xlu0 %v4765_v28, %s7294_s15  ;;  %5134 = vrot.lane.b32.xlu2 %v5119_v37, %s7295_s21  ;;  %v4435_v28 = vld [vmem:[#allocation3 + $0x1f] sm:$0x1]  ;;  %v4476_v37 = vrot.slane %v4434_v53, 2 }
 0x392   : > { %3573 = vmatmul.f32.gmra.mxu2 %v7737_v50 }
 0x394   : > { %3656 = vmatpush.xpose.msra.mxu1 %v3492_v46  ;;  %v4466_v46 = vrot.slane %v4429_v9, 7 }
 0x396   : > { %v4467_v10 = vsel %vm1031_vm2, %v4466_v46, %v4428_v14  ;;  %v4427_v14 = vld [vmem:[#allocation3 + $0xf] sm:$0x1]  ;;  %vm6614_vm2 = vcmask 386304  }
 0x397   : > { %7014 = vmatmul.msk.f32.gmra.mxu1 %vm1065_vm9, %v7731_v48  ;;  %7015 = vmatmul.msk.f32.vlgmr.msra.gmra.mxu0 %vm1065_vm9, %v7711_v38  ;;  %v4469_v22 = vsel %vm1034_vm3, %v4468_v12, %v4467_v10  ;;  %v4464_v10 = vrot.slane %v4427_v14, 1 }
 0x398   : > { %v4471_v11 = vsel %vm1037_vm4, %v4470_v25, %v4469_v22 }
 0x399   : > { %v4473_v16 = vsel %vm1040_vm5, %v4472_v4, %v4471_v11 }
 0x39a   : > { %v4475_v54 = vsel %vm1043_vm6, %v4474_v19, %v4473_v16 }
 0x39f   : > { %7017 = vmatmul.msk.f32.vlgmr.msra.gmra.mxu1 %vm1065_vm9, %v7711_v38  ;;  %7016 = vmatmul.msk.f32.gmra.mxu0 %vm1065_vm9, %v7731_v48 }
 0x3a7   : > { %7018 = vmatmul.msk.f32.gmra.mxu1 %vm1065_vm9, %v7731_v48 }
 0x3d1   : > { %v3775_v33 = vpop.permute.xlu1 %3774 }
 0x3d2   : > { %v3778_v15 = vsel %vm1065_vm9, %v3775_v33, 0  ;;  %v4459_v33 = vsel %vm1040_vm5, %v4458_v29, %v4457_v41 }
 0x3d3   : > { %v8405_v1 = vand.u32 4294901760, %v3778_v15 }
 0x3d5   : > { %v3830_v62 = vsub.f32 %v3778_v15, %v8405_v1  ;;  %3795 = vmatpush.xpose.msra.mxu2 %v8405_v1  ;;  %3896 = vmatpush.xpose.msrb.mxu1 %v8405_v1  ;;  %v4426_v15 = vld [vmem:[#allocation3 + $0xd] sm:$0x1] }
 0x3d7   : > { %v3831_v40 = vand.u32 4294901760, %v3830_v62  ;;  %3866 = vmatpush.xpose.msrb.mxu0 %v3830_v62 }
 0x3d9   : > { %v3832_v36 = vsub.f32 %v3830_v62, %v3831_v40  ;;  %v4129_v0 = vpop.permute.xlu1 %4128  ;;  %v4127_v13 = vpop.permute.xlu2 %4126  ;;  %v4460_v62 = vrot.slane %v4425_v44, 3 }
 0x3da   : > { %v4132_v63 = vsel %vm1065_vm9, %v4129_v0, 0  ;;  %v4130_v47 = vsel %vm1065_vm9, %v4127_v13, 0  ;;  %v4478_v0 = vrot.slane %v4435_v28, 1 }
 0x3db   : > { %v3833_v43 = vand.u32 4294901760, %v3832_v36  ;;  %v8411_v39 = vand.u32 4294901760, %v4132_v63  ;;  %v8418_v18 = vand.u32 4294901760, %v4130_v47 }
 0x3dd   : > { %3834 = vmatpush.xpose.msra.mxu3 %v3833_v43  ;;  %v8415_v21 = vsub.f32 %v4132_v63, %v8411_v39  ;;  %v8424_v56 = vsub.f32 %v4130_v47, %v8418_v18  ;;  %v4477_v43 = vsel %vm1046_vm7, %v4476_v37, %v4475_v54  ;;  %v4461_v63 = vsel %vm1043_vm6, %v4460_v62, %v4459_v33 }
 0x3de   : > { %v4479_v47 = vsel %vm1049_vm8, %v4478_v0, %v4477_v43 }
 0x3df   : > { %v4185_v23 = vand.u32 4294901760, %v8415_v21  ;;  %v4191_v32 = vand.u32 4294901760, %v8424_v56  ;;  %v4482_v61 = vsel %vm1065_vm9, %v4479_v47, 0 }
 0x3e1   : > { %v4186_v49 = vsub.f32 %v8415_v21, %v4185_v23  ;;  %v4192_v59 = vsub.f32 %v8424_v56, %v4191_v32 }
 0x3e3   : > { %v4187_v5 = vand.u32 4294901760, %v4186_v49  ;;  %v4193_v13 = vand.u32 4294901760, %v4192_v59  ;;  %v4783_v7 = vpop.permute.xlu2 %4782 }
 0x3e4   : > { %v4786_v22 = vsel %vm1065_vm9, %v4783_v7, 0 }
 0x3e5   : > { %v8463_v3 = vand.u32 4294901760, %v4786_v22 }
 0x3eb   : > { %v5135_v53 = vpop.permute.xlu2 %5134 }
 0x3ec   : > { %v5138_v41 = vsel %vm1065_vm9, %v5135_v53, 0 }
 0x3f2   : > { %v3773_v31 = vpop.permute.xlu0 %3772 }
 0x3f3   : > { %v3776_v26 = vsel %vm1065_vm9, %v3773_v31, 0 }
 0x3f4   : > { %v3796_v35 = vand.u32 4294901760, %v3776_v26 }
 0x3f6   : > { %v3836_v45 = vsub.f32 %v3776_v26, %v3796_v35  ;;  %3797 = vmatpush.xpose.msra.mxu2 %v3796_v35  ;;  %3898 = vmatpush.xpose.msrb.mxu1 %v3796_v35 }
 0x3f8   : > { %3869 = vmatpush.xpose.msrb.mxu0 %v3836_v45  ;;  %v3837_v36 = vand.u32 4294901760, %v3836_v45 }
 0x3f9   : > { %3803 = vmatmul.f32.vlgmr.msra.gmra.mxu2 %v7724_v8  ;;  %3902 = vmatmul.f32.vlgmr.msrb.gmra.mxu1 %v7720_v20 }
 0x3fa   : > { %3929 = vmatpush.xpose.msrb.mxu2 %v3831_v40  ;;  %4188 = vmatpush.xpose.msra.mxu1 %v4187_v5  ;;  %v3838_v9 = vsub.f32 %v3836_v45, %v3837_v36  ;;  %v4462_v40 = vrot.slane %v4426_v15, 2  ;;  %v8445_v58 = vpop.permute.xlu0 %5136 }
 0x3fb   : > { %3872 = vmatmul.f32.vlgmr.msrb.gmra.mxu0 %v7717_v42  ;;  %v5140_v26 = vsel %vm1065_vm9, %v8445_v58, 0 }
 0x3fc   : > { %4149 = vmatpush.xpose.msra.mxu0 %v8411_v39  ;;  %v3839_v17 = vand.u32 4294901760, %v3838_v9  ;;  %v4463_v46 = vsel %vm1046_vm7, %v4462_v40, %v4461_v63  ;;  %v8502_v19 = vand.u32 4294901760, %v5140_v26 }
 0x3fd   : > { %v4465_v12 = vsel %vm1049_vm8, %v4464_v10, %v4463_v46 }
 0x3fe   : > { %3933 = vmatpush.xpose.msrb.mxu2 %v3837_v36  ;;  %4194 = vmatpush.xpose.msra.mxu1 %v4193_v13  ;;  %v4480_v55 = vsel %vm1065_vm9, %v4465_v12, 0  ;;  %v5192_v44 = vsub.f32 %v5140_v26, %v8502_v19 }
 0x3ff   : > { %3840 = vmatpush.xpose.msra.mxu3 %v3839_v17  ;;  %v4500_v34 = vand.u32 4294901760, %v4480_v55 }
 0x400   : > { %4151 = vmatpush.xpose.msra.mxu0 %v8418_v18  ;;  %v5193_v54 = vand.u32 4294901760, %v5192_v44 }
 0x401   : > { %3811 = vmatmul.f32.gmra.mxu2 %v7746_v52  ;;  %3908 = vmatmul.f32.gmra.mxu1 %v7740_v51  ;;  %v4540_v25 = vsub.f32 %v4480_v55, %v4500_v34 }
 0x402   : > { %4220 = vmatpush.xpose.msra.mxu2 %v8415_v21  ;;  %4312 = vmatpush.xpose.msrb.mxu1 %v8411_v39  ;;  %v4498_v21 = vand.u32 4294901760, %v4482_v61  ;;  %v5194_v28 = vsub.f32 %v5192_v44, %v5193_v54 }
 0x403   : > { %3958 = vmatpush.xpose.msrb.mxu3 %v8405_v1  ;;  %3877 = vmatmul.f32.gmra.mxu0 %v7737_v50  ;;  %v4541_v6 = vand.u32 4294901760, %v4540_v25 }
 0x404   : > { %4283 = vmatpush.xpose.msrb.mxu0 %v4185_v23  ;;  %7019 = vmatmul.msk.f32.vlgmr.msra.gmra.mxu3 %vm1065_vm9, %v7711_v38  ;;  %v4534_v1 = vsub.f32 %v4482_v61, %v4498_v21  ;;  %v4781_v23 = vpop.permute.xlu0 %4780  ;;  %v3500_v29 = vpop.f32.mrf.mxu0  ;;  %v5195_v36 = vand.u32 4294901760, %v5194_v28 }
 0x405   : > { %v4542_v2 = vsub.f32 %v4540_v25, %v4541_v6 }
 0x406   : > { %4223 = vmatpush.xpose.msra.mxu2 %v8424_v56  ;;  %4314 = vmatpush.xpose.msrb.mxu1 %v8418_v18  ;;  %v4535_v27 = vand.u32 4294901760, %v4534_v1  ;;  %v4784_v56 = vsel %vm1065_vm9, %v4781_v23, 0 }
 0x407   : > { %3960 = vmatpush.xpose.msrb.mxu3 %v3796_v35  ;;  %v4543_v57 = vand.u32 4294901760, %v4542_v2  ;;  %v8511_v35 = vand.u32 4294901760, %v5138_v41 }
 0x408   : > { %4287 = vmatpush.xpose.msrb.mxu0 %v4191_v32  ;;  %v4536_v60 = vsub.f32 %v4534_v1, %v4535_v27 }
 0x409   : > { %7021 = vmatmul.msk.f32.vlgmr.msrb.gmra.mxu2 %vm1065_vm9, %v7711_v38  ;;  %7025 = vmatmul.msk.f32.vlgmr.msra.gmra.mxu1 %vm1065_vm9, %v7711_v38  ;;  %v5198_v5 = vsub.f32 %v5138_v41, %v8511_v35 }
 0x40a   : > { %4499 = vmatpush.xpose.msrb.mxu2 %v4498_v21  ;;  %4600 = vmatpush.xpose.msra.mxu1 %v4498_v21  ;;  %v4537_v4 = vand.u32 4294901760, %v4536_v60  ;;  %v3599_v0 = vpop.f32.mrf.mxu3 }
 0x40b   : > { %4250 = vmatpush.xpose.msra.mxu3 %v8411_v39  ;;  %4157 = vmatmul.f32.vlgmr.msra.gmra.mxu0 %v7724_v8  ;;  %v4838_v39 = vsub.f32 %v4786_v22, %v8463_v3  ;;  %v5199_v37 = vand.u32 4294901760, %v5198_v5 }
 0x40c   : > { %7020 = vmatmul.msk.f32.gmra.mxu3 %vm1065_vm9, %v7731_v48  ;;  %4570 = vmatpush.xpose.msra.mxu0 %v4534_v1  ;;  %v3539_v45 = vpop.f32.mrf.mxu1  ;;  %v3569_v33 = vpop.f32.mrf.mxu2 }
 0x40d   : > { %v4839_v11 = vand.u32 4294901760, %v4838_v39  ;;  %v3540_v59 = vadd.f32 %v3539_v45, %v3500_v29  ;;  %v3508_v15 = vpop.f32.mrf.mxu0  ;;  %v5200_v43 = vsub.f32 %v5198_v5, %v5199_v37 }
 0x40e   : > { %4501 = vmatpush.xpose.msrb.mxu2 %v4500_v34  ;;  %4602 = vmatpush.xpose.msra.mxu1 %v4500_v34 }
 0x40f   : > { %4252 = vmatpush.xpose.msra.mxu3 %v8418_v18  ;;  %v4804_v18 = vand.u32 4294901760, %v4784_v56  ;;  %v4840_v49 = vsub.f32 %v4838_v39, %v4839_v11  ;;  %v3570_v62 = vadd.f32 %v3569_v33, %v3540_v59  ;;  %v5201_v9 = vand.u32 4294901760, %v5200_v43 }
 0x410   : > { %4573 = vmatpush.xpose.msra.mxu0 %v4540_v25 }
 0x411   : > { %v4844_v30 = vsub.f32 %v4784_v56, %v4804_v18  ;;  %7022 = vmatmul.msk.f32.gmra.mxu2 %vm1065_vm9, %v7731_v48  ;;  %7026 = vmatmul.msk.f32.gmra.mxu1 %vm1065_vm9, %v7731_v48  ;;  %v4841_v31 = vand.u32 4294901760, %v4840_v49  ;;  %v3600_v13 = vadd.f32 %v3599_v0, %v3570_v62 }
 0x413   : > { %4165 = vmatmul.f32.gmra.mxu0 %v7746_v52  ;;  %v4845_v24 = vand.u32 4294901760, %v4844_v30  ;;  %v3605_v22 = vpop.f32.mrf.mxu3 }
 0x414   : > { %7023 = vmatmul.msk.f32.vlgmr.msrb.gmra.mxu3 %vm1065_vm9, %v7711_v38  ;;  %v3543_v63 = vpop.f32.mrf.mxu1 }
 0x415   : > { %4538 = vmatpush.xpose.msrb.mxu3 %v4537_v4  ;;  %v4846_v32 = vsub.f32 %v4844_v30, %v4845_v24  ;;  %v3632_v14 = vpop.f32.mrf.mxu0  ;;  %v3544_v55 = vadd.f32 %v3543_v63, %v3508_v15  ;;  %v3574_v1 = vpop.f32.mrf.mxu2 }
 0x416   : > { %v3633_v40 = vadd.f32 %v3632_v14, %v3600_v13 }
 0x417   : > { %v4847_v16 = vand.u32 4294901760, %v4846_v32 }
 0x419   : > { %4544 = vmatpush.xpose.msrb.mxu3 %v4543_v57  ;;  %4226 = vmatmul.f32.vlgmr.msra.gmra.mxu2 %v7717_v42 }
 0x41a   : > { %7029 = vmatmul.msk.f32.vlgmr.msrb.gmra.mxu1 %vm1065_vm9, %v7711_v38  ;;  %4633 = vmatpush.xpose.msra.mxu2 %v4535_v27 }
 0x41b   : > { %4842 = vmatpush.xpose.msrb.mxu1 %v4841_v31  ;;  %7027 = vmatmul.msk.f32.vlgmr.msrb.gmra.mxu0 %vm1065_vm9, %v7711_v38 }
 0x41c   : > { %7024 = vmatmul.msk.f32.gmra.mxu3 %vm1065_vm9, %v7731_v48  ;;  %4803 = vmatpush.xpose.msrb.mxu0 %v8463_v3  ;;  %v3659_v47 = vpop.f32.mrf.mxu1 }
 0x41d   : > { %v3660_v17 = vadd.f32 %v3659_v47, %v3633_v40 }
 0x41e   : > { %4637 = vmatpush.xpose.msra.mxu2 %v4541_v6 }
 0x41f   : > { %4848 = vmatpush.xpose.msrb.mxu1 %v4847_v16  ;;  %v3668_v46 = vrot.slane %v3660_v17, 1  ;;  %v3669_v58 = vrot.slane %v3660_v17, 2  ;;  %v3670_v10 = vrot.slane %v3660_v17, 3  ;;  %3696 = vst.msk [vmem:[#allocation2] sm:$0x1] %vm1296_vm12, %v3660_v17  ;;  %v3671_v61 = vrot.slane %v3660_v17, 4 }
 0x420   : > { %4805 = vmatpush.xpose.msrb.mxu0 %v4804_v18  ;;  %v3672_v12 = vrot.slane %v3660_v17, 5  ;;  %v3674_v7 = vrot.slane %v3660_v17, 7 }
 0x421   : > { %4231 = vmatmul.f32.gmra.mxu2 %v7737_v50  ;;  %3697 = vst.msk [vmem:[#allocation2 + $0x2] sm:$0x1] %vm1296_vm12, %v3668_v46 }
 0x422   : > { %7030 = vmatmul.msk.f32.gmra.mxu1 %vm1065_vm9, %v7731_v48  ;;  %3698 = vst.msk [vmem:[#allocation2 + $0x4] sm:$0x1] %vm1296_vm12, %v3669_v58 }
 0x423   : > { %7028 = vmatmul.msk.f32.gmra.mxu0 %vm1065_vm9, %v7731_v48  ;;  %3699 = vst.msk [vmem:[#allocation2 + $0x6] sm:$0x1] %vm1296_vm12, %v3670_v10 }
 0x424   : > { %4256 = vmatmul.f32.vlgmr.msra.gmra.mxu3 %v7720_v20  ;;  %3700 = vst.msk [vmem:[#allocation2 + $0x8] sm:$0x1] %vm1296_vm12, %v3671_v61  ;;  %v3663_v25 = vpop.f32.mrf.mxu1 }
 0x425   : > { %4662 = vmatpush.xpose.msra.mxu3 %v4498_v21  ;;  %v3673_v21 = vrot.slane %v3660_v17, 6  ;;  %3701 = vst.msk [vmem:[#allocation2 + $0xa] sm:$0x1] %vm1296_vm12, %v3672_v12 }
 0x426   : > { %3703 = vst.msk [vmem:[#allocation2 + $0xe] sm:$0x1] %vm1296_vm12, %v3674_v7 }
 0x427   : > { %3702 = vst.msk [vmem:[#allocation2 + $0xc] sm:$0x1] %vm1296_vm12, %v3673_v21 }
 0x429   : > { %4664 = vmatpush.xpose.msra.mxu3 %v4500_v34  ;;  %4507 = vmatmul.f32.vlgmr.msrb.gmra.mxu2 %v7724_v8  ;;  %v3575_v34 = vadd.f32 %v3574_v1, %v3544_v55 }
 0x42a   : > { %4606 = vmatmul.f32.vlgmr.msra.gmra.mxu1 %v7720_v20  ;;  %4874 = vmatpush.xpose.msrb.mxu2 %v4838_v39 }
 0x42b   : > { %4966 = vmatpush.xpose.msra.mxu1 %v8463_v3  ;;  %4576 = vmatmul.f32.vlgmr.msra.gmra.mxu0 %v7717_v42  ;;  %v3606_v23 = vadd.f32 %v3605_v22, %v3575_v34 }
 0x42c   : > { %4262 = vmatmul.f32.gmra.mxu3 %v7740_v51  ;;  %4937 = vmatpush.xpose.msra.mxu0 %v4839_v11 }
 0x42e   : > { %4877 = vmatpush.xpose.msrb.mxu2 %v4844_v30 }
 0x42f   : > { %4968 = vmatpush.xpose.msra.mxu1 %v4804_v18 }
 0x430   : > { %4941 = vmatpush.xpose.msra.mxu0 %v4845_v24 }
 0x431   : > { %4515 = vmatmul.f32.gmra.mxu2 %v7746_v52 }
 0x432   : > { %4612 = vmatmul.f32.gmra.mxu1 %v7740_v51 }
 0x433   : > { %4581 = vmatmul.f32.gmra.mxu0 %v7737_v50 }
 0x434   : > { %7031 = vmatmul.msk.f32.vlgmr.msrb.gmra.mxu3 %vm1065_vm9, %v7711_v38 }
 0x435   : > { %4904 = vmatpush.xpose.msrb.mxu3 %v8463_v3  ;;  %v3636_v3 = vpop.f32.mrf.mxu0 }
 0x436   : > { %v3637_v27 = vadd.f32 %v3636_v3, %v3606_v23 }
 0x438   : > { %v3664_v56 = vadd.f32 %v3663_v25, %v3637_v27 }
 0x439   : > { %4906 = vmatpush.xpose.msrb.mxu3 %v4804_v18  ;;  %7033 = vmatmul.msk.f32.vlgmr.msra.gmra.mxu2 %vm1065_vm9, %v7711_v38 }
 0x43a   : > { %7037 = vmatmul.msk.f32.vlgmr.msrb.gmra.mxu1 %vm1065_vm9, %v7711_v38  ;;  %5157 = vmatpush.xpose.msra.mxu2 %v8502_v19  ;;  %v3675_v39 = vrot.slane %v3664_v56, 1  ;;  %v3676_v18 = vrot.slane %v3664_v56, 2  ;;  %v3677_v60 = vrot.slane %v3664_v56, 3  ;;  %3704 = vst.msk [vmem:[#allocation2 + $0x10] sm:$0x1] %vm1296_vm12, %v3664_v56  ;;  %v3679_v6 = vrot.slane %v3664_v56, 5 }
 0x43b   : > { %5258 = vmatpush.xpose.msrb.mxu1 %v8502_v19  ;;  %4811 = vmatmul.f32.vlgmr.msrb.gmra.mxu0 %v7724_v8 }
 0x43c   : > { %7032 = vmatmul.msk.f32.gmra.mxu3 %vm1065_vm9, %v7731_v48  ;;  %5228 = vmatpush.xpose.msrb.mxu0 %v5192_v44  ;;  %3705 = vst.msk [vmem:[#allocation2 + $0x12] sm:$0x1] %vm1296_vm12, %v3675_v39 }
 0x43d   : > { %3706 = vst.msk [vmem:[#allocation2 + $0x14] sm:$0x1] %vm1296_vm12, %v3676_v18 }
 0x43e   : > { %5159 = vmatpush.xpose.msra.mxu2 %v8511_v35  ;;  %3707 = vst.msk [vmem:[#allocation2 + $0x16] sm:$0x1] %vm1296_vm12, %v3677_v60 }
 0x43f   : > { %5260 = vmatpush.xpose.msrb.mxu1 %v8511_v35  ;;  %3709 = vst.msk [vmem:[#allocation2 + $0x1a] sm:$0x1] %vm1296_vm12, %v3679_v6 }
 0x440   : > { %5231 = vmatpush.xpose.msrb.mxu0 %v5198_v5 }
 0x441   : > { %7034 = vmatmul.msk.f32.gmra.mxu2 %vm1065_vm9, %v7731_v48 }
 0x442   : > { %7038 = vmatmul.msk.f32.gmra.mxu1 %vm1065_vm9, %v7731_v48 }
 0x443   : > { %4819 = vmatmul.f32.gmra.mxu0 %v7746_v52 }
 0x444   : > { %7035 = vmatmul.msk.f32.vlgmr.msra.gmra.mxu3 %vm1065_vm9, %v7711_v38 }
 0x445   : > { %5196 = vmatpush.xpose.msra.mxu3 %v5195_v36 }
 0x449   : > { %5202 = vmatpush.xpose.msra.mxu3 %v5201_v9  ;;  %4880 = vmatmul.f32.vlgmr.msrb.gmra.mxu2 %v7717_v42 }
 0x44a   : > { %5291 = vmatpush.xpose.msrb.mxu2 %v5193_v54  ;;  %7041 = vmatmul.msk.f32.vlgmr.msra.gmra.mxu1 %vm1065_vm9, %v7711_v38 }
 0x44b   : > { %7039 = vmatmul.msk.f32.vlgmr.msra.gmra.mxu0 %vm1065_vm9, %v7711_v38 }
 0x44c   : > { %7036 = vmatmul.msk.f32.gmra.mxu3 %vm1065_vm9, %v7731_v48 }
 0x44e   : > { %5295 = vmatpush.xpose.msrb.mxu2 %v5199_v37 }
 0x451   : > { %4885 = vmatmul.f32.gmra.mxu2 %v7737_v50 }
 0x452   : > { %7042 = vmatmul.msk.f32.gmra.mxu1 %vm1065_vm9, %v7731_v48 }
 0x453   : > { %7040 = vmatmul.msk.f32.gmra.mxu0 %vm1065_vm9, %v7731_v48 }
 0x454   : > { %4910 = vmatmul.f32.vlgmr.msrb.gmra.mxu3 %v7720_v20 }
 0x455   : > { %5320 = vmatpush.xpose.msrb.mxu3 %v8502_v19 }
 0x459   : > { %5322 = vmatpush.xpose.msrb.mxu3 %v8511_v35  ;;  %5165 = vmatmul.f32.vlgmr.msra.gmra.mxu2 %v7724_v8  ;;  %v3678_v8 = vrot.slane %v3664_v56, 4 }
 0x45a   : > { %5264 = vmatmul.f32.vlgmr.msrb.gmra.mxu1 %v7720_v20  ;;  %v3680_v20 = vrot.slane %v3664_v56, 6 }
 0x45b   : > { %5234 = vmatmul.f32.vlgmr.msrb.gmra.mxu0 %v7717_v42  ;;  %v3681_v42 = vrot.slane %v3664_v56, 7  ;;  %3708 = vst.msk [vmem:[#allocation2 + $0x18] sm:$0x1] %vm1296_vm12, %v3678_v8 }
 0x45c   : > { %4916 = vmatmul.f32.gmra.mxu3 %v7740_v51  ;;  %3710 = vst.msk [vmem:[#allocation2 + $0x1c] sm:$0x1] %vm1296_vm12, %v3680_v20 }
 0x45d   : > { %3711 = vst.msk [vmem:[#allocation2 + $0x1e] sm:$0x1] %vm1296_vm12, %v3681_v42 }
 0x461   : > { %5173 = vmatmul.f32.gmra.mxu2 %v7746_v52 }
 0x462   : > { %5270 = vmatmul.f32.gmra.mxu1 %v7740_v51 }
 0x463   : > { %5239 = vmatmul.f32.gmra.mxu0 %v7737_v50 }
 0x464   : > { %7043 = vmatmul.msk.f32.vlgmr.msra.gmra.mxu3 %vm1065_vm9, %v7711_v38 }
 0x469   : > { %7045 = vmatmul.msk.f32.vlgmr.msrb.gmra.mxu2 %vm1065_vm9, %v7711_v38 }
 0x46c   : > { %7044 = vmatmul.msk.f32.gmra.mxu3 %vm1065_vm9, %v7731_v48 }
 0x471   : > { %7046 = vmatmul.msk.f32.gmra.mxu2 %vm1065_vm9, %v7731_v48 }
 0x474   : > { %7047 = vmatmul.msk.f32.vlgmr.msrb.gmra.mxu3 %vm1065_vm9, %v7711_v38 }
 0x476   : > { %v3903_v51 = vpop.f32.mrf.mxu1 }
 0x478   : > { %v3873_v50 = vpop.f32.mrf.mxu0 }
 0x47c   : > { %7048 = vmatmul.msk.f32.gmra.mxu3 %vm1065_vm9, %v7731_v48  ;;  %v3804_v52 = vpop.f32.mrf.mxu2 }
 0x47e   : > { %v3909_v30 = vpop.f32.mrf.mxu1 }
 0x480   : > { %v3878_v11 = vpop.f32.mrf.mxu0 }
 0x484   : > { %v3812_v4 = vpop.f32.mrf.mxu2 }
 0x486   : > { %v4197_v24 = vpop.f32.mrf.mxu1 }
 0x487   : > { %v3843_v2 = vpop.f32.mrf.mxu3 }
 0x488   : > { %v4158_v49 = vpop.f32.mrf.mxu0  ;;  %v3844_v57 = vadd.f32 %v3843_v2, %v3804_v52 }
 0x489   : > { %v4198_v55 = vadd.f32 %v4197_v24, %v4158_v49 }
 0x48a   : > { %v3874_v16 = vadd.f32 %v3873_v50, %v3844_v57 }
 0x48c   : > { %v3936_v31 = vpop.f32.mrf.mxu2  ;;  %v3904_v53 = vadd.f32 %v3903_v51, %v3874_v16 }
 0x48e   : > { %v3937_v38 = vadd.f32 %v3936_v31, %v3904_v53  ;;  %v8585_v35 = vpop.f32.mrf.mxu1 }
 0x48f   : > { %v3847_v32 = vpop.f32.mrf.mxu3 }
 0x490   : > { %v8583_v26 = vpop.f32.mrf.mxu0  ;;  %v3848_v54 = vadd.f32 %v3847_v32, %v3812_v4 }
 0x491   : > { %v4202_v16 = vadd.f32 %v8585_v35, %v8583_v26 }
 0x492   : > { %v3879_v62 = vadd.f32 %v3878_v11, %v3848_v54 }
 0x494   : > { %v3940_v19 = vpop.f32.mrf.mxu2  ;;  %v3910_v13 = vadd.f32 %v3909_v30, %v3879_v62 }
 0x496   : > { %v3941_v40 = vadd.f32 %v3940_v19, %v3910_v13 }
 0x497   : > { %v3963_v41 = vpop.f32.mrf.mxu3  ;;  %v4317_v0 = vpop.f32.mrf.mxu1 }
 0x498   : > { %v3964_v48 = vadd.f32 %v3963_v41, %v3937_v38  ;;  %v4290_v28 = vpop.f32.mrf.mxu0 }
 0x49a   : > { %v3986_v44 = vperm.slane %v3964_v48, 0  ;;  %v3973_v29 = vrot.slane %v3964_v48, 2  ;;  %v3972_v5 = vrot.slane %v3964_v48, 1  ;;  %v3974_v37 = vrot.slane %v3964_v48, 3 }
 0x49b   : > { %v3976_v36 = vrot.slane %v3964_v48, 5  ;;  %v3975_v43 = vrot.slane %v3964_v48, 4  ;;  %v3977_v47 = vrot.slane %v3964_v48, 6  ;;  %v3978_v61 = vrot.slane %v3964_v48, 7 }
 0x49c   : > { %4002 = vrot.lane.b32.xlu2 %v3986_v44, %s7297_s18  ;;  %v3988_v45 = vperm.slane %v3973_v29, 0  ;;  %v3987_v59 = vperm.slane %v3972_v5, 0  ;;  %v4227_v33 = vpop.f32.mrf.mxu2  ;;  %v3989_v63 = vperm.slane %v3974_v37, 0 }
 0x49d   : > { %v3991_v9 = vperm.slane %v3976_v36, 0  ;;  %v3990_v14 = vperm.slane %v3975_v43, 0  ;;  %v3992_v12 = vperm.slane %v3977_v47, 0  ;;  %v3993_v1 = vperm.slane %v3978_v61, 0 }
 0x49e   : > { %4006 = vrot.lane.b32.xlu1 %v3988_v45, %s7297_s18  ;;  %4004 = vrot.lane.b32.xlu0 %v3987_v59, %s7297_s18  ;;  %v4228_v3 = vadd.f32 %v4227_v33, %v4198_v55 }
 0x49f   : > { %v3967_v15 = vpop.f32.mrf.mxu3  ;;  %v8595_v21 = vpop.f32.mrf.mxu1 }
 0x4a0   : > { %v8593_v58 = vpop.f32.mrf.mxu0  ;;  %v3968_v10 = vadd.f32 %v3967_v15, %v3941_v40 }
 0x4a2   : > { %v3994_v7 = vperm.slane %v3968_v10, 0  ;;  %v3979_v34 = vrot.slane %v3968_v10, 1  ;;  %v3982_v25 = vrot.slane %v3968_v10, 4  ;;  %v3980_v27 = vrot.slane %v3968_v10, 2 }
 0x4a3   : > { %v3983_v20 = vrot.slane %v3968_v10, 5  ;;  %v3985_v52 = vrot.slane %v3968_v10, 7  ;;  %v3981_v11 = vrot.slane %v3968_v10, 3  ;;  %v3984_v48 = vrot.slane %v3968_v10, 6 }
 0x4a4   : > { %4008 = vrot.lane.b32.xlu2 %v3989_v63, %s7297_s18  ;;  %v4232_v17 = vpop.f32.mrf.mxu2  ;;  %v3995_v39 = vperm.slane %v3979_v34, 0  ;;  %v3998_v60 = vperm.slane %v3982_v25, 0  ;;  %v3996_v8 = vperm.slane %v3980_v27, 0 }
 0x4a5   : > { %v3999_v4 = vperm.slane %v3983_v20, 0  ;;  %v4001_v57 = vperm.slane %v3985_v52, 0  ;;  %v3997_v24 = vperm.slane %v3981_v11, 0  ;;  %v4233_v5 = vadd.f32 %v4232_v17, %v4202_v16 }
 0x4a6   : > { %4012 = vrot.lane.b32.xlu1 %v3991_v9, %s7297_s18  ;;  %4010 = vrot.lane.b32.xlu0 %v3990_v14, %s7297_s18  ;;  %v4000_v45 = vperm.slane %v3984_v48, 0 }
 0x4a7   : > { %v4257_v46 = vpop.f32.mrf.mxu3  ;;  %v4607_v6 = vpop.f32.mrf.mxu1 }
 0x4a8   : > { %v4577_v56 = vpop.f32.mrf.mxu0  ;;  %v4258_v18 = vadd.f32 %v4257_v46, %v4228_v3 }
 0x4aa   : > { %v4291_v51 = vadd.f32 %v4290_v28, %v4258_v18 }
 0x4ac   : > { %4014 = vrot.lane.b32.xlu2 %v3992_v12, %s7297_s18  ;;  %v4508_v22 = vpop.f32.mrf.mxu2  ;;  %v8603_v49 = vadd.f32 %v4317_v0, %v4291_v51 }
 0x4ae   : > { %4018 = vrot.lane.b32.xlu1 %v3994_v7, %s7297_s18  ;;  %4016 = vrot.lane.b32.xlu0 %v3993_v1, %s7297_s18  ;;  %v4327_v41 = vrot.slane %v8603_v49, 2  ;;  %v4340_v29 = vperm.slane %v8603_v49, 0  ;;  %v4328_v26 = vrot.slane %v8603_v49, 3  ;;  %v4330_v35 = vrot.slane %v8603_v49, 5 }
 0x4af   : > { %v4263_v23 = vpop.f32.mrf.mxu3  ;;  %v4613_v38 = vpop.f32.mrf.mxu1  ;;  %v4326_v43 = vrot.slane %v8603_v49, 1  ;;  %v4331_v1 = vrot.slane %v8603_v49, 6  ;;  %v4329_v3 = vrot.slane %v8603_v49, 4 }
 0x4b0   : > { %v4582_v2 = vpop.f32.mrf.mxu0  ;;  %v4342_v54 = vperm.slane %v4327_v41, 0  ;;  %v4264_v62 = vadd.f32 %v4263_v23, %v4233_v5  ;;  %v4343_v13 = vperm.slane %v4328_v26, 0  ;;  %v4345_v47 = vperm.slane %v4330_v35, 0 }
 0x4b1   : > { %v4341_v10 = vperm.slane %v4326_v43, 0  ;;  %v4344_v20 = vperm.slane %v4329_v3, 0 }
 0x4b2   : > { %v4295_v46 = vadd.f32 %v8593_v58, %v4264_v62 }
 0x4b4   : > { %4020 = vrot.lane.b32.xlu2 %v3995_v39, %s7297_s18  ;;  %v4516_v42 = vpop.f32.mrf.mxu2 }
 0x4b6   : > { %4026 = vrot.lane.b32.xlu1 %v3998_v60, %s7297_s18  ;;  %4022 = vrot.lane.b32.xlu0 %v3996_v8, %s7297_s18 }
 0x4b7   : > { %v4547_v50 = vpop.f32.mrf.mxu3  ;;  %v4851_v63 = vpop.f32.mrf.mxu1 }
 0x4b8   : > { %v4548_v30 = vadd.f32 %v4547_v50, %v4508_v22  ;;  %v4812_v37 = vpop.f32.mrf.mxu0  ;;  %v8629_v22 = vadd.f32 %v8595_v21, %v4295_v46 }
 0x4b9   : > { %v4852_v23 = vadd.f32 %v4851_v63, %v4812_v37 }
 0x4ba   : > { %v4578_v31 = vadd.f32 %v4577_v56, %v4548_v30  ;;  %v4346_v56 = vperm.slane %v4331_v1, 0  ;;  %v4334_v11 = vrot.slane %v8629_v22, 2  ;;  %v4335_v41 = vrot.slane %v8629_v22, 3 }
 0x4bb   : > { %v4336_v48 = vrot.slane %v8629_v22, 4 }
 0x4bc   : > { %4028 = vrot.lane.b32.xlu2 %v3999_v4, %s7297_s18  ;;  %v4640_v32 = vpop.f32.mrf.mxu2  ;;  %v4608_v19 = vadd.f32 %v4607_v6, %v4578_v31  ;;  %v4348_v6 = vperm.slane %v8629_v22, 0  ;;  %v4333_v4 = vrot.slane %v8629_v22, 1  ;;  %v4350_v31 = vperm.slane %v4334_v11, 0 }
 0x4bd   : > { %v4352_v5 = vperm.slane %v4336_v48, 0 }
 0x4be   : > { %4032 = vrot.lane.b32.xlu1 %v4001_v57, %s7297_s18  ;;  %4024 = vrot.lane.b32.xlu0 %v3997_v24, %s7297_s18  ;;  %v4641_v28 = vadd.f32 %v4640_v32, %v4608_v19  ;;  %v4349_v32 = vperm.slane %v4333_v4, 0  ;;  %v4338_v19 = vrot.slane %v8629_v22, 6 }
 0x4bf   : > { %v4551_v53 = vpop.f32.mrf.mxu3  ;;  %v4855_v21 = vpop.f32.mrf.mxu1 }
 0x4c0   : > { %v4552_v44 = vadd.f32 %v4551_v53, %v4516_v42  ;;  %v4820_v34 = vpop.f32.mrf.mxu0 }
 0x4c1   : > { %v4856_v26 = vadd.f32 %v4855_v21, %v4820_v34 }
 0x4c2   : > { %v4583_v59 = vadd.f32 %v4582_v2, %v4552_v44  ;;  %v4332_v2 = vrot.slane %v8603_v49, 7  ;;  %v4354_v44 = vperm.slane %v4338_v19, 0 }
 0x4c4   : > { %4356 = vrot.lane.b32.xlu2 %v4340_v29, %s7298_s29  ;;  %v4644_v15 = vpop.f32.mrf.mxu2  ;;  %v4614_v36 = vadd.f32 %v4613_v38, %v4583_v59  ;;  %v4347_v16 = vperm.slane %v4332_v2, 0  ;;  %v4351_v29 = vperm.slane %v4335_v41, 0  ;;  %v4337_v59 = vrot.slane %v8629_v22, 5 }
 0x4c6   : > { %4360 = vrot.lane.b32.xlu1 %v4342_v54, %s7298_s29  ;;  %4030 = vrot.lane.b32.xlu0 %v4000_v45, %s7297_s18  ;;  %v4645_v12 = vadd.f32 %v4644_v15, %v4614_v36  ;;  %v4353_v35 = vperm.slane %v4337_v59, 0 }
 0x4c7   : > { %v4667_v33 = vpop.f32.mrf.mxu3  ;;  %v4971_v38 = vpop.f32.mrf.mxu1 }
 0x4c8   : > { %v4668_v0 = vadd.f32 %v4667_v33, %v4641_v28  ;;  %v4944_v24 = vpop.f32.mrf.mxu0  ;;  %v4339_v28 = vrot.slane %v8629_v22, 7 }
 0x4ca   : > { %v4676_v9 = vrot.slane %v4668_v0, 1  ;;  %v4677_v14 = vrot.slane %v4668_v0, 2  ;;  %v4678_v40 = vrot.slane %v4668_v0, 3  ;;  %4704 = vst.msk [vmem:[#allocation2 + $0x1] sm:$0x1] %vm1296_vm12, %v4668_v0  ;;  %v4679_v17 = vrot.slane %v4668_v0, 4 }
 0x4cb   : > { %v4680_v61 = vrot.slane %v4668_v0, 5  ;;  %v4681_v55 = vrot.slane %v4668_v0, 6  ;;  %v4682_v7 = vrot.slane %v4668_v0, 7  ;;  %v4355_v33 = vperm.slane %v4339_v28, 0 }
 0x4cc   : > { %4362 = vrot.lane.b32.xlu2 %v4343_v13, %s7298_s29  ;;  %4705 = vst.msk [vmem:[#allocation2 + $0x3] sm:$0x1] %vm1296_vm12, %v4676_v9  ;;  %v4881_v27 = vpop.f32.mrf.mxu2 }
 0x4cd   : > { %4706 = vst.msk [vmem:[#allocation2 + $0x5] sm:$0x1] %vm1296_vm12, %v4677_v14  ;;  %v4882_v50 = vadd.f32 %v4881_v27, %v4852_v23 }
 0x4ce   : > { %4366 = vrot.lane.b32.xlu1 %v4345_v47, %s7298_s29  ;;  %4358 = vrot.lane.b32.xlu0 %v4341_v10, %s7298_s29  ;;  %4707 = vst.msk [vmem:[#allocation2 + $0x7] sm:$0x1] %vm1296_vm12, %v4678_v40 }
 0x4cf   : > { %4708 = vst.msk [vmem:[#allocation2 + $0x9] sm:$0x1] %vm1296_vm12, %v4679_v17  ;;  %v4671_v58 = vpop.f32.mrf.mxu3 }
 0x4d0   : > { %4709 = vst.msk [vmem:[#allocation2 + $0xb] sm:$0x1] %vm1296_vm12, %v4680_v61  ;;  %v4672_v25 = vadd.f32 %v4671_v58, %v4645_v12  ;;  %v4948_v9 = vpop.f32.mrf.mxu0  ;;  %v4975_v61 = vpop.f32.mrf.mxu1 }
 0x4d1   : > { %4710 = vst.msk [vmem:[#allocation2 + $0xd] sm:$0x1] %vm1296_vm12, %v4681_v55 }
 0x4d2   : > { %4711 = vst.msk [vmem:[#allocation2 + $0xf] sm:$0x1] %vm1296_vm12, %v4682_v7  ;;  %v4683_v39 = vrot.slane %v4672_v25, 1  ;;  %v4684_v18 = vrot.slane %v4672_v25, 2  ;;  %v4685_v60 = vrot.slane %v4672_v25, 3  ;;  %v4686_v8 = vrot.slane %v4672_v25, 4 }
 0x4d3   : > { %4712 = vst.msk [vmem:[#allocation2 + $0x11] sm:$0x1] %vm1296_vm12, %v4672_v25  ;;  %v4687_v42 = vrot.slane %v4672_v25, 5  ;;  %v4688_v51 = vrot.slane %v4672_v25, 6  ;;  %v4689_v52 = vrot.slane %v4672_v25, 7 }
 0x4d4   : > { %4368 = vrot.lane.b32.xlu2 %v4346_v56, %s7298_s29  ;;  %4713 = vst.msk [vmem:[#allocation2 + $0x13] sm:$0x1] %vm1296_vm12, %v4683_v39  ;;  %v4886_v37 = vpop.f32.mrf.mxu2 }
 0x4d5   : > { %4714 = vst.msk [vmem:[#allocation2 + $0x15] sm:$0x1] %vm1296_vm12, %v4684_v18  ;;  %v4887_v62 = vadd.f32 %v4886_v37, %v4856_v26 }
 0x4d6   : > { %4372 = vrot.lane.b32.xlu1 %v4348_v6, %s7298_s29  ;;  %4364 = vrot.lane.b32.xlu0 %v4344_v20, %s7298_s29  ;;  %4715 = vst.msk [vmem:[#allocation2 + $0x17] sm:$0x1] %vm1296_vm12, %v4685_v60 }
 0x4d7   : > { %4716 = vst.msk [vmem:[#allocation2 + $0x19] sm:$0x1] %vm1296_vm12, %v4686_v8  ;;  %v4911_v30 = vpop.f32.mrf.mxu3 }
 0x4d8   : > { %4717 = vst.msk [vmem:[#allocation2 + $0x1b] sm:$0x1] %vm1296_vm12, %v4687_v42  ;;  %v4912_v57 = vadd.f32 %v4911_v30, %v4882_v50  ;;  %v5235_v3 = vpop.f32.mrf.mxu0  ;;  %v5265_v60 = vpop.f32.mrf.mxu1 }
 0x4d9   : > { %4718 = vst.msk [vmem:[#allocation2 + $0x1d] sm:$0x1] %vm1296_vm12, %v4688_v51 }
 0x4da   : > { %4719 = vst.msk [vmem:[#allocation2 + $0x1f] sm:$0x1] %vm1296_vm12, %v4689_v52  ;;  %v4945_v53 = vadd.f32 %v4944_v24, %v4912_v57 }
 0x4dc   : > { %4376 = vrot.lane.b32.xlu2 %v4350_v31, %s7298_s29  ;;  %v4972_v49 = vadd.f32 %v4971_v38, %v4945_v53  ;;  %v5166_v0 = vpop.f32.mrf.mxu2 }
 0x4de   : > { %4374 = vrot.lane.b32.xlu1 %v4349_v32, %s7298_s29  ;;  %4370 = vrot.lane.b32.xlu0 %v4347_v16, %s7298_s29  ;;  %v4980_v54 = vrot.slane %v4972_v49, 1  ;;  %v4983_v36 = vrot.slane %v4972_v49, 4  ;;  %v4981_v43 = vrot.slane %v4972_v49, 2  ;;  %v4994_v14 = vperm.slane %v4972_v49, 0 }
 0x4df   : > { %v4917_v15 = vpop.f32.mrf.mxu3  ;;  %v4986_v10 = vrot.slane %v4972_v49, 7  ;;  %v4982_v12 = vrot.slane %v4972_v49, 3  ;;  %v4984_v55 = vrot.slane %v4972_v49, 5  ;;  %v4985_v39 = vrot.slane %v4972_v49, 6 }
 0x4e0   : > { %v4995_v45 = vperm.slane %v4980_v54, 0  ;;  %v4918_v63 = vadd.f32 %v4917_v15, %v4887_v62  ;;  %v4998_v13 = vperm.slane %v4983_v36, 0  ;;  %v4996_v40 = vperm.slane %v4981_v43, 0  ;;  %v5240_v48 = vpop.f32.mrf.mxu0  ;;  %v5271_v59 = vpop.f32.mrf.mxu1 }
 0x4e1   : > { %v5001_v1 = vperm.slane %v4986_v10, 0  ;;  %v4997_v34 = vperm.slane %v4982_v12, 0  ;;  %v4999_v22 = vperm.slane %v4984_v55, 0  ;;  %v5000_v21 = vperm.slane %v4985_v39, 0 }
 0x4e2   : > { %v4949_v17 = vadd.f32 %v4948_v9, %v4918_v63 }
 0x4e4   : > { %4384 = vrot.lane.b32.xlu2 %v4354_v44, %s7298_s29  ;;  %v8668_v7 = vadd.f32 %v4975_v61, %v4949_v17  ;;  %v5174_v58 = vpop.f32.mrf.mxu2 }
 0x4e6   : > { %4378 = vrot.lane.b32.xlu1 %v4351_v29, %s7298_s29  ;;  %4380 = vrot.lane.b32.xlu0 %v4352_v5, %s7298_s29  ;;  %v4988_v27 = vrot.slane %v8668_v7, 2  ;;  %v5002_v6 = vperm.slane %v8668_v7, 0  ;;  %v4991_v51 = vrot.slane %v8668_v7, 5  ;;  %v4987_v11 = vrot.slane %v8668_v7, 1 }
 0x4e7   : > { %v5205_v47 = vpop.f32.mrf.mxu3  ;;  %v4989_v30 = vrot.slane %v8668_v7, 3  ;;  %v4990_v19 = vrot.slane %v8668_v7, 4  ;;  %v4992_v49 = vrot.slane %v8668_v7, 6  ;;  %v4993_v26 = vrot.slane %v8668_v7, 7 }
 0x4e8   : > { %v5206_v23 = vadd.f32 %v5205_v47, %v5166_v0  ;;  %v5004_v8 = vperm.slane %v4988_v27, 0  ;;  %v5007_v2 = vperm.slane %v4991_v51, 0  ;;  %v5003_v57 = vperm.slane %v4987_v11, 0 }
 0x4e9   : > { %v5005_v24 = vperm.slane %v4989_v30, 0  ;;  %v5006_v44 = vperm.slane %v4990_v19, 0  ;;  %v5008_v29 = vperm.slane %v4992_v49, 0  ;;  %v5009_v36 = vperm.slane %v4993_v26, 0 }
 0x4ea   : > { %v5236_v18 = vadd.f32 %v5235_v3, %v5206_v23 }
 0x4ec   : > { %5012 = vrot.lane.b32.xlu2 %v4995_v45, %s7297_s18  ;;  %v5266_v20 = vadd.f32 %v5265_v60, %v5236_v18  ;;  %v5298_v42 = vpop.f32.mrf.mxu2 }
 0x4ee   : > { %4382 = vrot.lane.b32.xlu1 %v4353_v35, %s7298_s29  ;;  %4386 = vrot.lane.b32.xlu0 %v4355_v33, %s7298_s29  ;;  %v5299_v52 = vadd.f32 %v5298_v42, %v5266_v20 }
 0x4ef   : > { %v5209_v56 = vpop.f32.mrf.mxu3 }
 0x4f0   : > { %v5210_v41 = vadd.f32 %v5209_v56, %v5174_v58 }
 0x4f2   : > { %v5241_v5 = vadd.f32 %v5240_v48, %v5210_v41 }
 0x4f4   : > { %5018 = vrot.lane.b32.xlu2 %v4998_v13, %s7297_s18  ;;  %v5272_v33 = vadd.f32 %v5271_v59, %v5241_v5  ;;  %v5302_v62 = vpop.f32.mrf.mxu2 }
 0x4f6   : > { %v4003_v46 = vpop.permute.xlu2 %4002  ;;  %5010 = vrot.lane.b32.xlu1 %v4994_v14, %s7297_s18  ;;  %5014 = vrot.lane.b32.xlu0 %v4996_v40, %s7297_s18  ;;  %v5303_v0 = vadd.f32 %v5302_v62, %v5272_v33  ;;  %v7220_v62 = vld [vmem:[%s7414_s17] ss:$0 sm:$0xff] }
 0x4f7   : > { %4050 = vst.msk [vmem:[#allocation2] sm:$0x1] %vm1651_vm13, %v4003_v46  ;;  %v5325_v4 = vpop.f32.mrf.mxu3 }
 0x4f8   : > { %v8684_v31 = vadd.f32 %v5325_v4, %v5299_v52 }
 0x4fa   : > { %v5348_v38 = vperm.slane %v8684_v31, 0  ;;  %v5336_v45 = vrot.slane %v8684_v31, 3  ;;  %v5334_v35 = vrot.slane %v8684_v31, 1  ;;  %v5339_v13 = vrot.slane %v8684_v31, 6 }
 0x4fb   : > { %v5335_v47 = vrot.slane %v8684_v31, 2  ;;  %v5337_v17 = vrot.slane %v8684_v31, 4 }
 0x4fc   : > { %5024 = vrot.lane.b32.xlu2 %v5001_v1, %s7297_s18  ;;  %v5351_v15 = vperm.slane %v5336_v45, 0  ;;  %v5349_v43 = vperm.slane %v5334_v35, 0  ;;  %v5354_v10 = vperm.slane %v5339_v13, 0 }
 0x4fd   : > { %v5350_v61 = vperm.slane %v5335_v47, 0  ;;  %v5352_v12 = vperm.slane %v5337_v17, 0 }
 0x4fe   : > { %v4009_v25 = vpop.permute.xlu2 %4008  ;;  %5016 = vrot.lane.b32.xlu1 %v4997_v34, %s7297_s18  ;;  %5020 = vrot.lane.b32.xlu0 %v4999_v22, %s7297_s18  ;;  %v5338_v34 = vrot.slane %v8684_v31, 5  ;;  %v5340_v22 = vrot.slane %v8684_v31, 7 }
 0x4ff   : > { %4053 = vst.msk [vmem:[#allocation2 + $0x6] sm:$0x1] %vm1651_vm13, %v4009_v25  ;;  %v5329_v9 = vpop.f32.mrf.mxu3 }
 0x500   : > { %v5330_v46 = vadd.f32 %v5329_v9, %v5303_v0  ;;  %v5353_v3 = vperm.slane %v5338_v34, 0  ;;  %v5355_v25 = vperm.slane %v5340_v22, 0 }
 0x502   : > { %v5341_v7 = vrot.slane %v5330_v46, 1  ;;  %v5344_v56 = vrot.slane %v5330_v46, 4  ;;  %v5342_v60 = vrot.slane %v5330_v46, 2  ;;  %v5347_v42 = vrot.slane %v5330_v46, 7 }
 0x503   : > { %v5343_v52 = vrot.slane %v5330_v46, 3  ;;  %v5345_v11 = vrot.slane %v5330_v46, 5 }
 0x504   : > { %5030 = vrot.lane.b32.xlu2 %v5004_v8, %s7297_s18  ;;  %v5357_v23 = vperm.slane %v5341_v7, 0  ;;  %v5360_v8 = vperm.slane %v5344_v56, 0  ;;  %v5363_v30 = vperm.slane %v5347_v42, 0  ;;  %v7224_v56 = vld [vmem:[%s7414_s17 + $0x2] ss:$0 sm:$0xff] }
 0x505   : > { %v5359_v4 = vperm.slane %v5343_v52, 0  ;;  %v7227_v52 = vld [vmem:[%s7404_s26 + $0x4] ss:$0 sm:$0xff] }
 0x506   : > { %v4015_v50 = vpop.permute.xlu2 %4014  ;;  %5022 = vrot.lane.b32.xlu1 %v5000_v21, %s7297_s18  ;;  %5026 = vrot.lane.b32.xlu0 %v5002_v6, %s7297_s18  ;;  %v5356_v21 = vperm.slane %v5330_v46, 0  ;;  %v5358_v6 = vperm.slane %v5342_v60, 0 }
 0x507   : > { %4056 = vst.msk [vmem:[#allocation2 + $0xc] sm:$0x1] %vm1651_vm13, %v4015_v50 }
 0x50c   : > { %5036 = vrot.lane.b32.xlu2 %v5007_v2, %s7297_s18  ;;  %v5361_v2 = vperm.slane %v5345_v11, 0 }
 0x50e   : > { %v4021_v32 = vpop.permute.xlu2 %4020  ;;  %5028 = vrot.lane.b32.xlu1 %v5003_v57, %s7297_s18  ;;  %5032 = vrot.lane.b32.xlu0 %v5005_v24, %s7297_s18 }
 0x50f   : > { %4059 = vst.msk [vmem:[#allocation2 + $0x12] sm:$0x1] %vm1651_vm13, %v4021_v32  ;;  %v5346_v32 = vrot.slane %v5330_v46, 6 }
 0x510   : > { %v4007_v16 = vpop.permute.xlu1 %4006  ;;  %v4005_v53 = vpop.permute.xlu0 %4004 }
 0x511   : > { %4052 = vst.msk [vmem:[#allocation2 + $0x4] sm:$0x1] %vm1651_vm13, %v4007_v16  ;;  %v5362_v16 = vperm.slane %v5346_v32, 0  ;;  %v7229_v32 = vld [vmem:[%s7404_s26 + $0x5] ss:$0 sm:$0xff] }
 0x512   : > { %4051 = vst.msk [vmem:[#allocation2 + $0x2] sm:$0x1] %vm1651_vm13, %v4005_v53 }
 0x514   : > { %5364 = vrot.lane.b32.xlu2 %v5348_v38, %s7298_s29 }
 0x516   : > { %v4029_v54 = vpop.permute.xlu2 %4028  ;;  %5034 = vrot.lane.b32.xlu1 %v5006_v44, %s7297_s18  ;;  %5038 = vrot.lane.b32.xlu0 %v5008_v29, %s7297_s18 }
 0x517   : > { %4063 = vst.msk [vmem:[#allocation2 + $0x1a] sm:$0x1] %vm1651_vm13, %v4029_v54 }
 0x518   : > { %v4013_v28 = vpop.permute.xlu1 %4012  ;;  %v4011_v37 = vpop.permute.xlu0 %4010 }
 0x519   : > { %4055 = vst.msk [vmem:[#allocation2 + $0xa] sm:$0x1] %vm1651_vm13, %v4013_v28 }
 0x51a   : > { %4054 = vst.msk [vmem:[#allocation2 + $0x8] sm:$0x1] %vm1651_vm13, %v4011_v37 }
 0x51c   : > { %5370 = vrot.lane.b32.xlu2 %v5351_v15, %s7298_s29 }
 0x51e   : > { %v4357_v63 = vpop.permute.xlu2 %4356  ;;  %5040 = vrot.lane.b32.xlu1 %v5009_v36, %s7297_s18  ;;  %5366 = vrot.lane.b32.xlu0 %v5349_v43, %s7298_s29 }
 0x51f   : > { %4404 = vst.msk [vmem:[#allocation2] sm:$0x1] %vm2006_vm14, %v4357_v63 }
 0x520   : > { %v4019_v14 = vpop.permute.xlu1 %4018  ;;  %v4017_v40 = vpop.permute.xlu0 %4016 }
 0x521   : > { %4058 = vst.msk [vmem:[#allocation2 + $0x10] sm:$0x1] %vm1651_vm13, %v4019_v14 }
 0x522   : > { %4057 = vst.msk [vmem:[#allocation2 + $0xe] sm:$0x1] %vm1651_vm13, %v4017_v40 }
 0x524   : > { %5376 = vrot.lane.b32.xlu2 %v5354_v10, %s7298_s29 }
 0x526   : > { %v4363_v55 = vpop.permute.xlu2 %4362  ;;  %5368 = vrot.lane.b32.xlu1 %v5350_v61, %s7298_s29  ;;  %5372 = vrot.lane.b32.xlu0 %v5352_v12, %s7298_s29 }
 0x527   : > { %4407 = vst.msk [vmem:[#allocation2 + $0x6] sm:$0x1] %vm2006_vm14, %v4363_v55  ;;  %v7221_v55 = vld [vmem:[%s7404_s26 + $0x1] ss:$0 sm:$0xff] }
 0x528   : > { %v4027_v1 = vpop.permute.xlu1 %4026  ;;  %v4023_v58 = vpop.permute.xlu0 %4022 }
 0x529   : > { %4062 = vst.msk [vmem:[#allocation2 + $0x18] sm:$0x1] %vm1651_vm13, %v4027_v1  ;;  %v7222_v1 = vld [vmem:[%s7414_s17 + $0x1] ss:$0 sm:$0xff] }
 0x52a   : > { %4060 = vst.msk [vmem:[#allocation2 + $0x14] sm:$0x1] %vm1651_vm13, %v4023_v58 }
 0x52c   : > { %5382 = vrot.lane.b32.xlu2 %v5357_v23, %s7298_s29 }
 0x52e   : > { %v4369_v27 = vpop.permute.xlu2 %4368  ;;  %5374 = vrot.lane.b32.xlu1 %v5353_v3, %s7298_s29  ;;  %5378 = vrot.lane.b32.xlu0 %v5355_v25, %s7298_s29  ;;  %v7223_v25 = vld [vmem:[%s7404_s26 + $0x2] ss:$0 sm:$0xff] }
 0x52f   : > { %4410 = vst.msk [vmem:[#allocation2 + $0xc] sm:$0x1] %vm2006_vm14, %v4369_v27 }
 0x530   : > { %v4033_v39 = vpop.permute.xlu1 %4032  ;;  %v4025_v18 = vpop.permute.xlu0 %4024 }
 0x531   : > { %4065 = vst.msk [vmem:[#allocation2 + $0x1e] sm:$0x1] %vm1651_vm13, %v4033_v39 }
 0x532   : > { %4061 = vst.msk [vmem:[#allocation2 + $0x16] sm:$0x1] %vm1651_vm13, %v4025_v18 }
 0x534   : > { %5388 = vrot.lane.b32.xlu2 %v5360_v8, %s7298_s29 }
 0x536   : > { %v4377_v20 = vpop.permute.xlu2 %4376  ;;  %5380 = vrot.lane.b32.xlu1 %v5356_v21, %s7298_s29  ;;  %5384 = vrot.lane.b32.xlu0 %v5358_v6, %s7298_s29  ;;  %v7225_v21 = vld [vmem:[%s7404_s26 + $0x3] ss:$0 sm:$0xff] }
 0x537   : > { %4414 = vst.msk [vmem:[#allocation2 + $0x14] sm:$0x1] %vm2006_vm14, %v4377_v20 }
 0x538   : > { %v4361_v50 = vpop.permute.xlu1 %4360  ;;  %v4031_v51 = vpop.permute.xlu0 %4030 }
 0x539   : > { %4406 = vst.msk [vmem:[#allocation2 + $0x4] sm:$0x1] %vm2006_vm14, %v4361_v50  ;;  %v7226_v50 = vld [vmem:[%s7414_s17 + $0x3] ss:$0 sm:$0xff] }
 0x53a   : > { %4064 = vst.msk [vmem:[#allocation2 + $0x1c] sm:$0x1] %vm1651_vm13, %v4031_v51 }
 0x53c   : > { %5394 = vrot.lane.b32.xlu2 %v5363_v30, %s7298_s29 }
 0x53e   : > { %v4385_v57 = vpop.permute.xlu2 %4384  ;;  %5386 = vrot.lane.b32.xlu1 %v5359_v4, %s7298_s29  ;;  %5390 = vrot.lane.b32.xlu0 %v5361_v2, %s7298_s29  ;;  %v7228_v2 = vld [vmem:[%s7414_s17 + $0x4] ss:$0 sm:$0xff] }
 0x53f   : > { %4418 = vst.msk [vmem:[#allocation2 + $0x1c] sm:$0x1] %vm2006_vm14, %v4385_v57 }
 0x540   : > { %v4367_v24 = vpop.permute.xlu1 %4366  ;;  %v4359_v31 = vpop.permute.xlu0 %4358 }
 0x541   : > { %4409 = vst.msk [vmem:[#allocation2 + $0xa] sm:$0x1] %vm2006_vm14, %v4367_v24 }
 0x542   : > { %4405 = vst.msk [vmem:[#allocation2 + $0x2] sm:$0x1] %vm2006_vm14, %v4359_v31 }
 0x546   : > { %v5013_v53 = vpop.permute.xlu2 %5012  ;;  %5392 = vrot.lane.b32.xlu1 %v5362_v16, %s7298_s29 }
 0x547   : > { %5059 = vst.msk [vmem:[#allocation2 + $0x3] sm:$0x1] %vm1651_vm13, %v5013_v53 }
 0x548   : > { %v4373_v38 = vpop.permute.xlu1 %4372  ;;  %v4365_v19 = vpop.permute.xlu0 %4364 }
 0x549   : > { %4412 = vst.msk [vmem:[#allocation2 + $0x10] sm:$0x1] %vm2006_vm14, %v4373_v38  ;;  %v7230_v38 = vld [vmem:[%s7414_s17 + $0x5] ss:$0 sm:$0xff] }
 0x54a   : > { %4408 = vst.msk [vmem:[#allocation2 + $0x8] sm:$0x1] %vm2006_vm14, %v4365_v19 }
 0x54e   : > { %v5019_v49 = vpop.permute.xlu2 %5018 }
 0x54f   : > { %5062 = vst.msk [vmem:[#allocation2 + $0x9] sm:$0x1] %vm1651_vm13, %v5019_v49 }
 0x550   : > { %v4375_v41 = vpop.permute.xlu1 %4374  ;;  %v4371_v48 = vpop.permute.xlu0 %4370 }
 0x551   : > { %4413 = vst.msk [vmem:[#allocation2 + $0x12] sm:$0x1] %vm2006_vm14, %v4375_v41  ;;  %v7231_v41 = vld [vmem:[%s7404_s26 + $0x6] ss:$0 sm:$0xff] }
 0x552   : > { %4411 = vst.msk [vmem:[#allocation2 + $0xe] sm:$0x1] %vm2006_vm14, %v4371_v48 }
 0x556   : > { %v5025_v44 = vpop.permute.xlu2 %5024 }
 0x557   : > { %5065 = vst.msk [vmem:[#allocation2 + $0xf] sm:$0x1] %vm1651_vm13, %v5025_v44 }
 0x558   : > { %v4379_v29 = vpop.permute.xlu1 %4378  ;;  %v4381_v5 = vpop.permute.xlu0 %4380 }
 0x559   : > { %4415 = vst.msk [vmem:[#allocation2 + $0x16] sm:$0x1] %vm2006_vm14, %v4379_v29 }
 0x55a   : > { %4416 = vst.msk [vmem:[#allocation2 + $0x18] sm:$0x1] %vm2006_vm14, %v4381_v5  ;;  %v7232_v5 = vld [vmem:[%s7414_s17 + $0x6] ss:$0 sm:$0xff] }
 0x55e   : > { %v5031_v54 = vpop.permute.xlu2 %5030 }
 0x55f   : > { %5068 = vst.msk [vmem:[#allocation2 + $0x15] sm:$0x1] %vm1651_vm13, %v5031_v54 }
 0x560   : > { %v4383_v45 = vpop.permute.xlu1 %4382  ;;  %v4387_v59 = vpop.permute.xlu0 %4386 }
 0x561   : > { %4417 = vst.msk [vmem:[#allocation2 + $0x1a] sm:$0x1] %vm2006_vm14, %v4383_v45  ;;  %v7233_v45 = vld [vmem:[%s7404_s26 + $0x7] ss:$0 sm:$0xff] }
 0x562   : > { %4419 = vst.msk [vmem:[#allocation2 + $0x1e] sm:$0x1] %vm2006_vm14, %v4387_v59 }
 0x566   : > { %v5037_v28 = vpop.permute.xlu2 %5036 }
 0x567   : > { %5071 = vst.msk [vmem:[#allocation2 + $0x1b] sm:$0x1] %vm1651_vm13, %v5037_v28 }
 0x568   : > { %v5011_v37 = vpop.permute.xlu1 %5010  ;;  %v5015_v26 = vpop.permute.xlu0 %5014 }
 0x569   : > { %5058 = vst.msk [vmem:[#allocation2 + $0x1] sm:$0x1] %vm1651_vm13, %v5011_v37 }
 0x56a   : > { %5060 = vst.msk [vmem:[#allocation2 + $0x5] sm:$0x1] %vm1651_vm13, %v5015_v26 }
 0x56e   : > { %v5365_v35 = vpop.permute.xlu2 %5364 }
 0x56f   : > { %5412 = vst.msk [vmem:[#allocation2 + $0x1] sm:$0x1] %vm2006_vm14, %v5365_v35  ;;  %v7234_v35 = vld [vmem:[%s7414_s17 + $0x7] ss:$0 sm:$0xff] }
 0x570   : > { %v5017_v33 = vpop.permute.xlu1 %5016  ;;  %v5021_v15 = vpop.permute.xlu0 %5020 }
 0x571   : > { %5061 = vst.msk [vmem:[#allocation2 + $0x7] sm:$0x1] %vm1651_vm13, %v5017_v33 }
 0x572   : > { %5063 = vst.msk [vmem:[#allocation2 + $0xb] sm:$0x1] %vm1651_vm13, %v5021_v15 }
 0x576   : > { %v5428_v36 = vld [vmem:[#allocation2] sm:$0x3]  ;;  %v5371_v43 = vpop.permute.xlu2 %5370 }
 0x577   : > { %v5433_v0 = vmul.f32 %v7220_v62, %v5428_v36  ;;  %5415 = vst.msk [vmem:[#allocation2 + $0x7] sm:$0x1] %vm2006_vm14, %v5371_v43  ;;  %v7235_v36 = vld [vmem:[%s7404_s26 + $0x8] ss:$0 sm:$0xff] }
 0x578   : > { %v5023_v63 = vpop.permute.xlu1 %5022  ;;  %v5027_v13 = vpop.permute.xlu0 %5026 }
 0x579   : > { %5434 = vst.msk [vmem:[#allocation2] sm:$0x3] %vm622_vm1, %v5433_v0  ;;  %v5441_v58 = vmul.f32 %v7221_v55, %v5433_v0  ;;  %v7236_v0 = vld [vmem:[%s7414_s17 + $0x8] ss:$0 sm:$0xff] }
 0x57a   : > { %5064 = vst.msk [vmem:[#allocation2 + $0xd] sm:$0x1] %vm1651_vm13, %v5023_v63 }
 0x57b   : > { %5066 = vst.msk [vmem:[#allocation2 + $0x11] sm:$0x1] %vm1651_vm13, %v5027_v13 }
 0x57e   : > { %v5377_v9 = vpop.permute.xlu2 %5376  ;;  %v5465_v51 = vld [vmem:[#allocation2 + $0x6] sm:$0x3] }
 0x57f   : > { %5418 = vst.msk [vmem:[#allocation2 + $0xd] sm:$0x1] %vm2006_vm14, %v5377_v9  ;;  %v7237_v9 = vld [vmem:[%s7404_s26 + $0x9] ss:$0 sm:$0xff] }
 0x580   : > { %v5029_v14 = vpop.permute.xlu1 %5028  ;;  %v5033_v40 = vpop.permute.xlu0 %5032 }
 0x581   : > { %5067 = vst.msk [vmem:[#allocation2 + $0x13] sm:$0x1] %vm1651_vm13, %v5029_v14 }
 0x582   : > { %5069 = vst.msk [vmem:[#allocation2 + $0x17] sm:$0x1] %vm1651_vm13, %v5033_v40 }
 0x586   : > { %v5383_v47 = vpop.permute.xlu2 %5382  ;;  %v5510_v54 = vld [vmem:[#allocation2 + $0xc] sm:$0x3] }
 0x587   : > { %5421 = vst.msk [vmem:[#allocation2 + $0x13] sm:$0x1] %vm2006_vm14, %v5383_v47 }
 0x588   : > { %v5035_v17 = vpop.permute.xlu1 %5034  ;;  %v5039_v46 = vpop.permute.xlu0 %5038 }
 0x589   : > { %5070 = vst.msk [vmem:[#allocation2 + $0x19] sm:$0x1] %vm1651_vm13, %v5035_v17  ;;  %v7238_v17 = vld [vmem:[%s7414_s17 + $0x9] ss:$0 sm:$0xff] }
 0x58a   : > { %5072 = vst.msk [vmem:[#allocation2 + $0x1d] sm:$0x1] %vm1651_vm13, %v5039_v46 }
 0x58e   : > { %v5389_v10 = vpop.permute.xlu2 %5388  ;;  %v5555_v46 = vld [vmem:[#allocation2 + $0x12] sm:$0x3] }
 0x58f   : > { %5424 = vst.msk [vmem:[#allocation2 + $0x19] sm:$0x1] %vm2006_vm14, %v5389_v10  ;;  %v7239_v10 = vld [vmem:[%s7404_s26 + $0xa] ss:$0 sm:$0xff] }
 0x590   : > { %v5041_v61 = vpop.permute.xlu1 %5040  ;;  %v5367_v12 = vpop.permute.xlu0 %5366 }
 0x591   : > { %5073 = vst.msk [vmem:[#allocation2 + $0x1f] sm:$0x1] %vm1651_vm13, %v5041_v61 }
 0x592   : > { %5413 = vst.msk [vmem:[#allocation2 + $0x3] sm:$0x1] %vm2006_vm14, %v5367_v12 }
 0x596   : > { %v5395_v7 = vpop.permute.xlu2 %5394 }
 0x597   : > { %5427 = vst.msk [vmem:[#allocation2 + $0x1f] sm:$0x1] %vm2006_vm14, %v5395_v7  ;;  %v7240_v7 = vld [vmem:[%s7414_s17 + $0xa] ss:$0 sm:$0xff] }
 0x598   : > { %v5369_v34 = vpop.permute.xlu1 %5368  ;;  %v5373_v22 = vpop.permute.xlu0 %5372 }
 0x599   : > { %v5435_v23 = vld [vmem:[#allocation2 + $0x2] sm:$0x3]  ;;  %5414 = vst.msk [vmem:[#allocation2 + $0x5] sm:$0x1] %vm2006_vm14, %v5369_v34 }
 0x59a   : > { %v5442_v3 = vsub.f32 %v5435_v23, %v5441_v58  ;;  %5416 = vst.msk [vmem:[#allocation2 + $0x9] sm:$0x1] %vm2006_vm14, %v5373_v22  ;;  %v7241_v22 = vld [vmem:[%s7404_s26 + $0xb] ss:$0 sm:$0xff] }
 0x59c   : > { %v5448_v27 = vmul.f32 %v7222_v1, %v5442_v3  ;;  %v7242_v3 = vld [vmem:[%s7414_s17 + $0xb] ss:$0 sm:$0xff] }
 0x59e   : > { %5449 = vst.msk [vmem:[#allocation2 + $0x2] sm:$0x3] %vm622_vm1, %v5448_v27  ;;  %v5456_v39 = vmul.f32 %v7223_v25, %v5448_v27 }
 0x5a0   : > { %v5450_v18 = vld [vmem:[#allocation2 + $0x4] sm:$0x3]  ;;  %v5375_v60 = vpop.permute.xlu1 %5374  ;;  %v5379_v8 = vpop.permute.xlu0 %5378 }
 0x5a1   : > { %v5457_v6 = vsub.f32 %v5450_v18, %v5456_v39  ;;  %5417 = vst.msk [vmem:[#allocation2 + $0xb] sm:$0x1] %vm2006_vm14, %v5375_v60  ;;  %v5480_v24 = vld [vmem:[#allocation2 + $0x8] sm:$0x3] }
 0x5a2   : > { %5419 = vst.msk [vmem:[#allocation2 + $0xf] sm:$0x1] %vm2006_vm14, %v5379_v8  ;;  %v7244_v8 = vld [vmem:[%s7414_s17 + $0xc] ss:$0 sm:$0xff] }
 0x5a3   : > { %v5463_v20 = vmul.f32 %v7224_v56, %v5457_v6  ;;  %v7243_v56 = vld [vmem:[%s7404_s26 + $0xc] ss:$0 sm:$0xff]  ;;  %v7245_v6 = vld [vmem:[%s7404_s26 + $0xd] ss:$0 sm:$0xff] }
 0x5a5   : > { %5464 = vst.msk [vmem:[#allocation2 + $0x4] sm:$0x3] %vm622_vm1, %v5463_v20  ;;  %v5471_v42 = vmul.f32 %v7225_v21, %v5463_v20  ;;  %v5600_v21 = vld [vmem:[#allocation2 + $0x18] sm:$0x3] }
 0x5a7   : > { %v5472_v11 = vsub.f32 %v5465_v51, %v5471_v42 }
 0x5a8   : > { %v5381_v4 = vpop.permute.xlu1 %5380  ;;  %v5385_v53 = vpop.permute.xlu0 %5384  ;;  %v5495_v49 = vld [vmem:[#allocation2 + $0xa] sm:$0x3] }
 0x5a9   : > { %v5478_v30 = vmul.f32 %v7226_v50, %v5472_v11  ;;  %5420 = vst.msk [vmem:[#allocation2 + $0x11] sm:$0x1] %vm2006_vm14, %v5381_v4  ;;  %v5525_v15 = vld [vmem:[#allocation2 + $0xe] sm:$0x3]  ;;  %v7246_v50 = vld [vmem:[%s7414_s17 + $0xd] ss:$0 sm:$0xff] }
 0x5aa   : > { %5422 = vst.msk [vmem:[#allocation2 + $0x15] sm:$0x1] %vm2006_vm14, %v5385_v53  ;;  %v7250_v53 = vld [vmem:[%s7414_s17 + $0xf] ss:$0 sm:$0xff] }
 0x5ab   : > { %5479 = vst.msk [vmem:[#allocation2 + $0x6] sm:$0x3] %vm622_vm1, %v5478_v30  ;;  %v5486_v57 = vmul.f32 %v7227_v52, %v5478_v30  ;;  %v7247_v30 = vld [vmem:[%s7404_s26 + $0xe] ss:$0 sm:$0xff] }
 0x5ad   : > { %v5487_v31 = vsub.f32 %v5480_v24, %v5486_v57 }
 0x5af   : > { %v5493_v16 = vmul.f32 %v7228_v2, %v5487_v31  ;;  %v7248_v2 = vld [vmem:[%s7414_s17 + $0xe] ss:$0 sm:$0xff]  ;;  %v7249_v31 = vld [vmem:[%s7404_s26 + $0xf] ss:$0 sm:$0xff]  ;;  %s7093_s26 = sld [smem:[#allocation5 + $0x1]] }
 0x5b0   : > { %v5387_v37 = vpop.permute.xlu1 %5386  ;;  %v5391_v26 = vpop.permute.xlu0 %5390  ;;  %v5540_v13 = vld [vmem:[#allocation2 + $0x10] sm:$0x3]  ;;  %s7099_s17 = sld [smem:[#allocation5 + $0x101]] }
 0x5b1   : > { %5494 = vst.msk [vmem:[#allocation2 + $0x8] sm:$0x3] %vm622_vm1, %v5493_v16  ;;  %v5501_v19 = vmul.f32 %v7229_v32, %v5493_v16  ;;  %v5570_v58 = vld [vmem:[#allocation2 + $0x14] sm:$0x3] }
 0x5b2   : > { %5423 = vst.msk [vmem:[#allocation2 + $0x17] sm:$0x1] %vm2006_vm14, %v5387_v37 }
 0x5b3   : > { %v5502_v48 = vsub.f32 %v5495_v49, %v5501_v19  ;;  %5425 = vst.msk [vmem:[#allocation2 + $0x1b] sm:$0x1] %vm2006_vm14, %v5391_v26  ;;  %v5645_v19 = vld [vmem:[#allocation2 + $0x1e] sm:$0x3]  ;;  %v7251_v49 = vld [vmem:[%s7409_s13 + $0xe] ss:$0 sm:$0xff] }
 0x5b4   : > { %v7254_v26 = vld [vmem:[%s7409_s13 + $0xb] ss:$0 sm:$0xff] }
 0x5b5   : > { %v5508_v44 = vmul.f32 %v7230_v38, %v5502_v48 }
 0x5b7   : > { %5509 = vst.msk [vmem:[#allocation2 + $0xa] sm:$0x3] %vm622_vm1, %v5508_v44  ;;  %v5516_v29 = vmul.f32 %v7231_v41, %v5508_v44  ;;  %v7252_v44 = vld [vmem:[%s7409_s13 + $0xd] ss:$0 sm:$0xff] }
 0x5b8   : > { %v5393_v12 = vpop.permute.xlu1 %5392 }
 0x5b9   : > { %v5517_v59 = vsub.f32 %v5510_v54, %v5516_v29  ;;  %5426 = vst.msk [vmem:[#allocation2 + $0x1d] sm:$0x1] %vm2006_vm14, %v5393_v12  ;;  %v5585_v27 = vld [vmem:[#allocation2 + $0x16] sm:$0x3] }
 0x5ba   : > { %v5615_v52 = vld [vmem:[#allocation2 + $0x1a] sm:$0x3] }
 0x5bb   : > { %v5523_v28 = vmul.f32 %v7232_v5, %v5517_v59 }
 0x5bd   : > { %v5531_v33 = vmul.f32 %v7233_v45, %v5523_v28  ;;  %5524 = vst.msk [vmem:[#allocation2 + $0xc] sm:$0x3] %vm622_vm1, %v5523_v28  ;;  %v7253_v45 = vld [vmem:[%s7409_s13 + $0xc] ss:$0 sm:$0xff] }
 0x5bf   : > { %v5532_v62 = vsub.f32 %v5525_v15, %v5531_v33 }
 0x5c0   : > { %v5630_v24 = vld [vmem:[#allocation2 + $0x1c] sm:$0x3] }
 0x5c1   : > { %v5538_v43 = vmul.f32 %v7234_v35, %v5532_v62  ;;  %v7255_v62 = vld [vmem:[%s7409_s13 + $0xa] ss:$0 sm:$0xff] }
 0x5c3   : > { %5539 = vst.msk [vmem:[#allocation2 + $0xe] sm:$0x3] %vm622_vm1, %v5538_v43  ;;  %v5546_v63 = vmul.f32 %v7235_v36, %v5538_v43 }
 0x5c5   : > { %v5547_v14 = vsub.f32 %v5540_v13, %v5546_v63  ;;  %v7256_v63 = vld [vmem:[%s7409_s13 + $0x9] ss:$0 sm:$0xff] }
 0x5c7   : > { %v5553_v40 = vmul.f32 %v7236_v0, %v5547_v14 }
 0x5c9   : > { %5554 = vst.msk [vmem:[#allocation2 + $0x10] sm:$0x3] %vm622_vm1, %v5553_v40  ;;  %v5561_v47 = vmul.f32 %v7237_v9, %v5553_v40  ;;  %v7257_v40 = vld [vmem:[%s7409_s13 + $0x8] ss:$0 sm:$0xff] }
 0x5cb   : > { %v5562_v61 = vsub.f32 %v5555_v46, %v5561_v47 }
 0x5cd   : > { %v5568_v55 = vmul.f32 %v7238_v17, %v5562_v61 }
 0x5cf   : > { %v5576_v1 = vmul.f32 %v7239_v10, %v5568_v55  ;;  %5569 = vst.msk [vmem:[#allocation2 + $0x12] sm:$0x3] %vm622_vm1, %v5568_v55  ;;  %v7258_v10 = vld [vmem:[%s7409_s13 + $0x7] ss:$0 sm:$0xff] }
 0x5d0   : > { %v5714_v12 = vld [vmem:[#allocation2 + $0x10] sm:$0x3] }
 0x5d1   : > { %v5577_v34 = vsub.f32 %v5570_v58, %v5576_v1  ;;  %v8842_v1 = vstv %s7096_s2  ;;  %v8844_v58 = vstv %s7094_s3 }
 0x5d3   : > { %v5583_v23 = vmul.f32 %v7240_v7, %v5577_v34  ;;  %v8846_v34 = vstv %s7093_s26 }
 0x5d5   : > { %5584 = vst.msk [vmem:[#allocation2 + $0x14] sm:$0x3] %vm622_vm1, %v5583_v23  ;;  %v5591_v25 = vmul.f32 %v7241_v22, %v5583_v23  ;;  %v7259_v22 = vld [vmem:[%s7409_s13 + $0x6] ss:$0 sm:$0xff] }
 0x5d6   : > { %v5705_v17 = vld [vmem:[#allocation2 + $0x12] sm:$0x3] }
 0x5d7   : > { %v5592_v39 = vsub.f32 %v5585_v27, %v5591_v25 }
 0x5d9   : > { %v5598_v18 = vmul.f32 %v7242_v3, %v5592_v39 }
 0x5db   : > { %5599 = vst.msk [vmem:[#allocation2 + $0x16] sm:$0x3] %vm622_vm1, %v5598_v18  ;;  %v5606_v60 = vmul.f32 %v7243_v56, %v5598_v18  ;;  %v5723_v56 = vld [vmem:[#allocation2 + $0xe] sm:$0x3]  ;;  %v7260_v18 = vld [vmem:[%s7409_s13 + $0x5] ss:$0 sm:$0xff] }
 0x5dc   : > { %v5696_v9 = vld [vmem:[#allocation2 + $0x14] sm:$0x3] }
 0x5dd   : > { %v5607_v20 = vsub.f32 %v5600_v21, %v5606_v60  ;;  %v8861_v21 = vstv %s7099_s17 }
 0x5df   : > { %v5613_v42 = vmul.f32 %v7244_v8, %v5607_v20  ;;  %v5732_v8 = vld [vmem:[#allocation2 + $0xc] sm:$0x3] }
 0x5e1   : > { %v5621_v51 = vmul.f32 %v7245_v6, %v5613_v42  ;;  %5614 = vst.msk [vmem:[#allocation2 + $0x18] sm:$0x3] %vm622_vm1, %v5613_v42  ;;  %v8865_v42 = vstv %s7097_s28 }
 0x5e2   : > { %v5687_v43 = vld [vmem:[#allocation2 + $0x16] sm:$0x3] }
 0x5e3   : > { %v5622_v11 = vsub.f32 %v5615_v52, %v5621_v51 }
 0x5e5   : > { %v5628_v4 = vmul.f32 %v7246_v50, %v5622_v11  ;;  %v7261_v50 = vld [vmem:[%s7409_s13 + $0x4] ss:$0 sm:$0xff] }
 0x5e7   : > { %5629 = vst.msk [vmem:[#allocation2 + $0x1a] sm:$0x3] %vm622_vm1, %v5628_v4  ;;  %v5636_v57 = vmul.f32 %v7247_v30, %v5628_v4  ;;  %v5741_v30 = vld [vmem:[#allocation2 + $0xa] sm:$0x3] }
 0x5e8   : > { %v5678_v33 = vld [vmem:[#allocation2 + $0x18] sm:$0x3] }
 0x5e9   : > { %v5637_v32 = vsub.f32 %v5630_v24, %v5636_v57  ;;  %v7262_v57 = vld [vmem:[%s7409_s13 + $0x3] ss:$0 sm:$0xff] }
 0x5eb   : > { %v5643_v16 = vmul.f32 %v7248_v2, %v5637_v32 }
 0x5ed   : > { %5644 = vst.msk [vmem:[#allocation2 + $0x1c] sm:$0x3] %vm622_vm1, %v5643_v16  ;;  %v5651_v38 = vmul.f32 %v7249_v31, %v5643_v16  ;;  %v5750_v31 = vld [vmem:[#allocation2 + $0x8] sm:$0x3]  ;;  %v8880_v16 = vstv %s7100_s22 }
 0x5ee   : > { %v5669_v28 = vld [vmem:[#allocation2 + $0x1a] sm:$0x3] }
 0x5ef   : > { %v5652_v41 = vsub.f32 %v5645_v19, %v5651_v38 }
 0x5f1   : > { %v5658_v48 = vmul.f32 %v7250_v53, %v5652_v41  ;;  %v7263_v53 = vld [vmem:[%s7409_s13 + $0x2] ss:$0 sm:$0xff]  ;;  %v5759_v41 = vld [vmem:[#allocation2 + $0x6] sm:$0x3] }
 0x5f3   : > { %v5666_v29 = vmul.f32 %v7251_v49, %v5658_v48  ;;  %5659 = vst.msk [vmem:[#allocation2 + $0x1e] sm:$0x3] %vm622_vm1, %v5658_v48 }
 0x5f4   : > { %v5660_v5 = vld [vmem:[#allocation2 + $0x1c] sm:$0x3] }
 0x5f5   : > { %v5667_v54 = vsub.f32 %v5660_v5, %v5666_v29  ;;  %v7264_v29 = vld [vmem:[%s7409_s13 + $0x1] ss:$0 sm:$0xff] }
 0x5f7   : > { %v5675_v59 = vmul.f32 %v7252_v44, %v5667_v54  ;;  %5668 = vst.msk [vmem:[#allocation2 + $0x1c] sm:$0x3] %vm622_vm1, %v5667_v54  ;;  %v5768_v54 = vld [vmem:[#allocation2 + $0x4] sm:$0x3] }
 0x5f9   : > { %v5676_v37 = vsub.f32 %v5669_v28, %v5675_v59  ;;  %v7265_v28 = vld [vmem:[%s7409_s13] ss:$0 sm:$0xff]  ;;  %s7098_s13 = sld [smem:[#allocation5 + $0x100]] }
 0x5fa   : > { %v8840_v7 = vld [vmem:[#allocation2 + $0x1e] sm:$0x3] }
 0x5fb   : > { %v5684_v35 = vmul.f32 %v7253_v45, %v5676_v37  ;;  %5677 = vst.msk [vmem:[#allocation2 + $0x1a] sm:$0x3] %vm622_vm1, %v5676_v37  ;;  %v6076_v3 = vmul.f32 %v8842_v1, %v8840_v7  ;;  %v5943_v25 = vmul.f32 %v8844_v58, %v8840_v7  ;;  %v5845_v27 = vmul.f32 %v8846_v34, %v8840_v7 }
 0x5fc   : > { %v6371_v52 = vmul.f32 %v8861_v21, %v8840_v7  ;;  %v6174_v4 = vmul.f32 %v8865_v42, %v8840_v7  ;;  %v6469_v48 = vmul.f32 %v8880_v16, %v8840_v7 }
 0x5fd   : > { %v5685_v15 = vsub.f32 %v5678_v33, %v5684_v35  ;;  %6123 = vrot.lane.b32.xlu2 %v6076_v3, %s7294_s15  ;;  %5990 = vrot.lane.b32.xlu1 %v5943_v25, %s7295_s21  ;;  %v5777_v33 = vld [vmem:[#allocation2 + $0x2] sm:$0x3] }
 0x5fe   : > { %5892 = vrot.lane.b32.xlu0 %v5845_v27, %s7294_s15  ;;  %v8863_v6 = vld [vmem:[#allocation2 + $0x1c] sm:$0x3] }
 0x5ff   : > { %v5693_v36 = vmul.f32 %v7254_v26, %v5685_v15  ;;  %5686 = vst.msk [vmem:[#allocation2 + $0x18] sm:$0x3] %vm622_vm1, %v5685_v15  ;;  %v6075_v11 = vmul.f32 %v8842_v1, %v8863_v6  ;;  %v6370_v19 = vmul.f32 %v8861_v21, %v8863_v6  ;;  %v5844_v49 = vmul.f32 %v8846_v34, %v8863_v6 }
 0x600   : > { %v6173_v26 = vmul.f32 %v8865_v42, %v8863_v6  ;;  %v5942_v15 = vmul.f32 %v8844_v58, %v8863_v6 }
 0x601   : > { %v5694_v0 = vsub.f32 %v5687_v43, %v5693_v36  ;;  %v5786_v43 = vld [vmem:[#allocation2] sm:$0x3] }
 0x602   : > { %v8895_v45 = vld [vmem:[#allocation2 + $0x1a] sm:$0x3] }
 0x603   : > { %v5702_v13 = vmul.f32 %v7255_v62, %v5694_v0  ;;  %5695 = vst.msk [vmem:[#allocation2 + $0x16] sm:$0x3] %vm622_vm1, %v5694_v0  ;;  %v5843_v35 = vmul.f32 %v8846_v34, %v8895_v45 }
 0x605   : > { %v5703_v14 = vsub.f32 %v5696_v9, %v5702_v13  ;;  %6418 = vrot.lane.b32.xlu2 %v6371_v52, %s7294_s15  ;;  %6121 = vrot.lane.b32.xlu1 %v6075_v11, %s7294_s15  ;;  %v6172_v13 = vmul.f32 %v8865_v42, %v8895_v45  ;;  %v6074_v9 = vmul.f32 %v8842_v1, %v8895_v45 }
 0x606   : > { %6221 = vrot.lane.b32.xlu0 %v6174_v4, %s7295_s21 }
 0x607   : > { %v5711_v47 = vmul.f32 %v7256_v63, %v5703_v14  ;;  %5704 = vst.msk [vmem:[#allocation2 + $0x14] sm:$0x3] %vm622_vm1, %v5703_v14  ;;  %v6468_v63 = vmul.f32 %v8880_v16, %v8863_v6  ;;  %v5941_v14 = vmul.f32 %v8844_v58, %v8895_v45 }
 0x609   : > { %v5712_v46 = vsub.f32 %v5705_v17, %v5711_v47  ;;  %v6369_v47 = vmul.f32 %v8861_v21, %v8895_v45  ;;  %v8928_v17 = vld [vmem:[#allocation2 + $0x18] sm:$0x3] }
 0x60a   : > { %v6466_v27 = vmul.f32 %v8880_v16, %v8928_v17 }
 0x60b   : > { %v5720_v61 = vmul.f32 %v7257_v40, %v5712_v46  ;;  %5713 = vst.msk [vmem:[#allocation2 + $0x12] sm:$0x3] %vm622_vm1, %v5712_v46  ;;  %v6467_v40 = vmul.f32 %v8880_v16, %v8895_v45  ;;  %v6073_v46 = vmul.f32 %v8842_v1, %v8928_v17 }
 0x60d   : > { %v5721_v55 = vsub.f32 %v5714_v12, %v5720_v61  ;;  %6416 = vrot.lane.b32.xlu1 %v6370_v19, %s7294_s15  ;;  %5890 = vrot.lane.b32.xlu2 %v5844_v49, %s7294_s15  ;;  %v5842_v61 = vmul.f32 %v8846_v34, %v8928_v17  ;;  %v8939_v12 = vld [vmem:[#allocation2 + $0x16] sm:$0x3] }
 0x60e   : > { %6516 = vrot.lane.b32.xlu0 %v6469_v48, %s7295_s21  ;;  %v6367_v3 = vmul.f32 %v8861_v21, %v8939_v12  ;;  %v5841_v25 = vmul.f32 %v8846_v34, %v8939_v12 }
 0x60f   : > { %v5729_v23 = vmul.f32 %v7258_v10, %v5721_v55  ;;  %5722 = vst.msk [vmem:[#allocation2 + $0x10] sm:$0x3] %vm622_vm1, %v5721_v55  ;;  %v5940_v10 = vmul.f32 %v8844_v58, %v8928_v17  ;;  %v6368_v55 = vmul.f32 %v8861_v21, %v8928_v17 }
 0x611   : > { %v5730_v39 = vsub.f32 %v5723_v56, %v5729_v23  ;;  %v6171_v23 = vmul.f32 %v8865_v42, %v8928_v17  ;;  %v8959_v56 = vld [vmem:[#allocation2 + $0x14] sm:$0x3] }
 0x612   : > { %v6464_v52 = vmul.f32 %v8880_v16, %v8959_v56  ;;  %v6366_v11 = vmul.f32 %v8861_v21, %v8959_v56  ;;  %v8988_v4 = vld [vmem:[#allocation2 + $0x12] sm:$0x3] }
 0x613   : > { %v5738_v60 = vmul.f32 %v7259_v22, %v5730_v39  ;;  %5731 = vst.msk [vmem:[#allocation2 + $0xe] sm:$0x3] %vm622_vm1, %v5730_v39  ;;  %v6072_v22 = vmul.f32 %v8842_v1, %v8939_v12  ;;  %v6170_v39 = vmul.f32 %v8865_v42, %v8939_v12  ;;  %v6365_v49 = vmul.f32 %v8861_v21, %v8988_v4 }
 0x614   : > { %v6168_v48 = vmul.f32 %v8865_v42, %v8988_v4 }
 0x615   : > { %v5739_v20 = vsub.f32 %v5732_v8, %v5738_v60  ;;  %6219 = vrot.lane.b32.xlu2 %v6173_v26, %s7295_s21  ;;  %5888 = vrot.lane.b32.xlu1 %v5843_v35, %s7294_s15  ;;  %v5939_v60 = vmul.f32 %v8844_v58, %v8939_v12  ;;  %v6465_v8 = vmul.f32 %v8880_v16, %v8939_v12 }
 0x616   : > { %5988 = vrot.lane.b32.xlu0 %v5942_v15, %s7295_s21  ;;  %v9003_v19 = vld [vmem:[#allocation2 + $0x10] sm:$0x3] }
 0x617   : > { %v5747_v51 = vmul.f32 %v7260_v18, %v5739_v20  ;;  %5740 = vst.msk [vmem:[#allocation2 + $0xc] sm:$0x3] %vm622_vm1, %v5739_v20  ;;  %v5840_v18 = vmul.f32 %v8846_v34, %v8959_v56  ;;  %v6169_v20 = vmul.f32 %v8865_v42, %v8959_v56 }
 0x619   : > { %v5748_v2 = vsub.f32 %v5741_v30, %v5747_v51  ;;  %v5938_v51 = vmul.f32 %v8844_v58, %v8959_v56 }
 0x61b   : > { %v5756_v24 = vmul.f32 %v7261_v50, %v5748_v2  ;;  %5749 = vst.msk [vmem:[#allocation2 + $0xa] sm:$0x3] %vm622_vm1, %v5748_v2  ;;  %v6071_v50 = vmul.f32 %v8842_v1, %v8959_v56  ;;  %v6070_v2 = vmul.f32 %v8842_v1, %v8988_v4 }
 0x61d   : > { %v5757_v32 = vsub.f32 %v5750_v31, %v5756_v24  ;;  %6514 = vrot.lane.b32.xlu2 %v6468_v63, %s7295_s21  ;;  %6217 = vrot.lane.b32.xlu1 %v6172_v13, %s7295_s21  ;;  %v8994_v24 = vstv %s7098_s13  ;;  %v5839_v31 = vmul.f32 %v8846_v34, %v8988_v4  ;;  %v5936_v63 = vmul.f32 %v8844_v58, %v9003_v19 }
 0x61e   : > { %6119 = vrot.lane.b32.xlu0 %v6074_v9, %s7294_s15 }
 0x61f   : > { %v5765_v38 = vmul.f32 %v7262_v57, %v5757_v32  ;;  %5758 = vst.msk [vmem:[#allocation2 + $0x8] sm:$0x3] %vm622_vm1, %v5757_v32  ;;  %v5937_v57 = vmul.f32 %v8844_v58, %v8988_v4  ;;  %v6353_v32 = vmul.f32 %v8994_v24, %v8840_v7 }
 0x621   : > { %v5766_v44 = vsub.f32 %v5759_v41, %v5765_v38  ;;  %v6069_v41 = vmul.f32 %v8842_v1, %v9003_v19 }
 0x623   : > { %v5774_v5 = vmul.f32 %v7263_v53, %v5766_v44  ;;  %5767 = vst.msk [vmem:[#allocation2 + $0x6] sm:$0x3] %vm622_vm1, %v5766_v44 }
 0x625   : > { %v5775_v59 = vsub.f32 %v5768_v54, %v5774_v5  ;;  %5986 = vrot.lane.b32.xlu2 %v5941_v14, %s7295_s21  ;;  %6512 = vrot.lane.b32.xlu1 %v6467_v40, %s7295_s21  ;;  %v6364_v5 = vmul.f32 %v8861_v21, %v9003_v19  ;;  %v9018_v54 = vstv %s5810_s1 }
 0x626   : > { %6414 = vrot.lane.b32.xlu0 %v6369_v47, %s7294_s15 }
 0x627   : > { %v5783_v37 = vmul.f32 %v7264_v29, %v5775_v59  ;;  %5776 = vst.msk [vmem:[#allocation2 + $0x4] sm:$0x3] %vm622_vm1, %v5775_v59  ;;  %v5838_v29 = vmul.f32 %v8846_v34, %v9003_v19  ;;  %v6463_v59 = vmul.f32 %v8880_v16, %v8988_v4 }
 0x629   : > { %v5784_v62 = vsub.f32 %v5777_v33, %v5783_v37  ;;  %v5827_v37 = vmul.f32 %v9018_v54, %v8840_v7  ;;  %v9027_v33 = vld [vmem:[#allocation2 + $0xe] sm:$0x3] }
 0x62b   : > { %v5791_v36 = vmul.f32 %v7265_v28, %v5784_v62  ;;  %5785 = vst.msk [vmem:[#allocation2 + $0x2] sm:$0x3] %vm622_vm1, %v5784_v62  ;;  %v9029_v62 = vstv %s7095_s14 }
 0x62c   : > { %v6058_v13 = vmul.f32 %v9029_v62, %v8840_v7  ;;  %v6057_v9 = vmul.f32 %v9029_v62, %v8863_v6  ;;  %v6462_v7 = vmul.f32 %v8880_v16, %v9003_v19 }
 0x62d   : > { %v5792_v0 = vsub.f32 %v5786_v43, %v5791_v36  ;;  %6117 = vrot.lane.b32.xlu2 %v6073_v46, %s7294_s15  ;;  %5984 = vrot.lane.b32.xlu1 %v5940_v10, %s7295_s21  ;;  %v6167_v43 = vmul.f32 %v8865_v42, %v9003_v19 }
 0x62e   : > { %5886 = vrot.lane.b32.xlu0 %v5842_v61, %s7294_s15 }
 0x62f   : > { %5793 = vst.msk [vmem:[#allocation2] sm:$0x3] %vm622_vm1, %v5792_v0  ;;  %v5837_v0 = vmul.f32 %v8846_v34, %v9027_v33 }
 0x635   : > { %6412 = vrot.lane.b32.xlu2 %v6368_v55, %s7294_s15  ;;  %6115 = vrot.lane.b32.xlu1 %v6072_v22, %s7294_s15  ;;  %v6166_v22 = vmul.f32 %v8865_v42, %v9027_v33 }
 0x636   : > { %6215 = vrot.lane.b32.xlu0 %v6171_v23, %s7295_s21  ;;  %v6068_v23 = vmul.f32 %v8842_v1, %v9027_v33 }
 0x63d   : > { %6410 = vrot.lane.b32.xlu1 %v6367_v3, %s7294_s15  ;;  %5884 = vrot.lane.b32.xlu2 %v5841_v25, %s7294_s15  ;;  %v6352_v3 = vmul.f32 %v8994_v24, %v8863_v6 }
 0x63e   : > { %6510 = vrot.lane.b32.xlu0 %v6466_v27, %s7295_s21 }
 0x645   : > { %6213 = vrot.lane.b32.xlu2 %v6170_v39, %s7295_s21  ;;  %5882 = vrot.lane.b32.xlu1 %v5840_v18, %s7294_s15 }
 0x646   : > { %5982 = vrot.lane.b32.xlu0 %v5939_v60, %s7295_s21 }
 0x64d   : > { %6508 = vrot.lane.b32.xlu2 %v6465_v8, %s7295_s21  ;;  %6211 = vrot.lane.b32.xlu1 %v6169_v20, %s7295_s21  ;;  %v5935_v20 = vmul.f32 %v8844_v58, %v9027_v33 }
 0x64e   : > { %6113 = vrot.lane.b32.xlu0 %v6071_v50, %s7294_s15  ;;  %v6461_v50 = vmul.f32 %v8880_v16, %v9027_v33 }
 0x655   : > { %5980 = vrot.lane.b32.xlu2 %v5938_v51, %s7295_s21  ;;  %6506 = vrot.lane.b32.xlu1 %v6464_v52, %s7295_s21  ;;  %v6363_v51 = vmul.f32 %v8861_v21, %v9027_v33  ;;  %v5826_v52 = vmul.f32 %v9018_v54, %v8863_v6 }
 0x656   : > { %6408 = vrot.lane.b32.xlu0 %v6366_v11, %s7294_s15  ;;  %v5825_v11 = vmul.f32 %v9018_v54, %v8895_v45 }
 0x657   : > { %v6124_v30 = vpop.permute.xlu2 %6123 }
 0x658   : > { %v6156_v14 = vadd.f32 %v6124_v30, %v6058_v13 }
 0x65d   : > { %6111 = vrot.lane.b32.xlu2 %v6070_v2, %s7294_s15  ;;  %5978 = vrot.lane.b32.xlu1 %v5937_v57, %s7295_s21 }
 0x65e   : > { %5880 = vrot.lane.b32.xlu0 %v5839_v31, %s7294_s15 }
 0x65f   : > { %v6419_v53 = vpop.permute.xlu2 %6418 }
 0x660   : > { %v6451_v38 = vadd.f32 %v6419_v53, %v6353_v32  ;;  %v9077_v53 = vld [vmem:[#allocation2 + $0xc] sm:$0x3] }
 0x661   : > { %v6067_v6 = vmul.f32 %v8842_v1, %v9077_v53 }
 0x665   : > { %6406 = vrot.lane.b32.xlu2 %v6365_v49, %s7294_s15  ;;  %6109 = vrot.lane.b32.xlu1 %v6069_v41, %s7294_s15  ;;  %v5934_v41 = vmul.f32 %v8844_v58, %v9077_v53 }
 0x666   : > { %6209 = vrot.lane.b32.xlu0 %v6168_v48, %s7295_s21  ;;  %v5836_v48 = vmul.f32 %v8846_v34, %v9077_v53 }
 0x667   : > { %v5891_v44 = vpop.permute.xlu2 %5890 }
 0x668   : > { %v5924_v30 = vadd.f32 %v5891_v44, %v5826_v52  ;;  %v6056_v44 = vmul.f32 %v9029_v62, %v8895_v45 }
 0x66d   : > { %5878 = vrot.lane.b32.xlu2 %v5838_v29, %s7294_s15  ;;  %6404 = vrot.lane.b32.xlu1 %v6364_v5, %s7294_s15 }
 0x66e   : > { %6504 = vrot.lane.b32.xlu0 %v6463_v59, %s7295_s21 }
 0x66f   : > { %v5991_v28 = vpop.permute.xlu1 %5990  ;;  %v6220_v26 = vpop.permute.xlu2 %6219 }
 0x670   : > { %v5893_v35 = vpop.permute.xlu0 %5892 }
 0x671   : > { %v5925_v15 = vadd.f32 %v5893_v35, %v5827_v37  ;;  %v6362_v35 = vmul.f32 %v8861_v21, %v9077_v53 }
 0x673   : > { %v6023_v36 = vadd.f32 %v5991_v28, %v5925_v15  ;;  %v9092_v28 = vld [vmem:[#allocation2 + $0xa] sm:$0x3] }
 0x674   : > { %v6066_v15 = vmul.f32 %v8842_v1, %v9092_v28 }
 0x675   : > { %6207 = vrot.lane.b32.xlu2 %v6167_v43, %s7295_s21  ;;  %5876 = vrot.lane.b32.xlu1 %v5837_v0, %s7294_s15  ;;  %6040 = vst.msk [vmem:[#allocation2 + $0x1e] sm:$0x3] %vm6024_vm15, %v6023_v36  ;;  %v6165_v36 = vmul.f32 %v8865_v42, %v9077_v53  ;;  %v6351_v43 = vmul.f32 %v8994_v24, %v8895_v45 }
 0x676   : > { %5976 = vrot.lane.b32.xlu0 %v5936_v63, %s7295_s21 }
 0x677   : > { %v6122_v40 = vpop.permute.xlu1 %6121  ;;  %v6515_v47 = vpop.permute.xlu2 %6514 }
 0x678   : > { %v6222_v46 = vpop.permute.xlu0 %6221  ;;  %v6155_v10 = vadd.f32 %v6122_v40, %v6057_v9  ;;  %v5835_v40 = vmul.f32 %v8846_v34, %v9092_v28 }
 0x679   : > { %v9045_v61 = vadd.f32 %v6222_v46, %v6156_v14  ;;  %v6460_v46 = vmul.f32 %v8880_v16, %v9077_v53 }
 0x67a   : > { %v9047_v55 = vadd.f32 %v6220_v26, %v6155_v10  ;;  %v5824_v10 = vmul.f32 %v9018_v54, %v8928_v17 }
 0x67d   : > { %6502 = vrot.lane.b32.xlu2 %v6462_v7, %s7295_s21  ;;  %6205 = vrot.lane.b32.xlu1 %v6166_v22, %s7295_s21 }
 0x67e   : > { %6107 = vrot.lane.b32.xlu0 %v6068_v23, %s7294_s15  ;;  %v9120_v23 = vld [vmem:[#allocation2 + $0x8] sm:$0x3] }
 0x67f   : > { %v6417_v25 = vpop.permute.xlu1 %6416  ;;  %v5987_v27 = vpop.permute.xlu2 %5986 }
 0x680   : > { %v6517_v39 = vpop.permute.xlu0 %6516  ;;  %v6450_v18 = vadd.f32 %v6417_v25, %v6352_v3 }
 0x681   : > { %v9060_v60 = vadd.f32 %v6517_v39, %v6451_v38  ;;  %v5834_v39 = vmul.f32 %v8846_v34, %v9120_v23 }
 0x682   : > { %v9062_v8 = vadd.f32 %v6515_v47, %v6450_v18  ;;  %v6361_v47 = vmul.f32 %v8861_v21, %v9092_v28  ;;  %v5933_v18 = vmul.f32 %v8844_v58, %v9092_v28 }
 0x685   : > { %5974 = vrot.lane.b32.xlu2 %v5935_v20, %s7295_s21  ;;  %6500 = vrot.lane.b32.xlu1 %v6461_v50, %s7295_s21  ;;  %v6055_v20 = vmul.f32 %v9029_v62, %v8928_v17  ;;  %v6054_v50 = vmul.f32 %v9029_v62, %v8939_v12 }
 0x686   : > { %6402 = vrot.lane.b32.xlu0 %v6363_v51, %s7294_s15 }
 0x687   : > { %v5889_v2 = vpop.permute.xlu1 %5888  ;;  %v6118_v57 = vpop.permute.xlu2 %6117 }
 0x688   : > { %v5989_v31 = vpop.permute.xlu0 %5988  ;;  %v5923_v32 = vadd.f32 %v5889_v2, %v5825_v11  ;;  %v6153_v51 = vadd.f32 %v6118_v57, %v6055_v20  ;;  %v6350_v57 = vmul.f32 %v8994_v24, %v8928_v17  ;;  %v5932_v17 = vmul.f32 %v8844_v58, %v9120_v23 }
 0x689   : > { %v6022_v38 = vadd.f32 %v5989_v31, %v5924_v30 }
 0x68a   : > { %v6021_v49 = vadd.f32 %v5987_v27, %v5923_v32  ;;  %v6164_v27 = vmul.f32 %v8865_v42, %v9092_v28 }
 0x68b   : > { %6039 = vst.msk [vmem:[#allocation2 + $0x1c] sm:$0x3] %vm6024_vm15, %v6022_v38  ;;  %v6459_v38 = vmul.f32 %v8880_v16, %v9092_v28 }
 0x68c   : > { %6038 = vst.msk [vmem:[#allocation2 + $0x1a] sm:$0x3] %vm6024_vm15, %v6021_v49  ;;  %v6163_v49 = vmul.f32 %v8865_v42, %v9120_v23 }
 0x68d   : > { %6105 = vrot.lane.b32.xlu2 %v6067_v6, %s7294_s15  ;;  %5972 = vrot.lane.b32.xlu1 %v5934_v41, %s7295_s21  ;;  %v6065_v6 = vmul.f32 %v8842_v1, %v9120_v23  ;;  %v6349_v41 = vmul.f32 %v8994_v24, %v8939_v12 }
 0x68e   : > { %5874 = vrot.lane.b32.xlu0 %v5836_v48, %s7294_s15 }
 0x68f   : > { %v6218_v29 = vpop.permute.xlu1 %6217  ;;  %v6413_v5 = vpop.permute.xlu2 %6412 }
 0x690   : > { %v6120_v59 = vpop.permute.xlu0 %6119  ;;  %v6448_v48 = vadd.f32 %v6413_v5, %v6350_v57  ;;  %v5823_v5 = vmul.f32 %v9018_v54, %v8939_v12 }
 0x691   : > { %v6154_v37 = vadd.f32 %v6120_v59, %v6056_v44 }
 0x693   : > { %v9094_v26 = vadd.f32 %v6218_v29, %v6154_v37 }
 0x695   : > { %6400 = vrot.lane.b32.xlu2 %v6362_v35, %s7294_s15  ;;  %6103 = vrot.lane.b32.xlu1 %v6066_v15, %s7294_s15 }
 0x696   : > { %6203 = vrot.lane.b32.xlu0 %v6165_v36, %s7295_s21  ;;  %v6458_v36 = vmul.f32 %v8880_v16, %v9120_v23 }
 0x697   : > { %v6513_v0 = vpop.permute.xlu1 %6512  ;;  %v5885_v63 = vpop.permute.xlu2 %5884 }
 0x698   : > { %v6415_v13 = vpop.permute.xlu0 %6414 }
 0x699   : > { %v6449_v9 = vadd.f32 %v6415_v13, %v6351_v43  ;;  %v6360_v43 = vmul.f32 %v8861_v21, %v9120_v23  ;;  %v5921_v13 = vadd.f32 %v5885_v63, %v5823_v5 }
 0x69b   : > { %v9107_v14 = vadd.f32 %v6513_v0, %v6449_v9  ;;  %v5822_v0 = vmul.f32 %v9018_v54, %v8959_v56 }
 0x69d   : > { %5872 = vrot.lane.b32.xlu2 %v5835_v40, %s7294_s15  ;;  %6398 = vrot.lane.b32.xlu1 %v6361_v47, %s7294_s15 }
 0x69e   : > { %6498 = vrot.lane.b32.xlu0 %v6460_v46, %s7295_s21 }
 0x69f   : > { %v5985_v45 = vpop.permute.xlu1 %5984  ;;  %v6214_v7 = vpop.permute.xlu2 %6213 }
 0x6a0   : > { %v5887_v22 = vpop.permute.xlu0 %5886 }
 0x6a1   : > { %v5922_v3 = vadd.f32 %v5887_v22, %v5824_v10 }
 0x6a3   : > { %v6020_v25 = vadd.f32 %v5985_v45, %v5922_v3  ;;  %v9172_v45 = vld [vmem:[#allocation2 + $0x6] sm:$0x3]  ;;  %v6053_v3 = vmul.f32 %v9029_v62, %v8959_v56 }
 0x6a4   : > { %v6064_v12 = vmul.f32 %v8842_v1, %v9172_v45  ;;  %v5931_v22 = vmul.f32 %v8844_v58, %v9172_v45  ;;  %v5833_v63 = vmul.f32 %v8846_v34, %v9172_v45 }
 0x6a5   : > { %6201 = vrot.lane.b32.xlu2 %v6164_v27, %s7295_s21  ;;  %5870 = vrot.lane.b32.xlu1 %v5834_v39, %s7294_s15  ;;  %6037 = vst.msk [vmem:[#allocation2 + $0x18] sm:$0x3] %vm6024_vm15, %v6020_v25 }
 0x6a6   : > { %5970 = vrot.lane.b32.xlu0 %v5933_v18, %s7295_s21  ;;  %v9189_v18 = vld [vmem:[#allocation2 + $0x4] sm:$0x3] }
 0x6a7   : > { %v6116_v52 = vpop.permute.xlu1 %6115  ;;  %v6509_v11 = vpop.permute.xlu2 %6508  ;;  %v6161_v5 = vmul.f32 %v8865_v42, %v9189_v18 }
 0x6a8   : > { %v6216_v30 = vpop.permute.xlu0 %6215  ;;  %v6152_v2 = vadd.f32 %v6116_v52, %v6054_v50  ;;  %v6063_v52 = vmul.f32 %v8842_v1, %v9189_v18 }
 0x6a9   : > { %v9136_v31 = vadd.f32 %v6216_v30, %v6153_v51  ;;  %v6359_v51 = vmul.f32 %v8861_v21, %v9172_v45  ;;  %v6348_v30 = vmul.f32 %v8994_v24, %v8959_v56 }
 0x6aa   : > { %v9138_v32 = vadd.f32 %v6214_v7, %v6152_v2 }
 0x6ad   : > { %6496 = vrot.lane.b32.xlu2 %v6459_v38, %s7295_s21  ;;  %6199 = vrot.lane.b32.xlu1 %v6163_v49, %s7295_s21 }
 0x6ae   : > { %6101 = vrot.lane.b32.xlu0 %v6065_v6, %s7294_s15 }
 0x6af   : > { %v6411_v44 = vpop.permute.xlu1 %6410  ;;  %v5981_v29 = vpop.permute.xlu2 %5980 }
 0x6b0   : > { %v6511_v59 = vpop.permute.xlu0 %6510  ;;  %v6447_v37 = vadd.f32 %v6411_v44, %v6349_v41  ;;  %v5832_v41 = vmul.f32 %v8846_v34, %v9189_v18  ;;  %v6457_v44 = vmul.f32 %v8880_v16, %v9172_v45 }
 0x6b1   : > { %v9153_v35 = vadd.f32 %v6511_v59, %v6448_v48  ;;  %v6358_v48 = vmul.f32 %v8861_v21, %v9189_v18  ;;  %v5821_v59 = vmul.f32 %v9018_v54, %v8988_v4 }
 0x6b2   : > { %v9155_v15 = vadd.f32 %v6509_v11, %v6447_v37  ;;  %v6162_v11 = vmul.f32 %v8865_v42, %v9172_v45 }
 0x6b5   : > { %5968 = vrot.lane.b32.xlu2 %v5932_v17, %s7295_s21  ;;  %6494 = vrot.lane.b32.xlu1 %v6458_v36, %s7295_s21  ;;  %v9217_v17 = vld [vmem:[#allocation2 + $0x2] sm:$0x3] }
 0x6b6   : > { %6396 = vrot.lane.b32.xlu0 %v6360_v43, %s7294_s15 }
 0x6b7   : > { %v5883_v9 = vpop.permute.xlu1 %5882  ;;  %v9170_v40 = vpop.permute.xlu2 %6111 }
 0x6b8   : > { %v5983_v47 = vpop.permute.xlu0 %5982  ;;  %v5920_v46 = vadd.f32 %v5883_v9, %v5822_v0  ;;  %v5831_v0 = vmul.f32 %v8846_v34, %v9217_v17  ;;  %v6051_v9 = vmul.f32 %v9029_v62, %v9003_v19 }
 0x6b9   : > { %v6019_v10 = vadd.f32 %v5983_v47, %v5921_v13  ;;  %v5930_v13 = vmul.f32 %v8844_v58, %v9189_v18 }
 0x6ba   : > { %v6018_v7 = vadd.f32 %v5981_v29, %v5920_v46 }
 0x6bb   : > { %6036 = vst.msk [vmem:[#allocation2 + $0x16] sm:$0x3] %vm6024_vm15, %v6019_v10 }
 0x6bc   : > { %6035 = vst.msk [vmem:[#allocation2 + $0x14] sm:$0x3] %vm6024_vm15, %v6018_v7 }
 0x6bd   : > { %6099 = vrot.lane.b32.xlu2 %v6064_v12, %s7294_s15  ;;  %5966 = vrot.lane.b32.xlu1 %v5931_v22, %s7295_s21  ;;  %v6456_v22 = vmul.f32 %v8880_v16, %v9189_v18 }
 0x6be   : > { %5868 = vrot.lane.b32.xlu0 %v5833_v63, %s7294_s15  ;;  %v6160_v63 = vmul.f32 %v8865_v42, %v9217_v17 }
 0x6bf   : > { %v6212_v25 = vpop.permute.xlu1 %6211  ;;  %v9187_v27 = vpop.permute.xlu2 %6406 }
 0x6c0   : > { %v6114_v39 = vpop.permute.xlu0 %6113 }
 0x6c1   : > { %v6151_v20 = vadd.f32 %v6114_v39, %v6053_v3  ;;  %v6062_v3 = vmul.f32 %v8842_v1, %v9217_v17 }
 0x6c3   : > { %v9191_v50 = vadd.f32 %v6212_v25, %v6151_v20  ;;  %v6346_v25 = vmul.f32 %v8994_v24, %v9003_v19 }
 0x6c5   : > { %6394 = vrot.lane.b32.xlu2 %v6359_v51, %s7294_s15  ;;  %6097 = vrot.lane.b32.xlu1 %v6063_v52, %s7294_s15 }
 0x6c6   : > { %6197 = vrot.lane.b32.xlu0 %v6162_v11, %s7295_s21 }
 0x6c7   : > { %v6507_v2 = vpop.permute.xlu1 %6506  ;;  %v5879_v38 = vpop.permute.xlu2 %5878 }
 0x6c8   : > { %v6409_v49 = vpop.permute.xlu0 %6408 }
 0x6c9   : > { %v6446_v6 = vadd.f32 %v6409_v49, %v6348_v30  ;;  %v5929_v30 = vmul.f32 %v8844_v58, %v9217_v17  ;;  %v6357_v49 = vmul.f32 %v8861_v21, %v9217_v17 }
 0x6cb   : > { %v9204_v57 = vadd.f32 %v6507_v2, %v6446_v6  ;;  %v6455_v2 = vmul.f32 %v8880_v16, %v9217_v17  ;;  %v5820_v6 = vmul.f32 %v9018_v54, %v9003_v19 }
 0x6cd   : > { %5866 = vrot.lane.b32.xlu2 %v5832_v41, %s7294_s15  ;;  %6392 = vrot.lane.b32.xlu1 %v6358_v48, %s7294_s15  ;;  %v5819_v41 = vmul.f32 %v9018_v54, %v9027_v33  ;;  %v5918_v48 = vadd.f32 %v5879_v38, %v5820_v6  ;;  %v6345_v6 = vmul.f32 %v8994_v24, %v9027_v33 }
 0x6ce   : > { %6492 = vrot.lane.b32.xlu0 %v6457_v44, %s7295_s21 }
 0x6cf   : > { %v6208_v56 = vpop.permute.xlu2 %6207  ;;  %v5979_v29 = vpop.permute.xlu1 %5978 }
 0x6d0   : > { %v5881_v37 = vpop.permute.xlu0 %5880 }
 0x6d1   : > { %v5919_v36 = vadd.f32 %v5881_v37, %v5821_v59  ;;  %v9265_v37 = vld [vmem:[#allocation2] sm:$0x3] }
 0x6d2   : > { %v6061_v19 = vmul.f32 %v8842_v1, %v9265_v37  ;;  %v5830_v38 = vmul.f32 %v8846_v34, %v9265_v37 }
 0x6d3   : > { %v6017_v43 = vadd.f32 %v5979_v29, %v5919_v36 }
 0x6d5   : > { %6195 = vrot.lane.b32.xlu2 %v6161_v5, %s7295_s21  ;;  %5864 = vrot.lane.b32.xlu1 %v5831_v0, %s7294_s15  ;;  %6034 = vst.msk [vmem:[#allocation2 + $0x12] sm:$0x3] %vm6024_vm15, %v6017_v43  ;;  %v5928_v5 = vmul.f32 %v8844_v58, %v9265_v37  ;;  %v6356_v58 = vmul.f32 %v8861_v21, %v9265_v37 }
 0x6d6   : > { %5964 = vrot.lane.b32.xlu0 %v5930_v13, %s7295_s21 }
 0x6d7   : > { %v6503_v47 = vpop.permute.xlu2 %6502  ;;  %v6110_v46 = vpop.permute.xlu1 %6109 }
 0x6d8   : > { %v6149_v10 = vadd.f32 %v6110_v46, %v6051_v9  ;;  %v9231_v7 = vpop.permute.xlu0 %6209  ;;  %v6159_v9 = vmul.f32 %v8865_v42, %v9265_v37 }
 0x6da   : > { %v9233_v12 = vadd.f32 %v6208_v56, %v6149_v10  ;;  %v6454_v10 = vmul.f32 %v8880_v16, %v9265_v37  ;;  %v6052_v16 = vmul.f32 %v9029_v62, %v8988_v4 }
 0x6dd   : > { %6490 = vrot.lane.b32.xlu2 %v6456_v22, %s7295_s21  ;;  %6193 = vrot.lane.b32.xlu1 %v6160_v63, %s7295_s21 }
 0x6de   : > { %6095 = vrot.lane.b32.xlu0 %v6062_v3, %s7294_s15 }
 0x6df   : > { %v5975_v39 = vpop.permute.xlu2 %5974  ;;  %v6405_v20 = vpop.permute.xlu1 %6404 }
 0x6e0   : > { %v6444_v51 = vadd.f32 %v6405_v20, %v6346_v25  ;;  %v9246_v52 = vpop.permute.xlu0 %6504 }
 0x6e2   : > { %v9248_v11 = vadd.f32 %v6503_v47, %v6444_v51 }
 0x6e5   : > { %5962 = vrot.lane.b32.xlu2 %v5929_v30, %s7295_s21  ;;  %6488 = vrot.lane.b32.xlu1 %v6455_v2, %s7295_s21 }
 0x6e6   : > { %6390 = vrot.lane.b32.xlu0 %v6357_v49, %s7294_s15 }
 0x6e7   : > { %v9263_v44 = vpop.permute.xlu2 %6105  ;;  %v5877_v56 = vpop.permute.xlu1 %5876 }
 0x6e8   : > { %v5917_v29 = vadd.f32 %v5877_v56, %v5819_v41  ;;  %v5977_v59 = vpop.permute.xlu0 %5976 }
 0x6e9   : > { %v6016_v36 = vadd.f32 %v5977_v59, %v5918_v48 }
 0x6ea   : > { %v6015_v43 = vadd.f32 %v5975_v39, %v5917_v29  ;;  %v6150_v39 = vadd.f32 %v9170_v40, %v6052_v16  ;;  %v5815_v16 = vmul.f32 %v9018_v54, %v9172_v45 }
 0x6eb   : > { %6033 = vst.msk [vmem:[#allocation2 + $0x10] sm:$0x3] %vm6024_vm15, %v6016_v36 }
 0x6ec   : > { %6032 = vst.msk [vmem:[#allocation2 + $0xe] sm:$0x3] %vm6024_vm15, %v6015_v43  ;;  %v6248_v20 = vadd.f32 %v9231_v7, %v6150_v39 }
 0x6ed   : > { %6093 = vrot.lane.b32.xlu2 %v6061_v19, %s7294_s15  ;;  %5960 = vrot.lane.b32.xlu1 %v5928_v5, %s7295_s21 }
 0x6ee   : > { %5862 = vrot.lane.b32.xlu0 %v5830_v38, %s7294_s15  ;;  %v6047_v38 = vmul.f32 %v9029_v62, %v9120_v23 }
 0x6ef   : > { %v9278_v0 = vpop.permute.xlu2 %6400  ;;  %v6206_v13 = vpop.permute.xlu1 %6205 }
 0x6f0   : > { %v6108_v1 = vpop.permute.xlu0 %6107 }
 0x6f5   : > { %6388 = vrot.lane.b32.xlu2 %v6356_v58, %s7294_s15  ;;  %6301 = vrot.lane.b32.xlu1 %v9045_v61, %s7297_s18  ;;  %v5818_v61 = vmul.f32 %v9018_v54, %v9077_v53 }
 0x6f6   : > { %6191 = vrot.lane.b32.xlu0 %v6159_v9, %s7295_s21 }
 0x6f7   : > { %v5873_v34 = vpop.permute.xlu2 %5872  ;;  %v6501_v47 = vpop.permute.xlu1 %6500 }
 0x6f8   : > { %v6403_v46 = vpop.permute.xlu0 %6402 }
 0x6fd   : > { %6297 = vrot.lane.b32.xlu2 %v9094_v26, %s7297_s18  ;;  %6295 = vrot.lane.b32.xlu1 %v9136_v31, %s7297_s18 }
 0x6fe   : > { %6486 = vrot.lane.b32.xlu0 %v6454_v10, %s7295_s21 }
 0x6ff   : > { %v9295_v21 = vpop.permute.xlu2 %6201  ;;  %v5973_v42 = vpop.permute.xlu1 %5972 }
 0x700   : > { %v5875_v22 = vpop.permute.xlu0 %5874 }
 0x701   : > { %v5916_v63 = vadd.f32 %v5875_v22, %v5818_v61 }
 0x703   : > { %v6014_v3 = vadd.f32 %v5973_v42, %v5916_v63  ;;  %v6343_v63 = vmul.f32 %v8994_v24, %v9092_v28 }
 0x705   : > { %6291 = vrot.lane.b32.xlu2 %v9191_v50, %s7297_s18  ;;  %6590 = vrot.lane.b32.xlu1 %v9153_v35, %s7298_s29  ;;  %6031 = vst.msk [vmem:[#allocation2 + $0xc] sm:$0x3] %vm6024_vm15, %v6014_v3  ;;  %v6050_v50 = vmul.f32 %v9029_v62, %v9027_v33 }
 0x706   : > { %6299 = vrot.lane.b32.xlu0 %v9047_v55, %s7297_s18  ;;  %v6347_v55 = vmul.f32 %v8994_v24, %v8988_v4  ;;  %v5816_v4 = vmul.f32 %v9018_v54, %v9120_v23 }
 0x707   : > { %v9308_v26 = vpop.permute.xlu2 %6496  ;;  %v6104_v31 = vpop.permute.xlu1 %6103  ;;  %v6148_v35 = vadd.f32 %v6108_v1, %v6050_v50 }
 0x708   : > { %v6204_v25 = vpop.permute.xlu0 %6203  ;;  %v6445_v7 = vadd.f32 %v9187_v27, %v6347_v55 }
 0x709   : > { %v6246_v49 = vadd.f32 %v6206_v13, %v6148_v35 }
 0x70a   : > { %v6543_v2 = vadd.f32 %v9246_v52, %v6445_v7  ;;  %v6443_v52 = vadd.f32 %v6403_v46, %v6345_v6  ;;  %v6342_v46 = vmul.f32 %v8994_v24, %v9120_v23 }
 0x70c   : > { %v6541_v43 = vadd.f32 %v6501_v47, %v6443_v52 }
 0x70d   : > { %6586 = vrot.lane.b32.xlu2 %v9204_v57, %s7298_s29  ;;  %6289 = vrot.lane.b32.xlu1 %v6248_v20, %s7297_s18  ;;  %v5817_v57 = vmul.f32 %v9018_v54, %v9092_v28 }
 0x70e   : > { %6293 = vrot.lane.b32.xlu0 %v9138_v32, %s7297_s18  ;;  %v6049_v32 = vmul.f32 %v9029_v62, %v9077_v53 }
 0x70f   : > { %v5969_v51 = vpop.permute.xlu2 %5968  ;;  %v6399_v30 = vpop.permute.xlu1 %6398  ;;  %v5915_v27 = vadd.f32 %v5873_v34, %v5817_v57 }
 0x710   : > { %v6499_v40 = vpop.permute.xlu0 %6498  ;;  %v6147_v33 = vadd.f32 %v9263_v44, %v6049_v32 }
 0x712   : > { %v6245_v19 = vadd.f32 %v6204_v25, %v6147_v33  ;;  %v6441_v25 = vadd.f32 %v6399_v30, %v6343_v63 }
 0x714   : > { %v6539_v20 = vadd.f32 %v9308_v26, %v6441_v25  ;;  %v6341_v26 = vmul.f32 %v8994_v24, %v9172_v45 }
 0x715   : > { %6584 = vrot.lane.b32.xlu1 %v6543_v2, %s7298_s29  ;;  %6285 = vrot.lane.b32.xlu2 %v6246_v49, %s7297_s18  ;;  %v6340_v2 = vmul.f32 %v8994_v24, %v9189_v18 }
 0x716   : > { %6588 = vrot.lane.b32.xlu0 %v9155_v15, %s7298_s29  ;;  %v6344_v15 = vmul.f32 %v8994_v24, %v9077_v53 }
 0x717   : > { %v6100_v41 = vpop.permute.xlu2 %6099  ;;  %v5871_v48 = vpop.permute.xlu1 %5870 }
 0x718   : > { %v5914_v56 = vadd.f32 %v5871_v48, %v5816_v4  ;;  %v5971_v29 = vpop.permute.xlu0 %5970  ;;  %v6442_v1 = vadd.f32 %v9278_v0, %v6344_v15  ;;  %v6044_v15 = vmul.f32 %v9029_v62, %v9217_v17 }
 0x719   : > { %v6013_v59 = vadd.f32 %v5971_v29, %v5915_v27 }
 0x71a   : > { %v6012_v36 = vadd.f32 %v5969_v51, %v5914_v56  ;;  %v6540_v9 = vadd.f32 %v6499_v40, %v6442_v1 }
 0x71b   : > { %6030 = vst.msk [vmem:[#allocation2 + $0xa] sm:$0x3] %vm6024_vm15, %v6013_v59 }
 0x71c   : > { %6029 = vst.msk [vmem:[#allocation2 + $0x8] sm:$0x3] %vm6024_vm15, %v6012_v36 }
 0x71d   : > { %6580 = vrot.lane.b32.xlu2 %v6541_v43, %s7298_s29  ;;  %6283 = vrot.lane.b32.xlu1 %v6245_v19, %s7297_s18 }
 0x71e   : > { %6287 = vrot.lane.b32.xlu0 %v9233_v12, %s7297_s18  ;;  %v6048_v12 = vmul.f32 %v9029_v62, %v9092_v28  ;;  %v6045_v28 = vmul.f32 %v9029_v62, %v9189_v18 }
 0x71f   : > { %v6395_v5 = vpop.permute.xlu2 %6394  ;;  %v6200_v44 = vpop.permute.xlu1 %6199 }
 0x720   : > { %v6102_v13 = vpop.permute.xlu0 %6101  ;;  %v6146_v10 = vadd.f32 %v6104_v31, %v6048_v12  ;;  %v6439_v49 = vadd.f32 %v6395_v5, %v6341_v26 }
 0x721   : > { %v6145_v58 = vadd.f32 %v6102_v13, %v6047_v38 }
 0x722   : > { %v6244_v22 = vadd.f32 %v9295_v21, %v6146_v10  ;;  %v6046_v21 = vmul.f32 %v9029_v62, %v9172_v45  ;;  %v5813_v45 = vmul.f32 %v9018_v54, %v9217_v17 }
 0x723   : > { %v6243_v34 = vadd.f32 %v6200_v44, %v6145_v58  ;;  %v6339_v58 = vmul.f32 %v8994_v24, %v9217_v17  ;;  %v6043_v17 = vmul.f32 %v9029_v62, %v9265_v37  ;;  %v6338_v62 = vmul.f32 %v8994_v24, %v9265_v37 }
 0x724   : > { %v6144_v50 = vadd.f32 %v6100_v41, %v6046_v21  ;;  %v5814_v41 = vmul.f32 %v9018_v54, %v9189_v18 }
 0x725   : > { %6578 = vrot.lane.b32.xlu1 %v6540_v9, %s7298_s29  ;;  %6279 = vrot.lane.b32.xlu2 %v6243_v34, %s7297_s18 }
 0x726   : > { %6582 = vrot.lane.b32.xlu0 %v9248_v11, %s7298_s29 }
 0x727   : > { %v5867_v53 = vpop.permute.xlu2 %5866  ;;  %v6495_v47 = vpop.permute.xlu1 %6494 }
 0x728   : > { %v6397_v0 = vpop.permute.xlu0 %6396  ;;  %v5912_v48 = vadd.f32 %v5867_v53, %v5814_v41 }
 0x729   : > { %v6440_v42 = vadd.f32 %v6397_v0, %v6342_v46 }
 0x72b   : > { %v6538_v61 = vadd.f32 %v6495_v47, %v6440_v42  ;;  %v5812_v47 = vmul.f32 %v9018_v54, %v9265_v37 }
 0x72d   : > { %6574 = vrot.lane.b32.xlu2 %v6538_v61, %s7298_s29 }
 0x72e   : > { %6281 = vrot.lane.b32.xlu0 %v6244_v22, %s7297_s18 }
 0x72f   : > { %v6196_v3 = vpop.permute.xlu2 %6195  ;;  %v5967_v11 = vpop.permute.xlu1 %5966 }
 0x730   : > { %v5869_v23 = vpop.permute.xlu0 %5868 }
 0x731   : > { %v5913_v31 = vadd.f32 %v5869_v23, %v5815_v16 }
 0x733   : > { %v6011_v39 = vadd.f32 %v5967_v11, %v5913_v31 }
 0x735   : > { %6028 = vst.msk [vmem:[#allocation2 + $0x6] sm:$0x3] %vm6024_vm15, %v6011_v39 }
 0x736   : > { %6576 = vrot.lane.b32.xlu0 %v6539_v20, %s7298_s29 }
 0x737   : > { %v6491_v55 = vpop.permute.xlu2 %6490  ;;  %v6098_v35 = vpop.permute.xlu1 %6097 }
 0x738   : > { %v6143_v51 = vadd.f32 %v6098_v35, %v6045_v28  ;;  %v6198_v30 = vpop.permute.xlu0 %6197 }
 0x739   : > { %v6242_v40 = vadd.f32 %v6198_v30, %v6144_v50 }
 0x73a   : > { %v6241_v7 = vadd.f32 %v6196_v3, %v6143_v51 }
 0x73b   : > { %6277 = vrot.lane.b32.xlu1 %v6242_v40, %s7297_s18 }
 0x73e   : > { %6275 = vrot.lane.b32.xlu0 %v6241_v7, %s7297_s18 }
 0x73f   : > { %v5963_v57 = vpop.permute.xlu2 %5962  ;;  %v6393_v6 = vpop.permute.xlu1 %6392 }
 0x740   : > { %v6438_v4 = vadd.f32 %v6393_v6, %v6340_v2  ;;  %v6493_v32 = vpop.permute.xlu0 %6492 }
 0x741   : > { %v6537_v27 = vadd.f32 %v6493_v32, %v6439_v49 }
 0x742   : > { %v6536_v52 = vadd.f32 %v6491_v55, %v6438_v4 }
 0x743   : > { %6572 = vrot.lane.b32.xlu1 %v6537_v27, %s7298_s29 }
 0x746   : > { %6570 = vrot.lane.b32.xlu0 %v6536_v52, %s7298_s29 }
 0x747   : > { %v6094_v56 = vpop.permute.xlu2 %6093  ;;  %v5865_v29 = vpop.permute.xlu1 %5864 }
 0x748   : > { %v5911_v33 = vadd.f32 %v5865_v29, %v5813_v45  ;;  %v5965_v59 = vpop.permute.xlu0 %5964  ;;  %v6141_v42 = vadd.f32 %v6094_v56, %v6043_v17 }
 0x749   : > { %v6010_v36 = vadd.f32 %v5965_v59, %v5912_v48 }
 0x74a   : > { %v6009_v43 = vadd.f32 %v5963_v57, %v5911_v33 }
 0x74b   : > { %6027 = vst.msk [vmem:[#allocation2 + $0x4] sm:$0x3] %vm6024_vm15, %v6010_v36 }
 0x74c   : > { %6026 = vst.msk [vmem:[#allocation2 + $0x2] sm:$0x3] %vm6024_vm15, %v6009_v43 }
 0x74e   : > { %6594 = vrot.lane.b32.xlu0 %v9062_v8, %s7298_s29 }
 0x74f   : > { %v6389_v18 = vpop.permute.xlu2 %6388  ;;  %v6194_v19 = vpop.permute.xlu1 %6193 }
 0x750   : > { %v6096_v5 = vpop.permute.xlu0 %6095  ;;  %v6436_v3 = vadd.f32 %v6389_v18, %v6338_v62 }
 0x751   : > { %v6142_v44 = vadd.f32 %v6096_v5, %v6044_v15 }
 0x753   : > { %v6240_v38 = vadd.f32 %v6194_v19, %v6142_v44 }
 0x755   : > { %6273 = vrot.lane.b32.xlu2 %v6240_v38, %s7297_s18 }
 0x757   : > { %v6298_v13 = vpop.permute.xlu2 %6297  ;;  %v6489_v1 = vpop.permute.xlu1 %6488 }
 0x758   : > { %6333 = vst.msk [vmem:[#allocation2 + $0x1a] sm:$0x3] %vm6319_vm0, %v6298_v13  ;;  %v6391_v9 = vpop.permute.xlu0 %6390 }
 0x759   : > { %v6437_v8 = vadd.f32 %v6391_v9, %v6339_v58 }
 0x75b   : > { %v6535_v34 = vadd.f32 %v6489_v1, %v6437_v8 }
 0x75d   : > { %6568 = vrot.lane.b32.xlu2 %v6535_v34, %s7298_s29 }
 0x75f   : > { %v6292_v12 = vpop.permute.xlu2 %6291  ;;  %v5961_v53 = vpop.permute.xlu1 %5960 }
 0x760   : > { %6330 = vst.msk [vmem:[#allocation2 + $0x14] sm:$0x3] %vm6319_vm0, %v6292_v12  ;;  %v5863_v46 = vpop.permute.xlu0 %5862 }
 0x761   : > { %v5910_v10 = vadd.f32 %v5863_v46, %v5812_v47 }
 0x763   : > { %v6008_v0 = vadd.f32 %v5961_v53, %v5910_v10 }
 0x765   : > { %6025 = vst.msk [vmem:[#allocation2] sm:$0x3] %vm6024_vm15, %v6008_v0  ;;  %6592 = vrot.lane.b32.xlu2 %v9107_v14, %s7298_s29 }
 0x767   : > { %v6587_v61 = vpop.permute.xlu2 %6586  ;;  %v6302_v22 = vpop.permute.xlu1 %6301 }
 0x768   : > { %6625 = vst.msk [vmem:[#allocation2 + $0x14] sm:$0x3] %vm6614_vm2, %v6587_v61  ;;  %v6192_v54 = vpop.permute.xlu0 %6191 }
 0x769   : > { %6335 = vst.msk [vmem:[#allocation2 + $0x1e] sm:$0x3] %vm6319_vm0, %v6302_v22  ;;  %v6239_v63 = vadd.f32 %v6192_v54, %v6141_v42 }
 0x76b   : > { %6271 = vrot.lane.b32.xlu1 %v6239_v63, %s7297_s18 }
 0x76f   : > { %v6296_v11 = vpop.permute.xlu1 %6295  ;;  %v6286_v16 = vpop.permute.xlu2 %6285 }
 0x770   : > { %6332 = vst.msk [vmem:[#allocation2 + $0x18] sm:$0x3] %vm6319_vm0, %v6296_v11  ;;  %v6487_v14 = vpop.permute.xlu0 %6486 }
 0x771   : > { %6327 = vst.msk [vmem:[#allocation2 + $0xe] sm:$0x3] %vm6319_vm0, %v6286_v16  ;;  %v6534_v25 = vadd.f32 %v6487_v14, %v6436_v3 }
 0x773   : > { %6566 = vrot.lane.b32.xlu1 %v6534_v25, %s7298_s29 }
 0x777   : > { %v6591_v23 = vpop.permute.xlu1 %6590  ;;  %v6581_v31 = vpop.permute.xlu2 %6580 }
 0x778   : > { %6627 = vst.msk [vmem:[#allocation2 + $0x18] sm:$0x3] %vm6614_vm2, %v6591_v23  ;;  %v6300_v39 = vpop.permute.xlu0 %6299 }
 0x779   : > { %6622 = vst.msk [vmem:[#allocation2 + $0xe] sm:$0x3] %vm6614_vm2, %v6581_v31 }
 0x77a   : > { %6334 = vst.msk [vmem:[#allocation2 + $0x1c] sm:$0x3] %vm6319_vm0, %v6300_v39 }
 0x77b   : > { %6596 = vrot.lane.b32.xlu1 %v9060_v60, %s7298_s29  ;;  %s6669_s29 = ssub.f32 (!%p7101_p10), 1.0, %s6635_s16 }
 0x77f   : > { %v6290_v24 = vpop.permute.xlu1 %6289  ;;  %v6280_v37 = vpop.permute.xlu2 %6279 }
 0x780   : > { %6329 = vst.msk [vmem:[#allocation2 + $0x12] sm:$0x3] %vm6319_vm0, %v6290_v24  ;;  %v6294_v20 = vpop.permute.xlu0 %6293 }
 0x781   : > { %6324 = vst.msk [vmem:[#allocation2 + $0x8] sm:$0x3] %vm6319_vm0, %v6280_v37 }
 0x782   : > { %6331 = vst.msk [vmem:[#allocation2 + $0x16] sm:$0x3] %vm6319_vm0, %v6294_v20 }
 0x787   : > { %v6585_v21 = vpop.permute.xlu1 %6584  ;;  %v6575_v28 = vpop.permute.xlu2 %6574 }
 0x788   : > { %6624 = vst.msk [vmem:[#allocation2 + $0x12] sm:$0x3] %vm6614_vm2, %v6585_v21  ;;  %v6589_v50 = vpop.permute.xlu0 %6588 }
 0x789   : > { %6619 = vst.msk [vmem:[#allocation2 + $0x8] sm:$0x3] %vm6614_vm2, %v6575_v28 }
 0x78a   : > { %6626 = vst.msk [vmem:[#allocation2 + $0x16] sm:$0x3] %vm6614_vm2, %v6589_v50 }
 0x78f   : > { %v6284_v55 = vpop.permute.xlu1 %6283 }
 0x790   : > { %6326 = vst.msk [vmem:[#allocation2 + $0xc] sm:$0x3] %vm6319_vm0, %v6284_v55  ;;  %v6288_v60 = vpop.permute.xlu0 %6287 }
 0x791   : > { %6328 = vst.msk [vmem:[#allocation2 + $0x10] sm:$0x3] %vm6319_vm0, %v6288_v60 }
 0x797   : > { %v6579_v35 = vpop.permute.xlu1 %6578 }
 0x798   : > { %6621 = vst.msk [vmem:[#allocation2 + $0xc] sm:$0x3] %vm6614_vm2, %v6579_v35  ;;  %v6583_v51 = vpop.permute.xlu0 %6582 }
 0x799   : > { %6623 = vst.msk [vmem:[#allocation2 + $0x10] sm:$0x3] %vm6614_vm2, %v6583_v51 }
 0x7a0   : > { %v6282_v30 = vpop.permute.xlu0 %6281 }
 0x7a1   : > { %6325 = vst.msk [vmem:[#allocation2 + $0xa] sm:$0x3] %vm6319_vm0, %v6282_v30 }
 0x7a8   : > { %v6577_v40 = vpop.permute.xlu0 %6576 }
 0x7a9   : > { %6620 = vst.msk [vmem:[#allocation2 + $0xa] sm:$0x3] %vm6614_vm2, %v6577_v40 }
 0x7ad   : > { %v6278_v7 = vpop.permute.xlu1 %6277 }
 0x7ae   : > { %6323 = vst.msk [vmem:[#allocation2 + $0x6] sm:$0x3] %vm6319_vm0, %v6278_v7 }
 0x7af   : > { %v6274_v26 = vpop.permute.xlu2 %6273 }
 0x7b0   : > { %6321 = vst.msk [vmem:[#allocation2 + $0x2] sm:$0x3] %vm6319_vm0, %v6274_v26  ;;  %v6276_v2 = vpop.permute.xlu0 %6275 }
 0x7b1   : > { %6322 = vst.msk [vmem:[#allocation2 + $0x4] sm:$0x3] %vm6319_vm0, %v6276_v2 }
 0x7b5   : > { %v6573_v49 = vpop.permute.xlu1 %6572 }
 0x7b6   : > { %6618 = vst.msk [vmem:[#allocation2 + $0x6] sm:$0x3] %vm6614_vm2, %v6573_v49 }
 0x7b7   : > { %v6569_v57 = vpop.permute.xlu2 %6568 }
 0x7b8   : > { %6616 = vst.msk [vmem:[#allocation2 + $0x2] sm:$0x3] %vm6614_vm2, %v6569_v57  ;;  %v6571_v6 = vpop.permute.xlu0 %6570 }
 0x7b9   : > { %6617 = vst.msk [vmem:[#allocation2 + $0x4] sm:$0x3] %vm6614_vm2, %v6571_v6 }
 0x7bf   : > { %v6593_v4 = vpop.permute.xlu2 %6592 }
 0x7c0   : > { %6628 = vst.msk [vmem:[#allocation2 + $0x1a] sm:$0x3] %vm6614_vm2, %v6593_v4  ;;  %v6595_v32 = vpop.permute.xlu0 %6594 }
 0x7c1   : > { %6629 = vst.msk [vmem:[#allocation2 + $0x1c] sm:$0x3] %vm6614_vm2, %v6595_v32 }
 0x7dd   : > { %v6272_v27 = vpop.permute.xlu1 %6271 }
 0x7de   : > { %6320 = vst.msk [vmem:[#allocation2] sm:$0x3] %vm6319_vm0, %v6272_v27 }
 0x7e5   : > { %v6567_v52 = vpop.permute.xlu1 %6566 }
 0x7e6   : > { %6615 = vst.msk [vmem:[#allocation2] sm:$0x3] %vm6614_vm2, %v6567_v52 }
 0x7ea   : > { %6634 = sbr.rel (%p7101_p10) target bundleno = 2054 (0x806), region = 80 }
 0x7ed   : > { %v6597_v41 = vpop.permute.xlu1 %6596 }
 0x7ee   : > { %6630 = vst.msk [vmem:[#allocation2 + $0x1e] sm:$0x3] %vm6614_vm2, %v6597_v41 }
 0x7ef   : > { %v6636_v45 = vld [vmem:[%s9588_s0] sm:$0x3]  ;;  %v6637_v56 = vld [vmem:[%s9588_s0 + $0x2] sm:$0x3]  ;;  %v6638_v33 = vld [vmem:[%s9588_s0 + $0x4] sm:$0x3]  ;;  %v9452_v18 = vstv %s6635_s16 }
 0x7f0   : > { %v6670_v48 = vld [vmem:[#allocation2] sm:$0x3]  ;;  %v6671_v29 = vld [vmem:[#allocation2 + $0x2] sm:$0x3]  ;;  %v6672_v59 = vld [vmem:[#allocation2 + $0x4] sm:$0x3]  ;;  %v6653_v5 = vmul.f32 %v9452_v18, %v6636_v45  ;;  %v6654_v44 = vmul.f32 %v9452_v18, %v6637_v56  ;;  %v6655_v38 = vmul.f32 %v9452_v18, %v6638_v33  ;;  %v9463_v9 = vstv %s6669_s29 }
 0x7f1   : > { %v6639_v36 = vld [vmem:[%s9588_s0 + $0x6] sm:$0x3]  ;;  %v6640_v43 = vld [vmem:[%s9588_s0 + $0x8] sm:$0x3]  ;;  %v6641_v13 = vld [vmem:[%s9588_s0 + $0xa] sm:$0x3]  ;;  %v6687_v53 = vmul.f32 %v9463_v9, %v6670_v48  ;;  %v6688_v47 = vmul.f32 %v9463_v9, %v6671_v29  ;;  %v6689_v46 = vmul.f32 %v9463_v9, %v6672_v59 }
 0x7f2   : > { %v6673_v19 = vld [vmem:[#allocation2 + $0x6] sm:$0x3]  ;;  %v6674_v15 = vld [vmem:[#allocation2 + $0x8] sm:$0x3]  ;;  %v6675_v1 = vld [vmem:[#allocation2 + $0xa] sm:$0x3]  ;;  %v6656_v8 = vmul.f32 %v9452_v18, %v6639_v36  ;;  %v6657_v34 = vmul.f32 %v9452_v18, %v6640_v43  ;;  %v6658_v61 = vmul.f32 %v9452_v18, %v6641_v13 }
 0x7f3   : > { %v6642_v58 = vld [vmem:[%s9588_s0 + $0xc] sm:$0x3]  ;;  %v6690_v10 = vmul.f32 %v9463_v9, %v6673_v19  ;;  %v6643_v0 = vld [vmem:[%s9588_s0 + $0xe] sm:$0x3]  ;;  %v6691_v42 = vmul.f32 %v9463_v9, %v6674_v15  ;;  %v6692_v22 = vmul.f32 %v9463_v9, %v6675_v1  ;;  %v6644_v63 = vld [vmem:[%s9588_s0 + $0x10] sm:$0x3]  ;;  %v6703_v3 = vadd.f32 %v6687_v53, %v6653_v5 }
 0x7f4   : > { %v6676_v12 = vld [vmem:[#allocation2 + $0xc] sm:$0x3]  ;;  %v6677_v17 = vld [vmem:[#allocation2 + $0xe] sm:$0x3]  ;;  %v6659_v54 = vmul.f32 %v9452_v18, %v6642_v58  ;;  %v6678_v62 = vld [vmem:[#allocation2 + $0x10] sm:$0x3]  ;;  %v6704_v11 = vadd.f32 %v6688_v47, %v6654_v44  ;;  %v6705_v16 = vadd.f32 %v6689_v46, %v6655_v38  ;;  %v6660_v39 = vmul.f32 %v9452_v18, %v6643_v0 }
 0x7f5   : > { %v6693_v14 = vmul.f32 %v9463_v9, %v6676_v12  ;;  %v6645_v25 = vld [vmem:[%s9588_s0 + $0x12] sm:$0x3]  ;;  %v6706_v31 = vadd.f32 %v6690_v10, %v6656_v8  ;;  %v6694_v24 = vmul.f32 %v9463_v9, %v6677_v17  ;;  %v6646_v37 = vld [vmem:[%s9588_s0 + $0x14] sm:$0x3]  ;;  %6719 = vst.msk [vmem:[%s9600_s12] sm:$0x3] %vm622_vm1, %v6703_v3  ;;  %v6707_v21 = vadd.f32 %v6691_v42, %v6657_v34 }
 0x7f6   : > { %v6679_v23 = vld [vmem:[#allocation2 + $0x12] sm:$0x3]  ;;  %v6680_v20 = vld [vmem:[#allocation2 + $0x14] sm:$0x3]  ;;  %v6661_v28 = vmul.f32 %v9452_v18, %v6644_v63  ;;  %v6695_v50 = vmul.f32 %v9463_v9, %v6678_v62  ;;  %v6647_v55 = vld [vmem:[%s9588_s0 + $0x16] sm:$0x3]  ;;  %v6708_v35 = vadd.f32 %v6692_v22, %v6658_v61  ;;  %v6662_v51 = vmul.f32 %v9452_v18, %v6645_v25 }
 0x7f7   : > { %v6681_v60 = vld [vmem:[#allocation2 + $0x16] sm:$0x3]  ;;  %6720 = vst.msk [vmem:[%s9600_s12 + $0x2] sm:$0x3] %vm622_vm1, %v6704_v11  ;;  %v6696_v30 = vmul.f32 %v9463_v9, %v6679_v23  ;;  %v6648_v40 = vld [vmem:[%s9588_s0 + $0x18] sm:$0x3]  ;;  %v6709_v26 = vadd.f32 %v6693_v14, %v6659_v54  ;;  %v6663_v2 = vmul.f32 %v9452_v18, %v6646_v37  ;;  %v6697_v49 = vmul.f32 %v9463_v9, %v6680_v20 }
 0x7f8   : > { %v6682_v7 = vld [vmem:[#allocation2 + $0x18] sm:$0x3]  ;;  %6721 = vst.msk [vmem:[%s9600_s12 + $0x4] sm:$0x3] %vm622_vm1, %v6705_v16  ;;  %v6649_v57 = vld [vmem:[%s9588_s0 + $0x1a] sm:$0x3]  ;;  %v6710_v4 = vadd.f32 %v6694_v24, %v6660_v39  ;;  %v6664_v32 = vmul.f32 %v9452_v18, %v6647_v55  ;;  %v6698_v27 = vmul.f32 %v9463_v9, %v6681_v60  ;;  %v6711_v45 = vadd.f32 %v6695_v50, %v6661_v28 }
 0x7f9   : > { %v6683_v6 = vld [vmem:[#allocation2 + $0x1a] sm:$0x3]  ;;  %6722 = vst.msk [vmem:[%s9600_s12 + $0x6] sm:$0x3] %vm622_vm1, %v6706_v31  ;;  %v6650_v52 = vld [vmem:[%s9588_s0 + $0x1c] sm:$0x3]  ;;  %v6665_v48 = vmul.f32 %v9452_v18, %v6648_v40  ;;  %v6699_v56 = vmul.f32 %v9463_v9, %v6682_v7  ;;  %v6712_v59 = vadd.f32 %v6696_v30, %v6662_v51  ;;  %v6666_v36 = vmul.f32 %v9452_v18, %v6649_v57 }
 0x7fa   : > { %v6684_v41 = vld [vmem:[#allocation2 + $0x1c] sm:$0x3]  ;;  %6723 = vst.msk [vmem:[%s9600_s12 + $0x8] sm:$0x3] %vm622_vm1, %v6707_v21  ;;  %v6651_v29 = vld [vmem:[%s9588_s0 + $0x1e] sm:$0x3]  ;;  %v6700_v43 = vmul.f32 %v9463_v9, %v6683_v6  ;;  %v6713_v19 = vadd.f32 %v6697_v49, %v6663_v2  ;;  %v6667_v15 = vmul.f32 %v9452_v18, %v6650_v52  ;;  %v6714_v44 = vadd.f32 %v6698_v27, %v6664_v32 }
 0x7fb   : > { %v6685_v33 = vld [vmem:[#allocation2 + $0x1e] sm:$0x3]  ;;  %6724 = vst.msk [vmem:[%s9600_s12 + $0xa] sm:$0x3] %vm622_vm1, %v6708_v35  ;;  %v6701_v5 = vmul.f32 %v9463_v9, %v6684_v41  ;;  %v6668_v38 = vmul.f32 %v9452_v18, %v6651_v29  ;;  %v6715_v1 = vadd.f32 %v6699_v56, %v6665_v48 }
 0x7fc   : > { %6725 = vst.msk [vmem:[%s9600_s12 + $0xc] sm:$0x3] %vm622_vm1, %v6709_v26  ;;  %v6702_v13 = vmul.f32 %v9463_v9, %v6685_v33  ;;  %v6716_v58 = vadd.f32 %v6700_v43, %v6666_v36 }
 0x7fd   : > { %6726 = vst.msk [vmem:[%s9600_s12 + $0xe] sm:$0x3] %vm622_vm1, %v6710_v4  ;;  %v6717_v18 = vadd.f32 %v6701_v5, %v6667_v15 }
 0x7fe   : > { %6727 = vst.msk [vmem:[%s9600_s12 + $0x10] sm:$0x3] %vm622_vm1, %v6711_v45  ;;  %v6718_v9 = vadd.f32 %v6702_v13, %v6668_v38 }
 0x7ff   : > { %6728 = vst.msk [vmem:[%s9600_s12 + $0x12] sm:$0x3] %vm622_vm1, %v6712_v59 }
 0x800   : > { %6729 = vst.msk [vmem:[%s9600_s12 + $0x14] sm:$0x3] %vm622_vm1, %v6713_v19 }
 0x801   : > { %6730 = vst.msk [vmem:[%s9600_s12 + $0x16] sm:$0x3] %vm622_vm1, %v6714_v44 }
 0x802   : > { %6731 = vst.msk [vmem:[%s9600_s12 + $0x18] sm:$0x3] %vm622_vm1, %v6715_v1 }
 0x803   : > { %6732 = vst.msk [vmem:[%s9600_s12 + $0x1a] sm:$0x3] %vm622_vm1, %v6716_v58 }
 0x804   : > { %6733 = vst.msk [vmem:[%s9600_s12 + $0x1c] sm:$0x3] %vm622_vm1, %v6717_v18 }
 0x805   : > { %6734 = vst.msk [vmem:[%s9600_s12 + $0x1e] sm:$0x3] %vm622_vm1, %v6718_v9 }
 0x806 PF: > { %s24_s23 = sadd.s32 1, %s7291_s23  }
 0x807   : > { %p21_p11 = scmp.ge.s32.totalorder %s24_s23, 5  }
 0x809   :  { %23 = sbr.rel (!%p21_p11) target bundleno = 6 (0x6), region = 293 }
 0x80e   :  { %6746 = vsyncpa [#allocation6], 1 }
 0x80f   :  { %6748 = vsyncpa [#allocation6 + $0x1], 1 }

</bundles_post_ra>
